<compile_context>
chip_gen: v7x
topology: tpu7x:2x2x1
jax: 0.10.0
libtpu: 0.0.40
codegen_flags: <defaults>
</compile_context>

<pallas_src>
import math

import jax
import jax.numpy as jnp
from jax import lax
from jax.experimental import pallas as pl
from jax.experimental.pallas import tpu as pltpu

# ----------------------------- config (small) -------------------------------
VOCAB = 64
D_MODEL = 32
N_HEAD = 4
D_HEAD = D_MODEL // N_HEAD
D_FF = 64
N_FF_EXPERTS = 4
N_ATTN_EXPERTS = 4
TOP_K = 2          # MoE FFN top-k (TransformerBlock.top_k)
ATTN_K = 1         # HeadSwitchSelfAttention default k=1
LAYER_REPETITION = 2
N_INIT_LAYERS = 1
N_MID_LAYERS = 1
N_FINAL_LAYERS = 1
N_BLOCKS = N_INIT_LAYERS + N_MID_LAYERS + N_FINAL_LAYERS
MAX_SEQ = 16
CAPACITY_FACTOR = 1.25
EMA_DECAY = 0.99
LN_EPS = 1e-5
NEG_INF = -1e30    # additive mask value (== -inf after softmax)

B, S = 2, 8
NT = B * S              # flattened token count
GW = N_HEAD * N_ATTN_EXPERTS * D_HEAD    # 128: (head,expert) V/W_o slab width
PAD = 128
LOGIT_PAD = 128


def _accum(parts):
    out = parts[0]
    for p_ in parts[1:]:
        out = out + p_
    return out


# ----------------------------- fused kernel ---------------------------------
def fused_forward_kernel(idx_ref, tok_ref, posb_ref, rep_ref, lnf_ref, head_ref,
                         amask_ref, slt_ref, egate_ref, cexp_ref, effn_ref,
                         wqkrv_ref, wobig_ref, ln_ref, wg_ref, w1_ref, w2_ref,
                         logits_ref, aux_ref):
    f32 = jnp.float32
    h, dh, Ea = N_HEAD, D_HEAD, N_ATTN_EXPERTS
    Ef, F = N_FF_EXPERTS, D_FF

    # ---- token + positional embedding (one-hot matmul -> stays on the MXU) ----
    ids = idx_ref[...]                                               # (NT, 1) int32
    tok_oh = (lax.broadcasted_iota(jnp.int32, (NT, VOCAB), 1) == ids).astype(f32)
    x = jnp.dot(tok_oh, tok_ref[...], preferred_element_type=f32) + posb_ref[...]

    # ---- hoisted constants (built / loaded ONCE; closed over by all blocks) ----
    attn_mask = amask_ref[...]        # (NT, NT) block-causal additive mask
    slt = slt_ref[...]                # (NT, NT) strictly-lower-triangular (capacity cumsum)
    egate = egate_ref[...]            # (128, 128) one-hot -> dh-wide-group expansion
    cexp = cexp_ref[...]              # (128, 128) within-head expert collapse + re-broadcast
    effn = effn_ref[...]              # (Ef, Ef*F) combine -> F-wide-group expansion

    lane128 = lax.broadcasted_iota(jnp.int32, (1, PAD), 1)
    iota128 = lax.broadcasted_iota(jnp.int32, (NT, PAD), 1)
    iota_e = lax.broadcasted_iota(jnp.int32, (NT, Ef), 1)

    gate_bias, qk_mask, headcol = [], [], []
    for hh in range(h):
        in_g = (lane128 >= hh * Ea) & (lane128 < (hh + 1) * Ea)
        gate_bias.append(jnp.where(in_g, 0.0, NEG_INF).astype(f32))       # (1,128)
        qk_mask.append(((lane128 >= hh * dh) &
                        (lane128 < (hh + 1) * dh)).astype(f32))           # (1,128)
        headcol.append(((lane128 >= hh * Ea * dh) &
                        (lane128 < (hh + 1) * Ea * dh)).astype(f32))      # (1,128)

    capacity = float(math.ceil(CAPACITY_FACTOR * NT / Ef))
    ema0 = jnp.zeros((1, PAD), f32)

    def layer_norm(z, g, beta):
        mu = jnp.mean(z, axis=-1, keepdims=True)
        var = jnp.mean(jnp.square(z - mu), axis=-1, keepdims=True)
        return (z - mu) * lax.rsqrt(var + LN_EPS) * g + beta

    # ---------------- head-switch self-attention (top-1 expert / head) ------
    def attention(z, wqkrv, wobig, ema):
        # One K=D matmul.  Columns (all 128-lane aligned):
        #   [0:128)   vbig : every (head,expert) V projection
        #   [128:256) Q    (scale 1/sqrt(dh) folded in; cols >= D are zero)
        #   [256:384) K
        #   [384:512) router logits (cols >= h*Ea are zero)
        qkrv = jnp.dot(z, wqkrv, preferred_element_type=f32)        # (NT, 512)
        vbig = qkrv[:, 0:PAD]
        qpad = qkrv[:, PAD:2 * PAD]
        kpad = qkrv[:, 2 * PAD:3 * PAD]
        glpad = qkrv[:, 3 * PAD:4 * PAD]

        # per-token top-1 expert per head: full-width one-hot over 128 lanes
        oh_parts = []
        for hh in range(h):
            glm = glpad + gate_bias[hh]
            mx = jnp.max(glm, axis=-1, keepdims=True)
            sel = jnp.min(jnp.where(glm == mx, iota128, PAD), axis=-1, keepdims=True)
            oh_parts.append((iota128 == sel).astype(f32))
        oh = _accum(oh_parts)                                        # (NT, 128), 1 per head group

        # EMA expert-usage update + load-balance loss.  The reference pools
        # the whole (h, E) _ema_counts buffer in one normalization, so a
        # single flat (1,128) EMA vector reproduces it exactly.
        counts = jnp.sum(oh, axis=0, keepdims=True)                  # (1, 128)
        ema = ema * EMA_DECAY + counts * ((1.0 - EMA_DECAY) / (NT * ATTN_K))
        tot = jnp.sum(ema, axis=-1, keepdims=True)                   # (1, 1)
        sq = jnp.sum(ema * ema, axis=-1, keepdims=True)              # (1, 1)
        aux = sq * (float(Ea * h) / ((tot + 1e-9) * (tot + 1e-9)))   # exact divide (aux)

        # expand one-hot to dh-wide column groups (constant matmul, MXU idle)
        gate128 = jnp.dot(oh, egate, preferred_element_type=f32)     # (NT, 128)
        vgated = vbig * gate128            # V gated by the SOURCE token's expert

        slabs = []
        for hh in range(h):                                          # static unroll, h = 4
            q_h = qpad * qk_mask[hh]                                 # full-width head mask
            scores = lax.dot_general(q_h, kpad, (((1,), (1,)), ((), ())),
                                     preferred_element_type=f32) + attn_mask
            m = jnp.max(scores, axis=-1, keepdims=True)
            ex = jnp.exp(scores - m)
            p = ex * pl.reciprocal(jnp.sum(ex, axis=-1, keepdims=True), approx=True)
            # attn_out[t] = sum_s p[s, t] * v(s)
            # (matches reference torch.einsum('bhst,hbsd->hbtd', p_attn, v_proj))
            slab = lax.dot_general(p, vgated, (((0,), (0,)), ((), ())),
                                   preferred_element_type=f32)       # (NT, 128)
            slabs.append(slab * headcol[hh])
        attn_slab = _accum(slabs)                                    # (NT, 128)

        # collapse experts within each head, re-broadcast to every expert slot,
        # gate by the OUTPUT token's expert, then one K=128 block-diagonal W_o.
        attn_exp = jnp.dot(attn_slab, cexp, preferred_element_type=f32)
        y = jnp.dot(attn_exp * gate128, wobig, preferred_element_type=f32)  # (NT, D)
        return y, aux, ema

    # ---------------- MoE feed-forward (top-2 + capacity routing) -----------
    def moe_ffn(z, wg, w1, w2):
        gl = jnp.dot(z, wg, preferred_element_type=f32)              # (NT, Ef)
        # top-2 (descending, tie -> lowest index first)
        v1 = jnp.max(gl, axis=-1, keepdims=True)
        s1 = jnp.min(jnp.where(gl == v1, iota_e, Ef), axis=-1, keepdims=True)
        oh1 = (iota_e == s1).astype(f32)
        gl2 = jnp.where(oh1 > 0.0, NEG_INF, gl)
        v2 = jnp.max(gl2, axis=-1, keepdims=True)
        s2 = jnp.min(jnp.where(gl2 == v2, iota_e, Ef), axis=-1, keepdims=True)
        oh2 = (iota_e == s2).astype(f32)
        # softmax over the two selected logits (v1 >= v2); reciprocal -> EUP
        dexp = jnp.exp(v2 - v1)
        inv = pl.reciprocal(1.0 + dexp, approx=True)
        p1 = inv
        p2 = dexp * inv

        # capacity check in the reference's token-major / slot-minor cumsum order
        both = oh1 + oh2
        prev = jnp.dot(slt, both, preferred_element_type=f32)        # (NT, Ef)
        keep1 = jnp.sum(oh1 * ((prev + 1.0) <= capacity).astype(f32),
                        axis=-1, keepdims=True)
        keep2 = jnp.sum(oh2 * ((prev + oh1 + 1.0) <= capacity).astype(f32),
                        axis=-1, keepdims=True)
        p1k = p1 * keep1
        p2k = p2 * keep2
        dinv = pl.reciprocal(p1k + p2k + 1e-9, approx=True)
        p1n = p1k * dinv
        p2n = p2k * dinv
        combine = p1n * oh1 + p2n * oh2                              # (NT, Ef)

        # expert-stacked FFN: one K=D matmul, lane-dense per-expert scaling
        # (constant block-broadcast matmul + ONE full-width multiply),
        # one K=Ef*F=256 matmul.
        hid = jnp.maximum(jnp.dot(z, w1, preferred_element_type=f32), 0.0)   # (NT, Ef*F)
        combine_big = jnp.dot(combine, effn, preferred_element_type=f32)     # (NT, Ef*F)
        y = jnp.dot(hid * combine_big, w2, preferred_element_type=f32)       # (NT, D)

        # switch-style auxiliary loss (batch statistics) — exact divides
        tpe = jnp.sum(oh1 * keep1 + oh2 * keep2, axis=0, keepdims=True)   # (1, Ef)
        imp = jnp.sum(oh1 * p1n + oh2 * p2n, axis=0, keepdims=True)       # (1, Ef)
        tfrac = tpe / (jnp.sum(tpe, axis=-1, keepdims=True) + 1e-9)
        ifrac = imp / (jnp.sum(imp, axis=-1, keepdims=True) + 1e-9)
        aux = jnp.sum(tfrac * ifrac, axis=-1, keepdims=True) * float(Ef)  # (1, 1)
        return y, aux

    # ---------------- one transformer block ----------------------------------
    def block(z, bidx, ema):
        lnp = ln_ref[bidx]                                           # (4, D)
        y, aux_attn, ema = attention(z, wqkrv_ref[bidx], wobig_ref[bidx], ema)
        z = z + y                                     # dropout == identity (eval)
        z = layer_norm(z, lnp[0:1, :], lnp[1:2, :])
        ff, aux_ffn = moe_ffn(z, wg_ref[bidx], w1_ref[bidx], w2_ref[bidx])
        z = z + ff
        z = layer_norm(z, lnp[2:3, :], lnp[3:4, :])
        return z, aux_attn + aux_ffn, ema

    # ---------------- statically-unrolled block schedule ---------------------
    # TODO(synk): switch to lax.fori_loop over a dynamic block index into the
    # stacked weight refs if N_MID_LAYERS / LAYER_REPETITION ever grow.
    aux_total = jnp.zeros((1, 1), f32)
    bidx = 0
    for _ in range(N_INIT_LAYERS):
        x, aux, _ = block(x, bidx, ema0)
        aux_total = aux_total + aux
        bidx += 1

    mid_ids = list(range(bidx, bidx + N_MID_LAYERS))
    bidx += N_MID_LAYERS
    ema_mid = {i: ema0 for i in mid_ids}       # EMA threaded across repetitions
    for rep in range(LAYER_REPETITION):
        x = x + rep_ref[rep:rep + 1, :]
        for i in mid_ids:
            x, aux, ema_mid[i] = block(x, i, ema_mid[i])
            aux_total = aux_total + aux

    for _ in range(N_FINAL_LAYERS):
        x, aux, _ = block(x, bidx, ema0)
        aux_total = aux_total + aux
        bidx += 1

    # final LayerNorm + LM head; lane-dense single (NT, 128) store
    x = layer_norm(x, lnf_ref[0:1, :], lnf_ref[1:2, :])
    logits_ref[...] = jnp.dot(x, head_ref[...], preferred_element_type=f32)
    aux_ref[...] = aux_total


# ----------------------------- wrapper ---------------------------------------
def _vmem():
    return pl.BlockSpec(memory_space=pltpu.MemorySpace.VMEM)


def model_forward(prep, idx):
    Bb, Ss = idx.shape
    nt = Bb * Ss
    idx2 = idx.reshape(nt, 1).astype(jnp.int32)
    logits_pad, aux = pl.pallas_call(
        fused_forward_kernel,
        out_shape=(jax.ShapeDtypeStruct((nt, LOGIT_PAD), jnp.float32),
                   jax.ShapeDtypeStruct((1, 1), jnp.float32)),
        in_specs=[_vmem() for _ in range(17)],
        out_specs=(_vmem(), _vmem()),
    )(idx2, prep["tok_emb"], prep["posb"], prep["rep_emb"], prep["lnf"],
      prep["head"], prep["amask"], prep["slt"], prep["egate"], prep["cexp"],
      prep["effn"], prep["wqkrv"], prep["wobig"], prep["ln"], prep["wg"],
      prep["w1"], prep["w2"])
    return logits_pad[:, :VOCAB].reshape(Bb, Ss, VOCAB), aux[0, 0]


# ----------------------------- params ----------------------------------------
def _xavier(key, shape, fan_in, fan_out):
    lim = math.sqrt(6.0 / (fan_in + fan_out))
    return jax.random.uniform(key, shape, jnp.float32, -lim, lim)


def init_block_params(key):
    ks = jax.random.split(key, 6 + 2 * N_FF_EXPERTS)
    h, dh, E = N_HEAD, D_HEAD, N_ATTN_EXPERTS
    p = {
        "wq": _xavier(ks[0], (D_MODEL, D_MODEL), D_MODEL, D_MODEL),
        "wk": _xavier(ks[1], (D_MODEL, D_MODEL), D_MODEL, D_MODEL),
        "wv": _xavier(ks[2], (h, E, dh, dh), dh, dh),
        "wo": _xavier(ks[3], (h, E, dh, dh), dh, dh),
        "wr": _xavier(ks[4], (D_MODEL, h * E), D_MODEL, h * E),
        "ln1_g": jnp.ones((1, D_MODEL), jnp.float32),
        "ln1_b": jnp.zeros((1, D_MODEL), jnp.float32),
        "ln2_g": jnp.ones((1, D_MODEL), jnp.float32),
        "ln2_b": jnp.zeros((1, D_MODEL), jnp.float32),
        "wg": _xavier(ks[5], (D_MODEL, N_FF_EXPERTS), D_MODEL, N_FF_EXPERTS),
    }
    # expert MLP weights stacked for the fused kernel:  W1 (D, E*F),  W2 (E*F, D)
    p["w1"] = jnp.concatenate(
        [_xavier(ks[6 + e], (D_MODEL, D_FF), D_MODEL, D_FF)
         for e in range(N_FF_EXPERTS)], axis=1)
    p["w2"] = jnp.concatenate(
        [_xavier(ks[6 + N_FF_EXPERTS + e], (D_FF, D_MODEL), D_FF, D_MODEL)
         for e in range(N_FF_EXPERTS)], axis=0)
    return p


def init_model_params(key):
    ks = jax.random.split(key, 4 + N_BLOCKS)
    params = {
        "tok_emb": 0.02 * jax.random.normal(ks[0], (VOCAB, D_MODEL), jnp.float32),
        "pos_emb": 0.02 * jax.random.normal(ks[1], (MAX_SEQ, D_MODEL), jnp.float32),
        "rep_emb": 0.02 * jax.random.normal(ks[2], (LAYER_REPETITION, D_MODEL),
                                            jnp.float32),
        "lnf_g": jnp.ones((1, D_MODEL), jnp.float32),
        "lnf_b": jnp.zeros((1, D_MODEL), jnp.float32),
        "head": _xavier(ks[3], (D_MODEL, VOCAB), D_MODEL, VOCAB),
    }
    bkeys = ks[4:]
    params["init_blocks"] = [init_block_params(bkeys[i])
                             for i in range(N_INIT_LAYERS)]
    params["mid_blocks"] = [init_block_params(bkeys[N_INIT_LAYERS + i])
                            for i in range(N_MID_LAYERS)]
    params["final_blocks"] = [
        init_block_params(bkeys[N_INIT_LAYERS + N_MID_LAYERS + i])
        for i in range(N_FINAL_LAYERS)]
    return params


def prepare_params(params):
    """One-time restructuring of the parameters + constant operands."""
    h, dh, E = N_HEAD, D_HEAD, N_ATTN_EXPERTS
    eye_h = jnp.eye(h, dtype=jnp.float32)

    def pad_cols(w, width):
        return jnp.concatenate(
            [w, jnp.zeros((w.shape[0], width - w.shape[1]), jnp.float32)], axis=1)

    def prep_block(p):
        # Block-diagonal expert-stacked projections:
        #   wv_big[g*dh+i, (g*E+e)*dh+o] = W_v[g, e, i, o]   (x @ wv_big = all expert V)
        #   wo_big[(g*E+e)*dh+i, g*dh+o] = W_o[g, e, i, o]   (gated slab @ wo_big = y)
        wv_big = jnp.einsum("hg,geio->higeo", eye_h, p["wv"]).reshape(
            h * dh, h * E * dh)
        wo_big = jnp.einsum("gh,geio->geiho", eye_h, p["wo"]).reshape(
            h * E * dh, h * dh)
        wq_scaled = p["wq"] * (1.0 / math.sqrt(dh))   # fold attention scale
        # 128-lane aligned fused column layout: [vbig | Q | K | router]
        wqkrv = jnp.concatenate(
            [wv_big, pad_cols(wq_scaled, PAD), pad_cols(p["wk"], PAD),
             pad_cols(p["wr"], PAD)], axis=1)                    # (D, 512)
        ln = jnp.concatenate([p["ln1_g"], p["ln1_b"], p["ln2_g"], p["ln2_b"]],
                             axis=0)
        return wqkrv, wo_big, ln, p["wg"], p["w1"], p["w2"]

    blocks = params["init_blocks"] + params["mid_blocks"] + params["final_blocks"]
    prepped = [prep_block(p) for p in blocks]

    def stack(i):
        return jnp.stack([pr[i] for pr in prepped], axis=0)

    pos = params["pos_emb"][:S]                                  # (S, D)
    posb = jnp.concatenate([pos] * B, axis=0)                    # (NT, D)

    # ---- constant operands (built once on host, tiny one-time DMA) ----
    r = jnp.arange(NT)
    bid = r // S
    rown = r[:, None]
    coln = r[None, :]
    allowed = (bid[:, None] == bid[None, :]) & (coln <= rown)
    amask = jnp.where(allowed, 0.0, NEG_INF).astype(jnp.float32)     # (NT, NT)
    slt = (coln < rown).astype(jnp.float32)                          # (NT, NT)

    ri = jnp.arange(PAD)[:, None]
    cj = jnp.arange(PAD)[None, :]
    egate = (((cj >= ri * dh) & (cj < (ri + 1) * dh)) &
             (ri < h * E)).astype(jnp.float32)                       # (128, 128)
    cexp = (((ri // (E * dh)) == (cj // (E * dh))) &
            ((ri % dh) == (cj % dh))).astype(jnp.float32)            # (128, 128)

    r4 = jnp.arange(N_FF_EXPERTS)[:, None]
    c256 = jnp.arange(N_FF_EXPERTS * D_FF)[None, :]
    effn = ((c256 >= r4 * D_FF) & (c256 < (r4 + 1) * D_FF)).astype(jnp.float32)

    return {
        "tok_emb": params["tok_emb"],
        "posb": posb,
        "rep_emb": params["rep_emb"],
        "lnf": jnp.concatenate([params["lnf_g"], params["lnf_b"]], axis=0),
        "head": pad_cols(params["head"], LOGIT_PAD),   # (D, 128) lane-dense logits
        "amask": amask,
        "slt": slt,
        "egate": egate,
        "cexp": cexp,
        "effn": effn,
        "wqkrv": stack(0),      # (N_BLOCKS, D, 512)
        "wobig": stack(1),      # (N_BLOCKS, h*E*dh, D)
        "ln": stack(2),         # (N_BLOCKS, 4, D)
        "wg": stack(3),         # (N_BLOCKS, D, Ef)
        "w1": stack(4),         # (N_BLOCKS, D, Ef*F)
        "w2": stack(5),         # (N_BLOCKS, Ef*F, D)
    }


# ----------------------------- main -------------------------------------------
if __name__ == "__main__":
    key = jax.random.PRNGKey(0)
    pkey, dkey = jax.random.split(key)
    params = init_model_params(pkey)
    prep = prepare_params(params)
    idx = jax.random.randint(dkey, (B, S), 0, VOCAB, dtype=jnp.int32)

    logits, aux = jax.jit(model_forward)(prep, idx)
    jax.block_until_ready((logits, aux))
    assert logits.shape == (B, S, VOCAB)
    assert logits.dtype == jnp.float32
    print("KERNEL_OK")
</pallas_src>

<mosaic_0001>
module attributes {stable_mosaic.version = 11 : i64} {
  func.func @fused_forward_kernel(%arg0: memref<16x1xi32, #tpu.memory_space<vmem>>, %arg1: memref<64x32xf32, #tpu.memory_space<vmem>>, %arg2: memref<16x32xf32, #tpu.memory_space<vmem>>, %arg3: memref<2x32xf32, #tpu.memory_space<vmem>>, %arg4: memref<2x32xf32, #tpu.memory_space<vmem>>, %arg5: memref<32x128xf32, #tpu.memory_space<vmem>>, %arg6: memref<16x16xf32, #tpu.memory_space<vmem>>, %arg7: memref<16x16xf32, #tpu.memory_space<vmem>>, %arg8: memref<128x128xf32, #tpu.memory_space<vmem>>, %arg9: memref<128x128xf32, #tpu.memory_space<vmem>>, %arg10: memref<4x256xf32, #tpu.memory_space<vmem>>, %arg11: memref<3x32x512xf32, #tpu.memory_space<vmem>>, %arg12: memref<3x128x32xf32, #tpu.memory_space<vmem>>, %arg13: memref<3x4x32xf32, #tpu.memory_space<vmem>>, %arg14: memref<3x32x4xf32, #tpu.memory_space<vmem>>, %arg15: memref<3x32x256xf32, #tpu.memory_space<vmem>>, %arg16: memref<3x256x32xf32, #tpu.memory_space<vmem>>, %arg17: memref<16x128xf32, #tpu.memory_space<vmem>>, %arg18: memref<1x1xf32, #tpu.memory_space<vmem>>) attributes {dimension_semantics = [], scalar_prefetch = 0 : i64, scratch_operands = 0 : i64, tpu.core_type = #tpu.core_type<tc>} {
    %c0 = arith.constant 0 : index
    %c0_0 = arith.constant 0 : index
    %0 = vector.load %arg0[%c0, %c0_0] : memref<16x1xi32, #tpu.memory_space<vmem>>, vector<16x1xi32>
    %1 = tpu.iota {dimensions = array<i32: 1>} : vector<16x64xi32>
    %2 = vector.broadcast %0 : vector<16x1xi32> to vector<16x64xi32>
    %3 = arith.cmpi eq, %1, %2 : vector<16x64xi32>
    %4 = arith.extui %3 : vector<16x64xi1> to vector<16x64xi32>
    %5 = arith.sitofp %4 : vector<16x64xi32> to vector<16x64xf32>
    %c0_1 = arith.constant 0 : index
    %c0_2 = arith.constant 0 : index
    %6 = vector.load %arg1[%c0_1, %c0_2] : memref<64x32xf32, #tpu.memory_space<vmem>>, vector<64x32xf32>
    %cst = arith.constant dense<0.000000e+00> : vector<16x32xf32>
    %7 = tpu.matmul %5, %6, %cst {dimension_numbers = #tpu.dot_dimension_numbers<[1], [0], [0], [1], [0, 0, 1, 1], [], []>} : vector<16x64xf32>, vector<64x32xf32>, vector<16x32xf32> -> vector<16x32xf32>
    %c0_3 = arith.constant 0 : index
    %c0_4 = arith.constant 0 : index
    %8 = vector.load %arg2[%c0_3, %c0_4] : memref<16x32xf32, #tpu.memory_space<vmem>>, vector<16x32xf32>
    %9 = arith.addf %7, %8 : vector<16x32xf32>
    %c0_5 = arith.constant 0 : index
    %c0_6 = arith.constant 0 : index
    %10 = vector.load %arg6[%c0_5, %c0_6] : memref<16x16xf32, #tpu.memory_space<vmem>>, vector<16x16xf32>
    %c0_7 = arith.constant 0 : index
    %c0_8 = arith.constant 0 : index
    %11 = vector.load %arg7[%c0_7, %c0_8] : memref<16x16xf32, #tpu.memory_space<vmem>>, vector<16x16xf32>
    %c0_9 = arith.constant 0 : index
    %c0_10 = arith.constant 0 : index
    %12 = vector.load %arg8[%c0_9, %c0_10] : memref<128x128xf32, #tpu.memory_space<vmem>>, vector<128x128xf32>
    %c0_11 = arith.constant 0 : index
    %c0_12 = arith.constant 0 : index
    %13 = vector.load %arg9[%c0_11, %c0_12] : memref<128x128xf32, #tpu.memory_space<vmem>>, vector<128x128xf32>
    %c0_13 = arith.constant 0 : index
    %c0_14 = arith.constant 0 : index
    %14 = vector.load %arg10[%c0_13, %c0_14] : memref<4x256xf32, #tpu.memory_space<vmem>>, vector<4x256xf32>
    %15 = tpu.iota {dimensions = array<i32: 1>} : vector<1x128xi32>
    %16 = tpu.iota {dimensions = array<i32: 1>} : vector<16x128xi32>
    %17 = tpu.iota {dimensions = array<i32: 1>} : vector<16x4xi32>
    %c0_i32 = arith.constant 0 : i32
    %18 = vector.broadcast %c0_i32 : i32 to vector<1x128xi32>
    %19 = arith.cmpi sge, %15, %18 : vector<1x128xi32>
    %c4_i32 = arith.constant 4 : i32
    %20 = vector.broadcast %c4_i32 : i32 to vector<1x128xi32>
    %21 = arith.cmpi slt, %15, %20 : vector<1x128xi32>
    %22 = arith.andi %19, %21 : vector<1x128xi1>
    %cst_15 = arith.constant 0.000000e+00 : f32
    %cst_16 = arith.constant -1.000000e+30 : f32
    %23 = vector.broadcast %cst_15 : f32 to vector<1x128xf32>
    %24 = vector.broadcast %cst_16 : f32 to vector<1x128xf32>
    %25 = arith.select %22, %23, %24 : vector<1x128xi1>, vector<1x128xf32>
    %c0_i32_17 = arith.constant 0 : i32
    %26 = vector.broadcast %c0_i32_17 : i32 to vector<1x128xi32>
    %27 = arith.cmpi sge, %15, %26 : vector<1x128xi32>
    %c8_i32 = arith.constant 8 : i32
    %28 = vector.broadcast %c8_i32 : i32 to vector<1x128xi32>
    %29 = arith.cmpi slt, %15, %28 : vector<1x128xi32>
    %30 = arith.andi %27, %29 : vector<1x128xi1>
    %31 = arith.extui %30 : vector<1x128xi1> to vector<1x128xi32>
    %32 = arith.sitofp %31 : vector<1x128xi32> to vector<1x128xf32>
    %c0_i32_18 = arith.constant 0 : i32
    %33 = vector.broadcast %c0_i32_18 : i32 to vector<1x128xi32>
    %34 = arith.cmpi sge, %15, %33 : vector<1x128xi32>
    %c32_i32 = arith.constant 32 : i32
    %35 = vector.broadcast %c32_i32 : i32 to vector<1x128xi32>
    %36 = arith.cmpi slt, %15, %35 : vector<1x128xi32>
    %37 = arith.andi %34, %36 : vector<1x128xi1>
    %38 = arith.extui %37 : vector<1x128xi1> to vector<1x128xi32>
    %39 = arith.sitofp %38 : vector<1x128xi32> to vector<1x128xf32>
    %c4_i32_19 = arith.constant 4 : i32
    %40 = vector.broadcast %c4_i32_19 : i32 to vector<1x128xi32>
    %41 = arith.cmpi sge, %15, %40 : vector<1x128xi32>
    %c8_i32_20 = arith.constant 8 : i32
    %42 = vector.broadcast %c8_i32_20 : i32 to vector<1x128xi32>
    %43 = arith.cmpi slt, %15, %42 : vector<1x128xi32>
    %44 = arith.andi %41, %43 : vector<1x128xi1>
    %cst_21 = arith.constant 0.000000e+00 : f32
    %cst_22 = arith.constant -1.000000e+30 : f32
    %45 = vector.broadcast %cst_21 : f32 to vector<1x128xf32>
    %46 = vector.broadcast %cst_22 : f32 to vector<1x128xf32>
    %47 = arith.select %44, %45, %46 : vector<1x128xi1>, vector<1x128xf32>
    %c8_i32_23 = arith.constant 8 : i32
    %48 = vector.broadcast %c8_i32_23 : i32 to vector<1x128xi32>
    %49 = arith.cmpi sge, %15, %48 : vector<1x128xi32>
    %c16_i32 = arith.constant 16 : i32
    %50 = vector.broadcast %c16_i32 : i32 to vector<1x128xi32>
    %51 = arith.cmpi slt, %15, %50 : vector<1x128xi32>
    %52 = arith.andi %49, %51 : vector<1x128xi1>
    %53 = arith.extui %52 : vector<1x128xi1> to vector<1x128xi32>
    %54 = arith.sitofp %53 : vector<1x128xi32> to vector<1x128xf32>
    %c32_i32_24 = arith.constant 32 : i32
    %55 = vector.broadcast %c32_i32_24 : i32 to vector<1x128xi32>
    %56 = arith.cmpi sge, %15, %55 : vector<1x128xi32>
    %c64_i32 = arith.constant 64 : i32
    %57 = vector.broadcast %c64_i32 : i32 to vector<1x128xi32>
    %58 = arith.cmpi slt, %15, %57 : vector<1x128xi32>
    %59 = arith.andi %56, %58 : vector<1x128xi1>
    %60 = arith.extui %59 : vector<1x128xi1> to vector<1x128xi32>
    %61 = arith.sitofp %60 : vector<1x128xi32> to vector<1x128xf32>
    %c8_i32_25 = arith.constant 8 : i32
    %62 = vector.broadcast %c8_i32_25 : i32 to vector<1x128xi32>
    %63 = arith.cmpi sge, %15, %62 : vector<1x128xi32>
    %c12_i32 = arith.constant 12 : i32
    %64 = vector.broadcast %c12_i32 : i32 to vector<1x128xi32>
    %65 = arith.cmpi slt, %15, %64 : vector<1x128xi32>
    %66 = arith.andi %63, %65 : vector<1x128xi1>
    %cst_26 = arith.constant 0.000000e+00 : f32
    %cst_27 = arith.constant -1.000000e+30 : f32
    %67 = vector.broadcast %cst_26 : f32 to vector<1x128xf32>
    %68 = vector.broadcast %cst_27 : f32 to vector<1x128xf32>
    %69 = arith.select %66, %67, %68 : vector<1x128xi1>, vector<1x128xf32>
    %c16_i32_28 = arith.constant 16 : i32
    %70 = vector.broadcast %c16_i32_28 : i32 to vector<1x128xi32>
    %71 = arith.cmpi sge, %15, %70 : vector<1x128xi32>
    %c24_i32 = arith.constant 24 : i32
    %72 = vector.broadcast %c24_i32 : i32 to vector<1x128xi32>
    %73 = arith.cmpi slt, %15, %72 : vector<1x128xi32>
    %74 = arith.andi %71, %73 : vector<1x128xi1>
    %75 = arith.extui %74 : vector<1x128xi1> to vector<1x128xi32>
    %76 = arith.sitofp %75 : vector<1x128xi32> to vector<1x128xf32>
    %c64_i32_29 = arith.constant 64 : i32
    %77 = vector.broadcast %c64_i32_29 : i32 to vector<1x128xi32>
    %78 = arith.cmpi sge, %15, %77 : vector<1x128xi32>
    %c96_i32 = arith.constant 96 : i32
    %79 = vector.broadcast %c96_i32 : i32 to vector<1x128xi32>
    %80 = arith.cmpi slt, %15, %79 : vector<1x128xi32>
    %81 = arith.andi %78, %80 : vector<1x128xi1>
    %82 = arith.extui %81 : vector<1x128xi1> to vector<1x128xi32>
    %83 = arith.sitofp %82 : vector<1x128xi32> to vector<1x128xf32>
    %c12_i32_30 = arith.constant 12 : i32
    %84 = vector.broadcast %c12_i32_30 : i32 to vector<1x128xi32>
    %85 = arith.cmpi sge, %15, %84 : vector<1x128xi32>
    %c16_i32_31 = arith.constant 16 : i32
    %86 = vector.broadcast %c16_i32_31 : i32 to vector<1x128xi32>
    %87 = arith.cmpi slt, %15, %86 : vector<1x128xi32>
    %88 = arith.andi %85, %87 : vector<1x128xi1>
    %cst_32 = arith.constant 0.000000e+00 : f32
    %cst_33 = arith.constant -1.000000e+30 : f32
    %89 = vector.broadcast %cst_32 : f32 to vector<1x128xf32>
    %90 = vector.broadcast %cst_33 : f32 to vector<1x128xf32>
    %91 = arith.select %88, %89, %90 : vector<1x128xi1>, vector<1x128xf32>
    %c24_i32_34 = arith.constant 24 : i32
    %92 = vector.broadcast %c24_i32_34 : i32 to vector<1x128xi32>
    %93 = arith.cmpi sge, %15, %92 : vector<1x128xi32>
    %c32_i32_35 = arith.constant 32 : i32
    %94 = vector.broadcast %c32_i32_35 : i32 to vector<1x128xi32>
    %95 = arith.cmpi slt, %15, %94 : vector<1x128xi32>
    %96 = arith.andi %93, %95 : vector<1x128xi1>
    %97 = arith.extui %96 : vector<1x128xi1> to vector<1x128xi32>
    %98 = arith.sitofp %97 : vector<1x128xi32> to vector<1x128xf32>
    %c96_i32_36 = arith.constant 96 : i32
    %99 = vector.broadcast %c96_i32_36 : i32 to vector<1x128xi32>
    %100 = arith.cmpi sge, %15, %99 : vector<1x128xi32>
    %c128_i32 = arith.constant 128 : i32
    %101 = vector.broadcast %c128_i32 : i32 to vector<1x128xi32>
    %102 = arith.cmpi slt, %15, %101 : vector<1x128xi32>
    %103 = arith.andi %100, %102 : vector<1x128xi1>
    %104 = arith.extui %103 : vector<1x128xi1> to vector<1x128xi32>
    %105 = arith.sitofp %104 : vector<1x128xi32> to vector<1x128xf32>
    %cst_37 = arith.constant 0.000000e+00 : f32
    %106 = vector.broadcast %cst_37 : f32 to vector<1x128xf32>
    %cst_38 = arith.constant 0.000000e+00 : f32
    %107 = vector.broadcast %cst_38 : f32 to vector<1x1xf32>
    %c0_39 = arith.constant 0 : index
    %c0_40 = arith.constant 0 : index
    %c0_41 = arith.constant 0 : index
    %108 = vector.load %arg13[%c0_39, %c0_40, %c0_41] : memref<3x4x32xf32, #tpu.memory_space<vmem>>, vector<1x4x32xf32>
    %109 = vector.shape_cast %108 : vector<1x4x32xf32> to vector<4x32xf32>
    %c0_42 = arith.constant 0 : index
    %c0_43 = arith.constant 0 : index
    %c0_44 = arith.constant 0 : index
    %110 = vector.load %arg11[%c0_42, %c0_43, %c0_44] : memref<3x32x512xf32, #tpu.memory_space<vmem>>, vector<1x32x512xf32>
    %111 = vector.shape_cast %110 : vector<1x32x512xf32> to vector<32x512xf32>
    %c0_45 = arith.constant 0 : index
    %c0_46 = arith.constant 0 : index
    %c0_47 = arith.constant 0 : index
    %112 = vector.load %arg12[%c0_45, %c0_46, %c0_47] : memref<3x128x32xf32, #tpu.memory_space<vmem>>, vector<1x128x32xf32>
    %113 = vector.shape_cast %112 : vector<1x128x32xf32> to vector<128x32xf32>
    %cst_48 = arith.constant dense<0.000000e+00> : vector<16x512xf32>
    %114 = tpu.matmul %9, %111, %cst_48 {dimension_numbers = #tpu.dot_dimension_numbers<[1], [0], [0], [1], [0, 0, 1, 1], [], []>} : vector<16x32xf32>, vector<32x512xf32>, vector<16x512xf32> -> vector<16x512xf32>
    %115 = vector.extract_strided_slice %114 {offsets = [0, 0], sizes = [16, 128], strides = [1, 1]} : vector<16x512xf32> to vector<16x128xf32>
    %116 = vector.extract_strided_slice %114 {offsets = [0, 128], sizes = [16, 128], strides = [1, 1]} : vector<16x512xf32> to vector<16x128xf32>
    %117 = vector.extract_strided_slice %114 {offsets = [0, 256], sizes = [16, 128], strides = [1, 1]} : vector<16x512xf32> to vector<16x128xf32>
    %118 = vector.extract_strided_slice %114 {offsets = [0, 384], sizes = [16, 128], strides = [1, 1]} : vector<16x512xf32> to vector<16x128xf32>
    %119 = vector.broadcast %25 : vector<1x128xf32> to vector<16x128xf32>
    %120 = arith.addf %118, %119 : vector<16x128xf32>
    %cst_49 = arith.constant dense<0xFF800000> : vector<16xf32>
    %121 = vector.multi_reduction <maximumf>, %120, %cst_49 [1] : vector<16x128xf32> to vector<16xf32>
    %122 = vector.shape_cast %121 : vector<16xf32> to vector<16x1xf32>
    %123 = vector.broadcast %122 : vector<16x1xf32> to vector<16x128xf32>
    %124 = arith.cmpf oeq, %120, %123 : vector<16x128xf32>
    %c128_i32_50 = arith.constant 128 : i32
    %125 = vector.broadcast %c128_i32_50 : i32 to vector<16x128xi32>
    %126 = arith.select %124, %16, %125 : vector<16x128xi1>, vector<16x128xi32>
    %cst_51 = arith.constant dense<2147483647> : vector<16xi32>
    %127 = vector.multi_reduction <minsi>, %126, %cst_51 [1] : vector<16x128xi32> to vector<16xi32>
    %128 = vector.shape_cast %127 : vector<16xi32> to vector<16x1xi32>
    %129 = vector.broadcast %128 : vector<16x1xi32> to vector<16x128xi32>
    %130 = arith.cmpi eq, %16, %129 : vector<16x128xi32>
    %131 = arith.extui %130 : vector<16x128xi1> to vector<16x128xi32>
    %132 = arith.sitofp %131 : vector<16x128xi32> to vector<16x128xf32>
    %133 = vector.broadcast %47 : vector<1x128xf32> to vector<16x128xf32>
    %134 = arith.addf %118, %133 : vector<16x128xf32>
    %cst_52 = arith.constant dense<0xFF800000> : vector<16xf32>
    %135 = vector.multi_reduction <maximumf>, %134, %cst_52 [1] : vector<16x128xf32> to vector<16xf32>
    %136 = vector.shape_cast %135 : vector<16xf32> to vector<16x1xf32>
    %137 = vector.broadcast %136 : vector<16x1xf32> to vector<16x128xf32>
    %138 = arith.cmpf oeq, %134, %137 : vector<16x128xf32>
    %c128_i32_53 = arith.constant 128 : i32
    %139 = vector.broadcast %c128_i32_53 : i32 to vector<16x128xi32>
    %140 = arith.select %138, %16, %139 : vector<16x128xi1>, vector<16x128xi32>
    %cst_54 = arith.constant dense<2147483647> : vector<16xi32>
    %141 = vector.multi_reduction <minsi>, %140, %cst_54 [1] : vector<16x128xi32> to vector<16xi32>
    %142 = vector.shape_cast %141 : vector<16xi32> to vector<16x1xi32>
    %143 = vector.broadcast %142 : vector<16x1xi32> to vector<16x128xi32>
    %144 = arith.cmpi eq, %16, %143 : vector<16x128xi32>
    %145 = arith.extui %144 : vector<16x128xi1> to vector<16x128xi32>
    %146 = arith.sitofp %145 : vector<16x128xi32> to vector<16x128xf32>
    %147 = vector.broadcast %69 : vector<1x128xf32> to vector<16x128xf32>
    %148 = arith.addf %118, %147 : vector<16x128xf32>
    %cst_55 = arith.constant dense<0xFF800000> : vector<16xf32>
    %149 = vector.multi_reduction <maximumf>, %148, %cst_55 [1] : vector<16x128xf32> to vector<16xf32>
    %150 = vector.shape_cast %149 : vector<16xf32> to vector<16x1xf32>
    %151 = vector.broadcast %150 : vector<16x1xf32> to vector<16x128xf32>
    %152 = arith.cmpf oeq, %148, %151 : vector<16x128xf32>
    %c128_i32_56 = arith.constant 128 : i32
    %153 = vector.broadcast %c128_i32_56 : i32 to vector<16x128xi32>
    %154 = arith.select %152, %16, %153 : vector<16x128xi1>, vector<16x128xi32>
    %cst_57 = arith.constant dense<2147483647> : vector<16xi32>
    %155 = vector.multi_reduction <minsi>, %154, %cst_57 [1] : vector<16x128xi32> to vector<16xi32>
    %156 = vector.shape_cast %155 : vector<16xi32> to vector<16x1xi32>
    %157 = vector.broadcast %156 : vector<16x1xi32> to vector<16x128xi32>
    %158 = arith.cmpi eq, %16, %157 : vector<16x128xi32>
    %159 = arith.extui %158 : vector<16x128xi1> to vector<16x128xi32>
    %160 = arith.sitofp %159 : vector<16x128xi32> to vector<16x128xf32>
    %161 = vector.broadcast %91 : vector<1x128xf32> to vector<16x128xf32>
    %162 = arith.addf %118, %161 : vector<16x128xf32>
    %cst_58 = arith.constant dense<0xFF800000> : vector<16xf32>
    %163 = vector.multi_reduction <maximumf>, %162, %cst_58 [1] : vector<16x128xf32> to vector<16xf32>
    %164 = vector.shape_cast %163 : vector<16xf32> to vector<16x1xf32>
    %165 = vector.broadcast %164 : vector<16x1xf32> to vector<16x128xf32>
    %166 = arith.cmpf oeq, %162, %165 : vector<16x128xf32>
    %c128_i32_59 = arith.constant 128 : i32
    %167 = vector.broadcast %c128_i32_59 : i32 to vector<16x128xi32>
    %168 = arith.select %166, %16, %167 : vector<16x128xi1>, vector<16x128xi32>
    %cst_60 = arith.constant dense<2147483647> : vector<16xi32>
    %169 = vector.multi_reduction <minsi>, %168, %cst_60 [1] : vector<16x128xi32> to vector<16xi32>
    %170 = vector.shape_cast %169 : vector<16xi32> to vector<16x1xi32>
    %171 = vector.broadcast %170 : vector<16x1xi32> to vector<16x128xi32>
    %172 = arith.cmpi eq, %16, %171 : vector<16x128xi32>
    %173 = arith.extui %172 : vector<16x128xi1> to vector<16x128xi32>
    %174 = arith.sitofp %173 : vector<16x128xi32> to vector<16x128xf32>
    %175 = arith.addf %132, %146 : vector<16x128xf32>
    %176 = arith.addf %175, %160 : vector<16x128xf32>
    %177 = arith.addf %176, %174 : vector<16x128xf32>
    %cst_61 = arith.constant dense<0.000000e+00> : vector<128xf32>
    %178 = vector.multi_reduction <add>, %177, %cst_61 [0] : vector<16x128xf32> to vector<128xf32>
    %179 = vector.shape_cast %178 : vector<128xf32> to vector<1x128xf32>
    %cst_62 = arith.constant 9.900000e-01 : f32
    %180 = vector.broadcast %cst_62 : f32 to vector<1x128xf32>
    %181 = arith.mulf %106, %180 : vector<1x128xf32>
    %cst_63 = arith.constant 6.250000e-04 : f32
    %182 = vector.broadcast %cst_63 : f32 to vector<1x128xf32>
    %183 = arith.mulf %179, %182 : vector<1x128xf32>
    %184 = arith.addf %181, %183 : vector<1x128xf32>
    %cst_64 = arith.constant dense<0.000000e+00> : vector<1xf32>
    %185 = vector.multi_reduction <add>, %184, %cst_64 [1] : vector<1x128xf32> to vector<1xf32>
    %186 = vector.shape_cast %185 : vector<1xf32> to vector<1x1xf32>
    %187 = arith.mulf %184, %184 : vector<1x128xf32>
    %cst_65 = arith.constant dense<0.000000e+00> : vector<1xf32>
    %188 = vector.multi_reduction <add>, %187, %cst_65 [1] : vector<1x128xf32> to vector<1xf32>
    %189 = vector.shape_cast %188 : vector<1xf32> to vector<1x1xf32>
    %cst_66 = arith.constant 9.99999971E-10 : f32
    %190 = vector.broadcast %cst_66 : f32 to vector<1x1xf32>
    %191 = arith.addf %186, %190 : vector<1x1xf32>
    %cst_67 = arith.constant 9.99999971E-10 : f32
    %192 = vector.broadcast %cst_67 : f32 to vector<1x1xf32>
    %193 = arith.addf %186, %192 : vector<1x1xf32>
    %194 = arith.mulf %191, %193 : vector<1x1xf32>
    %cst_68 = arith.constant 1.600000e+01 : f32
    %195 = vector.broadcast %cst_68 : f32 to vector<1x1xf32>
    %196 = arith.divf %195, %194 : vector<1x1xf32>
    %197 = arith.mulf %189, %196 : vector<1x1xf32>
    %cst_69 = arith.constant dense<0.000000e+00> : vector<16x128xf32>
    %198 = tpu.matmul %177, %12, %cst_69 {dimension_numbers = #tpu.dot_dimension_numbers<[1], [0], [0], [1], [0, 0, 1, 1], [], []>} : vector<16x128xf32>, vector<128x128xf32>, vector<16x128xf32> -> vector<16x128xf32>
    %199 = arith.mulf %115, %198 : vector<16x128xf32>
    %200 = vector.broadcast %32 : vector<1x128xf32> to vector<16x128xf32>
    %201 = arith.mulf %116, %200 : vector<16x128xf32>
    %cst_70 = arith.constant dense<0.000000e+00> : vector<16x16xf32>
    %202 = tpu.matmul %201, %117, %cst_70 {dimension_numbers = #tpu.dot_dimension_numbers<[1], [1], [0], [0], [0, 0, 1, 0], [], []>} : vector<16x128xf32>, vector<16x128xf32>, vector<16x16xf32> -> vector<16x16xf32>
    %203 = arith.addf %202, %10 : vector<16x16xf32>
    %cst_71 = arith.constant dense<0xFF800000> : vector<16xf32>
    %204 = vector.multi_reduction <maximumf>, %203, %cst_71 [1] : vector<16x16xf32> to vector<16xf32>
    %205 = vector.shape_cast %204 : vector<16xf32> to vector<16x1xf32>
    %206 = vector.broadcast %205 : vector<16x1xf32> to vector<16x16xf32>
    %207 = arith.subf %203, %206 : vector<16x16xf32>
    %208 = math.exp %207 : vector<16x16xf32>
    %cst_72 = arith.constant dense<0.000000e+00> : vector<16xf32>
    %209 = vector.multi_reduction <add>, %208, %cst_72 [1] : vector<16x16xf32> to vector<16xf32>
    %210 = vector.shape_cast %209 : vector<16xf32> to vector<16x1xf32>
    %211 = tpu.reciprocal %210 {approx = true} : vector<16x1xf32> -> vector<16x1xf32>
    %212 = vector.broadcast %211 : vector<16x1xf32> to vector<16x16xf32>
    %213 = arith.mulf %208, %212 : vector<16x16xf32>
    %cst_73 = arith.constant dense<0.000000e+00> : vector<16x128xf32>
    %214 = tpu.matmul %213, %199, %cst_73 {dimension_numbers = #tpu.dot_dimension_numbers<[0], [0], [1], [1], [0, 1, 1, 1], [], []>} : vector<16x16xf32>, vector<16x128xf32>, vector<16x128xf32> -> vector<16x128xf32>
    %215 = vector.broadcast %39 : vector<1x128xf32> to vector<16x128xf32>
    %216 = arith.mulf %214, %215 : vector<16x128xf32>
    %217 = vector.broadcast %54 : vector<1x128xf32> to vector<16x128xf32>
    %218 = arith.mulf %116, %217 : vector<16x128xf32>
    %cst_74 = arith.constant dense<0.000000e+00> : vector<16x16xf32>
    %219 = tpu.matmul %218, %117, %cst_74 {dimension_numbers = #tpu.dot_dimension_numbers<[1], [1], [0], [0], [0, 0, 1, 0], [], []>} : vector<16x128xf32>, vector<16x128xf32>, vector<16x16xf32> -> vector<16x16xf32>
    %220 = arith.addf %219, %10 : vector<16x16xf32>
    %cst_75 = arith.constant dense<0xFF800000> : vector<16xf32>
    %221 = vector.multi_reduction <maximumf>, %220, %cst_75 [1] : vector<16x16xf32> to vector<16xf32>
    %222 = vector.shape_cast %221 : vector<16xf32> to vector<16x1xf32>
    %223 = vector.broadcast %222 : vector<16x1xf32> to vector<16x16xf32>
    %224 = arith.subf %220, %223 : vector<16x16xf32>
    %225 = math.exp %224 : vector<16x16xf32>
    %cst_76 = arith.constant dense<0.000000e+00> : vector<16xf32>
    %226 = vector.multi_reduction <add>, %225, %cst_76 [1] : vector<16x16xf32> to vector<16xf32>
    %227 = vector.shape_cast %226 : vector<16xf32> to vector<16x1xf32>
    %228 = tpu.reciprocal %227 {approx = true} : vector<16x1xf32> -> vector<16x1xf32>
    %229 = vector.broadcast %228 : vector<16x1xf32> to vector<16x16xf32>
    %230 = arith.mulf %225, %229 : vector<16x16xf32>
    %cst_77 = arith.constant dense<0.000000e+00> : vector<16x128xf32>
    %231 = tpu.matmul %230, %199, %cst_77 {dimension_numbers = #tpu.dot_dimension_numbers<[0], [0], [1], [1], [0, 1, 1, 1], [], []>} : vector<16x16xf32>, vector<16x128xf32>, vector<16x128xf32> -> vector<16x128xf32>
    %232 = vector.broadcast %61 : vector<1x128xf32> to vector<16x128xf32>
    %233 = arith.mulf %231, %232 : vector<16x128xf32>
    %234 = vector.broadcast %76 : vector<1x128xf32> to vector<16x128xf32>
    %235 = arith.mulf %116, %234 : vector<16x128xf32>
    %cst_78 = arith.constant dense<0.000000e+00> : vector<16x16xf32>
    %236 = tpu.matmul %235, %117, %cst_78 {dimension_numbers = #tpu.dot_dimension_numbers<[1], [1], [0], [0], [0, 0, 1, 0], [], []>} : vector<16x128xf32>, vector<16x128xf32>, vector<16x16xf32> -> vector<16x16xf32>
    %237 = arith.addf %236, %10 : vector<16x16xf32>
    %cst_79 = arith.constant dense<0xFF800000> : vector<16xf32>
    %238 = vector.multi_reduction <maximumf>, %237, %cst_79 [1] : vector<16x16xf32> to vector<16xf32>
    %239 = vector.shape_cast %238 : vector<16xf32> to vector<16x1xf32>
    %240 = vector.broadcast %239 : vector<16x1xf32> to vector<16x16xf32>
    %241 = arith.subf %237, %240 : vector<16x16xf32>
    %242 = math.exp %241 : vector<16x16xf32>
    %cst_80 = arith.constant dense<0.000000e+00> : vector<16xf32>
    %243 = vector.multi_reduction <add>, %242, %cst_80 [1] : vector<16x16xf32> to vector<16xf32>
    %244 = vector.shape_cast %243 : vector<16xf32> to vector<16x1xf32>
    %245 = tpu.reciprocal %244 {approx = true} : vector<16x1xf32> -> vector<16x1xf32>
    %246 = vector.broadcast %245 : vector<16x1xf32> to vector<16x16xf32>
    %247 = arith.mulf %242, %246 : vector<16x16xf32>
    %cst_81 = arith.constant dense<0.000000e+00> : vector<16x128xf32>
    %248 = tpu.matmul %247, %199, %cst_81 {dimension_numbers = #tpu.dot_dimension_numbers<[0], [0], [1], [1], [0, 1, 1, 1], [], []>} : vector<16x16xf32>, vector<16x128xf32>, vector<16x128xf32> -> vector<16x128xf32>
    %249 = vector.broadcast %83 : vector<1x128xf32> to vector<16x128xf32>
    %250 = arith.mulf %248, %249 : vector<16x128xf32>
    %251 = vector.broadcast %98 : vector<1x128xf32> to vector<16x128xf32>
    %252 = arith.mulf %116, %251 : vector<16x128xf32>
    %cst_82 = arith.constant dense<0.000000e+00> : vector<16x16xf32>
    %253 = tpu.matmul %252, %117, %cst_82 {dimension_numbers = #tpu.dot_dimension_numbers<[1], [1], [0], [0], [0, 0, 1, 0], [], []>} : vector<16x128xf32>, vector<16x128xf32>, vector<16x16xf32> -> vector<16x16xf32>
    %254 = arith.addf %253, %10 : vector<16x16xf32>
    %cst_83 = arith.constant dense<0xFF800000> : vector<16xf32>
    %255 = vector.multi_reduction <maximumf>, %254, %cst_83 [1] : vector<16x16xf32> to vector<16xf32>
    %256 = vector.shape_cast %255 : vector<16xf32> to vector<16x1xf32>
    %257 = vector.broadcast %256 : vector<16x1xf32> to vector<16x16xf32>
    %258 = arith.subf %254, %257 : vector<16x16xf32>
    %259 = math.exp %258 : vector<16x16xf32>
    %cst_84 = arith.constant dense<0.000000e+00> : vector<16xf32>
    %260 = vector.multi_reduction <add>, %259, %cst_84 [1] : vector<16x16xf32> to vector<16xf32>
    %261 = vector.shape_cast %260 : vector<16xf32> to vector<16x1xf32>
    %262 = tpu.reciprocal %261 {approx = true} : vector<16x1xf32> -> vector<16x1xf32>
    %263 = vector.broadcast %262 : vector<16x1xf32> to vector<16x16xf32>
    %264 = arith.mulf %259, %263 : vector<16x16xf32>
    %cst_85 = arith.constant dense<0.000000e+00> : vector<16x128xf32>
    %265 = tpu.matmul %264, %199, %cst_85 {dimension_numbers = #tpu.dot_dimension_numbers<[0], [0], [1], [1], [0, 1, 1, 1], [], []>} : vector<16x16xf32>, vector<16x128xf32>, vector<16x128xf32> -> vector<16x128xf32>
    %266 = vector.broadcast %105 : vector<1x128xf32> to vector<16x128xf32>
    %267 = arith.mulf %265, %266 : vector<16x128xf32>
    %268 = arith.addf %216, %233 : vector<16x128xf32>
    %269 = arith.addf %268, %250 : vector<16x128xf32>
    %270 = arith.addf %269, %267 : vector<16x128xf32>
    %cst_86 = arith.constant dense<0.000000e+00> : vector<16x128xf32>
    %271 = tpu.matmul %270, %13, %cst_86 {dimension_numbers = #tpu.dot_dimension_numbers<[1], [0], [0], [1], [0, 0, 1, 1], [], []>} : vector<16x128xf32>, vector<128x128xf32>, vector<16x128xf32> -> vector<16x128xf32>
    %272 = arith.mulf %271, %198 : vector<16x128xf32>
    %cst_87 = arith.constant dense<0.000000e+00> : vector<16x32xf32>
    %273 = tpu.matmul %272, %113, %cst_87 {dimension_numbers = #tpu.dot_dimension_numbers<[1], [0], [0], [1], [0, 0, 1, 1], [], []>} : vector<16x128xf32>, vector<128x32xf32>, vector<16x32xf32> -> vector<16x32xf32>
    %274 = arith.addf %9, %273 : vector<16x32xf32>
    %275 = vector.extract_strided_slice %109 {offsets = [0, 0], sizes = [1, 32], strides = [1, 1]} : vector<4x32xf32> to vector<1x32xf32>
    %276 = vector.extract_strided_slice %109 {offsets = [1, 0], sizes = [1, 32], strides = [1, 1]} : vector<4x32xf32> to vector<1x32xf32>
    %cst_88 = arith.constant dense<0.000000e+00> : vector<16xf32>
    %277 = vector.multi_reduction <add>, %274, %cst_88 [1] : vector<16x32xf32> to vector<16xf32>
    %278 = vector.shape_cast %277 : vector<16xf32> to vector<16x1xf32>
    %cst_89 = arith.constant 3.200000e+01 : f32
    %279 = vector.broadcast %cst_89 : f32 to vector<16x1xf32>
    %280 = arith.divf %278, %279 : vector<16x1xf32>
    %281 = vector.broadcast %280 : vector<16x1xf32> to vector<16x32xf32>
    %282 = arith.subf %274, %281 : vector<16x32xf32>
    %283 = arith.mulf %282, %282 : vector<16x32xf32>
    %cst_90 = arith.constant dense<0.000000e+00> : vector<16xf32>
    %284 = vector.multi_reduction <add>, %283, %cst_90 [1] : vector<16x32xf32> to vector<16xf32>
    %285 = vector.shape_cast %284 : vector<16xf32> to vector<16x1xf32>
    %cst_91 = arith.constant 3.200000e+01 : f32
    %286 = vector.broadcast %cst_91 : f32 to vector<16x1xf32>
    %287 = arith.divf %285, %286 : vector<16x1xf32>
    %288 = vector.broadcast %280 : vector<16x1xf32> to vector<16x32xf32>
    %289 = arith.subf %274, %288 : vector<16x32xf32>
    %cst_92 = arith.constant 9.99999974E-6 : f32
    %290 = vector.broadcast %cst_92 : f32 to vector<16x1xf32>
    %291 = arith.addf %287, %290 : vector<16x1xf32>
    %292 = math.rsqrt %291 : vector<16x1xf32>
    %293 = vector.broadcast %292 : vector<16x1xf32> to vector<16x32xf32>
    %294 = arith.mulf %289, %293 : vector<16x32xf32>
    %295 = vector.broadcast %275 : vector<1x32xf32> to vector<16x32xf32>
    %296 = arith.mulf %294, %295 : vector<16x32xf32>
    %297 = vector.broadcast %276 : vector<1x32xf32> to vector<16x32xf32>
    %298 = arith.addf %296, %297 : vector<16x32xf32>
    %c0_93 = arith.constant 0 : index
    %c0_94 = arith.constant 0 : index
    %c0_95 = arith.constant 0 : index
    %299 = vector.load %arg14[%c0_93, %c0_94, %c0_95] : memref<3x32x4xf32, #tpu.memory_space<vmem>>, vector<1x32x4xf32>
    %300 = vector.shape_cast %299 : vector<1x32x4xf32> to vector<32x4xf32>
    %c0_96 = arith.constant 0 : index
    %c0_97 = arith.constant 0 : index
    %c0_98 = arith.constant 0 : index
    %301 = vector.load %arg15[%c0_96, %c0_97, %c0_98] : memref<3x32x256xf32, #tpu.memory_space<vmem>>, vector<1x32x256xf32>
    %302 = vector.shape_cast %301 : vector<1x32x256xf32> to vector<32x256xf32>
    %c0_99 = arith.constant 0 : index
    %c0_100 = arith.constant 0 : index
    %c0_101 = arith.constant 0 : index
    %303 = vector.load %arg16[%c0_99, %c0_100, %c0_101] : memref<3x256x32xf32, #tpu.memory_space<vmem>>, vector<1x256x32xf32>
    %304 = vector.shape_cast %303 : vector<1x256x32xf32> to vector<256x32xf32>
    %cst_102 = arith.constant dense<0.000000e+00> : vector<16x4xf32>
    %305 = tpu.matmul %298, %300, %cst_102 {dimension_numbers = #tpu.dot_dimension_numbers<[1], [0], [0], [1], [0, 0, 1, 1], [], []>} : vector<16x32xf32>, vector<32x4xf32>, vector<16x4xf32> -> vector<16x4xf32>
    %cst_103 = arith.constant dense<0xFF800000> : vector<16xf32>
    %306 = vector.multi_reduction <maximumf>, %305, %cst_103 [1] : vector<16x4xf32> to vector<16xf32>
    %307 = vector.shape_cast %306 : vector<16xf32> to vector<16x1xf32>
    %308 = vector.broadcast %307 : vector<16x1xf32> to vector<16x4xf32>
    %309 = arith.cmpf oeq, %305, %308 : vector<16x4xf32>
    %c4_i32_104 = arith.constant 4 : i32
    %310 = vector.broadcast %c4_i32_104 : i32 to vector<16x4xi32>
    %311 = arith.select %309, %17, %310 : vector<16x4xi1>, vector<16x4xi32>
    %cst_105 = arith.constant dense<2147483647> : vector<16xi32>
    %312 = vector.multi_reduction <minsi>, %311, %cst_105 [1] : vector<16x4xi32> to vector<16xi32>
    %313 = vector.shape_cast %312 : vector<16xi32> to vector<16x1xi32>
    %314 = vector.broadcast %313 : vector<16x1xi32> to vector<16x4xi32>
    %315 = arith.cmpi eq, %17, %314 : vector<16x4xi32>
    %316 = arith.extui %315 : vector<16x4xi1> to vector<16x4xi32>
    %317 = arith.sitofp %316 : vector<16x4xi32> to vector<16x4xf32>
    %cst_106 = arith.constant 0.000000e+00 : f32
    %318 = vector.broadcast %cst_106 : f32 to vector<16x4xf32>
    %319 = arith.cmpf ogt, %317, %318 : vector<16x4xf32>
    %cst_107 = arith.constant -1.000000e+30 : f32
    %320 = vector.broadcast %cst_107 : f32 to vector<16x4xf32>
    %321 = arith.select %319, %320, %305 : vector<16x4xi1>, vector<16x4xf32>
    %cst_108 = arith.constant dense<0xFF800000> : vector<16xf32>
    %322 = vector.multi_reduction <maximumf>, %321, %cst_108 [1] : vector<16x4xf32> to vector<16xf32>
    %323 = vector.shape_cast %322 : vector<16xf32> to vector<16x1xf32>
    %324 = vector.broadcast %323 : vector<16x1xf32> to vector<16x4xf32>
    %325 = arith.cmpf oeq, %321, %324 : vector<16x4xf32>
    %c4_i32_109 = arith.constant 4 : i32
    %326 = vector.broadcast %c4_i32_109 : i32 to vector<16x4xi32>
    %327 = arith.select %325, %17, %326 : vector<16x4xi1>, vector<16x4xi32>
    %cst_110 = arith.constant dense<2147483647> : vector<16xi32>
    %328 = vector.multi_reduction <minsi>, %327, %cst_110 [1] : vector<16x4xi32> to vector<16xi32>
    %329 = vector.shape_cast %328 : vector<16xi32> to vector<16x1xi32>
    %330 = vector.broadcast %329 : vector<16x1xi32> to vector<16x4xi32>
    %331 = arith.cmpi eq, %17, %330 : vector<16x4xi32>
    %332 = arith.extui %331 : vector<16x4xi1> to vector<16x4xi32>
    %333 = arith.sitofp %332 : vector<16x4xi32> to vector<16x4xf32>
    %334 = arith.subf %323, %307 : vector<16x1xf32>
    %335 = math.exp %334 : vector<16x1xf32>
    %cst_111 = arith.constant 1.000000e+00 : f32
    %336 = vector.broadcast %cst_111 : f32 to vector<16x1xf32>
    %337 = arith.addf %336, %335 : vector<16x1xf32>
    %338 = tpu.reciprocal %337 {approx = true} : vector<16x1xf32> -> vector<16x1xf32>
    %339 = arith.mulf %335, %338 : vector<16x1xf32>
    %340 = arith.addf %317, %333 : vector<16x4xf32>
    %cst_112 = arith.constant dense<0.000000e+00> : vector<16x4xf32>
    %341 = tpu.matmul %11, %340, %cst_112 {dimension_numbers = #tpu.dot_dimension_numbers<[1], [0], [0], [1], [0, 0, 1, 1], [], []>} : vector<16x16xf32>, vector<16x4xf32>, vector<16x4xf32> -> vector<16x4xf32>
    %cst_113 = arith.constant 1.000000e+00 : f32
    %342 = vector.broadcast %cst_113 : f32 to vector<16x4xf32>
    %343 = arith.addf %341, %342 : vector<16x4xf32>
    %cst_114 = arith.constant 5.000000e+00 : f32
    %344 = vector.broadcast %cst_114 : f32 to vector<16x4xf32>
    %345 = arith.cmpf ole, %343, %344 : vector<16x4xf32>
    %346 = arith.extui %345 : vector<16x4xi1> to vector<16x4xi32>
    %347 = arith.sitofp %346 : vector<16x4xi32> to vector<16x4xf32>
    %348 = arith.mulf %317, %347 : vector<16x4xf32>
    %cst_115 = arith.constant dense<0.000000e+00> : vector<16xf32>
    %349 = vector.multi_reduction <add>, %348, %cst_115 [1] : vector<16x4xf32> to vector<16xf32>
    %350 = vector.shape_cast %349 : vector<16xf32> to vector<16x1xf32>
    %351 = arith.addf %341, %317 : vector<16x4xf32>
    %cst_116 = arith.constant 1.000000e+00 : f32
    %352 = vector.broadcast %cst_116 : f32 to vector<16x4xf32>
    %353 = arith.addf %351, %352 : vector<16x4xf32>
    %cst_117 = arith.constant 5.000000e+00 : f32
    %354 = vector.broadcast %cst_117 : f32 to vector<16x4xf32>
    %355 = arith.cmpf ole, %353, %354 : vector<16x4xf32>
    %356 = arith.extui %355 : vector<16x4xi1> to vector<16x4xi32>
    %357 = arith.sitofp %356 : vector<16x4xi32> to vector<16x4xf32>
    %358 = arith.mulf %333, %357 : vector<16x4xf32>
    %cst_118 = arith.constant dense<0.000000e+00> : vector<16xf32>
    %359 = vector.multi_reduction <add>, %358, %cst_118 [1] : vector<16x4xf32> to vector<16xf32>
    %360 = vector.shape_cast %359 : vector<16xf32> to vector<16x1xf32>
    %361 = arith.mulf %338, %350 : vector<16x1xf32>
    %362 = arith.mulf %339, %360 : vector<16x1xf32>
    %363 = arith.addf %361, %362 : vector<16x1xf32>
    %cst_119 = arith.constant 9.99999971E-10 : f32
    %364 = vector.broadcast %cst_119 : f32 to vector<16x1xf32>
    %365 = arith.addf %363, %364 : vector<16x1xf32>
    %366 = tpu.reciprocal %365 {approx = true} : vector<16x1xf32> -> vector<16x1xf32>
    %367 = arith.mulf %361, %366 : vector<16x1xf32>
    %368 = arith.mulf %362, %366 : vector<16x1xf32>
    %369 = vector.broadcast %367 : vector<16x1xf32> to vector<16x4xf32>
    %370 = arith.mulf %369, %317 : vector<16x4xf32>
    %371 = vector.broadcast %368 : vector<16x1xf32> to vector<16x4xf32>
    %372 = arith.mulf %371, %333 : vector<16x4xf32>
    %373 = arith.addf %370, %372 : vector<16x4xf32>
    %cst_120 = arith.constant dense<0.000000e+00> : vector<16x256xf32>
    %374 = tpu.matmul %298, %302, %cst_120 {dimension_numbers = #tpu.dot_dimension_numbers<[1], [0], [0], [1], [0, 0, 1, 1], [], []>} : vector<16x32xf32>, vector<32x256xf32>, vector<16x256xf32> -> vector<16x256xf32>
    %cst_121 = arith.constant 0.000000e+00 : f32
    %375 = vector.broadcast %cst_121 : f32 to vector<16x256xf32>
    %376 = arith.maximumf %374, %375 : vector<16x256xf32>
    %cst_122 = arith.constant dense<0.000000e+00> : vector<16x256xf32>
    %377 = tpu.matmul %373, %14, %cst_122 {dimension_numbers = #tpu.dot_dimension_numbers<[1], [0], [0], [1], [0, 0, 1, 1], [], []>} : vector<16x4xf32>, vector<4x256xf32>, vector<16x256xf32> -> vector<16x256xf32>
    %378 = arith.mulf %376, %377 : vector<16x256xf32>
    %cst_123 = arith.constant dense<0.000000e+00> : vector<16x32xf32>
    %379 = tpu.matmul %378, %304, %cst_123 {dimension_numbers = #tpu.dot_dimension_numbers<[1], [0], [0], [1], [0, 0, 1, 1], [], []>} : vector<16x256xf32>, vector<256x32xf32>, vector<16x32xf32> -> vector<16x32xf32>
    %380 = vector.broadcast %350 : vector<16x1xf32> to vector<16x4xf32>
    %381 = arith.mulf %317, %380 : vector<16x4xf32>
    %382 = vector.broadcast %360 : vector<16x1xf32> to vector<16x4xf32>
    %383 = arith.mulf %333, %382 : vector<16x4xf32>
    %384 = arith.addf %381, %383 : vector<16x4xf32>
    %cst_124 = arith.constant dense<0.000000e+00> : vector<4xf32>
    %385 = vector.multi_reduction <add>, %384, %cst_124 [0] : vector<16x4xf32> to vector<4xf32>
    %386 = vector.shape_cast %385 : vector<4xf32> to vector<1x4xf32>
    %387 = vector.broadcast %367 : vector<16x1xf32> to vector<16x4xf32>
    %388 = arith.mulf %317, %387 : vector<16x4xf32>
    %389 = vector.broadcast %368 : vector<16x1xf32> to vector<16x4xf32>
    %390 = arith.mulf %333, %389 : vector<16x4xf32>
    %391 = arith.addf %388, %390 : vector<16x4xf32>
    %cst_125 = arith.constant dense<0.000000e+00> : vector<4xf32>
    %392 = vector.multi_reduction <add>, %391, %cst_125 [0] : vector<16x4xf32> to vector<4xf32>
    %393 = vector.shape_cast %392 : vector<4xf32> to vector<1x4xf32>
    %cst_126 = arith.constant dense<0.000000e+00> : vector<1xf32>
    %394 = vector.multi_reduction <add>, %386, %cst_126 [1] : vector<1x4xf32> to vector<1xf32>
    %395 = vector.shape_cast %394 : vector<1xf32> to vector<1x1xf32>
    %cst_127 = arith.constant 9.99999971E-10 : f32
    %396 = vector.broadcast %cst_127 : f32 to vector<1x1xf32>
    %397 = arith.addf %395, %396 : vector<1x1xf32>
    %398 = vector.broadcast %397 : vector<1x1xf32> to vector<1x4xf32>
    %399 = arith.divf %386, %398 : vector<1x4xf32>
    %cst_128 = arith.constant dense<0.000000e+00> : vector<1xf32>
    %400 = vector.multi_reduction <add>, %393, %cst_128 [1] : vector<1x4xf32> to vector<1xf32>
    %401 = vector.shape_cast %400 : vector<1xf32> to vector<1x1xf32>
    %cst_129 = arith.constant 9.99999971E-10 : f32
    %402 = vector.broadcast %cst_129 : f32 to vector<1x1xf32>
    %403 = arith.addf %401, %402 : vector<1x1xf32>
    %404 = vector.broadcast %403 : vector<1x1xf32> to vector<1x4xf32>
    %405 = arith.divf %393, %404 : vector<1x4xf32>
    %406 = arith.mulf %399, %405 : vector<1x4xf32>
    %cst_130 = arith.constant dense<0.000000e+00> : vector<1xf32>
    %407 = vector.multi_reduction <add>, %406, %cst_130 [1] : vector<1x4xf32> to vector<1xf32>
    %408 = vector.shape_cast %407 : vector<1xf32> to vector<1x1xf32>
    %cst_131 = arith.constant 4.000000e+00 : f32
    %409 = vector.broadcast %cst_131 : f32 to vector<1x1xf32>
    %410 = arith.mulf %408, %409 : vector<1x1xf32>
    %411 = arith.addf %298, %379 : vector<16x32xf32>
    %412 = vector.extract_strided_slice %109 {offsets = [2, 0], sizes = [1, 32], strides = [1, 1]} : vector<4x32xf32> to vector<1x32xf32>
    %413 = vector.extract_strided_slice %109 {offsets = [3, 0], sizes = [1, 32], strides = [1, 1]} : vector<4x32xf32> to vector<1x32xf32>
    %cst_132 = arith.constant dense<0.000000e+00> : vector<16xf32>
    %414 = vector.multi_reduction <add>, %411, %cst_132 [1] : vector<16x32xf32> to vector<16xf32>
    %415 = vector.shape_cast %414 : vector<16xf32> to vector<16x1xf32>
    %cst_133 = arith.constant 3.200000e+01 : f32
    %416 = vector.broadcast %cst_133 : f32 to vector<16x1xf32>
    %417 = arith.divf %415, %416 : vector<16x1xf32>
    %418 = vector.broadcast %417 : vector<16x1xf32> to vector<16x32xf32>
    %419 = arith.subf %411, %418 : vector<16x32xf32>
    %420 = arith.mulf %419, %419 : vector<16x32xf32>
    %cst_134 = arith.constant dense<0.000000e+00> : vector<16xf32>
    %421 = vector.multi_reduction <add>, %420, %cst_134 [1] : vector<16x32xf32> to vector<16xf32>
    %422 = vector.shape_cast %421 : vector<16xf32> to vector<16x1xf32>
    %cst_135 = arith.constant 3.200000e+01 : f32
    %423 = vector.broadcast %cst_135 : f32 to vector<16x1xf32>
    %424 = arith.divf %422, %423 : vector<16x1xf32>
    %425 = vector.broadcast %417 : vector<16x1xf32> to vector<16x32xf32>
    %426 = arith.subf %411, %425 : vector<16x32xf32>
    %cst_136 = arith.constant 9.99999974E-6 : f32
    %427 = vector.broadcast %cst_136 : f32 to vector<16x1xf32>
    %428 = arith.addf %424, %427 : vector<16x1xf32>
    %429 = math.rsqrt %428 : vector<16x1xf32>
    %430 = vector.broadcast %429 : vector<16x1xf32> to vector<16x32xf32>
    %431 = arith.mulf %426, %430 : vector<16x32xf32>
    %432 = vector.broadcast %412 : vector<1x32xf32> to vector<16x32xf32>
    %433 = arith.mulf %431, %432 : vector<16x32xf32>
    %434 = vector.broadcast %413 : vector<1x32xf32> to vector<16x32xf32>
    %435 = arith.addf %433, %434 : vector<16x32xf32>
    %436 = arith.addf %197, %410 : vector<1x1xf32>
    %437 = arith.addf %107, %436 : vector<1x1xf32>
    %c0_137 = arith.constant 0 : index
    %c0_138 = arith.constant 0 : index
    %438 = vector.load %arg3[%c0_137, %c0_138] : memref<2x32xf32, #tpu.memory_space<vmem>>, vector<1x32xf32>
    %439 = vector.broadcast %438 : vector<1x32xf32> to vector<16x32xf32>
    %440 = arith.addf %435, %439 : vector<16x32xf32>
    %c1 = arith.constant 1 : index
    %c0_139 = arith.constant 0 : index
    %c0_140 = arith.constant 0 : index
    %441 = vector.load %arg13[%c1, %c0_139, %c0_140] : memref<3x4x32xf32, #tpu.memory_space<vmem>>, vector<1x4x32xf32>
    %442 = vector.shape_cast %441 : vector<1x4x32xf32> to vector<4x32xf32>
    %c1_141 = arith.constant 1 : index
    %c0_142 = arith.constant 0 : index
    %c0_143 = arith.constant 0 : index
    %443 = vector.load %arg11[%c1_141, %c0_142, %c0_143] : memref<3x32x512xf32, #tpu.memory_space<vmem>>, vector<1x32x512xf32>
    %444 = vector.shape_cast %443 : vector<1x32x512xf32> to vector<32x512xf32>
    %c1_144 = arith.constant 1 : index
    %c0_145 = arith.constant 0 : index
    %c0_146 = arith.constant 0 : index
    %445 = vector.load %arg12[%c1_144, %c0_145, %c0_146] : memref<3x128x32xf32, #tpu.memory_space<vmem>>, vector<1x128x32xf32>
    %446 = vector.shape_cast %445 : vector<1x128x32xf32> to vector<128x32xf32>
    %cst_147 = arith.constant dense<0.000000e+00> : vector<16x512xf32>
    %447 = tpu.matmul %440, %444, %cst_147 {dimension_numbers = #tpu.dot_dimension_numbers<[1], [0], [0], [1], [0, 0, 1, 1], [], []>} : vector<16x32xf32>, vector<32x512xf32>, vector<16x512xf32> -> vector<16x512xf32>
    %448 = vector.extract_strided_slice %447 {offsets = [0, 0], sizes = [16, 128], strides = [1, 1]} : vector<16x512xf32> to vector<16x128xf32>
    %449 = vector.extract_strided_slice %447 {offsets = [0, 128], sizes = [16, 128], strides = [1, 1]} : vector<16x512xf32> to vector<16x128xf32>
    %450 = vector.extract_strided_slice %447 {offsets = [0, 256], sizes = [16, 128], strides = [1, 1]} : vector<16x512xf32> to vector<16x128xf32>
    %451 = vector.extract_strided_slice %447 {offsets = [0, 384], sizes = [16, 128], strides = [1, 1]} : vector<16x512xf32> to vector<16x128xf32>
    %452 = vector.broadcast %25 : vector<1x128xf32> to vector<16x128xf32>
    %453 = arith.addf %451, %452 : vector<16x128xf32>
    %cst_148 = arith.constant dense<0xFF800000> : vector<16xf32>
    %454 = vector.multi_reduction <maximumf>, %453, %cst_148 [1] : vector<16x128xf32> to vector<16xf32>
    %455 = vector.shape_cast %454 : vector<16xf32> to vector<16x1xf32>
    %456 = vector.broadcast %455 : vector<16x1xf32> to vector<16x128xf32>
    %457 = arith.cmpf oeq, %453, %456 : vector<16x128xf32>
    %c128_i32_149 = arith.constant 128 : i32
    %458 = vector.broadcast %c128_i32_149 : i32 to vector<16x128xi32>
    %459 = arith.select %457, %16, %458 : vector<16x128xi1>, vector<16x128xi32>
    %cst_150 = arith.constant dense<2147483647> : vector<16xi32>
    %460 = vector.multi_reduction <minsi>, %459, %cst_150 [1] : vector<16x128xi32> to vector<16xi32>
    %461 = vector.shape_cast %460 : vector<16xi32> to vector<16x1xi32>
    %462 = vector.broadcast %461 : vector<16x1xi32> to vector<16x128xi32>
    %463 = arith.cmpi eq, %16, %462 : vector<16x128xi32>
    %464 = arith.extui %463 : vector<16x128xi1> to vector<16x128xi32>
    %465 = arith.sitofp %464 : vector<16x128xi32> to vector<16x128xf32>
    %466 = vector.broadcast %47 : vector<1x128xf32> to vector<16x128xf32>
    %467 = arith.addf %451, %466 : vector<16x128xf32>
    %cst_151 = arith.constant dense<0xFF800000> : vector<16xf32>
    %468 = vector.multi_reduction <maximumf>, %467, %cst_151 [1] : vector<16x128xf32> to vector<16xf32>
    %469 = vector.shape_cast %468 : vector<16xf32> to vector<16x1xf32>
    %470 = vector.broadcast %469 : vector<16x1xf32> to vector<16x128xf32>
    %471 = arith.cmpf oeq, %467, %470 : vector<16x128xf32>
    %c128_i32_152 = arith.constant 128 : i32
    %472 = vector.broadcast %c128_i32_152 : i32 to vector<16x128xi32>
    %473 = arith.select %471, %16, %472 : vector<16x128xi1>, vector<16x128xi32>
    %cst_153 = arith.constant dense<2147483647> : vector<16xi32>
    %474 = vector.multi_reduction <minsi>, %473, %cst_153 [1] : vector<16x128xi32> to vector<16xi32>
    %475 = vector.shape_cast %474 : vector<16xi32> to vector<16x1xi32>
    %476 = vector.broadcast %475 : vector<16x1xi32> to vector<16x128xi32>
    %477 = arith.cmpi eq, %16, %476 : vector<16x128xi32>
    %478 = arith.extui %477 : vector<16x128xi1> to vector<16x128xi32>
    %479 = arith.sitofp %478 : vector<16x128xi32> to vector<16x128xf32>
    %480 = vector.broadcast %69 : vector<1x128xf32> to vector<16x128xf32>
    %481 = arith.addf %451, %480 : vector<16x128xf32>
    %cst_154 = arith.constant dense<0xFF800000> : vector<16xf32>
    %482 = vector.multi_reduction <maximumf>, %481, %cst_154 [1] : vector<16x128xf32> to vector<16xf32>
    %483 = vector.shape_cast %482 : vector<16xf32> to vector<16x1xf32>
    %484 = vector.broadcast %483 : vector<16x1xf32> to vector<16x128xf32>
    %485 = arith.cmpf oeq, %481, %484 : vector<16x128xf32>
    %c128_i32_155 = arith.constant 128 : i32
    %486 = vector.broadcast %c128_i32_155 : i32 to vector<16x128xi32>
    %487 = arith.select %485, %16, %486 : vector<16x128xi1>, vector<16x128xi32>
    %cst_156 = arith.constant dense<2147483647> : vector<16xi32>
    %488 = vector.multi_reduction <minsi>, %487, %cst_156 [1] : vector<16x128xi32> to vector<16xi32>
    %489 = vector.shape_cast %488 : vector<16xi32> to vector<16x1xi32>
    %490 = vector.broadcast %489 : vector<16x1xi32> to vector<16x128xi32>
    %491 = arith.cmpi eq, %16, %490 : vector<16x128xi32>
    %492 = arith.extui %491 : vector<16x128xi1> to vector<16x128xi32>
    %493 = arith.sitofp %492 : vector<16x128xi32> to vector<16x128xf32>
    %494 = vector.broadcast %91 : vector<1x128xf32> to vector<16x128xf32>
    %495 = arith.addf %451, %494 : vector<16x128xf32>
    %cst_157 = arith.constant dense<0xFF800000> : vector<16xf32>
    %496 = vector.multi_reduction <maximumf>, %495, %cst_157 [1] : vector<16x128xf32> to vector<16xf32>
    %497 = vector.shape_cast %496 : vector<16xf32> to vector<16x1xf32>
    %498 = vector.broadcast %497 : vector<16x1xf32> to vector<16x128xf32>
    %499 = arith.cmpf oeq, %495, %498 : vector<16x128xf32>
    %c128_i32_158 = arith.constant 128 : i32
    %500 = vector.broadcast %c128_i32_158 : i32 to vector<16x128xi32>
    %501 = arith.select %499, %16, %500 : vector<16x128xi1>, vector<16x128xi32>
    %cst_159 = arith.constant dense<2147483647> : vector<16xi32>
    %502 = vector.multi_reduction <minsi>, %501, %cst_159 [1] : vector<16x128xi32> to vector<16xi32>
    %503 = vector.shape_cast %502 : vector<16xi32> to vector<16x1xi32>
    %504 = vector.broadcast %503 : vector<16x1xi32> to vector<16x128xi32>
    %505 = arith.cmpi eq, %16, %504 : vector<16x128xi32>
    %506 = arith.extui %505 : vector<16x128xi1> to vector<16x128xi32>
    %507 = arith.sitofp %506 : vector<16x128xi32> to vector<16x128xf32>
    %508 = arith.addf %465, %479 : vector<16x128xf32>
    %509 = arith.addf %508, %493 : vector<16x128xf32>
    %510 = arith.addf %509, %507 : vector<16x128xf32>
    %cst_160 = arith.constant dense<0.000000e+00> : vector<128xf32>
    %511 = vector.multi_reduction <add>, %510, %cst_160 [0] : vector<16x128xf32> to vector<128xf32>
    %512 = vector.shape_cast %511 : vector<128xf32> to vector<1x128xf32>
    %cst_161 = arith.constant 9.900000e-01 : f32
    %513 = vector.broadcast %cst_161 : f32 to vector<1x128xf32>
    %514 = arith.mulf %106, %513 : vector<1x128xf32>
    %cst_162 = arith.constant 6.250000e-04 : f32
    %515 = vector.broadcast %cst_162 : f32 to vector<1x128xf32>
    %516 = arith.mulf %512, %515 : vector<1x128xf32>
    %517 = arith.addf %514, %516 : vector<1x128xf32>
    %cst_163 = arith.constant dense<0.000000e+00> : vector<1xf32>
    %518 = vector.multi_reduction <add>, %517, %cst_163 [1] : vector<1x128xf32> to vector<1xf32>
    %519 = vector.shape_cast %518 : vector<1xf32> to vector<1x1xf32>
    %520 = arith.mulf %517, %517 : vector<1x128xf32>
    %cst_164 = arith.constant dense<0.000000e+00> : vector<1xf32>
    %521 = vector.multi_reduction <add>, %520, %cst_164 [1] : vector<1x128xf32> to vector<1xf32>
    %522 = vector.shape_cast %521 : vector<1xf32> to vector<1x1xf32>
    %cst_165 = arith.constant 9.99999971E-10 : f32
    %523 = vector.broadcast %cst_165 : f32 to vector<1x1xf32>
    %524 = arith.addf %519, %523 : vector<1x1xf32>
    %cst_166 = arith.constant 9.99999971E-10 : f32
    %525 = vector.broadcast %cst_166 : f32 to vector<1x1xf32>
    %526 = arith.addf %519, %525 : vector<1x1xf32>
    %527 = arith.mulf %524, %526 : vector<1x1xf32>
    %cst_167 = arith.constant 1.600000e+01 : f32
    %528 = vector.broadcast %cst_167 : f32 to vector<1x1xf32>
    %529 = arith.divf %528, %527 : vector<1x1xf32>
    %530 = arith.mulf %522, %529 : vector<1x1xf32>
    %cst_168 = arith.constant dense<0.000000e+00> : vector<16x128xf32>
    %531 = tpu.matmul %510, %12, %cst_168 {dimension_numbers = #tpu.dot_dimension_numbers<[1], [0], [0], [1], [0, 0, 1, 1], [], []>} : vector<16x128xf32>, vector<128x128xf32>, vector<16x128xf32> -> vector<16x128xf32>
    %532 = arith.mulf %448, %531 : vector<16x128xf32>
    %533 = vector.broadcast %32 : vector<1x128xf32> to vector<16x128xf32>
    %534 = arith.mulf %449, %533 : vector<16x128xf32>
    %cst_169 = arith.constant dense<0.000000e+00> : vector<16x16xf32>
    %535 = tpu.matmul %534, %450, %cst_169 {dimension_numbers = #tpu.dot_dimension_numbers<[1], [1], [0], [0], [0, 0, 1, 0], [], []>} : vector<16x128xf32>, vector<16x128xf32>, vector<16x16xf32> -> vector<16x16xf32>
    %536 = arith.addf %535, %10 : vector<16x16xf32>
    %cst_170 = arith.constant dense<0xFF800000> : vector<16xf32>
    %537 = vector.multi_reduction <maximumf>, %536, %cst_170 [1] : vector<16x16xf32> to vector<16xf32>
    %538 = vector.shape_cast %537 : vector<16xf32> to vector<16x1xf32>
    %539 = vector.broadcast %538 : vector<16x1xf32> to vector<16x16xf32>
    %540 = arith.subf %536, %539 : vector<16x16xf32>
    %541 = math.exp %540 : vector<16x16xf32>
    %cst_171 = arith.constant dense<0.000000e+00> : vector<16xf32>
    %542 = vector.multi_reduction <add>, %541, %cst_171 [1] : vector<16x16xf32> to vector<16xf32>
    %543 = vector.shape_cast %542 : vector<16xf32> to vector<16x1xf32>
    %544 = tpu.reciprocal %543 {approx = true} : vector<16x1xf32> -> vector<16x1xf32>
    %545 = vector.broadcast %544 : vector<16x1xf32> to vector<16x16xf32>
    %546 = arith.mulf %541, %545 : vector<16x16xf32>
    %cst_172 = arith.constant dense<0.000000e+00> : vector<16x128xf32>
    %547 = tpu.matmul %546, %532, %cst_172 {dimension_numbers = #tpu.dot_dimension_numbers<[0], [0], [1], [1], [0, 1, 1, 1], [], []>} : vector<16x16xf32>, vector<16x128xf32>, vector<16x128xf32> -> vector<16x128xf32>
    %548 = vector.broadcast %39 : vector<1x128xf32> to vector<16x128xf32>
    %549 = arith.mulf %547, %548 : vector<16x128xf32>
    %550 = vector.broadcast %54 : vector<1x128xf32> to vector<16x128xf32>
    %551 = arith.mulf %449, %550 : vector<16x128xf32>
    %cst_173 = arith.constant dense<0.000000e+00> : vector<16x16xf32>
    %552 = tpu.matmul %551, %450, %cst_173 {dimension_numbers = #tpu.dot_dimension_numbers<[1], [1], [0], [0], [0, 0, 1, 0], [], []>} : vector<16x128xf32>, vector<16x128xf32>, vector<16x16xf32> -> vector<16x16xf32>
    %553 = arith.addf %552, %10 : vector<16x16xf32>
    %cst_174 = arith.constant dense<0xFF800000> : vector<16xf32>
    %554 = vector.multi_reduction <maximumf>, %553, %cst_174 [1] : vector<16x16xf32> to vector<16xf32>
    %555 = vector.shape_cast %554 : vector<16xf32> to vector<16x1xf32>
    %556 = vector.broadcast %555 : vector<16x1xf32> to vector<16x16xf32>
    %557 = arith.subf %553, %556 : vector<16x16xf32>
    %558 = math.exp %557 : vector<16x16xf32>
    %cst_175 = arith.constant dense<0.000000e+00> : vector<16xf32>
    %559 = vector.multi_reduction <add>, %558, %cst_175 [1] : vector<16x16xf32> to vector<16xf32>
    %560 = vector.shape_cast %559 : vector<16xf32> to vector<16x1xf32>
    %561 = tpu.reciprocal %560 {approx = true} : vector<16x1xf32> -> vector<16x1xf32>
    %562 = vector.broadcast %561 : vector<16x1xf32> to vector<16x16xf32>
    %563 = arith.mulf %558, %562 : vector<16x16xf32>
    %cst_176 = arith.constant dense<0.000000e+00> : vector<16x128xf32>
    %564 = tpu.matmul %563, %532, %cst_176 {dimension_numbers = #tpu.dot_dimension_numbers<[0], [0], [1], [1], [0, 1, 1, 1], [], []>} : vector<16x16xf32>, vector<16x128xf32>, vector<16x128xf32> -> vector<16x128xf32>
    %565 = vector.broadcast %61 : vector<1x128xf32> to vector<16x128xf32>
    %566 = arith.mulf %564, %565 : vector<16x128xf32>
    %567 = vector.broadcast %76 : vector<1x128xf32> to vector<16x128xf32>
    %568 = arith.mulf %449, %567 : vector<16x128xf32>
    %cst_177 = arith.constant dense<0.000000e+00> : vector<16x16xf32>
    %569 = tpu.matmul %568, %450, %cst_177 {dimension_numbers = #tpu.dot_dimension_numbers<[1], [1], [0], [0], [0, 0, 1, 0], [], []>} : vector<16x128xf32>, vector<16x128xf32>, vector<16x16xf32> -> vector<16x16xf32>
    %570 = arith.addf %569, %10 : vector<16x16xf32>
    %cst_178 = arith.constant dense<0xFF800000> : vector<16xf32>
    %571 = vector.multi_reduction <maximumf>, %570, %cst_178 [1] : vector<16x16xf32> to vector<16xf32>
    %572 = vector.shape_cast %571 : vector<16xf32> to vector<16x1xf32>
    %573 = vector.broadcast %572 : vector<16x1xf32> to vector<16x16xf32>
    %574 = arith.subf %570, %573 : vector<16x16xf32>
    %575 = math.exp %574 : vector<16x16xf32>
    %cst_179 = arith.constant dense<0.000000e+00> : vector<16xf32>
    %576 = vector.multi_reduction <add>, %575, %cst_179 [1] : vector<16x16xf32> to vector<16xf32>
    %577 = vector.shape_cast %576 : vector<16xf32> to vector<16x1xf32>
    %578 = tpu.reciprocal %577 {approx = true} : vector<16x1xf32> -> vector<16x1xf32>
    %579 = vector.broadcast %578 : vector<16x1xf32> to vector<16x16xf32>
    %580 = arith.mulf %575, %579 : vector<16x16xf32>
    %cst_180 = arith.constant dense<0.000000e+00> : vector<16x128xf32>
    %581 = tpu.matmul %580, %532, %cst_180 {dimension_numbers = #tpu.dot_dimension_numbers<[0], [0], [1], [1], [0, 1, 1, 1], [], []>} : vector<16x16xf32>, vector<16x128xf32>, vector<16x128xf32> -> vector<16x128xf32>
    %582 = vector.broadcast %83 : vector<1x128xf32> to vector<16x128xf32>
    %583 = arith.mulf %581, %582 : vector<16x128xf32>
    %584 = vector.broadcast %98 : vector<1x128xf32> to vector<16x128xf32>
    %585 = arith.mulf %449, %584 : vector<16x128xf32>
    %cst_181 = arith.constant dense<0.000000e+00> : vector<16x16xf32>
    %586 = tpu.matmul %585, %450, %cst_181 {dimension_numbers = #tpu.dot_dimension_numbers<[1], [1], [0], [0], [0, 0, 1, 0], [], []>} : vector<16x128xf32>, vector<16x128xf32>, vector<16x16xf32> -> vector<16x16xf32>
    %587 = arith.addf %586, %10 : vector<16x16xf32>
    %cst_182 = arith.constant dense<0xFF800000> : vector<16xf32>
    %588 = vector.multi_reduction <maximumf>, %587, %cst_182 [1] : vector<16x16xf32> to vector<16xf32>
    %589 = vector.shape_cast %588 : vector<16xf32> to vector<16x1xf32>
    %590 = vector.broadcast %589 : vector<16x1xf32> to vector<16x16xf32>
    %591 = arith.subf %587, %590 : vector<16x16xf32>
    %592 = math.exp %591 : vector<16x16xf32>
    %cst_183 = arith.constant dense<0.000000e+00> : vector<16xf32>
    %593 = vector.multi_reduction <add>, %592, %cst_183 [1] : vector<16x16xf32> to vector<16xf32>
    %594 = vector.shape_cast %593 : vector<16xf32> to vector<16x1xf32>
    %595 = tpu.reciprocal %594 {approx = true} : vector<16x1xf32> -> vector<16x1xf32>
    %596 = vector.broadcast %595 : vector<16x1xf32> to vector<16x16xf32>
    %597 = arith.mulf %592, %596 : vector<16x16xf32>
    %cst_184 = arith.constant dense<0.000000e+00> : vector<16x128xf32>
    %598 = tpu.matmul %597, %532, %cst_184 {dimension_numbers = #tpu.dot_dimension_numbers<[0], [0], [1], [1], [0, 1, 1, 1], [], []>} : vector<16x16xf32>, vector<16x128xf32>, vector<16x128xf32> -> vector<16x128xf32>
    %599 = vector.broadcast %105 : vector<1x128xf32> to vector<16x128xf32>
    %600 = arith.mulf %598, %599 : vector<16x128xf32>
    %601 = arith.addf %549, %566 : vector<16x128xf32>
    %602 = arith.addf %601, %583 : vector<16x128xf32>
    %603 = arith.addf %602, %600 : vector<16x128xf32>
    %cst_185 = arith.constant dense<0.000000e+00> : vector<16x128xf32>
    %604 = tpu.matmul %603, %13, %cst_185 {dimension_numbers = #tpu.dot_dimension_numbers<[1], [0], [0], [1], [0, 0, 1, 1], [], []>} : vector<16x128xf32>, vector<128x128xf32>, vector<16x128xf32> -> vector<16x128xf32>
    %605 = arith.mulf %604, %531 : vector<16x128xf32>
    %cst_186 = arith.constant dense<0.000000e+00> : vector<16x32xf32>
    %606 = tpu.matmul %605, %446, %cst_186 {dimension_numbers = #tpu.dot_dimension_numbers<[1], [0], [0], [1], [0, 0, 1, 1], [], []>} : vector<16x128xf32>, vector<128x32xf32>, vector<16x32xf32> -> vector<16x32xf32>
    %607 = arith.addf %440, %606 : vector<16x32xf32>
    %608 = vector.extract_strided_slice %442 {offsets = [0, 0], sizes = [1, 32], strides = [1, 1]} : vector<4x32xf32> to vector<1x32xf32>
    %609 = vector.extract_strided_slice %442 {offsets = [1, 0], sizes = [1, 32], strides = [1, 1]} : vector<4x32xf32> to vector<1x32xf32>
    %cst_187 = arith.constant dense<0.000000e+00> : vector<16xf32>
    %610 = vector.multi_reduction <add>, %607, %cst_187 [1] : vector<16x32xf32> to vector<16xf32>
    %611 = vector.shape_cast %610 : vector<16xf32> to vector<16x1xf32>
    %cst_188 = arith.constant 3.200000e+01 : f32
    %612 = vector.broadcast %cst_188 : f32 to vector<16x1xf32>
    %613 = arith.divf %611, %612 : vector<16x1xf32>
    %614 = vector.broadcast %613 : vector<16x1xf32> to vector<16x32xf32>
    %615 = arith.subf %607, %614 : vector<16x32xf32>
    %616 = arith.mulf %615, %615 : vector<16x32xf32>
    %cst_189 = arith.constant dense<0.000000e+00> : vector<16xf32>
    %617 = vector.multi_reduction <add>, %616, %cst_189 [1] : vector<16x32xf32> to vector<16xf32>
    %618 = vector.shape_cast %617 : vector<16xf32> to vector<16x1xf32>
    %cst_190 = arith.constant 3.200000e+01 : f32
    %619 = vector.broadcast %cst_190 : f32 to vector<16x1xf32>
    %620 = arith.divf %618, %619 : vector<16x1xf32>
    %621 = vector.broadcast %613 : vector<16x1xf32> to vector<16x32xf32>
    %622 = arith.subf %607, %621 : vector<16x32xf32>
    %cst_191 = arith.constant 9.99999974E-6 : f32
    %623 = vector.broadcast %cst_191 : f32 to vector<16x1xf32>
    %624 = arith.addf %620, %623 : vector<16x1xf32>
    %625 = math.rsqrt %624 : vector<16x1xf32>
    %626 = vector.broadcast %625 : vector<16x1xf32> to vector<16x32xf32>
    %627 = arith.mulf %622, %626 : vector<16x32xf32>
    %628 = vector.broadcast %608 : vector<1x32xf32> to vector<16x32xf32>
    %629 = arith.mulf %627, %628 : vector<16x32xf32>
    %630 = vector.broadcast %609 : vector<1x32xf32> to vector<16x32xf32>
    %631 = arith.addf %629, %630 : vector<16x32xf32>
    %c1_192 = arith.constant 1 : index
    %c0_193 = arith.constant 0 : index
    %c0_194 = arith.constant 0 : index
    %632 = vector.load %arg14[%c1_192, %c0_193, %c0_194] : memref<3x32x4xf32, #tpu.memory_space<vmem>>, vector<1x32x4xf32>
    %633 = vector.shape_cast %632 : vector<1x32x4xf32> to vector<32x4xf32>
    %c1_195 = arith.constant 1 : index
    %c0_196 = arith.constant 0 : index
    %c0_197 = arith.constant 0 : index
    %634 = vector.load %arg15[%c1_195, %c0_196, %c0_197] : memref<3x32x256xf32, #tpu.memory_space<vmem>>, vector<1x32x256xf32>
    %635 = vector.shape_cast %634 : vector<1x32x256xf32> to vector<32x256xf32>
    %c1_198 = arith.constant 1 : index
    %c0_199 = arith.constant 0 : index
    %c0_200 = arith.constant 0 : index
    %636 = vector.load %arg16[%c1_198, %c0_199, %c0_200] : memref<3x256x32xf32, #tpu.memory_space<vmem>>, vector<1x256x32xf32>
    %637 = vector.shape_cast %636 : vector<1x256x32xf32> to vector<256x32xf32>
    %cst_201 = arith.constant dense<0.000000e+00> : vector<16x4xf32>
    %638 = tpu.matmul %631, %633, %cst_201 {dimension_numbers = #tpu.dot_dimension_numbers<[1], [0], [0], [1], [0, 0, 1, 1], [], []>} : vector<16x32xf32>, vector<32x4xf32>, vector<16x4xf32> -> vector<16x4xf32>
    %cst_202 = arith.constant dense<0xFF800000> : vector<16xf32>
    %639 = vector.multi_reduction <maximumf>, %638, %cst_202 [1] : vector<16x4xf32> to vector<16xf32>
    %640 = vector.shape_cast %639 : vector<16xf32> to vector<16x1xf32>
    %641 = vector.broadcast %640 : vector<16x1xf32> to vector<16x4xf32>
    %642 = arith.cmpf oeq, %638, %641 : vector<16x4xf32>
    %c4_i32_203 = arith.constant 4 : i32
    %643 = vector.broadcast %c4_i32_203 : i32 to vector<16x4xi32>
    %644 = arith.select %642, %17, %643 : vector<16x4xi1>, vector<16x4xi32>
    %cst_204 = arith.constant dense<2147483647> : vector<16xi32>
    %645 = vector.multi_reduction <minsi>, %644, %cst_204 [1] : vector<16x4xi32> to vector<16xi32>
    %646 = vector.shape_cast %645 : vector<16xi32> to vector<16x1xi32>
    %647 = vector.broadcast %646 : vector<16x1xi32> to vector<16x4xi32>
    %648 = arith.cmpi eq, %17, %647 : vector<16x4xi32>
    %649 = arith.extui %648 : vector<16x4xi1> to vector<16x4xi32>
    %650 = arith.sitofp %649 : vector<16x4xi32> to vector<16x4xf32>
    %cst_205 = arith.constant 0.000000e+00 : f32
    %651 = vector.broadcast %cst_205 : f32 to vector<16x4xf32>
    %652 = arith.cmpf ogt, %650, %651 : vector<16x4xf32>
    %cst_206 = arith.constant -1.000000e+30 : f32
    %653 = vector.broadcast %cst_206 : f32 to vector<16x4xf32>
    %654 = arith.select %652, %653, %638 : vector<16x4xi1>, vector<16x4xf32>
    %cst_207 = arith.constant dense<0xFF800000> : vector<16xf32>
    %655 = vector.multi_reduction <maximumf>, %654, %cst_207 [1] : vector<16x4xf32> to vector<16xf32>
    %656 = vector.shape_cast %655 : vector<16xf32> to vector<16x1xf32>
    %657 = vector.broadcast %656 : vector<16x1xf32> to vector<16x4xf32>
    %658 = arith.cmpf oeq, %654, %657 : vector<16x4xf32>
    %c4_i32_208 = arith.constant 4 : i32
    %659 = vector.broadcast %c4_i32_208 : i32 to vector<16x4xi32>
    %660 = arith.select %658, %17, %659 : vector<16x4xi1>, vector<16x4xi32>
    %cst_209 = arith.constant dense<2147483647> : vector<16xi32>
    %661 = vector.multi_reduction <minsi>, %660, %cst_209 [1] : vector<16x4xi32> to vector<16xi32>
    %662 = vector.shape_cast %661 : vector<16xi32> to vector<16x1xi32>
    %663 = vector.broadcast %662 : vector<16x1xi32> to vector<16x4xi32>
    %664 = arith.cmpi eq, %17, %663 : vector<16x4xi32>
    %665 = arith.extui %664 : vector<16x4xi1> to vector<16x4xi32>
    %666 = arith.sitofp %665 : vector<16x4xi32> to vector<16x4xf32>
    %667 = arith.subf %656, %640 : vector<16x1xf32>
    %668 = math.exp %667 : vector<16x1xf32>
    %cst_210 = arith.constant 1.000000e+00 : f32
    %669 = vector.broadcast %cst_210 : f32 to vector<16x1xf32>
    %670 = arith.addf %669, %668 : vector<16x1xf32>
    %671 = tpu.reciprocal %670 {approx = true} : vector<16x1xf32> -> vector<16x1xf32>
    %672 = arith.mulf %668, %671 : vector<16x1xf32>
    %673 = arith.addf %650, %666 : vector<16x4xf32>
    %cst_211 = arith.constant dense<0.000000e+00> : vector<16x4xf32>
    %674 = tpu.matmul %11, %673, %cst_211 {dimension_numbers = #tpu.dot_dimension_numbers<[1], [0], [0], [1], [0, 0, 1, 1], [], []>} : vector<16x16xf32>, vector<16x4xf32>, vector<16x4xf32> -> vector<16x4xf32>
    %cst_212 = arith.constant 1.000000e+00 : f32
    %675 = vector.broadcast %cst_212 : f32 to vector<16x4xf32>
    %676 = arith.addf %674, %675 : vector<16x4xf32>
    %cst_213 = arith.constant 5.000000e+00 : f32
    %677 = vector.broadcast %cst_213 : f32 to vector<16x4xf32>
    %678 = arith.cmpf ole, %676, %677 : vector<16x4xf32>
    %679 = arith.extui %678 : vector<16x4xi1> to vector<16x4xi32>
    %680 = arith.sitofp %679 : vector<16x4xi32> to vector<16x4xf32>
    %681 = arith.mulf %650, %680 : vector<16x4xf32>
    %cst_214 = arith.constant dense<0.000000e+00> : vector<16xf32>
    %682 = vector.multi_reduction <add>, %681, %cst_214 [1] : vector<16x4xf32> to vector<16xf32>
    %683 = vector.shape_cast %682 : vector<16xf32> to vector<16x1xf32>
    %684 = arith.addf %674, %650 : vector<16x4xf32>
    %cst_215 = arith.constant 1.000000e+00 : f32
    %685 = vector.broadcast %cst_215 : f32 to vector<16x4xf32>
    %686 = arith.addf %684, %685 : vector<16x4xf32>
    %cst_216 = arith.constant 5.000000e+00 : f32
    %687 = vector.broadcast %cst_216 : f32 to vector<16x4xf32>
    %688 = arith.cmpf ole, %686, %687 : vector<16x4xf32>
    %689 = arith.extui %688 : vector<16x4xi1> to vector<16x4xi32>
    %690 = arith.sitofp %689 : vector<16x4xi32> to vector<16x4xf32>
    %691 = arith.mulf %666, %690 : vector<16x4xf32>
    %cst_217 = arith.constant dense<0.000000e+00> : vector<16xf32>
    %692 = vector.multi_reduction <add>, %691, %cst_217 [1] : vector<16x4xf32> to vector<16xf32>
    %693 = vector.shape_cast %692 : vector<16xf32> to vector<16x1xf32>
    %694 = arith.mulf %671, %683 : vector<16x1xf32>
    %695 = arith.mulf %672, %693 : vector<16x1xf32>
    %696 = arith.addf %694, %695 : vector<16x1xf32>
    %cst_218 = arith.constant 9.99999971E-10 : f32
    %697 = vector.broadcast %cst_218 : f32 to vector<16x1xf32>
    %698 = arith.addf %696, %697 : vector<16x1xf32>
    %699 = tpu.reciprocal %698 {approx = true} : vector<16x1xf32> -> vector<16x1xf32>
    %700 = arith.mulf %694, %699 : vector<16x1xf32>
    %701 = arith.mulf %695, %699 : vector<16x1xf32>
    %702 = vector.broadcast %700 : vector<16x1xf32> to vector<16x4xf32>
    %703 = arith.mulf %702, %650 : vector<16x4xf32>
    %704 = vector.broadcast %701 : vector<16x1xf32> to vector<16x4xf32>
    %705 = arith.mulf %704, %666 : vector<16x4xf32>
    %706 = arith.addf %703, %705 : vector<16x4xf32>
    %cst_219 = arith.constant dense<0.000000e+00> : vector<16x256xf32>
    %707 = tpu.matmul %631, %635, %cst_219 {dimension_numbers = #tpu.dot_dimension_numbers<[1], [0], [0], [1], [0, 0, 1, 1], [], []>} : vector<16x32xf32>, vector<32x256xf32>, vector<16x256xf32> -> vector<16x256xf32>
    %cst_220 = arith.constant 0.000000e+00 : f32
    %708 = vector.broadcast %cst_220 : f32 to vector<16x256xf32>
    %709 = arith.maximumf %707, %708 : vector<16x256xf32>
    %cst_221 = arith.constant dense<0.000000e+00> : vector<16x256xf32>
    %710 = tpu.matmul %706, %14, %cst_221 {dimension_numbers = #tpu.dot_dimension_numbers<[1], [0], [0], [1], [0, 0, 1, 1], [], []>} : vector<16x4xf32>, vector<4x256xf32>, vector<16x256xf32> -> vector<16x256xf32>
    %711 = arith.mulf %709, %710 : vector<16x256xf32>
    %cst_222 = arith.constant dense<0.000000e+00> : vector<16x32xf32>
    %712 = tpu.matmul %711, %637, %cst_222 {dimension_numbers = #tpu.dot_dimension_numbers<[1], [0], [0], [1], [0, 0, 1, 1], [], []>} : vector<16x256xf32>, vector<256x32xf32>, vector<16x32xf32> -> vector<16x32xf32>
    %713 = vector.broadcast %683 : vector<16x1xf32> to vector<16x4xf32>
    %714 = arith.mulf %650, %713 : vector<16x4xf32>
    %715 = vector.broadcast %693 : vector<16x1xf32> to vector<16x4xf32>
    %716 = arith.mulf %666, %715 : vector<16x4xf32>
    %717 = arith.addf %714, %716 : vector<16x4xf32>
    %cst_223 = arith.constant dense<0.000000e+00> : vector<4xf32>
    %718 = vector.multi_reduction <add>, %717, %cst_223 [0] : vector<16x4xf32> to vector<4xf32>
    %719 = vector.shape_cast %718 : vector<4xf32> to vector<1x4xf32>
    %720 = vector.broadcast %700 : vector<16x1xf32> to vector<16x4xf32>
    %721 = arith.mulf %650, %720 : vector<16x4xf32>
    %722 = vector.broadcast %701 : vector<16x1xf32> to vector<16x4xf32>
    %723 = arith.mulf %666, %722 : vector<16x4xf32>
    %724 = arith.addf %721, %723 : vector<16x4xf32>
    %cst_224 = arith.constant dense<0.000000e+00> : vector<4xf32>
    %725 = vector.multi_reduction <add>, %724, %cst_224 [0] : vector<16x4xf32> to vector<4xf32>
    %726 = vector.shape_cast %725 : vector<4xf32> to vector<1x4xf32>
    %cst_225 = arith.constant dense<0.000000e+00> : vector<1xf32>
    %727 = vector.multi_reduction <add>, %719, %cst_225 [1] : vector<1x4xf32> to vector<1xf32>
    %728 = vector.shape_cast %727 : vector<1xf32> to vector<1x1xf32>
    %cst_226 = arith.constant 9.99999971E-10 : f32
    %729 = vector.broadcast %cst_226 : f32 to vector<1x1xf32>
    %730 = arith.addf %728, %729 : vector<1x1xf32>
    %731 = vector.broadcast %730 : vector<1x1xf32> to vector<1x4xf32>
    %732 = arith.divf %719, %731 : vector<1x4xf32>
    %cst_227 = arith.constant dense<0.000000e+00> : vector<1xf32>
    %733 = vector.multi_reduction <add>, %726, %cst_227 [1] : vector<1x4xf32> to vector<1xf32>
    %734 = vector.shape_cast %733 : vector<1xf32> to vector<1x1xf32>
    %cst_228 = arith.constant 9.99999971E-10 : f32
    %735 = vector.broadcast %cst_228 : f32 to vector<1x1xf32>
    %736 = arith.addf %734, %735 : vector<1x1xf32>
    %737 = vector.broadcast %736 : vector<1x1xf32> to vector<1x4xf32>
    %738 = arith.divf %726, %737 : vector<1x4xf32>
    %739 = arith.mulf %732, %738 : vector<1x4xf32>
    %cst_229 = arith.constant dense<0.000000e+00> : vector<1xf32>
    %740 = vector.multi_reduction <add>, %739, %cst_229 [1] : vector<1x4xf32> to vector<1xf32>
    %741 = vector.shape_cast %740 : vector<1xf32> to vector<1x1xf32>
    %cst_230 = arith.constant 4.000000e+00 : f32
    %742 = vector.broadcast %cst_230 : f32 to vector<1x1xf32>
    %743 = arith.mulf %741, %742 : vector<1x1xf32>
    %744 = arith.addf %631, %712 : vector<16x32xf32>
    %745 = vector.extract_strided_slice %442 {offsets = [2, 0], sizes = [1, 32], strides = [1, 1]} : vector<4x32xf32> to vector<1x32xf32>
    %746 = vector.extract_strided_slice %442 {offsets = [3, 0], sizes = [1, 32], strides = [1, 1]} : vector<4x32xf32> to vector<1x32xf32>
    %cst_231 = arith.constant dense<0.000000e+00> : vector<16xf32>
    %747 = vector.multi_reduction <add>, %744, %cst_231 [1] : vector<16x32xf32> to vector<16xf32>
    %748 = vector.shape_cast %747 : vector<16xf32> to vector<16x1xf32>
    %cst_232 = arith.constant 3.200000e+01 : f32
    %749 = vector.broadcast %cst_232 : f32 to vector<16x1xf32>
    %750 = arith.divf %748, %749 : vector<16x1xf32>
    %751 = vector.broadcast %750 : vector<16x1xf32> to vector<16x32xf32>
    %752 = arith.subf %744, %751 : vector<16x32xf32>
    %753 = arith.mulf %752, %752 : vector<16x32xf32>
    %cst_233 = arith.constant dense<0.000000e+00> : vector<16xf32>
    %754 = vector.multi_reduction <add>, %753, %cst_233 [1] : vector<16x32xf32> to vector<16xf32>
    %755 = vector.shape_cast %754 : vector<16xf32> to vector<16x1xf32>
    %cst_234 = arith.constant 3.200000e+01 : f32
    %756 = vector.broadcast %cst_234 : f32 to vector<16x1xf32>
    %757 = arith.divf %755, %756 : vector<16x1xf32>
    %758 = vector.broadcast %750 : vector<16x1xf32> to vector<16x32xf32>
    %759 = arith.subf %744, %758 : vector<16x32xf32>
    %cst_235 = arith.constant 9.99999974E-6 : f32
    %760 = vector.broadcast %cst_235 : f32 to vector<16x1xf32>
    %761 = arith.addf %757, %760 : vector<16x1xf32>
    %762 = math.rsqrt %761 : vector<16x1xf32>
    %763 = vector.broadcast %762 : vector<16x1xf32> to vector<16x32xf32>
    %764 = arith.mulf %759, %763 : vector<16x32xf32>
    %765 = vector.broadcast %745 : vector<1x32xf32> to vector<16x32xf32>
    %766 = arith.mulf %764, %765 : vector<16x32xf32>
    %767 = vector.broadcast %746 : vector<1x32xf32> to vector<16x32xf32>
    %768 = arith.addf %766, %767 : vector<16x32xf32>
    %769 = arith.addf %530, %743 : vector<1x1xf32>
    %770 = arith.addf %437, %769 : vector<1x1xf32>
    %c1_236 = arith.constant 1 : index
    %c0_237 = arith.constant 0 : index
    %771 = vector.load %arg3[%c1_236, %c0_237] : memref<2x32xf32, #tpu.memory_space<vmem>>, vector<1x32xf32>
    %772 = vector.broadcast %771 : vector<1x32xf32> to vector<16x32xf32>
    %773 = arith.addf %768, %772 : vector<16x32xf32>
    %c1_238 = arith.constant 1 : index
    %c0_239 = arith.constant 0 : index
    %c0_240 = arith.constant 0 : index
    %774 = vector.load %arg13[%c1_238, %c0_239, %c0_240] : memref<3x4x32xf32, #tpu.memory_space<vmem>>, vector<1x4x32xf32>
    %775 = vector.shape_cast %774 : vector<1x4x32xf32> to vector<4x32xf32>
    %c1_241 = arith.constant 1 : index
    %c0_242 = arith.constant 0 : index
    %c0_243 = arith.constant 0 : index
    %776 = vector.load %arg11[%c1_241, %c0_242, %c0_243] : memref<3x32x512xf32, #tpu.memory_space<vmem>>, vector<1x32x512xf32>
    %777 = vector.shape_cast %776 : vector<1x32x512xf32> to vector<32x512xf32>
    %c1_244 = arith.constant 1 : index
    %c0_245 = arith.constant 0 : index
    %c0_246 = arith.constant 0 : index
    %778 = vector.load %arg12[%c1_244, %c0_245, %c0_246] : memref<3x128x32xf32, #tpu.memory_space<vmem>>, vector<1x128x32xf32>
    %779 = vector.shape_cast %778 : vector<1x128x32xf32> to vector<128x32xf32>
    %cst_247 = arith.constant dense<0.000000e+00> : vector<16x512xf32>
    %780 = tpu.matmul %773, %777, %cst_247 {dimension_numbers = #tpu.dot_dimension_numbers<[1], [0], [0], [1], [0, 0, 1, 1], [], []>} : vector<16x32xf32>, vector<32x512xf32>, vector<16x512xf32> -> vector<16x512xf32>
    %781 = vector.extract_strided_slice %780 {offsets = [0, 0], sizes = [16, 128], strides = [1, 1]} : vector<16x512xf32> to vector<16x128xf32>
    %782 = vector.extract_strided_slice %780 {offsets = [0, 128], sizes = [16, 128], strides = [1, 1]} : vector<16x512xf32> to vector<16x128xf32>
    %783 = vector.extract_strided_slice %780 {offsets = [0, 256], sizes = [16, 128], strides = [1, 1]} : vector<16x512xf32> to vector<16x128xf32>
    %784 = vector.extract_strided_slice %780 {offsets = [0, 384], sizes = [16, 128], strides = [1, 1]} : vector<16x512xf32> to vector<16x128xf32>
    %785 = vector.broadcast %25 : vector<1x128xf32> to vector<16x128xf32>
    %786 = arith.addf %784, %785 : vector<16x128xf32>
    %cst_248 = arith.constant dense<0xFF800000> : vector<16xf32>
    %787 = vector.multi_reduction <maximumf>, %786, %cst_248 [1] : vector<16x128xf32> to vector<16xf32>
    %788 = vector.shape_cast %787 : vector<16xf32> to vector<16x1xf32>
    %789 = vector.broadcast %788 : vector<16x1xf32> to vector<16x128xf32>
    %790 = arith.cmpf oeq, %786, %789 : vector<16x128xf32>
    %c128_i32_249 = arith.constant 128 : i32
    %791 = vector.broadcast %c128_i32_249 : i32 to vector<16x128xi32>
    %792 = arith.select %790, %16, %791 : vector<16x128xi1>, vector<16x128xi32>
    %cst_250 = arith.constant dense<2147483647> : vector<16xi32>
    %793 = vector.multi_reduction <minsi>, %792, %cst_250 [1] : vector<16x128xi32> to vector<16xi32>
    %794 = vector.shape_cast %793 : vector<16xi32> to vector<16x1xi32>
    %795 = vector.broadcast %794 : vector<16x1xi32> to vector<16x128xi32>
    %796 = arith.cmpi eq, %16, %795 : vector<16x128xi32>
    %797 = arith.extui %796 : vector<16x128xi1> to vector<16x128xi32>
    %798 = arith.sitofp %797 : vector<16x128xi32> to vector<16x128xf32>
    %799 = vector.broadcast %47 : vector<1x128xf32> to vector<16x128xf32>
    %800 = arith.addf %784, %799 : vector<16x128xf32>
    %cst_251 = arith.constant dense<0xFF800000> : vector<16xf32>
    %801 = vector.multi_reduction <maximumf>, %800, %cst_251 [1] : vector<16x128xf32> to vector<16xf32>
    %802 = vector.shape_cast %801 : vector<16xf32> to vector<16x1xf32>
    %803 = vector.broadcast %802 : vector<16x1xf32> to vector<16x128xf32>
    %804 = arith.cmpf oeq, %800, %803 : vector<16x128xf32>
    %c128_i32_252 = arith.constant 128 : i32
    %805 = vector.broadcast %c128_i32_252 : i32 to vector<16x128xi32>
    %806 = arith.select %804, %16, %805 : vector<16x128xi1>, vector<16x128xi32>
    %cst_253 = arith.constant dense<2147483647> : vector<16xi32>
    %807 = vector.multi_reduction <minsi>, %806, %cst_253 [1] : vector<16x128xi32> to vector<16xi32>
    %808 = vector.shape_cast %807 : vector<16xi32> to vector<16x1xi32>
    %809 = vector.broadcast %808 : vector<16x1xi32> to vector<16x128xi32>
    %810 = arith.cmpi eq, %16, %809 : vector<16x128xi32>
    %811 = arith.extui %810 : vector<16x128xi1> to vector<16x128xi32>
    %812 = arith.sitofp %811 : vector<16x128xi32> to vector<16x128xf32>
    %813 = vector.broadcast %69 : vector<1x128xf32> to vector<16x128xf32>
    %814 = arith.addf %784, %813 : vector<16x128xf32>
    %cst_254 = arith.constant dense<0xFF800000> : vector<16xf32>
    %815 = vector.multi_reduction <maximumf>, %814, %cst_254 [1] : vector<16x128xf32> to vector<16xf32>
    %816 = vector.shape_cast %815 : vector<16xf32> to vector<16x1xf32>
    %817 = vector.broadcast %816 : vector<16x1xf32> to vector<16x128xf32>
    %818 = arith.cmpf oeq, %814, %817 : vector<16x128xf32>
    %c128_i32_255 = arith.constant 128 : i32
    %819 = vector.broadcast %c128_i32_255 : i32 to vector<16x128xi32>
    %820 = arith.select %818, %16, %819 : vector<16x128xi1>, vector<16x128xi32>
    %cst_256 = arith.constant dense<2147483647> : vector<16xi32>
    %821 = vector.multi_reduction <minsi>, %820, %cst_256 [1] : vector<16x128xi32> to vector<16xi32>
    %822 = vector.shape_cast %821 : vector<16xi32> to vector<16x1xi32>
    %823 = vector.broadcast %822 : vector<16x1xi32> to vector<16x128xi32>
    %824 = arith.cmpi eq, %16, %823 : vector<16x128xi32>
    %825 = arith.extui %824 : vector<16x128xi1> to vector<16x128xi32>
    %826 = arith.sitofp %825 : vector<16x128xi32> to vector<16x128xf32>
    %827 = vector.broadcast %91 : vector<1x128xf32> to vector<16x128xf32>
    %828 = arith.addf %784, %827 : vector<16x128xf32>
    %cst_257 = arith.constant dense<0xFF800000> : vector<16xf32>
    %829 = vector.multi_reduction <maximumf>, %828, %cst_257 [1] : vector<16x128xf32> to vector<16xf32>
    %830 = vector.shape_cast %829 : vector<16xf32> to vector<16x1xf32>
    %831 = vector.broadcast %830 : vector<16x1xf32> to vector<16x128xf32>
    %832 = arith.cmpf oeq, %828, %831 : vector<16x128xf32>
    %c128_i32_258 = arith.constant 128 : i32
    %833 = vector.broadcast %c128_i32_258 : i32 to vector<16x128xi32>
    %834 = arith.select %832, %16, %833 : vector<16x128xi1>, vector<16x128xi32>
    %cst_259 = arith.constant dense<2147483647> : vector<16xi32>
    %835 = vector.multi_reduction <minsi>, %834, %cst_259 [1] : vector<16x128xi32> to vector<16xi32>
    %836 = vector.shape_cast %835 : vector<16xi32> to vector<16x1xi32>
    %837 = vector.broadcast %836 : vector<16x1xi32> to vector<16x128xi32>
    %838 = arith.cmpi eq, %16, %837 : vector<16x128xi32>
    %839 = arith.extui %838 : vector<16x128xi1> to vector<16x128xi32>
    %840 = arith.sitofp %839 : vector<16x128xi32> to vector<16x128xf32>
    %841 = arith.addf %798, %812 : vector<16x128xf32>
    %842 = arith.addf %841, %826 : vector<16x128xf32>
    %843 = arith.addf %842, %840 : vector<16x128xf32>
    %cst_260 = arith.constant dense<0.000000e+00> : vector<128xf32>
    %844 = vector.multi_reduction <add>, %843, %cst_260 [0] : vector<16x128xf32> to vector<128xf32>
    %845 = vector.shape_cast %844 : vector<128xf32> to vector<1x128xf32>
    %cst_261 = arith.constant 9.900000e-01 : f32
    %846 = vector.broadcast %cst_261 : f32 to vector<1x128xf32>
    %847 = arith.mulf %517, %846 : vector<1x128xf32>
    %cst_262 = arith.constant 6.250000e-04 : f32
    %848 = vector.broadcast %cst_262 : f32 to vector<1x128xf32>
    %849 = arith.mulf %845, %848 : vector<1x128xf32>
    %850 = arith.addf %847, %849 : vector<1x128xf32>
    %cst_263 = arith.constant dense<0.000000e+00> : vector<1xf32>
    %851 = vector.multi_reduction <add>, %850, %cst_263 [1] : vector<1x128xf32> to vector<1xf32>
    %852 = vector.shape_cast %851 : vector<1xf32> to vector<1x1xf32>
    %853 = arith.mulf %850, %850 : vector<1x128xf32>
    %cst_264 = arith.constant dense<0.000000e+00> : vector<1xf32>
    %854 = vector.multi_reduction <add>, %853, %cst_264 [1] : vector<1x128xf32> to vector<1xf32>
    %855 = vector.shape_cast %854 : vector<1xf32> to vector<1x1xf32>
    %cst_265 = arith.constant 9.99999971E-10 : f32
    %856 = vector.broadcast %cst_265 : f32 to vector<1x1xf32>
    %857 = arith.addf %852, %856 : vector<1x1xf32>
    %cst_266 = arith.constant 9.99999971E-10 : f32
    %858 = vector.broadcast %cst_266 : f32 to vector<1x1xf32>
    %859 = arith.addf %852, %858 : vector<1x1xf32>
    %860 = arith.mulf %857, %859 : vector<1x1xf32>
    %cst_267 = arith.constant 1.600000e+01 : f32
    %861 = vector.broadcast %cst_267 : f32 to vector<1x1xf32>
    %862 = arith.divf %861, %860 : vector<1x1xf32>
    %863 = arith.mulf %855, %862 : vector<1x1xf32>
    %cst_268 = arith.constant dense<0.000000e+00> : vector<16x128xf32>
    %864 = tpu.matmul %843, %12, %cst_268 {dimension_numbers = #tpu.dot_dimension_numbers<[1], [0], [0], [1], [0, 0, 1, 1], [], []>} : vector<16x128xf32>, vector<128x128xf32>, vector<16x128xf32> -> vector<16x128xf32>
    %865 = arith.mulf %781, %864 : vector<16x128xf32>
    %866 = vector.broadcast %32 : vector<1x128xf32> to vector<16x128xf32>
    %867 = arith.mulf %782, %866 : vector<16x128xf32>
    %cst_269 = arith.constant dense<0.000000e+00> : vector<16x16xf32>
    %868 = tpu.matmul %867, %783, %cst_269 {dimension_numbers = #tpu.dot_dimension_numbers<[1], [1], [0], [0], [0, 0, 1, 0], [], []>} : vector<16x128xf32>, vector<16x128xf32>, vector<16x16xf32> -> vector<16x16xf32>
    %869 = arith.addf %868, %10 : vector<16x16xf32>
    %cst_270 = arith.constant dense<0xFF800000> : vector<16xf32>
    %870 = vector.multi_reduction <maximumf>, %869, %cst_270 [1] : vector<16x16xf32> to vector<16xf32>
    %871 = vector.shape_cast %870 : vector<16xf32> to vector<16x1xf32>
    %872 = vector.broadcast %871 : vector<16x1xf32> to vector<16x16xf32>
    %873 = arith.subf %869, %872 : vector<16x16xf32>
    %874 = math.exp %873 : vector<16x16xf32>
    %cst_271 = arith.constant dense<0.000000e+00> : vector<16xf32>
    %875 = vector.multi_reduction <add>, %874, %cst_271 [1] : vector<16x16xf32> to vector<16xf32>
    %876 = vector.shape_cast %875 : vector<16xf32> to vector<16x1xf32>
    %877 = tpu.reciprocal %876 {approx = true} : vector<16x1xf32> -> vector<16x1xf32>
    %878 = vector.broadcast %877 : vector<16x1xf32> to vector<16x16xf32>
    %879 = arith.mulf %874, %878 : vector<16x16xf32>
    %cst_272 = arith.constant dense<0.000000e+00> : vector<16x128xf32>
    %880 = tpu.matmul %879, %865, %cst_272 {dimension_numbers = #tpu.dot_dimension_numbers<[0], [0], [1], [1], [0, 1, 1, 1], [], []>} : vector<16x16xf32>, vector<16x128xf32>, vector<16x128xf32> -> vector<16x128xf32>
    %881 = vector.broadcast %39 : vector<1x128xf32> to vector<16x128xf32>
    %882 = arith.mulf %880, %881 : vector<16x128xf32>
    %883 = vector.broadcast %54 : vector<1x128xf32> to vector<16x128xf32>
    %884 = arith.mulf %782, %883 : vector<16x128xf32>
    %cst_273 = arith.constant dense<0.000000e+00> : vector<16x16xf32>
    %885 = tpu.matmul %884, %783, %cst_273 {dimension_numbers = #tpu.dot_dimension_numbers<[1], [1], [0], [0], [0, 0, 1, 0], [], []>} : vector<16x128xf32>, vector<16x128xf32>, vector<16x16xf32> -> vector<16x16xf32>
    %886 = arith.addf %885, %10 : vector<16x16xf32>
    %cst_274 = arith.constant dense<0xFF800000> : vector<16xf32>
    %887 = vector.multi_reduction <maximumf>, %886, %cst_274 [1] : vector<16x16xf32> to vector<16xf32>
    %888 = vector.shape_cast %887 : vector<16xf32> to vector<16x1xf32>
    %889 = vector.broadcast %888 : vector<16x1xf32> to vector<16x16xf32>
    %890 = arith.subf %886, %889 : vector<16x16xf32>
    %891 = math.exp %890 : vector<16x16xf32>
    %cst_275 = arith.constant dense<0.000000e+00> : vector<16xf32>
    %892 = vector.multi_reduction <add>, %891, %cst_275 [1] : vector<16x16xf32> to vector<16xf32>
    %893 = vector.shape_cast %892 : vector<16xf32> to vector<16x1xf32>
    %894 = tpu.reciprocal %893 {approx = true} : vector<16x1xf32> -> vector<16x1xf32>
    %895 = vector.broadcast %894 : vector<16x1xf32> to vector<16x16xf32>
    %896 = arith.mulf %891, %895 : vector<16x16xf32>
    %cst_276 = arith.constant dense<0.000000e+00> : vector<16x128xf32>
    %897 = tpu.matmul %896, %865, %cst_276 {dimension_numbers = #tpu.dot_dimension_numbers<[0], [0], [1], [1], [0, 1, 1, 1], [], []>} : vector<16x16xf32>, vector<16x128xf32>, vector<16x128xf32> -> vector<16x128xf32>
    %898 = vector.broadcast %61 : vector<1x128xf32> to vector<16x128xf32>
    %899 = arith.mulf %897, %898 : vector<16x128xf32>
    %900 = vector.broadcast %76 : vector<1x128xf32> to vector<16x128xf32>
    %901 = arith.mulf %782, %900 : vector<16x128xf32>
    %cst_277 = arith.constant dense<0.000000e+00> : vector<16x16xf32>
    %902 = tpu.matmul %901, %783, %cst_277 {dimension_numbers = #tpu.dot_dimension_numbers<[1], [1], [0], [0], [0, 0, 1, 0], [], []>} : vector<16x128xf32>, vector<16x128xf32>, vector<16x16xf32> -> vector<16x16xf32>
    %903 = arith.addf %902, %10 : vector<16x16xf32>
    %cst_278 = arith.constant dense<0xFF800000> : vector<16xf32>
    %904 = vector.multi_reduction <maximumf>, %903, %cst_278 [1] : vector<16x16xf32> to vector<16xf32>
    %905 = vector.shape_cast %904 : vector<16xf32> to vector<16x1xf32>
    %906 = vector.broadcast %905 : vector<16x1xf32> to vector<16x16xf32>
    %907 = arith.subf %903, %906 : vector<16x16xf32>
    %908 = math.exp %907 : vector<16x16xf32>
    %cst_279 = arith.constant dense<0.000000e+00> : vector<16xf32>
    %909 = vector.multi_reduction <add>, %908, %cst_279 [1] : vector<16x16xf32> to vector<16xf32>
    %910 = vector.shape_cast %909 : vector<16xf32> to vector<16x1xf32>
    %911 = tpu.reciprocal %910 {approx = true} : vector<16x1xf32> -> vector<16x1xf32>
    %912 = vector.broadcast %911 : vector<16x1xf32> to vector<16x16xf32>
    %913 = arith.mulf %908, %912 : vector<16x16xf32>
    %cst_280 = arith.constant dense<0.000000e+00> : vector<16x128xf32>
    %914 = tpu.matmul %913, %865, %cst_280 {dimension_numbers = #tpu.dot_dimension_numbers<[0], [0], [1], [1], [0, 1, 1, 1], [], []>} : vector<16x16xf32>, vector<16x128xf32>, vector<16x128xf32> -> vector<16x128xf32>
    %915 = vector.broadcast %83 : vector<1x128xf32> to vector<16x128xf32>
    %916 = arith.mulf %914, %915 : vector<16x128xf32>
    %917 = vector.broadcast %98 : vector<1x128xf32> to vector<16x128xf32>
    %918 = arith.mulf %782, %917 : vector<16x128xf32>
    %cst_281 = arith.constant dense<0.000000e+00> : vector<16x16xf32>
    %919 = tpu.matmul %918, %783, %cst_281 {dimension_numbers = #tpu.dot_dimension_numbers<[1], [1], [0], [0], [0, 0, 1, 0], [], []>} : vector<16x128xf32>, vector<16x128xf32>, vector<16x16xf32> -> vector<16x16xf32>
    %920 = arith.addf %919, %10 : vector<16x16xf32>
    %cst_282 = arith.constant dense<0xFF800000> : vector<16xf32>
    %921 = vector.multi_reduction <maximumf>, %920, %cst_282 [1] : vector<16x16xf32> to vector<16xf32>
    %922 = vector.shape_cast %921 : vector<16xf32> to vector<16x1xf32>
    %923 = vector.broadcast %922 : vector<16x1xf32> to vector<16x16xf32>
    %924 = arith.subf %920, %923 : vector<16x16xf32>
    %925 = math.exp %924 : vector<16x16xf32>
    %cst_283 = arith.constant dense<0.000000e+00> : vector<16xf32>
    %926 = vector.multi_reduction <add>, %925, %cst_283 [1] : vector<16x16xf32> to vector<16xf32>
    %927 = vector.shape_cast %926 : vector<16xf32> to vector<16x1xf32>
    %928 = tpu.reciprocal %927 {approx = true} : vector<16x1xf32> -> vector<16x1xf32>
    %929 = vector.broadcast %928 : vector<16x1xf32> to vector<16x16xf32>
    %930 = arith.mulf %925, %929 : vector<16x16xf32>
    %cst_284 = arith.constant dense<0.000000e+00> : vector<16x128xf32>
    %931 = tpu.matmul %930, %865, %cst_284 {dimension_numbers = #tpu.dot_dimension_numbers<[0], [0], [1], [1], [0, 1, 1, 1], [], []>} : vector<16x16xf32>, vector<16x128xf32>, vector<16x128xf32> -> vector<16x128xf32>
    %932 = vector.broadcast %105 : vector<1x128xf32> to vector<16x128xf32>
    %933 = arith.mulf %931, %932 : vector<16x128xf32>
    %934 = arith.addf %882, %899 : vector<16x128xf32>
    %935 = arith.addf %934, %916 : vector<16x128xf32>
    %936 = arith.addf %935, %933 : vector<16x128xf32>
    %cst_285 = arith.constant dense<0.000000e+00> : vector<16x128xf32>
    %937 = tpu.matmul %936, %13, %cst_285 {dimension_numbers = #tpu.dot_dimension_numbers<[1], [0], [0], [1], [0, 0, 1, 1], [], []>} : vector<16x128xf32>, vector<128x128xf32>, vector<16x128xf32> -> vector<16x128xf32>
    %938 = arith.mulf %937, %864 : vector<16x128xf32>
    %cst_286 = arith.constant dense<0.000000e+00> : vector<16x32xf32>
    %939 = tpu.matmul %938, %779, %cst_286 {dimension_numbers = #tpu.dot_dimension_numbers<[1], [0], [0], [1], [0, 0, 1, 1], [], []>} : vector<16x128xf32>, vector<128x32xf32>, vector<16x32xf32> -> vector<16x32xf32>
    %940 = arith.addf %773, %939 : vector<16x32xf32>
    %941 = vector.extract_strided_slice %775 {offsets = [0, 0], sizes = [1, 32], strides = [1, 1]} : vector<4x32xf32> to vector<1x32xf32>
    %942 = vector.extract_strided_slice %775 {offsets = [1, 0], sizes = [1, 32], strides = [1, 1]} : vector<4x32xf32> to vector<1x32xf32>
    %cst_287 = arith.constant dense<0.000000e+00> : vector<16xf32>
    %943 = vector.multi_reduction <add>, %940, %cst_287 [1] : vector<16x32xf32> to vector<16xf32>
    %944 = vector.shape_cast %943 : vector<16xf32> to vector<16x1xf32>
    %cst_288 = arith.constant 3.200000e+01 : f32
    %945 = vector.broadcast %cst_288 : f32 to vector<16x1xf32>
    %946 = arith.divf %944, %945 : vector<16x1xf32>
    %947 = vector.broadcast %946 : vector<16x1xf32> to vector<16x32xf32>
    %948 = arith.subf %940, %947 : vector<16x32xf32>
    %949 = arith.mulf %948, %948 : vector<16x32xf32>
    %cst_289 = arith.constant dense<0.000000e+00> : vector<16xf32>
    %950 = vector.multi_reduction <add>, %949, %cst_289 [1] : vector<16x32xf32> to vector<16xf32>
    %951 = vector.shape_cast %950 : vector<16xf32> to vector<16x1xf32>
    %cst_290 = arith.constant 3.200000e+01 : f32
    %952 = vector.broadcast %cst_290 : f32 to vector<16x1xf32>
    %953 = arith.divf %951, %952 : vector<16x1xf32>
    %954 = vector.broadcast %946 : vector<16x1xf32> to vector<16x32xf32>
    %955 = arith.subf %940, %954 : vector<16x32xf32>
    %cst_291 = arith.constant 9.99999974E-6 : f32
    %956 = vector.broadcast %cst_291 : f32 to vector<16x1xf32>
    %957 = arith.addf %953, %956 : vector<16x1xf32>
    %958 = math.rsqrt %957 : vector<16x1xf32>
    %959 = vector.broadcast %958 : vector<16x1xf32> to vector<16x32xf32>
    %960 = arith.mulf %955, %959 : vector<16x32xf32>
    %961 = vector.broadcast %941 : vector<1x32xf32> to vector<16x32xf32>
    %962 = arith.mulf %960, %961 : vector<16x32xf32>
    %963 = vector.broadcast %942 : vector<1x32xf32> to vector<16x32xf32>
    %964 = arith.addf %962, %963 : vector<16x32xf32>
    %c1_292 = arith.constant 1 : index
    %c0_293 = arith.constant 0 : index
    %c0_294 = arith.constant 0 : index
    %965 = vector.load %arg14[%c1_292, %c0_293, %c0_294] : memref<3x32x4xf32, #tpu.memory_space<vmem>>, vector<1x32x4xf32>
    %966 = vector.shape_cast %965 : vector<1x32x4xf32> to vector<32x4xf32>
    %c1_295 = arith.constant 1 : index
    %c0_296 = arith.constant 0 : index
    %c0_297 = arith.constant 0 : index
    %967 = vector.load %arg15[%c1_295, %c0_296, %c0_297] : memref<3x32x256xf32, #tpu.memory_space<vmem>>, vector<1x32x256xf32>
    %968 = vector.shape_cast %967 : vector<1x32x256xf32> to vector<32x256xf32>
    %c1_298 = arith.constant 1 : index
    %c0_299 = arith.constant 0 : index
    %c0_300 = arith.constant 0 : index
    %969 = vector.load %arg16[%c1_298, %c0_299, %c0_300] : memref<3x256x32xf32, #tpu.memory_space<vmem>>, vector<1x256x32xf32>
    %970 = vector.shape_cast %969 : vector<1x256x32xf32> to vector<256x32xf32>
    %cst_301 = arith.constant dense<0.000000e+00> : vector<16x4xf32>
    %971 = tpu.matmul %964, %966, %cst_301 {dimension_numbers = #tpu.dot_dimension_numbers<[1], [0], [0], [1], [0, 0, 1, 1], [], []>} : vector<16x32xf32>, vector<32x4xf32>, vector<16x4xf32> -> vector<16x4xf32>
    %cst_302 = arith.constant dense<0xFF800000> : vector<16xf32>
    %972 = vector.multi_reduction <maximumf>, %971, %cst_302 [1] : vector<16x4xf32> to vector<16xf32>
    %973 = vector.shape_cast %972 : vector<16xf32> to vector<16x1xf32>
    %974 = vector.broadcast %973 : vector<16x1xf32> to vector<16x4xf32>
    %975 = arith.cmpf oeq, %971, %974 : vector<16x4xf32>
    %c4_i32_303 = arith.constant 4 : i32
    %976 = vector.broadcast %c4_i32_303 : i32 to vector<16x4xi32>
    %977 = arith.select %975, %17, %976 : vector<16x4xi1>, vector<16x4xi32>
    %cst_304 = arith.constant dense<2147483647> : vector<16xi32>
    %978 = vector.multi_reduction <minsi>, %977, %cst_304 [1] : vector<16x4xi32> to vector<16xi32>
    %979 = vector.shape_cast %978 : vector<16xi32> to vector<16x1xi32>
    %980 = vector.broadcast %979 : vector<16x1xi32> to vector<16x4xi32>
    %981 = arith.cmpi eq, %17, %980 : vector<16x4xi32>
    %982 = arith.extui %981 : vector<16x4xi1> to vector<16x4xi32>
    %983 = arith.sitofp %982 : vector<16x4xi32> to vector<16x4xf32>
    %cst_305 = arith.constant 0.000000e+00 : f32
    %984 = vector.broadcast %cst_305 : f32 to vector<16x4xf32>
    %985 = arith.cmpf ogt, %983, %984 : vector<16x4xf32>
    %cst_306 = arith.constant -1.000000e+30 : f32
    %986 = vector.broadcast %cst_306 : f32 to vector<16x4xf32>
    %987 = arith.select %985, %986, %971 : vector<16x4xi1>, vector<16x4xf32>
    %cst_307 = arith.constant dense<0xFF800000> : vector<16xf32>
    %988 = vector.multi_reduction <maximumf>, %987, %cst_307 [1] : vector<16x4xf32> to vector<16xf32>
    %989 = vector.shape_cast %988 : vector<16xf32> to vector<16x1xf32>
    %990 = vector.broadcast %989 : vector<16x1xf32> to vector<16x4xf32>
    %991 = arith.cmpf oeq, %987, %990 : vector<16x4xf32>
    %c4_i32_308 = arith.constant 4 : i32
    %992 = vector.broadcast %c4_i32_308 : i32 to vector<16x4xi32>
    %993 = arith.select %991, %17, %992 : vector<16x4xi1>, vector<16x4xi32>
    %cst_309 = arith.constant dense<2147483647> : vector<16xi32>
    %994 = vector.multi_reduction <minsi>, %993, %cst_309 [1] : vector<16x4xi32> to vector<16xi32>
    %995 = vector.shape_cast %994 : vector<16xi32> to vector<16x1xi32>
    %996 = vector.broadcast %995 : vector<16x1xi32> to vector<16x4xi32>
    %997 = arith.cmpi eq, %17, %996 : vector<16x4xi32>
    %998 = arith.extui %997 : vector<16x4xi1> to vector<16x4xi32>
    %999 = arith.sitofp %998 : vector<16x4xi32> to vector<16x4xf32>
    %1000 = arith.subf %989, %973 : vector<16x1xf32>
    %1001 = math.exp %1000 : vector<16x1xf32>
    %cst_310 = arith.constant 1.000000e+00 : f32
    %1002 = vector.broadcast %cst_310 : f32 to vector<16x1xf32>
    %1003 = arith.addf %1002, %1001 : vector<16x1xf32>
    %1004 = tpu.reciprocal %1003 {approx = true} : vector<16x1xf32> -> vector<16x1xf32>
    %1005 = arith.mulf %1001, %1004 : vector<16x1xf32>
    %1006 = arith.addf %983, %999 : vector<16x4xf32>
    %cst_311 = arith.constant dense<0.000000e+00> : vector<16x4xf32>
    %1007 = tpu.matmul %11, %1006, %cst_311 {dimension_numbers = #tpu.dot_dimension_numbers<[1], [0], [0], [1], [0, 0, 1, 1], [], []>} : vector<16x16xf32>, vector<16x4xf32>, vector<16x4xf32> -> vector<16x4xf32>
    %cst_312 = arith.constant 1.000000e+00 : f32
    %1008 = vector.broadcast %cst_312 : f32 to vector<16x4xf32>
    %1009 = arith.addf %1007, %1008 : vector<16x4xf32>
    %cst_313 = arith.constant 5.000000e+00 : f32
    %1010 = vector.broadcast %cst_313 : f32 to vector<16x4xf32>
    %1011 = arith.cmpf ole, %1009, %1010 : vector<16x4xf32>
    %1012 = arith.extui %1011 : vector<16x4xi1> to vector<16x4xi32>
    %1013 = arith.sitofp %1012 : vector<16x4xi32> to vector<16x4xf32>
    %1014 = arith.mulf %983, %1013 : vector<16x4xf32>
    %cst_314 = arith.constant dense<0.000000e+00> : vector<16xf32>
    %1015 = vector.multi_reduction <add>, %1014, %cst_314 [1] : vector<16x4xf32> to vector<16xf32>
    %1016 = vector.shape_cast %1015 : vector<16xf32> to vector<16x1xf32>
    %1017 = arith.addf %1007, %983 : vector<16x4xf32>
    %cst_315 = arith.constant 1.000000e+00 : f32
    %1018 = vector.broadcast %cst_315 : f32 to vector<16x4xf32>
    %1019 = arith.addf %1017, %1018 : vector<16x4xf32>
    %cst_316 = arith.constant 5.000000e+00 : f32
    %1020 = vector.broadcast %cst_316 : f32 to vector<16x4xf32>
    %1021 = arith.cmpf ole, %1019, %1020 : vector<16x4xf32>
    %1022 = arith.extui %1021 : vector<16x4xi1> to vector<16x4xi32>
    %1023 = arith.sitofp %1022 : vector<16x4xi32> to vector<16x4xf32>
    %1024 = arith.mulf %999, %1023 : vector<16x4xf32>
    %cst_317 = arith.constant dense<0.000000e+00> : vector<16xf32>
    %1025 = vector.multi_reduction <add>, %1024, %cst_317 [1] : vector<16x4xf32> to vector<16xf32>
    %1026 = vector.shape_cast %1025 : vector<16xf32> to vector<16x1xf32>
    %1027 = arith.mulf %1004, %1016 : vector<16x1xf32>
    %1028 = arith.mulf %1005, %1026 : vector<16x1xf32>
    %1029 = arith.addf %1027, %1028 : vector<16x1xf32>
    %cst_318 = arith.constant 9.99999971E-10 : f32
    %1030 = vector.broadcast %cst_318 : f32 to vector<16x1xf32>
    %1031 = arith.addf %1029, %1030 : vector<16x1xf32>
    %1032 = tpu.reciprocal %1031 {approx = true} : vector<16x1xf32> -> vector<16x1xf32>
    %1033 = arith.mulf %1027, %1032 : vector<16x1xf32>
    %1034 = arith.mulf %1028, %1032 : vector<16x1xf32>
    %1035 = vector.broadcast %1033 : vector<16x1xf32> to vector<16x4xf32>
    %1036 = arith.mulf %1035, %983 : vector<16x4xf32>
    %1037 = vector.broadcast %1034 : vector<16x1xf32> to vector<16x4xf32>
    %1038 = arith.mulf %1037, %999 : vector<16x4xf32>
    %1039 = arith.addf %1036, %1038 : vector<16x4xf32>
    %cst_319 = arith.constant dense<0.000000e+00> : vector<16x256xf32>
    %1040 = tpu.matmul %964, %968, %cst_319 {dimension_numbers = #tpu.dot_dimension_numbers<[1], [0], [0], [1], [0, 0, 1, 1], [], []>} : vector<16x32xf32>, vector<32x256xf32>, vector<16x256xf32> -> vector<16x256xf32>
    %cst_320 = arith.constant 0.000000e+00 : f32
    %1041 = vector.broadcast %cst_320 : f32 to vector<16x256xf32>
    %1042 = arith.maximumf %1040, %1041 : vector<16x256xf32>
    %cst_321 = arith.constant dense<0.000000e+00> : vector<16x256xf32>
    %1043 = tpu.matmul %1039, %14, %cst_321 {dimension_numbers = #tpu.dot_dimension_numbers<[1], [0], [0], [1], [0, 0, 1, 1], [], []>} : vector<16x4xf32>, vector<4x256xf32>, vector<16x256xf32> -> vector<16x256xf32>
    %1044 = arith.mulf %1042, %1043 : vector<16x256xf32>
    %cst_322 = arith.constant dense<0.000000e+00> : vector<16x32xf32>
    %1045 = tpu.matmul %1044, %970, %cst_322 {dimension_numbers = #tpu.dot_dimension_numbers<[1], [0], [0], [1], [0, 0, 1, 1], [], []>} : vector<16x256xf32>, vector<256x32xf32>, vector<16x32xf32> -> vector<16x32xf32>
    %1046 = vector.broadcast %1016 : vector<16x1xf32> to vector<16x4xf32>
    %1047 = arith.mulf %983, %1046 : vector<16x4xf32>
    %1048 = vector.broadcast %1026 : vector<16x1xf32> to vector<16x4xf32>
    %1049 = arith.mulf %999, %1048 : vector<16x4xf32>
    %1050 = arith.addf %1047, %1049 : vector<16x4xf32>
    %cst_323 = arith.constant dense<0.000000e+00> : vector<4xf32>
    %1051 = vector.multi_reduction <add>, %1050, %cst_323 [0] : vector<16x4xf32> to vector<4xf32>
    %1052 = vector.shape_cast %1051 : vector<4xf32> to vector<1x4xf32>
    %1053 = vector.broadcast %1033 : vector<16x1xf32> to vector<16x4xf32>
    %1054 = arith.mulf %983, %1053 : vector<16x4xf32>
    %1055 = vector.broadcast %1034 : vector<16x1xf32> to vector<16x4xf32>
    %1056 = arith.mulf %999, %1055 : vector<16x4xf32>
    %1057 = arith.addf %1054, %1056 : vector<16x4xf32>
    %cst_324 = arith.constant dense<0.000000e+00> : vector<4xf32>
    %1058 = vector.multi_reduction <add>, %1057, %cst_324 [0] : vector<16x4xf32> to vector<4xf32>
    %1059 = vector.shape_cast %1058 : vector<4xf32> to vector<1x4xf32>
    %cst_325 = arith.constant dense<0.000000e+00> : vector<1xf32>
    %1060 = vector.multi_reduction <add>, %1052, %cst_325 [1] : vector<1x4xf32> to vector<1xf32>
    %1061 = vector.shape_cast %1060 : vector<1xf32> to vector<1x1xf32>
    %cst_326 = arith.constant 9.99999971E-10 : f32
    %1062 = vector.broadcast %cst_326 : f32 to vector<1x1xf32>
    %1063 = arith.addf %1061, %1062 : vector<1x1xf32>
    %1064 = vector.broadcast %1063 : vector<1x1xf32> to vector<1x4xf32>
    %1065 = arith.divf %1052, %1064 : vector<1x4xf32>
    %cst_327 = arith.constant dense<0.000000e+00> : vector<1xf32>
    %1066 = vector.multi_reduction <add>, %1059, %cst_327 [1] : vector<1x4xf32> to vector<1xf32>
    %1067 = vector.shape_cast %1066 : vector<1xf32> to vector<1x1xf32>
    %cst_328 = arith.constant 9.99999971E-10 : f32
    %1068 = vector.broadcast %cst_328 : f32 to vector<1x1xf32>
    %1069 = arith.addf %1067, %1068 : vector<1x1xf32>
    %1070 = vector.broadcast %1069 : vector<1x1xf32> to vector<1x4xf32>
    %1071 = arith.divf %1059, %1070 : vector<1x4xf32>
    %1072 = arith.mulf %1065, %1071 : vector<1x4xf32>
    %cst_329 = arith.constant dense<0.000000e+00> : vector<1xf32>
    %1073 = vector.multi_reduction <add>, %1072, %cst_329 [1] : vector<1x4xf32> to vector<1xf32>
    %1074 = vector.shape_cast %1073 : vector<1xf32> to vector<1x1xf32>
    %cst_330 = arith.constant 4.000000e+00 : f32
    %1075 = vector.broadcast %cst_330 : f32 to vector<1x1xf32>
    %1076 = arith.mulf %1074, %1075 : vector<1x1xf32>
    %1077 = arith.addf %964, %1045 : vector<16x32xf32>
    %1078 = vector.extract_strided_slice %775 {offsets = [2, 0], sizes = [1, 32], strides = [1, 1]} : vector<4x32xf32> to vector<1x32xf32>
    %1079 = vector.extract_strided_slice %775 {offsets = [3, 0], sizes = [1, 32], strides = [1, 1]} : vector<4x32xf32> to vector<1x32xf32>
    %cst_331 = arith.constant dense<0.000000e+00> : vector<16xf32>
    %1080 = vector.multi_reduction <add>, %1077, %cst_331 [1] : vector<16x32xf32> to vector<16xf32>
    %1081 = vector.shape_cast %1080 : vector<16xf32> to vector<16x1xf32>
    %cst_332 = arith.constant 3.200000e+01 : f32
    %1082 = vector.broadcast %cst_332 : f32 to vector<16x1xf32>
    %1083 = arith.divf %1081, %1082 : vector<16x1xf32>
    %1084 = vector.broadcast %1083 : vector<16x1xf32> to vector<16x32xf32>
    %1085 = arith.subf %1077, %1084 : vector<16x32xf32>
    %1086 = arith.mulf %1085, %1085 : vector<16x32xf32>
    %cst_333 = arith.constant dense<0.000000e+00> : vector<16xf32>
    %1087 = vector.multi_reduction <add>, %1086, %cst_333 [1] : vector<16x32xf32> to vector<16xf32>
    %1088 = vector.shape_cast %1087 : vector<16xf32> to vector<16x1xf32>
    %cst_334 = arith.constant 3.200000e+01 : f32
    %1089 = vector.broadcast %cst_334 : f32 to vector<16x1xf32>
    %1090 = arith.divf %1088, %1089 : vector<16x1xf32>
    %1091 = vector.broadcast %1083 : vector<16x1xf32> to vector<16x32xf32>
    %1092 = arith.subf %1077, %1091 : vector<16x32xf32>
    %cst_335 = arith.constant 9.99999974E-6 : f32
    %1093 = vector.broadcast %cst_335 : f32 to vector<16x1xf32>
    %1094 = arith.addf %1090, %1093 : vector<16x1xf32>
    %1095 = math.rsqrt %1094 : vector<16x1xf32>
    %1096 = vector.broadcast %1095 : vector<16x1xf32> to vector<16x32xf32>
    %1097 = arith.mulf %1092, %1096 : vector<16x32xf32>
    %1098 = vector.broadcast %1078 : vector<1x32xf32> to vector<16x32xf32>
    %1099 = arith.mulf %1097, %1098 : vector<16x32xf32>
    %1100 = vector.broadcast %1079 : vector<1x32xf32> to vector<16x32xf32>
    %1101 = arith.addf %1099, %1100 : vector<16x32xf32>
    %1102 = arith.addf %863, %1076 : vector<1x1xf32>
    %1103 = arith.addf %770, %1102 : vector<1x1xf32>
    %c2 = arith.constant 2 : index
    %c0_336 = arith.constant 0 : index
    %c0_337 = arith.constant 0 : index
    %1104 = vector.load %arg13[%c2, %c0_336, %c0_337] : memref<3x4x32xf32, #tpu.memory_space<vmem>>, vector<1x4x32xf32>
    %1105 = vector.shape_cast %1104 : vector<1x4x32xf32> to vector<4x32xf32>
    %c2_338 = arith.constant 2 : index
    %c0_339 = arith.constant 0 : index
    %c0_340 = arith.constant 0 : index
    %1106 = vector.load %arg11[%c2_338, %c0_339, %c0_340] : memref<3x32x512xf32, #tpu.memory_space<vmem>>, vector<1x32x512xf32>
    %1107 = vector.shape_cast %1106 : vector<1x32x512xf32> to vector<32x512xf32>
    %c2_341 = arith.constant 2 : index
    %c0_342 = arith.constant 0 : index
    %c0_343 = arith.constant 0 : index
    %1108 = vector.load %arg12[%c2_341, %c0_342, %c0_343] : memref<3x128x32xf32, #tpu.memory_space<vmem>>, vector<1x128x32xf32>
    %1109 = vector.shape_cast %1108 : vector<1x128x32xf32> to vector<128x32xf32>
    %cst_344 = arith.constant dense<0.000000e+00> : vector<16x512xf32>
    %1110 = tpu.matmul %1101, %1107, %cst_344 {dimension_numbers = #tpu.dot_dimension_numbers<[1], [0], [0], [1], [0, 0, 1, 1], [], []>} : vector<16x32xf32>, vector<32x512xf32>, vector<16x512xf32> -> vector<16x512xf32>
    %1111 = vector.extract_strided_slice %1110 {offsets = [0, 0], sizes = [16, 128], strides = [1, 1]} : vector<16x512xf32> to vector<16x128xf32>
    %1112 = vector.extract_strided_slice %1110 {offsets = [0, 128], sizes = [16, 128], strides = [1, 1]} : vector<16x512xf32> to vector<16x128xf32>
    %1113 = vector.extract_strided_slice %1110 {offsets = [0, 256], sizes = [16, 128], strides = [1, 1]} : vector<16x512xf32> to vector<16x128xf32>
    %1114 = vector.extract_strided_slice %1110 {offsets = [0, 384], sizes = [16, 128], strides = [1, 1]} : vector<16x512xf32> to vector<16x128xf32>
    %1115 = vector.broadcast %25 : vector<1x128xf32> to vector<16x128xf32>
    %1116 = arith.addf %1114, %1115 : vector<16x128xf32>
    %cst_345 = arith.constant dense<0xFF800000> : vector<16xf32>
    %1117 = vector.multi_reduction <maximumf>, %1116, %cst_345 [1] : vector<16x128xf32> to vector<16xf32>
    %1118 = vector.shape_cast %1117 : vector<16xf32> to vector<16x1xf32>
    %1119 = vector.broadcast %1118 : vector<16x1xf32> to vector<16x128xf32>
    %1120 = arith.cmpf oeq, %1116, %1119 : vector<16x128xf32>
    %c128_i32_346 = arith.constant 128 : i32
    %1121 = vector.broadcast %c128_i32_346 : i32 to vector<16x128xi32>
    %1122 = arith.select %1120, %16, %1121 : vector<16x128xi1>, vector<16x128xi32>
    %cst_347 = arith.constant dense<2147483647> : vector<16xi32>
    %1123 = vector.multi_reduction <minsi>, %1122, %cst_347 [1] : vector<16x128xi32> to vector<16xi32>
    %1124 = vector.shape_cast %1123 : vector<16xi32> to vector<16x1xi32>
    %1125 = vector.broadcast %1124 : vector<16x1xi32> to vector<16x128xi32>
    %1126 = arith.cmpi eq, %16, %1125 : vector<16x128xi32>
    %1127 = arith.extui %1126 : vector<16x128xi1> to vector<16x128xi32>
    %1128 = arith.sitofp %1127 : vector<16x128xi32> to vector<16x128xf32>
    %1129 = vector.broadcast %47 : vector<1x128xf32> to vector<16x128xf32>
    %1130 = arith.addf %1114, %1129 : vector<16x128xf32>
    %cst_348 = arith.constant dense<0xFF800000> : vector<16xf32>
    %1131 = vector.multi_reduction <maximumf>, %1130, %cst_348 [1] : vector<16x128xf32> to vector<16xf32>
    %1132 = vector.shape_cast %1131 : vector<16xf32> to vector<16x1xf32>
    %1133 = vector.broadcast %1132 : vector<16x1xf32> to vector<16x128xf32>
    %1134 = arith.cmpf oeq, %1130, %1133 : vector<16x128xf32>
    %c128_i32_349 = arith.constant 128 : i32
    %1135 = vector.broadcast %c128_i32_349 : i32 to vector<16x128xi32>
    %1136 = arith.select %1134, %16, %1135 : vector<16x128xi1>, vector<16x128xi32>
    %cst_350 = arith.constant dense<2147483647> : vector<16xi32>
    %1137 = vector.multi_reduction <minsi>, %1136, %cst_350 [1] : vector<16x128xi32> to vector<16xi32>
    %1138 = vector.shape_cast %1137 : vector<16xi32> to vector<16x1xi32>
    %1139 = vector.broadcast %1138 : vector<16x1xi32> to vector<16x128xi32>
    %1140 = arith.cmpi eq, %16, %1139 : vector<16x128xi32>
    %1141 = arith.extui %1140 : vector<16x128xi1> to vector<16x128xi32>
    %1142 = arith.sitofp %1141 : vector<16x128xi32> to vector<16x128xf32>
    %1143 = vector.broadcast %69 : vector<1x128xf32> to vector<16x128xf32>
    %1144 = arith.addf %1114, %1143 : vector<16x128xf32>
    %cst_351 = arith.constant dense<0xFF800000> : vector<16xf32>
    %1145 = vector.multi_reduction <maximumf>, %1144, %cst_351 [1] : vector<16x128xf32> to vector<16xf32>
    %1146 = vector.shape_cast %1145 : vector<16xf32> to vector<16x1xf32>
    %1147 = vector.broadcast %1146 : vector<16x1xf32> to vector<16x128xf32>
    %1148 = arith.cmpf oeq, %1144, %1147 : vector<16x128xf32>
    %c128_i32_352 = arith.constant 128 : i32
    %1149 = vector.broadcast %c128_i32_352 : i32 to vector<16x128xi32>
    %1150 = arith.select %1148, %16, %1149 : vector<16x128xi1>, vector<16x128xi32>
    %cst_353 = arith.constant dense<2147483647> : vector<16xi32>
    %1151 = vector.multi_reduction <minsi>, %1150, %cst_353 [1] : vector<16x128xi32> to vector<16xi32>
    %1152 = vector.shape_cast %1151 : vector<16xi32> to vector<16x1xi32>
    %1153 = vector.broadcast %1152 : vector<16x1xi32> to vector<16x128xi32>
    %1154 = arith.cmpi eq, %16, %1153 : vector<16x128xi32>
    %1155 = arith.extui %1154 : vector<16x128xi1> to vector<16x128xi32>
    %1156 = arith.sitofp %1155 : vector<16x128xi32> to vector<16x128xf32>
    %1157 = vector.broadcast %91 : vector<1x128xf32> to vector<16x128xf32>
    %1158 = arith.addf %1114, %1157 : vector<16x128xf32>
    %cst_354 = arith.constant dense<0xFF800000> : vector<16xf32>
    %1159 = vector.multi_reduction <maximumf>, %1158, %cst_354 [1] : vector<16x128xf32> to vector<16xf32>
    %1160 = vector.shape_cast %1159 : vector<16xf32> to vector<16x1xf32>
    %1161 = vector.broadcast %1160 : vector<16x1xf32> to vector<16x128xf32>
    %1162 = arith.cmpf oeq, %1158, %1161 : vector<16x128xf32>
    %c128_i32_355 = arith.constant 128 : i32
    %1163 = vector.broadcast %c128_i32_355 : i32 to vector<16x128xi32>
    %1164 = arith.select %1162, %16, %1163 : vector<16x128xi1>, vector<16x128xi32>
    %cst_356 = arith.constant dense<2147483647> : vector<16xi32>
    %1165 = vector.multi_reduction <minsi>, %1164, %cst_356 [1] : vector<16x128xi32> to vector<16xi32>
    %1166 = vector.shape_cast %1165 : vector<16xi32> to vector<16x1xi32>
    %1167 = vector.broadcast %1166 : vector<16x1xi32> to vector<16x128xi32>
    %1168 = arith.cmpi eq, %16, %1167 : vector<16x128xi32>
    %1169 = arith.extui %1168 : vector<16x128xi1> to vector<16x128xi32>
    %1170 = arith.sitofp %1169 : vector<16x128xi32> to vector<16x128xf32>
    %1171 = arith.addf %1128, %1142 : vector<16x128xf32>
    %1172 = arith.addf %1171, %1156 : vector<16x128xf32>
    %1173 = arith.addf %1172, %1170 : vector<16x128xf32>
    %cst_357 = arith.constant dense<0.000000e+00> : vector<128xf32>
    %1174 = vector.multi_reduction <add>, %1173, %cst_357 [0] : vector<16x128xf32> to vector<128xf32>
    %1175 = vector.shape_cast %1174 : vector<128xf32> to vector<1x128xf32>
    %cst_358 = arith.constant 9.900000e-01 : f32
    %1176 = vector.broadcast %cst_358 : f32 to vector<1x128xf32>
    %1177 = arith.mulf %106, %1176 : vector<1x128xf32>
    %cst_359 = arith.constant 6.250000e-04 : f32
    %1178 = vector.broadcast %cst_359 : f32 to vector<1x128xf32>
    %1179 = arith.mulf %1175, %1178 : vector<1x128xf32>
    %1180 = arith.addf %1177, %1179 : vector<1x128xf32>
    %cst_360 = arith.constant dense<0.000000e+00> : vector<1xf32>
    %1181 = vector.multi_reduction <add>, %1180, %cst_360 [1] : vector<1x128xf32> to vector<1xf32>
    %1182 = vector.shape_cast %1181 : vector<1xf32> to vector<1x1xf32>
    %1183 = arith.mulf %1180, %1180 : vector<1x128xf32>
    %cst_361 = arith.constant dense<0.000000e+00> : vector<1xf32>
    %1184 = vector.multi_reduction <add>, %1183, %cst_361 [1] : vector<1x128xf32> to vector<1xf32>
    %1185 = vector.shape_cast %1184 : vector<1xf32> to vector<1x1xf32>
    %cst_362 = arith.constant 9.99999971E-10 : f32
    %1186 = vector.broadcast %cst_362 : f32 to vector<1x1xf32>
    %1187 = arith.addf %1182, %1186 : vector<1x1xf32>
    %cst_363 = arith.constant 9.99999971E-10 : f32
    %1188 = vector.broadcast %cst_363 : f32 to vector<1x1xf32>
    %1189 = arith.addf %1182, %1188 : vector<1x1xf32>
    %1190 = arith.mulf %1187, %1189 : vector<1x1xf32>
    %cst_364 = arith.constant 1.600000e+01 : f32
    %1191 = vector.broadcast %cst_364 : f32 to vector<1x1xf32>
    %1192 = arith.divf %1191, %1190 : vector<1x1xf32>
    %1193 = arith.mulf %1185, %1192 : vector<1x1xf32>
    %cst_365 = arith.constant dense<0.000000e+00> : vector<16x128xf32>
    %1194 = tpu.matmul %1173, %12, %cst_365 {dimension_numbers = #tpu.dot_dimension_numbers<[1], [0], [0], [1], [0, 0, 1, 1], [], []>} : vector<16x128xf32>, vector<128x128xf32>, vector<16x128xf32> -> vector<16x128xf32>
    %1195 = arith.mulf %1111, %1194 : vector<16x128xf32>
    %1196 = vector.broadcast %32 : vector<1x128xf32> to vector<16x128xf32>
    %1197 = arith.mulf %1112, %1196 : vector<16x128xf32>
    %cst_366 = arith.constant dense<0.000000e+00> : vector<16x16xf32>
    %1198 = tpu.matmul %1197, %1113, %cst_366 {dimension_numbers = #tpu.dot_dimension_numbers<[1], [1], [0], [0], [0, 0, 1, 0], [], []>} : vector<16x128xf32>, vector<16x128xf32>, vector<16x16xf32> -> vector<16x16xf32>
    %1199 = arith.addf %1198, %10 : vector<16x16xf32>
    %cst_367 = arith.constant dense<0xFF800000> : vector<16xf32>
    %1200 = vector.multi_reduction <maximumf>, %1199, %cst_367 [1] : vector<16x16xf32> to vector<16xf32>
    %1201 = vector.shape_cast %1200 : vector<16xf32> to vector<16x1xf32>
    %1202 = vector.broadcast %1201 : vector<16x1xf32> to vector<16x16xf32>
    %1203 = arith.subf %1199, %1202 : vector<16x16xf32>
    %1204 = math.exp %1203 : vector<16x16xf32>
    %cst_368 = arith.constant dense<0.000000e+00> : vector<16xf32>
    %1205 = vector.multi_reduction <add>, %1204, %cst_368 [1] : vector<16x16xf32> to vector<16xf32>
    %1206 = vector.shape_cast %1205 : vector<16xf32> to vector<16x1xf32>
    %1207 = tpu.reciprocal %1206 {approx = true} : vector<16x1xf32> -> vector<16x1xf32>
    %1208 = vector.broadcast %1207 : vector<16x1xf32> to vector<16x16xf32>
    %1209 = arith.mulf %1204, %1208 : vector<16x16xf32>
    %cst_369 = arith.constant dense<0.000000e+00> : vector<16x128xf32>
    %1210 = tpu.matmul %1209, %1195, %cst_369 {dimension_numbers = #tpu.dot_dimension_numbers<[0], [0], [1], [1], [0, 1, 1, 1], [], []>} : vector<16x16xf32>, vector<16x128xf32>, vector<16x128xf32> -> vector<16x128xf32>
    %1211 = vector.broadcast %39 : vector<1x128xf32> to vector<16x128xf32>
    %1212 = arith.mulf %1210, %1211 : vector<16x128xf32>
    %1213 = vector.broadcast %54 : vector<1x128xf32> to vector<16x128xf32>
    %1214 = arith.mulf %1112, %1213 : vector<16x128xf32>
    %cst_370 = arith.constant dense<0.000000e+00> : vector<16x16xf32>
    %1215 = tpu.matmul %1214, %1113, %cst_370 {dimension_numbers = #tpu.dot_dimension_numbers<[1], [1], [0], [0], [0, 0, 1, 0], [], []>} : vector<16x128xf32>, vector<16x128xf32>, vector<16x16xf32> -> vector<16x16xf32>
    %1216 = arith.addf %1215, %10 : vector<16x16xf32>
    %cst_371 = arith.constant dense<0xFF800000> : vector<16xf32>
    %1217 = vector.multi_reduction <maximumf>, %1216, %cst_371 [1] : vector<16x16xf32> to vector<16xf32>
    %1218 = vector.shape_cast %1217 : vector<16xf32> to vector<16x1xf32>
    %1219 = vector.broadcast %1218 : vector<16x1xf32> to vector<16x16xf32>
    %1220 = arith.subf %1216, %1219 : vector<16x16xf32>
    %1221 = math.exp %1220 : vector<16x16xf32>
    %cst_372 = arith.constant dense<0.000000e+00> : vector<16xf32>
    %1222 = vector.multi_reduction <add>, %1221, %cst_372 [1] : vector<16x16xf32> to vector<16xf32>
    %1223 = vector.shape_cast %1222 : vector<16xf32> to vector<16x1xf32>
    %1224 = tpu.reciprocal %1223 {approx = true} : vector<16x1xf32> -> vector<16x1xf32>
    %1225 = vector.broadcast %1224 : vector<16x1xf32> to vector<16x16xf32>
    %1226 = arith.mulf %1221, %1225 : vector<16x16xf32>
    %cst_373 = arith.constant dense<0.000000e+00> : vector<16x128xf32>
    %1227 = tpu.matmul %1226, %1195, %cst_373 {dimension_numbers = #tpu.dot_dimension_numbers<[0], [0], [1], [1], [0, 1, 1, 1], [], []>} : vector<16x16xf32>, vector<16x128xf32>, vector<16x128xf32> -> vector<16x128xf32>
    %1228 = vector.broadcast %61 : vector<1x128xf32> to vector<16x128xf32>
    %1229 = arith.mulf %1227, %1228 : vector<16x128xf32>
    %1230 = vector.broadcast %76 : vector<1x128xf32> to vector<16x128xf32>
    %1231 = arith.mulf %1112, %1230 : vector<16x128xf32>
    %cst_374 = arith.constant dense<0.000000e+00> : vector<16x16xf32>
    %1232 = tpu.matmul %1231, %1113, %cst_374 {dimension_numbers = #tpu.dot_dimension_numbers<[1], [1], [0], [0], [0, 0, 1, 0], [], []>} : vector<16x128xf32>, vector<16x128xf32>, vector<16x16xf32> -> vector<16x16xf32>
    %1233 = arith.addf %1232, %10 : vector<16x16xf32>
    %cst_375 = arith.constant dense<0xFF800000> : vector<16xf32>
    %1234 = vector.multi_reduction <maximumf>, %1233, %cst_375 [1] : vector<16x16xf32> to vector<16xf32>
    %1235 = vector.shape_cast %1234 : vector<16xf32> to vector<16x1xf32>
    %1236 = vector.broadcast %1235 : vector<16x1xf32> to vector<16x16xf32>
    %1237 = arith.subf %1233, %1236 : vector<16x16xf32>
    %1238 = math.exp %1237 : vector<16x16xf32>
    %cst_376 = arith.constant dense<0.000000e+00> : vector<16xf32>
    %1239 = vector.multi_reduction <add>, %1238, %cst_376 [1] : vector<16x16xf32> to vector<16xf32>
    %1240 = vector.shape_cast %1239 : vector<16xf32> to vector<16x1xf32>
    %1241 = tpu.reciprocal %1240 {approx = true} : vector<16x1xf32> -> vector<16x1xf32>
    %1242 = vector.broadcast %1241 : vector<16x1xf32> to vector<16x16xf32>
    %1243 = arith.mulf %1238, %1242 : vector<16x16xf32>
    %cst_377 = arith.constant dense<0.000000e+00> : vector<16x128xf32>
    %1244 = tpu.matmul %1243, %1195, %cst_377 {dimension_numbers = #tpu.dot_dimension_numbers<[0], [0], [1], [1], [0, 1, 1, 1], [], []>} : vector<16x16xf32>, vector<16x128xf32>, vector<16x128xf32> -> vector<16x128xf32>
    %1245 = vector.broadcast %83 : vector<1x128xf32> to vector<16x128xf32>
    %1246 = arith.mulf %1244, %1245 : vector<16x128xf32>
    %1247 = vector.broadcast %98 : vector<1x128xf32> to vector<16x128xf32>
    %1248 = arith.mulf %1112, %1247 : vector<16x128xf32>
    %cst_378 = arith.constant dense<0.000000e+00> : vector<16x16xf32>
    %1249 = tpu.matmul %1248, %1113, %cst_378 {dimension_numbers = #tpu.dot_dimension_numbers<[1], [1], [0], [0], [0, 0, 1, 0], [], []>} : vector<16x128xf32>, vector<16x128xf32>, vector<16x16xf32> -> vector<16x16xf32>
    %1250 = arith.addf %1249, %10 : vector<16x16xf32>
    %cst_379 = arith.constant dense<0xFF800000> : vector<16xf32>
    %1251 = vector.multi_reduction <maximumf>, %1250, %cst_379 [1] : vector<16x16xf32> to vector<16xf32>
    %1252 = vector.shape_cast %1251 : vector<16xf32> to vector<16x1xf32>
    %1253 = vector.broadcast %1252 : vector<16x1xf32> to vector<16x16xf32>
    %1254 = arith.subf %1250, %1253 : vector<16x16xf32>
    %1255 = math.exp %1254 : vector<16x16xf32>
    %cst_380 = arith.constant dense<0.000000e+00> : vector<16xf32>
    %1256 = vector.multi_reduction <add>, %1255, %cst_380 [1] : vector<16x16xf32> to vector<16xf32>
    %1257 = vector.shape_cast %1256 : vector<16xf32> to vector<16x1xf32>
    %1258 = tpu.reciprocal %1257 {approx = true} : vector<16x1xf32> -> vector<16x1xf32>
    %1259 = vector.broadcast %1258 : vector<16x1xf32> to vector<16x16xf32>
    %1260 = arith.mulf %1255, %1259 : vector<16x16xf32>
    %cst_381 = arith.constant dense<0.000000e+00> : vector<16x128xf32>
    %1261 = tpu.matmul %1260, %1195, %cst_381 {dimension_numbers = #tpu.dot_dimension_numbers<[0], [0], [1], [1], [0, 1, 1, 1], [], []>} : vector<16x16xf32>, vector<16x128xf32>, vector<16x128xf32> -> vector<16x128xf32>
    %1262 = vector.broadcast %105 : vector<1x128xf32> to vector<16x128xf32>
    %1263 = arith.mulf %1261, %1262 : vector<16x128xf32>
    %1264 = arith.addf %1212, %1229 : vector<16x128xf32>
    %1265 = arith.addf %1264, %1246 : vector<16x128xf32>
    %1266 = arith.addf %1265, %1263 : vector<16x128xf32>
    %cst_382 = arith.constant dense<0.000000e+00> : vector<16x128xf32>
    %1267 = tpu.matmul %1266, %13, %cst_382 {dimension_numbers = #tpu.dot_dimension_numbers<[1], [0], [0], [1], [0, 0, 1, 1], [], []>} : vector<16x128xf32>, vector<128x128xf32>, vector<16x128xf32> -> vector<16x128xf32>
    %1268 = arith.mulf %1267, %1194 : vector<16x128xf32>
    %cst_383 = arith.constant dense<0.000000e+00> : vector<16x32xf32>
    %1269 = tpu.matmul %1268, %1109, %cst_383 {dimension_numbers = #tpu.dot_dimension_numbers<[1], [0], [0], [1], [0, 0, 1, 1], [], []>} : vector<16x128xf32>, vector<128x32xf32>, vector<16x32xf32> -> vector<16x32xf32>
    %1270 = arith.addf %1101, %1269 : vector<16x32xf32>
    %1271 = vector.extract_strided_slice %1105 {offsets = [0, 0], sizes = [1, 32], strides = [1, 1]} : vector<4x32xf32> to vector<1x32xf32>
    %1272 = vector.extract_strided_slice %1105 {offsets = [1, 0], sizes = [1, 32], strides = [1, 1]} : vector<4x32xf32> to vector<1x32xf32>
    %cst_384 = arith.constant dense<0.000000e+00> : vector<16xf32>
    %1273 = vector.multi_reduction <add>, %1270, %cst_384 [1] : vector<16x32xf32> to vector<16xf32>
    %1274 = vector.shape_cast %1273 : vector<16xf32> to vector<16x1xf32>
    %cst_385 = arith.constant 3.200000e+01 : f32
    %1275 = vector.broadcast %cst_385 : f32 to vector<16x1xf32>
    %1276 = arith.divf %1274, %1275 : vector<16x1xf32>
    %1277 = vector.broadcast %1276 : vector<16x1xf32> to vector<16x32xf32>
    %1278 = arith.subf %1270, %1277 : vector<16x32xf32>
    %1279 = arith.mulf %1278, %1278 : vector<16x32xf32>
    %cst_386 = arith.constant dense<0.000000e+00> : vector<16xf32>
    %1280 = vector.multi_reduction <add>, %1279, %cst_386 [1] : vector<16x32xf32> to vector<16xf32>
    %1281 = vector.shape_cast %1280 : vector<16xf32> to vector<16x1xf32>
    %cst_387 = arith.constant 3.200000e+01 : f32
    %1282 = vector.broadcast %cst_387 : f32 to vector<16x1xf32>
    %1283 = arith.divf %1281, %1282 : vector<16x1xf32>
    %1284 = vector.broadcast %1276 : vector<16x1xf32> to vector<16x32xf32>
    %1285 = arith.subf %1270, %1284 : vector<16x32xf32>
    %cst_388 = arith.constant 9.99999974E-6 : f32
    %1286 = vector.broadcast %cst_388 : f32 to vector<16x1xf32>
    %1287 = arith.addf %1283, %1286 : vector<16x1xf32>
    %1288 = math.rsqrt %1287 : vector<16x1xf32>
    %1289 = vector.broadcast %1288 : vector<16x1xf32> to vector<16x32xf32>
    %1290 = arith.mulf %1285, %1289 : vector<16x32xf32>
    %1291 = vector.broadcast %1271 : vector<1x32xf32> to vector<16x32xf32>
    %1292 = arith.mulf %1290, %1291 : vector<16x32xf32>
    %1293 = vector.broadcast %1272 : vector<1x32xf32> to vector<16x32xf32>
    %1294 = arith.addf %1292, %1293 : vector<16x32xf32>
    %c2_389 = arith.constant 2 : index
    %c0_390 = arith.constant 0 : index
    %c0_391 = arith.constant 0 : index
    %1295 = vector.load %arg14[%c2_389, %c0_390, %c0_391] : memref<3x32x4xf32, #tpu.memory_space<vmem>>, vector<1x32x4xf32>
    %1296 = vector.shape_cast %1295 : vector<1x32x4xf32> to vector<32x4xf32>
    %c2_392 = arith.constant 2 : index
    %c0_393 = arith.constant 0 : index
    %c0_394 = arith.constant 0 : index
    %1297 = vector.load %arg15[%c2_392, %c0_393, %c0_394] : memref<3x32x256xf32, #tpu.memory_space<vmem>>, vector<1x32x256xf32>
    %1298 = vector.shape_cast %1297 : vector<1x32x256xf32> to vector<32x256xf32>
    %c2_395 = arith.constant 2 : index
    %c0_396 = arith.constant 0 : index
    %c0_397 = arith.constant 0 : index
    %1299 = vector.load %arg16[%c2_395, %c0_396, %c0_397] : memref<3x256x32xf32, #tpu.memory_space<vmem>>, vector<1x256x32xf32>
    %1300 = vector.shape_cast %1299 : vector<1x256x32xf32> to vector<256x32xf32>
    %cst_398 = arith.constant dense<0.000000e+00> : vector<16x4xf32>
    %1301 = tpu.matmul %1294, %1296, %cst_398 {dimension_numbers = #tpu.dot_dimension_numbers<[1], [0], [0], [1], [0, 0, 1, 1], [], []>} : vector<16x32xf32>, vector<32x4xf32>, vector<16x4xf32> -> vector<16x4xf32>
    %cst_399 = arith.constant dense<0xFF800000> : vector<16xf32>
    %1302 = vector.multi_reduction <maximumf>, %1301, %cst_399 [1] : vector<16x4xf32> to vector<16xf32>
    %1303 = vector.shape_cast %1302 : vector<16xf32> to vector<16x1xf32>
    %1304 = vector.broadcast %1303 : vector<16x1xf32> to vector<16x4xf32>
    %1305 = arith.cmpf oeq, %1301, %1304 : vector<16x4xf32>
    %c4_i32_400 = arith.constant 4 : i32
    %1306 = vector.broadcast %c4_i32_400 : i32 to vector<16x4xi32>
    %1307 = arith.select %1305, %17, %1306 : vector<16x4xi1>, vector<16x4xi32>
    %cst_401 = arith.constant dense<2147483647> : vector<16xi32>
    %1308 = vector.multi_reduction <minsi>, %1307, %cst_401 [1] : vector<16x4xi32> to vector<16xi32>
    %1309 = vector.shape_cast %1308 : vector<16xi32> to vector<16x1xi32>
    %1310 = vector.broadcast %1309 : vector<16x1xi32> to vector<16x4xi32>
    %1311 = arith.cmpi eq, %17, %1310 : vector<16x4xi32>
    %1312 = arith.extui %1311 : vector<16x4xi1> to vector<16x4xi32>
    %1313 = arith.sitofp %1312 : vector<16x4xi32> to vector<16x4xf32>
    %cst_402 = arith.constant 0.000000e+00 : f32
    %1314 = vector.broadcast %cst_402 : f32 to vector<16x4xf32>
    %1315 = arith.cmpf ogt, %1313, %1314 : vector<16x4xf32>
    %cst_403 = arith.constant -1.000000e+30 : f32
    %1316 = vector.broadcast %cst_403 : f32 to vector<16x4xf32>
    %1317 = arith.select %1315, %1316, %1301 : vector<16x4xi1>, vector<16x4xf32>
    %cst_404 = arith.constant dense<0xFF800000> : vector<16xf32>
    %1318 = vector.multi_reduction <maximumf>, %1317, %cst_404 [1] : vector<16x4xf32> to vector<16xf32>
    %1319 = vector.shape_cast %1318 : vector<16xf32> to vector<16x1xf32>
    %1320 = vector.broadcast %1319 : vector<16x1xf32> to vector<16x4xf32>
    %1321 = arith.cmpf oeq, %1317, %1320 : vector<16x4xf32>
    %c4_i32_405 = arith.constant 4 : i32
    %1322 = vector.broadcast %c4_i32_405 : i32 to vector<16x4xi32>
    %1323 = arith.select %1321, %17, %1322 : vector<16x4xi1>, vector<16x4xi32>
    %cst_406 = arith.constant dense<2147483647> : vector<16xi32>
    %1324 = vector.multi_reduction <minsi>, %1323, %cst_406 [1] : vector<16x4xi32> to vector<16xi32>
    %1325 = vector.shape_cast %1324 : vector<16xi32> to vector<16x1xi32>
    %1326 = vector.broadcast %1325 : vector<16x1xi32> to vector<16x4xi32>
    %1327 = arith.cmpi eq, %17, %1326 : vector<16x4xi32>
    %1328 = arith.extui %1327 : vector<16x4xi1> to vector<16x4xi32>
    %1329 = arith.sitofp %1328 : vector<16x4xi32> to vector<16x4xf32>
    %1330 = arith.subf %1319, %1303 : vector<16x1xf32>
    %1331 = math.exp %1330 : vector<16x1xf32>
    %cst_407 = arith.constant 1.000000e+00 : f32
    %1332 = vector.broadcast %cst_407 : f32 to vector<16x1xf32>
    %1333 = arith.addf %1332, %1331 : vector<16x1xf32>
    %1334 = tpu.reciprocal %1333 {approx = true} : vector<16x1xf32> -> vector<16x1xf32>
    %1335 = arith.mulf %1331, %1334 : vector<16x1xf32>
    %1336 = arith.addf %1313, %1329 : vector<16x4xf32>
    %cst_408 = arith.constant dense<0.000000e+00> : vector<16x4xf32>
    %1337 = tpu.matmul %11, %1336, %cst_408 {dimension_numbers = #tpu.dot_dimension_numbers<[1], [0], [0], [1], [0, 0, 1, 1], [], []>} : vector<16x16xf32>, vector<16x4xf32>, vector<16x4xf32> -> vector<16x4xf32>
    %cst_409 = arith.constant 1.000000e+00 : f32
    %1338 = vector.broadcast %cst_409 : f32 to vector<16x4xf32>
    %1339 = arith.addf %1337, %1338 : vector<16x4xf32>
    %cst_410 = arith.constant 5.000000e+00 : f32
    %1340 = vector.broadcast %cst_410 : f32 to vector<16x4xf32>
    %1341 = arith.cmpf ole, %1339, %1340 : vector<16x4xf32>
    %1342 = arith.extui %1341 : vector<16x4xi1> to vector<16x4xi32>
    %1343 = arith.sitofp %1342 : vector<16x4xi32> to vector<16x4xf32>
    %1344 = arith.mulf %1313, %1343 : vector<16x4xf32>
    %cst_411 = arith.constant dense<0.000000e+00> : vector<16xf32>
    %1345 = vector.multi_reduction <add>, %1344, %cst_411 [1] : vector<16x4xf32> to vector<16xf32>
    %1346 = vector.shape_cast %1345 : vector<16xf32> to vector<16x1xf32>
    %1347 = arith.addf %1337, %1313 : vector<16x4xf32>
    %cst_412 = arith.constant 1.000000e+00 : f32
    %1348 = vector.broadcast %cst_412 : f32 to vector<16x4xf32>
    %1349 = arith.addf %1347, %1348 : vector<16x4xf32>
    %cst_413 = arith.constant 5.000000e+00 : f32
    %1350 = vector.broadcast %cst_413 : f32 to vector<16x4xf32>
    %1351 = arith.cmpf ole, %1349, %1350 : vector<16x4xf32>
    %1352 = arith.extui %1351 : vector<16x4xi1> to vector<16x4xi32>
    %1353 = arith.sitofp %1352 : vector<16x4xi32> to vector<16x4xf32>
    %1354 = arith.mulf %1329, %1353 : vector<16x4xf32>
    %cst_414 = arith.constant dense<0.000000e+00> : vector<16xf32>
    %1355 = vector.multi_reduction <add>, %1354, %cst_414 [1] : vector<16x4xf32> to vector<16xf32>
    %1356 = vector.shape_cast %1355 : vector<16xf32> to vector<16x1xf32>
    %1357 = arith.mulf %1334, %1346 : vector<16x1xf32>
    %1358 = arith.mulf %1335, %1356 : vector<16x1xf32>
    %1359 = arith.addf %1357, %1358 : vector<16x1xf32>
    %cst_415 = arith.constant 9.99999971E-10 : f32
    %1360 = vector.broadcast %cst_415 : f32 to vector<16x1xf32>
    %1361 = arith.addf %1359, %1360 : vector<16x1xf32>
    %1362 = tpu.reciprocal %1361 {approx = true} : vector<16x1xf32> -> vector<16x1xf32>
    %1363 = arith.mulf %1357, %1362 : vector<16x1xf32>
    %1364 = arith.mulf %1358, %1362 : vector<16x1xf32>
    %1365 = vector.broadcast %1363 : vector<16x1xf32> to vector<16x4xf32>
    %1366 = arith.mulf %1365, %1313 : vector<16x4xf32>
    %1367 = vector.broadcast %1364 : vector<16x1xf32> to vector<16x4xf32>
    %1368 = arith.mulf %1367, %1329 : vector<16x4xf32>
    %1369 = arith.addf %1366, %1368 : vector<16x4xf32>
    %cst_416 = arith.constant dense<0.000000e+00> : vector<16x256xf32>
    %1370 = tpu.matmul %1294, %1298, %cst_416 {dimension_numbers = #tpu.dot_dimension_numbers<[1], [0], [0], [1], [0, 0, 1, 1], [], []>} : vector<16x32xf32>, vector<32x256xf32>, vector<16x256xf32> -> vector<16x256xf32>
    %cst_417 = arith.constant 0.000000e+00 : f32
    %1371 = vector.broadcast %cst_417 : f32 to vector<16x256xf32>
    %1372 = arith.maximumf %1370, %1371 : vector<16x256xf32>
    %cst_418 = arith.constant dense<0.000000e+00> : vector<16x256xf32>
    %1373 = tpu.matmul %1369, %14, %cst_418 {dimension_numbers = #tpu.dot_dimension_numbers<[1], [0], [0], [1], [0, 0, 1, 1], [], []>} : vector<16x4xf32>, vector<4x256xf32>, vector<16x256xf32> -> vector<16x256xf32>
    %1374 = arith.mulf %1372, %1373 : vector<16x256xf32>
    %cst_419 = arith.constant dense<0.000000e+00> : vector<16x32xf32>
    %1375 = tpu.matmul %1374, %1300, %cst_419 {dimension_numbers = #tpu.dot_dimension_numbers<[1], [0], [0], [1], [0, 0, 1, 1], [], []>} : vector<16x256xf32>, vector<256x32xf32>, vector<16x32xf32> -> vector<16x32xf32>
    %1376 = vector.broadcast %1346 : vector<16x1xf32> to vector<16x4xf32>
    %1377 = arith.mulf %1313, %1376 : vector<16x4xf32>
    %1378 = vector.broadcast %1356 : vector<16x1xf32> to vector<16x4xf32>
    %1379 = arith.mulf %1329, %1378 : vector<16x4xf32>
    %1380 = arith.addf %1377, %1379 : vector<16x4xf32>
    %cst_420 = arith.constant dense<0.000000e+00> : vector<4xf32>
    %1381 = vector.multi_reduction <add>, %1380, %cst_420 [0] : vector<16x4xf32> to vector<4xf32>
    %1382 = vector.shape_cast %1381 : vector<4xf32> to vector<1x4xf32>
    %1383 = vector.broadcast %1363 : vector<16x1xf32> to vector<16x4xf32>
    %1384 = arith.mulf %1313, %1383 : vector<16x4xf32>
    %1385 = vector.broadcast %1364 : vector<16x1xf32> to vector<16x4xf32>
    %1386 = arith.mulf %1329, %1385 : vector<16x4xf32>
    %1387 = arith.addf %1384, %1386 : vector<16x4xf32>
    %cst_421 = arith.constant dense<0.000000e+00> : vector<4xf32>
    %1388 = vector.multi_reduction <add>, %1387, %cst_421 [0] : vector<16x4xf32> to vector<4xf32>
    %1389 = vector.shape_cast %1388 : vector<4xf32> to vector<1x4xf32>
    %cst_422 = arith.constant dense<0.000000e+00> : vector<1xf32>
    %1390 = vector.multi_reduction <add>, %1382, %cst_422 [1] : vector<1x4xf32> to vector<1xf32>
    %1391 = vector.shape_cast %1390 : vector<1xf32> to vector<1x1xf32>
    %cst_423 = arith.constant 9.99999971E-10 : f32
    %1392 = vector.broadcast %cst_423 : f32 to vector<1x1xf32>
    %1393 = arith.addf %1391, %1392 : vector<1x1xf32>
    %1394 = vector.broadcast %1393 : vector<1x1xf32> to vector<1x4xf32>
    %1395 = arith.divf %1382, %1394 : vector<1x4xf32>
    %cst_424 = arith.constant dense<0.000000e+00> : vector<1xf32>
    %1396 = vector.multi_reduction <add>, %1389, %cst_424 [1] : vector<1x4xf32> to vector<1xf32>
    %1397 = vector.shape_cast %1396 : vector<1xf32> to vector<1x1xf32>
    %cst_425 = arith.constant 9.99999971E-10 : f32
    %1398 = vector.broadcast %cst_425 : f32 to vector<1x1xf32>
    %1399 = arith.addf %1397, %1398 : vector<1x1xf32>
    %1400 = vector.broadcast %1399 : vector<1x1xf32> to vector<1x4xf32>
    %1401 = arith.divf %1389, %1400 : vector<1x4xf32>
    %1402 = arith.mulf %1395, %1401 : vector<1x4xf32>
    %cst_426 = arith.constant dense<0.000000e+00> : vector<1xf32>
    %1403 = vector.multi_reduction <add>, %1402, %cst_426 [1] : vector<1x4xf32> to vector<1xf32>
    %1404 = vector.shape_cast %1403 : vector<1xf32> to vector<1x1xf32>
    %cst_427 = arith.constant 4.000000e+00 : f32
    %1405 = vector.broadcast %cst_427 : f32 to vector<1x1xf32>
    %1406 = arith.mulf %1404, %1405 : vector<1x1xf32>
    %1407 = arith.addf %1294, %1375 : vector<16x32xf32>
    %1408 = vector.extract_strided_slice %1105 {offsets = [2, 0], sizes = [1, 32], strides = [1, 1]} : vector<4x32xf32> to vector<1x32xf32>
    %1409 = vector.extract_strided_slice %1105 {offsets = [3, 0], sizes = [1, 32], strides = [1, 1]} : vector<4x32xf32> to vector<1x32xf32>
    %cst_428 = arith.constant dense<0.000000e+00> : vector<16xf32>
    %1410 = vector.multi_reduction <add>, %1407, %cst_428 [1] : vector<16x32xf32> to vector<16xf32>
    %1411 = vector.shape_cast %1410 : vector<16xf32> to vector<16x1xf32>
    %cst_429 = arith.constant 3.200000e+01 : f32
    %1412 = vector.broadcast %cst_429 : f32 to vector<16x1xf32>
    %1413 = arith.divf %1411, %1412 : vector<16x1xf32>
    %1414 = vector.broadcast %1413 : vector<16x1xf32> to vector<16x32xf32>
    %1415 = arith.subf %1407, %1414 : vector<16x32xf32>
    %1416 = arith.mulf %1415, %1415 : vector<16x32xf32>
    %cst_430 = arith.constant dense<0.000000e+00> : vector<16xf32>
    %1417 = vector.multi_reduction <add>, %1416, %cst_430 [1] : vector<16x32xf32> to vector<16xf32>
    %1418 = vector.shape_cast %1417 : vector<16xf32> to vector<16x1xf32>
    %cst_431 = arith.constant 3.200000e+01 : f32
    %1419 = vector.broadcast %cst_431 : f32 to vector<16x1xf32>
    %1420 = arith.divf %1418, %1419 : vector<16x1xf32>
    %1421 = vector.broadcast %1413 : vector<16x1xf32> to vector<16x32xf32>
    %1422 = arith.subf %1407, %1421 : vector<16x32xf32>
    %cst_432 = arith.constant 9.99999974E-6 : f32
    %1423 = vector.broadcast %cst_432 : f32 to vector<16x1xf32>
    %1424 = arith.addf %1420, %1423 : vector<16x1xf32>
    %1425 = math.rsqrt %1424 : vector<16x1xf32>
    %1426 = vector.broadcast %1425 : vector<16x1xf32> to vector<16x32xf32>
    %1427 = arith.mulf %1422, %1426 : vector<16x32xf32>
    %1428 = vector.broadcast %1408 : vector<1x32xf32> to vector<16x32xf32>
    %1429 = arith.mulf %1427, %1428 : vector<16x32xf32>
    %1430 = vector.broadcast %1409 : vector<1x32xf32> to vector<16x32xf32>
    %1431 = arith.addf %1429, %1430 : vector<16x32xf32>
    %1432 = arith.addf %1193, %1406 : vector<1x1xf32>
    %1433 = arith.addf %1103, %1432 : vector<1x1xf32>
    %c0_433 = arith.constant 0 : index
    %c0_434 = arith.constant 0 : index
    %1434 = vector.load %arg4[%c0_433, %c0_434] : memref<2x32xf32, #tpu.memory_space<vmem>>, vector<1x32xf32>
    %c1_435 = arith.constant 1 : index
    %c0_436 = arith.constant 0 : index
    %1435 = vector.load %arg4[%c1_435, %c0_436] : memref<2x32xf32, #tpu.memory_space<vmem>>, vector<1x32xf32>
    %cst_437 = arith.constant dense<0.000000e+00> : vector<16xf32>
    %1436 = vector.multi_reduction <add>, %1431, %cst_437 [1] : vector<16x32xf32> to vector<16xf32>
    %1437 = vector.shape_cast %1436 : vector<16xf32> to vector<16x1xf32>
    %cst_438 = arith.constant 3.200000e+01 : f32
    %1438 = vector.broadcast %cst_438 : f32 to vector<16x1xf32>
    %1439 = arith.divf %1437, %1438 : vector<16x1xf32>
    %1440 = vector.broadcast %1439 : vector<16x1xf32> to vector<16x32xf32>
    %1441 = arith.subf %1431, %1440 : vector<16x32xf32>
    %1442 = arith.mulf %1441, %1441 : vector<16x32xf32>
    %cst_439 = arith.constant dense<0.000000e+00> : vector<16xf32>
    %1443 = vector.multi_reduction <add>, %1442, %cst_439 [1] : vector<16x32xf32> to vector<16xf32>
    %1444 = vector.shape_cast %1443 : vector<16xf32> to vector<16x1xf32>
    %cst_440 = arith.constant 3.200000e+01 : f32
    %1445 = vector.broadcast %cst_440 : f32 to vector<16x1xf32>
    %1446 = arith.divf %1444, %1445 : vector<16x1xf32>
    %1447 = vector.broadcast %1439 : vector<16x1xf32> to vector<16x32xf32>
    %1448 = arith.subf %1431, %1447 : vector<16x32xf32>
    %cst_441 = arith.constant 9.99999974E-6 : f32
    %1449 = vector.broadcast %cst_441 : f32 to vector<16x1xf32>
    %1450 = arith.addf %1446, %1449 : vector<16x1xf32>
    %1451 = math.rsqrt %1450 : vector<16x1xf32>
    %1452 = vector.broadcast %1451 : vector<16x1xf32> to vector<16x32xf32>
    %1453 = arith.mulf %1448, %1452 : vector<16x32xf32>
    %1454 = vector.broadcast %1434 : vector<1x32xf32> to vector<16x32xf32>
    %1455 = arith.mulf %1453, %1454 : vector<16x32xf32>
    %1456 = vector.broadcast %1435 : vector<1x32xf32> to vector<16x32xf32>
    %1457 = arith.addf %1455, %1456 : vector<16x32xf32>
    %c0_442 = arith.constant 0 : index
    %c0_443 = arith.constant 0 : index
    %1458 = vector.load %arg5[%c0_442, %c0_443] : memref<32x128xf32, #tpu.memory_space<vmem>>, vector<32x128xf32>
    %cst_444 = arith.constant dense<0.000000e+00> : vector<16x128xf32>
    %1459 = tpu.matmul %1457, %1458, %cst_444 {dimension_numbers = #tpu.dot_dimension_numbers<[1], [0], [0], [1], [0, 0, 1, 1], [], []>} : vector<16x32xf32>, vector<32x128xf32>, vector<16x128xf32> -> vector<16x128xf32>
    %c0_445 = arith.constant 0 : index
    %c0_446 = arith.constant 0 : index
    %1460 = vector.load %arg17[%c0_445, %c0_446] : memref<16x128xf32, #tpu.memory_space<vmem>>, vector<16x128xf32>
    tpu.vector_store %arg17[%c0_445, %c0_446], %1459 {strides = array<i32>} : memref<16x128xf32, #tpu.memory_space<vmem>>, vector<16x128xf32>,
    %c0_447 = arith.constant 0 : index
    %c0_448 = arith.constant 0 : index
    %1461 = vector.load %arg18[%c0_447, %c0_448] : memref<1x1xf32, #tpu.memory_space<vmem>>, vector<1x1xf32>
    tpu.vector_store %arg18[%c0_447, %c0_448], %1433 {strides = array<i32>} : memref<1x1xf32, #tpu.memory_space<vmem>>, vector<1x1xf32>,
    return
  }
}

</mosaic_0001>

<bundles_post_ra>
// kernel: model_forward.1
= control target key start
LH: loop header
LB: loop body
LE: loop exit
PB: predicated region body
PF: predicated region fallthrough
CT: control target
= control target key end

     0   :  { %s14744_s0 = inlined_call_operand.vmem [shape: s32[16,1], index: 0, kind: input, shape index: {}]   ;;  %s14745_s1 = inlined_call_operand.vmem [shape: f32[64,32], index: 1, kind: input, shape index: {}]   ;;  %s14746_s2 = inlined_call_operand.vmem [shape: f32[16,32], index: 2, kind: input, shape index: {}]   ;;  %s14747_s3 = inlined_call_operand.vmem [shape: f32[2,32], index: 3, kind: input, shape index: {}]   ;;  %s14748_s4 = inlined_call_operand.vmem [shape: f32[2,32], index: 4, kind: input, shape index: {}]   ;;  %s14749_s5 = inlined_call_operand.vmem [shape: f32[32,128], index: 5, kind: input, shape index: {}]   ;;  %s14750_s6 = inlined_call_operand.vmem [shape: f32[16,16], index: 6, kind: input, shape index: {}]   ;;  %s14751_s7 = inlined_call_operand.vmem [shape: f32[16,16], index: 7, kind: input, shape index: {}]   ;;  %s14752_s8 = inlined_call_operand.vmem [shape: f32[128,128], index: 8, kind: input, shape index: {}]   ;;  %s14753_s9 = inlined_call_operand.vmem [shape: f32[128,128], index: 9, kind: input, shape index: {}]   ;;  %s14754_s10 = inlined_call_operand.vmem [shape: f32[4,256], index: 10, kind: input, shape index: {}]   ;;  %s14755_s11 = inlined_call_operand.vmem [shape: f32[3,32,512], index: 11, kind: input, shape index: {}]   ;;  %s14756_s12 = inlined_call_operand.vmem [shape: f32[3,128,32], index: 12, kind: input, shape index: {}]   ;;  %s14757_s13 = inlined_call_operand.vmem [shape: f32[3,4,32], index: 13, kind: input, shape index: {}]   ;;  %s14758_s14 = inlined_call_operand.vmem [shape: f32[3,32,4], index: 14, kind: input, shape index: {}]   ;;  %s14759_s15 = inlined_call_operand.vmem [shape: f32[3,32,256], index: 15, kind: input, shape index: {}]   ;;  %s14760_s16 = inlined_call_operand.vmem [shape: f32[3,256,32], index: 16, kind: input, shape index: {}]   ;;  %s14761_s17 = inlined_call_operand.vmem [shape: f32[16,128], index: 17, kind: output, shape index: {0}]   ;;  %s14762_s18 = inlined_call_operand.hbm [shape: f32[1,1], index: 18, kind: output, shape index: {1}]  }
   0x1   :  { %14875 = sst [smem:[#allocation73_spill]] %s14744_s0 }
   0x2   :  { %14876 = sst [smem:[#allocation74_spill]] %s14745_s1 }
   0x3   :  { %14877 = sst [smem:[#allocation75_spill]] %s14746_s2 }
   0x4   :  { %14878 = sst [smem:[#allocation76_spill]] %s14748_s4 }
   0x5   :  { %s14879_s29 = sld [smem:[#allocation73_spill]]  ;;  %s14880_s4 = sld [smem:[#allocation74_spill]]  ;;  %v11923_v2 = vmov 0  }
   0x6   :  { %11646 = vset.pattern.permute.xlu0 %v11923_v2 }
   0xb   :  { %v59_v0 = vld [vmem:[%s14879_s29] sm:$0xff]  ;;  %v76_v3 = vld [vmem:[%s14880_s4 + $0x8] sm:$0xff]  ;;  %v77_v4 = vld [vmem:[%s14880_s4 + $0x10] sm:$0xff] }
   0xc   :  { %v75_v1 = vld [vmem:[%s14880_s4] sm:$0xff]  ;;  %v78_v5 = vld [vmem:[%s14880_s4 + $0x18] sm:$0xff]  ;;  %64 = vperm.xlu0 %11646, %v59_v0   ;;  %v60_v6 = vld [vmem:[%s14879_s29 + $0x8] sm:$0xff] }
   0xd   :  { %v10834_v7 = vpack.c.bf16 %v76_v3, %v75_v1  ;;  %v10838_v8 = vpack.c.bf16 %v78_v5, %v77_v4  ;;  %v79_v9 = vld [vmem:[%s14880_s4 + $0x20] sm:$0xff]  ;;  %v80_v10 = vld [vmem:[%s14880_s4 + $0x28] sm:$0xff] }
   0xe   :  { %24 = vsyncpa [#allocation3], 0  ;;  %v10842_v11 = vpack.c.bf16 %v80_v10, %v79_v9  ;;  %v81_v12 = vld [vmem:[%s14880_s4 + $0x30] sm:$0xff]  ;;  %v82_v13 = vld [vmem:[%s14880_s4 + $0x38] sm:$0xff]  ;;  %v61_v18 = vlaneseq  ;;  %vm85_vm0 = vcmask 523264   ;;  %v14767_v23 = vmov 0.0  }
   0xf   :  { %10835 = vmatprep.subr.bf16.mxu1 %v10834_v7  ;;  %v10846_v14 = vpack.c.bf16 %v82_v13, %v81_v12  ;;  %v256_v15 = vld [vmem:[%s14755_s11 + $0x8] sm:$0xff]  ;;  %v255_v21 = vld [vmem:[%s14755_s11] sm:$0xff]  ;;  %v258_v34 = vld [vmem:[%s14755_s11 + $0x18] sm:$0xff]  ;;  %s14881_s27 = sld [smem:[#allocation75_spill]]  ;;  %vm287_vm3 = vcmask 261120  }
  0x10   :  { %10837 = vmatpush3.bf16.msra.mxu1 %v10834_v7  ;;  %67 = vperm.xlu0 %11646, %v60_v6   ;;  %v260_v16 = vld [vmem:[%s14755_s11 + $0x28] sm:$0xff]  ;;  %v12059_v19 = vand.u32 127, %v61_v18  ;;  %v259_v22 = vld [vmem:[%s14755_s11 + $0x20] sm:$0xff]  ;;  %v262_v35 = vld [vmem:[%s14755_s11 + $0x38] sm:$0xff]  ;;  %v11925_v59 = vmov -1e+30  }
  0x11   :  { %10839 = vmatprep.subr.bf16.mxu1 %v10838_v8  ;;  %v10850_v17 = vpack.c.bf16 %v260_v16, %v256_v15  ;;  %v10852_v26 = vpack.c.bf16 %v259_v22, %v255_v21  ;;  %v264_v28 = vld [vmem:[%s14755_s11 + $0x48] sm:$0xff]  ;;  %v263_v31 = vld [vmem:[%s14755_s11 + $0x40] sm:$0xff]  ;;  %v10858_v36 = vpack.c.bf16 %v262_v35, %v258_v34  ;;  %v257_v37 = vld [vmem:[%s14755_s11 + $0x10] sm:$0xff] }
  0x12   :  { %v268_v29 = vld [vmem:[%s14755_s11 + $0x68] sm:$0xff]  ;;  %v267_v32 = vld [vmem:[%s14755_s11 + $0x60] sm:$0xff]  ;;  %v261_v38 = vld [vmem:[%s14755_s11 + $0x30] sm:$0xff]  ;;  %vm219_vm4 = vcmp.ge.s32.totalorder %v12059_v19, 8  ;;  %vm220_vm5 = vcmp.lt.s32.totalorder %v12059_v19, 16  ;;  %vm208_vm7 = vcmp.lt.s32.totalorder %v12059_v19, 8 }
  0x13   :  { %v10854_v30 = vpack.c.bf16 %v268_v29, %v264_v28  ;;  %v10856_v33 = vpack.c.bf16 %v267_v32, %v263_v31  ;;  %v266_v40 = vld [vmem:[%s14755_s11 + $0x58] sm:$0xff]  ;;  %v10860_v44 = vpack.c.bf16 %v261_v38, %v257_v37  ;;  %v265_v47 = vld [vmem:[%s14755_s11 + $0x50] sm:$0xff]  ;;  %vm12135_vm6 = vmand %vm219_vm4, %vm220_vm5  ;;  %v12141_v53 = vsel %vm208_vm7, 1.0, %v14767_v23 }
  0x14   :  { %10841 = vmatpush3.bf16.msra.mxu1 %v10838_v8  ;;  %v270_v41 = vld [vmem:[%s14755_s11 + $0x78] sm:$0xff]  ;;  %v269_v48 = vld [vmem:[%s14755_s11 + $0x70] sm:$0xff]  ;;  %14884 = vst [vmem:[#allocation5_spill] sm:$0xff] %v12141_v53  ;;  %vm205_vm8 = vcmp.lt.s32.totalorder %v12059_v19, 4  ;;  %vm216_vm9 = vcmp.ge.s32.totalorder %v12059_v19, 4  ;;  %vm229_vm11 = vcmp.lt.s32.totalorder %v12059_v19, 12 }
  0x15   :  { %10843 = vmatprep.subr.bf16.mxu1 %v10842_v11  ;;  %v83_v39 = vld [vmem:[%s14881_s27] sm:$0xff]  ;;  %v10862_v46 = vpack.c.bf16 %v270_v41, %v266_v40  ;;  %v84_v49 = vld [vmem:[%s14881_s27 + $0x8] sm:$0xff]  ;;  %v10864_v50 = vpack.c.bf16 %v269_v48, %v265_v47  ;;  %v12155_v60 = vsel %vm205_vm8, 0.0, %v11925_v59  ;;  %vm217_vm10 = vmand %vm216_vm9, %vm208_vm7  ;;  %vm242_vm13 = vcmp.ge.s32.totalorder %v12059_v19, 12  ;;  %s15042_s27 = sld [smem:[#allocation76_spill]] }
  0x16   :  { %14885 = vst [vmem:[#allocation6_spill] sm:$0xff] %v12155_v60  ;;  %v12159_v0 = vsel %vm217_vm10, 0.0, %v11925_v59  ;;  %vm230_vm12 = vmand %vm219_vm4, %vm229_vm11 }
  0x17   :  { %14886 = vst [vmem:[#allocation7_spill] sm:$0xff] %v12159_v0  ;;  %v12169_v6 = vsel %vm230_vm12, 0.0, %v11925_v59  ;;  %vm243_vm14 = vmand %vm242_vm13, %vm220_vm5 }
  0x18   :  { %10845 = vmatpush3.bf16.msra.mxu1 %v10842_v11  ;;  %14887 = vst [vmem:[#allocation8_spill] sm:$0xff] %v12169_v6  ;;  %v12175_v8 = vsel %vm243_vm14, 0.0, %v11925_v59 }
  0x19   :  { %10847 = vmatprep.subr.bf16.mxu1 %v10846_v14  ;;  %14888 = vst [vmem:[#allocation9_spill] sm:$0xff] %v12175_v8 }
  0x1c   :  { %10849 = vmatpush3.bf16.msra.mxu1 %v10846_v14 }
  0x1d   :  { %10851 = vmatprep.subr.bf16.mxu1 %v10850_v17 }
  0x8b   :  { %v65_v20 = vpop.permute.xlu0 %64 }
  0x8c   :  { %vm69_vm1 = vcmp.eq.s32.totalorder %v12059_v19, %v65_v20 }
  0x8d   :  { %v9212_v24 = vsel %vm69_vm1, 1.0, %v14767_v23 }
  0x8e   :  { %10104 = vmatprep.mubr.msk.f32.mxu1 %vm85_vm0, %v9212_v24 }
  0x8f   :  { %v68_v25 = vpop.permute.xlu0 %67 }
  0x90   :  { %vm70_vm2 = vcmp.eq.s32.totalorder %v12059_v19, %v68_v25 }
  0x91   :  { %v9213_v27 = vsel %vm70_vm2, 1.0, %v14767_v23 }
  0x92   :  { %10105 = vmatmul.mubr.msk.f32.vlgmr.msra.gmra.mrb[0].mxu1 %vm85_vm0, %v9213_v27 }
  0x93   :  { %10853 = vmatpush1.bf16.msra.mxu1 %v10852_v26  ;;  %358 = vmatprep.mubr.f32.mxu1 %v14767_v23 }
  0x94   :  { %10855 = vmatprep.subr.bf16.mxu1 %v10854_v30 }
  0x97   :  { %10857 = vmatpush1.bf16.msra.mxu1 %v10856_v33 }
  0x98   :  { %10859 = vmatprep.subr.bf16.mxu1 %v10858_v36 }
 0x165   :  { %v10106_v42 = vpop.f32.mrb[0].mxu1 }
 0x166   :  { %v158_v43 = vpop.f32.mrb[1].mxu1  ;;  %v12119_v51 = vadd.f32 %v10106_v42, %v84_v49 }
 0x167   :  { %v12105_v45 = vadd.f32 %v158_v43, %v83_v39 }
 0x169   :  { %9224 = vmatmul.mubr.msk.f32.vlgmr.msra.gmra.mrb[2].mxu1 %vm287_vm3, %v12105_v45 }
 0x16a   :  { %10861 = vmatpush1.bf16.msra.mxu1 %v10860_v44  ;;  %364 = vmatprep.mubr.f32.mxu1 %v14767_v23 }
 0x16b   :  { %10863 = vmatprep.subr.bf16.mxu1 %v10862_v46 }
 0x16d   :  { %9225 = vmatmul.mubr.msk.f32.gmra.mrb[4].mxu1 %vm287_vm3, %v12119_v51 }
 0x16e   :  { %10865 = vmatpush1.bf16.msra.mxu1 %v10864_v50  ;;  %435 = vmatprep.mubr.f32.mxu1 %v14767_v23 }
 0x171   :  { %9226 = vmatmul.mubr.msk.f32.vlgmr.msra.gmra.mrb[6].mxu1 %vm287_vm3, %v12105_v45 }
 0x172   :  { %441 = vmatprep.mubr.f32.mxu1 %v14767_v23 }
 0x175   :  { %9227 = vmatmul.mubr.msk.f32.gmra.mrb[8].mxu1 %vm287_vm3, %v12119_v51 }
 0x23c   :  { %v12143_v54 = vpop.f32.mrb[2].mxu1 }
 0x23d   :  { %v12145_v55 = vpop.f32.mrb[3].mxu1 }
 0x23e   :  { %v726_v56 = vmul.f32 %v12141_v53, %v12145_v55 }
 0x240   :  { %v12149_v57 = vpop.f32.mrb[4].mxu1  ;;  %10146 = vmatprep.mubr.f32.mxu1 %v726_v56 }
 0x241   :  { %v12152_v58 = vpop.f32.mrb[5].mxu1 }
 0x242   :  { %v727_v9 = vmul.f32 %v12141_v53, %v12152_v58 }
 0x244   :  { %v437_v61 = vpop.f32.mrb[6].mxu1 }
 0x245   :  { %v439_v62 = vpop.f32.mrb[7].mxu1 }
 0x246   :  { %v448_v63 = vadd.f32 %v439_v62, %v12155_v60  ;;  %v492_v4 = vadd.f32 %v439_v62, %v12159_v0  ;;  %v536_v7 = vadd.f32 %v439_v62, %v12169_v6  ;;  %v580_v10 = vadd.f32 %v439_v62, %v12175_v8 }
 0x248   :  { %450 = vmax.xlane.f32.xlu1 %v448_v63  ;;  %v443_v1 = vpop.f32.mrb[8].mxu1 }
 0x249   :  { %v12163_v2 = vpack.c.bf16 %v443_v1, %v437_v61  ;;  %v445_v3 = vpop.f32.mrb[9].mxu1 }
 0x24a   :  { %v449_v5 = vadd.f32 %v445_v3, %v12155_v60  ;;  %v493_v11 = vadd.f32 %v445_v3, %v12159_v0  ;;  %v537_v12 = vadd.f32 %v445_v3, %v12169_v6  ;;  %v581_v13 = vadd.f32 %v445_v3, %v12175_v8 }
 0x24b   :  { %10899 = vmatprep.subr.bf16.mxu1 %v12163_v2 }
 0x24c   :  { %494 = vmax.xlane.f32.xlu1 %v492_v4  ;;  %10901 = vmatpush3.bf16.xpose.msra.mxu1 %v12163_v2 }
 0x24d   :  { %452 = vmax.xlane.f32.xlu0 %v449_v5 }
 0x250   :  { %538 = vmax.xlane.f32.xlu1 %v536_v7 }
 0x253   :  { %10147 = vmatmul.mubr.f32.vlgmr.msra.gmra.mrb[10].mxu1 %v727_v9 }
 0x254   :  { %582 = vmax.xlane.f32.xlu1 %v580_v10 }
 0x258   :  { %496 = vmax.xlane.f32.xlu1 %v493_v11 }
 0x25c   :  { %540 = vmax.xlane.f32.xlu1 %v537_v12 }
 0x260   :  { %584 = vmax.xlane.f32.xlu1 %v581_v13 }
 0x2d5   :  { %v451_v14 = vpop.xlane.xlu1 %450 }
 0x2d6   :  { %vm454_vm15 = vcmp.eq.f32.partialorder %v448_v63, %v451_v14 }
 0x2d7   :  { %v456_v15 = vsel %vm454_vm15, %v12059_v19, 128  ;;  %vm803_vm15 = vcmask 130048  }
 0x2d8   :  { %v459_v16 = vshra.s32 %v456_v15, 16  ;;  %v458_v59 = vand.u32 65535, %v456_v15 }
 0x2d9   :  { %v495_v17 = vpop.xlane.xlu1 %494 }
 0x2da   :  { %vm498_vm0 = vcmp.eq.f32.partialorder %v492_v4, %v495_v17  ;;  %v453_v20 = vpop.xlane.xlu0 %452  ;;  %v461_v21 = vcvt.s32.f32 %v459_v16  ;;  %v460_v62 = vcvt.s32.f32 %v458_v59  ;;  %v177_v59 = vld [vmem:[%s14752_s8 + $0x30] sm:$0xff] }
 0x2db   :  { %v500_v22 = vsel %vm498_vm0, %v12059_v19, 128  ;;  %vm455_vm1 = vcmp.eq.f32.partialorder %v449_v5, %v453_v20  ;;  %v12214_v20 = vld [vmem:[%s14750_s6] sm:$0xff] }
 0x2dc   :  { %462 = vmin.xlane.f32.xlu1 %v461_v21  ;;  %v503_v24 = vshra.s32 %v500_v22, 16  ;;  %v457_v27 = vsel %vm455_vm1, %v12059_v19, 128  ;;  %v502_v63 = vand.u32 65535, %v500_v22  ;;  %v172_v22 = vld [vmem:[%s14752_s8 + $0x8] sm:$0xff] }
 0x2dd   :  { %v539_v25 = vpop.xlane.xlu1 %538  ;;  %v473_v32 = vshra.s32 %v457_v27, 16 }
 0x2de   :  { %vm542_vm2 = vcmp.eq.f32.partialorder %v536_v7, %v539_v25  ;;  %v505_v26 = vcvt.s32.f32 %v503_v24  ;;  %v504_v4 = vcvt.s32.f32 %v502_v63 }
 0x2df   :  { %v544_v28 = vsel %vm542_vm2, %v12059_v19, 128  ;;  %v475_v35 = vcvt.s32.f32 %v473_v32 }
 0x2e0   :  { %506 = vmin.xlane.f32.xlu1 %v505_v26  ;;  %v547_v29 = vshra.s32 %v544_v28, 16  ;;  %v546_v5 = vand.u32 65535, %v544_v28 }
 0x2e1   :  { %v583_v30 = vpop.xlane.xlu1 %582 }
 0x2e2   :  { %vm586_vm4 = vcmp.eq.f32.partialorder %v580_v10, %v583_v30  ;;  %v549_v31 = vcvt.s32.f32 %v547_v29  ;;  %v548_v10 = vcvt.s32.f32 %v546_v5  ;;  %v181_v5 = vld [vmem:[%s14752_s8 + $0x50] sm:$0xff] }
 0x2e3   :  { %v588_v33 = vsel %vm586_vm4, %v12059_v19, 128 }
 0x2e4   :  { %550 = vmin.xlane.f32.xlu1 %v549_v31  ;;  %v591_v36 = vshra.s32 %v588_v33, 16  ;;  %v590_v15 = vand.u32 65535, %v588_v33  ;;  %v173_v33 = vld [vmem:[%s14752_s8 + $0x10] sm:$0xff] }
 0x2e5   :  { %v497_v34 = vpop.xlane.xlu1 %496 }
 0x2e6   :  { %vm499_vm5 = vcmp.eq.f32.partialorder %v493_v11, %v497_v34  ;;  %v593_v41 = vcvt.s32.f32 %v591_v36  ;;  %v472_v11 = vand.u32 65535, %v457_v27  ;;  %v592_v27 = vcvt.s32.f32 %v590_v15  ;;  %v174_v34 = vld [vmem:[%s14752_s8 + $0x18] sm:$0xff]  ;;  %v185_v15 = vld [vmem:[%s14752_s8 + $0x70] sm:$0xff] }
 0x2e7   :  { %v501_v37 = vsel %vm499_vm5, %v12059_v19, 128 }
 0x2e8   :  { %476 = vmin.xlane.f32.xlu1 %v475_v35  ;;  %v517_v38 = vshra.s32 %v501_v37, 16  ;;  %v474_v14 = vcvt.s32.f32 %v472_v11  ;;  %v516_v16 = vand.u32 65535, %v501_v37  ;;  %v183_v11 = vld [vmem:[%s14752_s8 + $0x60] sm:$0xff] }
 0x2e9   :  { %v541_v39 = vpop.xlane.xlu1 %540 }
 0x2ea   :  { %vm543_vm7 = vcmp.eq.f32.partialorder %v537_v12, %v541_v39  ;;  %v519_v40 = vcvt.s32.f32 %v517_v38  ;;  %v518_v28 = vcvt.s32.f32 %v516_v16  ;;  %v12244_v38 = vpack.c.bf16 %v174_v34, %v173_v33  ;;  %v186_v16 = vld [vmem:[%s14752_s8 + $0x78] sm:$0xff] }
 0x2eb   :  { %v545_v42 = vsel %vm543_vm7, %v12059_v19, 128 }
 0x2ec   :  { %520 = vmin.xlane.f32.xlu0 %v519_v40  ;;  %594 = vmin.xlane.f32.xlu1 %v593_v41  ;;  %v561_v43 = vshra.s32 %v545_v42, 16  ;;  %v560_v24 = vand.u32 65535, %v545_v42  ;;  %14890 = vst [vmem:[#allocation11_spill] sm:$0xff] %v12244_v38  ;;  %v175_v42 = vld [vmem:[%s14752_s8 + $0x20] sm:$0xff] }
 0x2ed   :  { %v585_v44 = vpop.xlane.xlu1 %584 }
 0x2ee   :  { %vm587_vm8 = vcmp.eq.f32.partialorder %v581_v13, %v585_v44  ;;  %v563_v46 = vcvt.s32.f32 %v561_v43  ;;  %v562_v36 = vcvt.s32.f32 %v560_v24  ;;  %v176_v43 = vld [vmem:[%s14752_s8 + $0x28] sm:$0xff] }
 0x2ef   :  { %v12191_v47 = vsel %vm587_vm8, %v12059_v19, 128 }
 0x2f0   :  { %564 = vmin.xlane.f32.xlu0 %v563_v46  ;;  %v605_v48 = vshra.s32 %v12191_v47, 16  ;;  %v604_v37 = vand.u32 65535, %v12191_v47  ;;  %v12264_v47 = vpack.c.bf16 %v176_v43, %v175_v42 }
 0x2f2   :  { %v12194_v49 = vcvt.s32.f32 %v605_v48  ;;  %14891 = vst [vmem:[#allocation12_spill] sm:$0xff] %v12264_v47 }
 0x2f4   :  { %608 = vmin.xlane.f32.xlu0 %v12194_v49 }
 0x326   :  { %v12197_v50 = vpop.f32.mrb[10].mxu1 }
 0x327   :  { %v794_v56 = vpop.f32.mrb[11].mxu1 }
 0x328   :  { %v12231_v30 = vadd.f32 %v794_v56, %v12214_v20 }
 0x32a   :  { %v804_v39 = vsel %vm803_vm15, %v12231_v30, -inf }
 0x369   :  { %v12199_v61 = vpop.xlane.xlu1 %462 }
 0x36a   :  { %vm464_vm9 = vcmp.eq.f32.partialorder %v461_v21, %v12199_v61  ;;  %v171_v21 = vld [vmem:[%s14752_s8] sm:$0xff]  ;;  %v469_v24 = vcvt.f32.s32 %v12199_v61 }
 0x36b   :  { %v465_v1 = vsel %vm464_vm9, %v460_v62, inf  ;;  %v12226_v29 = vpack.c.bf16 %v172_v22, %v171_v21  ;;  %v178_v62 = vld [vmem:[%s14752_s8 + $0x38] sm:$0xff] }
 0x36c   :  { %466 = vmin.xlane.f32.xlu1 %v465_v1  ;;  %v12280_v63 = vpack.c.bf16 %v178_v62, %v177_v59  ;;  %v180_v1 = vld [vmem:[%s14752_s8 + $0x48] sm:$0xff]  ;;  %v470_v34 = vshll.u32 %v469_v24, 16 }
 0x36d   :  { %v12202_v3 = vpop.xlane.xlu1 %506  ;;  %14889 = vst [vmem:[#allocation10_spill] sm:$0xff] %v12226_v29  ;;  %10867 = vmatprep.subr.bf16.mxu0 %v12226_v29 }
 0x36e   :  { %vm508_vm10 = vcmp.eq.f32.partialorder %v505_v26, %v12202_v3  ;;  %10869 = vmatpush3.bf16.msra.mxu0 %v12226_v29  ;;  %14892 = vst [vmem:[#allocation13_spill] sm:$0xff] %v12280_v63  ;;  %v513_v21 = vcvt.f32.s32 %v12202_v3 }
 0x36f   :  { %v509_v7 = vsel %vm508_vm10, %v504_v4, inf  ;;  %10871 = vmatprep.subr.bf16.mxu0 %v12244_v38 }
 0x370   :  { %510 = vmin.xlane.f32.xlu0 %v509_v7  ;;  %v182_v7 = vld [vmem:[%s14752_s8 + $0x58] sm:$0xff] }
 0x371   :  { %v12205_v9 = vpop.xlane.xlu1 %550 }
 0x372   :  { %vm552_vm11 = vcmp.eq.f32.partialorder %v549_v31, %v12205_v9  ;;  %10873 = vmatpush3.bf16.msra.mxu0 %v12244_v38 }
 0x373   :  { %v553_v12 = vsel %vm552_vm11, %v548_v10, inf  ;;  %10875 = vmatprep.subr.bf16.mxu0 %v12264_v47  ;;  %v12302_v10 = vpack.c.bf16 %v182_v7, %v181_v5 }
 0x374   :  { %554 = vmin.xlane.f32.xlu1 %v553_v12  ;;  %v184_v12 = vld [vmem:[%s14752_s8 + $0x68] sm:$0xff] }
 0x375   :  { %v12208_v13 = vpop.xlane.xlu1 %476  ;;  %14894 = vst [vmem:[#allocation15_spill] sm:$0xff] %v12302_v10 }
 0x376   :  { %vm478_vm12 = vcmp.eq.f32.partialorder %v475_v35, %v12208_v13  ;;  %10877 = vmatpush3.bf16.msra.mxu0 %v12264_v47 }
 0x377   :  { %v479_v17 = vsel %vm478_vm12, %v474_v14, inf  ;;  %10879 = vmatprep.subr.bf16.mxu0 %v12280_v63  ;;  %v12312_v14 = vpack.c.bf16 %v184_v12, %v183_v11  ;;  %vm233_vm12 = vcmp.lt.s32.totalorder %v12059_v19, 24 }
 0x378   :  { %480 = vmin.xlane.f32.xlu1 %v479_v17  ;;  %v12322_v17 = vpack.c.bf16 %v186_v16, %v185_v15 }
 0x379   :  { %v12222_v25 = vpop.xlane.xlu1 %594  ;;  %v12224_v26 = vpop.xlane.xlu0 %520  ;;  %14895 = vst [vmem:[#allocation16_spill] sm:$0xff] %v12312_v14 }
 0x37a   :  { %vm596_vm13 = vcmp.eq.f32.partialorder %v593_v41, %v12222_v25  ;;  %vm522_vm14 = vcmp.eq.f32.partialorder %v519_v40, %v12224_v26  ;;  %v12253_v41 = vld [vmem:[%s14750_s6 + $0x8] sm:$0xff]  ;;  %10881 = vmatpush3.bf16.msra.mxu0 %v12280_v63  ;;  %14896 = vst [vmem:[#allocation17_spill] sm:$0xff] %v12322_v17  ;;  %v601_v3 = vcvt.f32.s32 %v12222_v25 }
 0x37b   :  { %v597_v31 = vsel %vm596_vm13, %v592_v27, inf  ;;  %v523_v32 = vsel %vm522_vm14, %v518_v28, inf  ;;  %v12270_v48 = vadd.f32 %v12197_v50, %v12253_v41  ;;  %v179_v50 = vld [vmem:[%s14752_s8 + $0x40] sm:$0xff]  ;;  %v557_v28 = vcvt.f32.s32 %v12205_v9 }
 0x37c   :  { %598 = vmin.xlane.f32.xlu1 %v597_v31  ;;  %524 = vmin.xlane.f32.xlu0 %v523_v32  ;;  %v12292_v4 = vpack.c.bf16 %v180_v1, %v179_v50  ;;  %v514_v32 = vshll.u32 %v513_v21, 16  ;;  %vm212_vm14 = vcmp.lt.s32.totalorder %v12059_v19, 32 }
 0x37d   :  { %v12240_v35 = vpop.xlane.xlu0 %564 }
 0x37e   :  { %vm566_vm0 = vcmp.eq.f32.partialorder %v563_v46, %v12240_v35  ;;  %v606_v46 = vcvt.s32.f32 %v604_v37  ;;  %14893 = vst [vmem:[#allocation14_spill] sm:$0xff] %v12292_v4  ;;  %10883 = vmatprep.subr.bf16.mxu0 %v12292_v4  ;;  %v571_v1 = vcvt.f32.s32 %v12240_v35 }
 0x37f   :  { %v567_v40 = vsel %vm566_vm0, %v562_v36, inf  ;;  %10885 = vmatpush3.bf16.msra.mxu0 %v12292_v4  ;;  %vm245_vm0 = vcmp.ge.s32.totalorder %v12059_v19, 24 }
 0x380   :  { %805 = vmax.xlane.f32.xlu1 %v804_v39  ;;  %568 = vmin.xlane.f32.xlu0 %v567_v40  ;;  %v558_v39 = vshll.u32 %v557_v28, 16 }
 0x381   :  { %v12261_v44 = vpop.xlane.xlu0 %608  ;;  %10887 = vmatprep.subr.bf16.mxu0 %v12302_v10 }
 0x382   :  { %vm610_vm1 = vcmp.eq.f32.partialorder %v12194_v49, %v12261_v44  ;;  %v807_v49 = vsel %vm803_vm15, %v12270_v48, -inf  ;;  %v615_v24 = vcvt.f32.s32 %v12261_v44 }
 0x383   :  { %v611_v56 = vsel %vm610_vm1, %v606_v46, inf  ;;  %10889 = vmatpush3.bf16.msra.mxu0 %v12302_v10  ;;  %v483_v46 = vcvt.f32.s32 %v12208_v13  ;;  %vm246_vm1 = vmand %vm245_vm0, %vm212_vm14 }
 0x384   :  { %612 = vmin.xlane.f32.xlu0 %v611_v56  ;;  %10891 = vmatprep.subr.bf16.mxu0 %v12312_v14  ;;  %v527_v56 = vcvt.f32.s32 %v12224_v26 }
 0x385   :  { %v484_v62 = vshll.u32 %v483_v46, 16 }
 0x386   :  { %v528_v50 = vshll.u32 %v527_v56, 16 }
 0x387   :  { %10893 = vmatpush3.bf16.msra.mxu0 %v12312_v14 }
 0x388   :  { %808 = vmax.xlane.f32.xlu0 %v807_v49  ;;  %10895 = vmatprep.subr.bf16.mxu0 %v12322_v17  ;;  %v602_v49 = vshll.u32 %v601_v3, 16 }
 0x38b   :  { %10897 = vmatpush3.bf16.msra.mxu0 %v12322_v17 }
 0x3f9   :  { %v467_v22 = vpop.xlane.xlu1 %466 }
 0x3fa   :  { %v468_v33 = vcvt.f32.s32 %v467_v22  ;;  %v572_v22 = vshll.u32 %v571_v1, 16 }
 0x3fc   :  { %v471_v42 = vadd.s32 %v470_v34, %v468_v33 }
 0x3fd   :  { %v511_v27 = vpop.xlane.xlu0 %510 }
 0x3fe   :  { %v512_v31 = vcvt.f32.s32 %v511_v27  ;;  %vm486_vm4 = vcmp.eq.s32.totalorder %v12059_v19, %v471_v42 }
 0x3ff   :  { %v9228_v25 = vsel %vm486_vm4, 1.0, %v14767_v23  ;;  %vm225_vm4 = vcmp.lt.s32.totalorder %v12059_v19, 64 }
 0x400   :  { %v515_v36 = vadd.s32 %v514_v32, %v512_v31 }
 0x401   :  { %v555_v37 = vpop.xlane.xlu1 %554 }
 0x402   :  { %v556_v40 = vcvt.f32.s32 %v555_v37  ;;  %vm530_vm2 = vcmp.eq.s32.totalorder %v12059_v19, %v515_v36 }
 0x403   :  { %v9230_v59 = vsel %vm530_vm2, 1.0, %v14767_v23  ;;  %vm224_vm2 = vcmp.ge.s32.totalorder %v12059_v19, 32 }
 0x404   :  { %v559_v43 = vadd.s32 %v558_v39, %v556_v40  ;;  %v624_v12 = vadd.f32 %v9230_v59, %v9228_v25  ;;  %v616_v40 = vshll.u32 %v615_v24, 16 }
 0x405   :  { %v481_v61 = vpop.xlane.xlu1 %480 }
 0x406   :  { %vm574_vm5 = vcmp.eq.s32.totalorder %v12059_v19, %v559_v43  ;;  %v482_v9 = vcvt.f32.s32 %v481_v61 }
 0x407   :  { %v9232_v11 = vsel %vm574_vm5, 1.0, %v14767_v23  ;;  %vm226_vm5 = vmand %vm224_vm2, %vm225_vm4 }
 0x408   :  { %v485_v15 = vadd.s32 %v484_v62, %v482_v9  ;;  %v626_v31 = vadd.f32 %v9232_v11, %v624_v12 }
 0x409   :  { %v599_v13 = vpop.xlane.xlu1 %598  ;;  %v525_v5 = vpop.xlane.xlu0 %524 }
 0x40a   :  { %v600_v26 = vcvt.f32.s32 %v599_v13  ;;  %v526_v7 = vcvt.f32.s32 %v525_v5  ;;  %vm487_vm9 = vcmp.eq.s32.totalorder %v12059_v19, %v485_v15 }
 0x40c   :  { %v603_v16 = vadd.s32 %v602_v49, %v600_v26  ;;  %v529_v21 = vadd.s32 %v528_v50, %v526_v7 }
 0x40d   :  { %v806_v27 = vpop.xlane.xlu1 %805  ;;  %v569_v28 = vpop.xlane.xlu0 %568 }
 0x40e   :  { %vm531_vm7 = vcmp.eq.s32.totalorder %v12059_v19, %v529_v21  ;;  %v810_v35 = vsub.f32 %v12231_v30, %v806_v27  ;;  %v570_v32 = vcvt.f32.s32 %v569_v28  ;;  %vm618_vm8 = vcmp.eq.s32.totalorder %v12059_v19, %v603_v16 }
 0x40f   :  { %v9234_v33 = vsel %vm618_vm8, 1.0, %v14767_v23  ;;  %v9231_v39 = vsel %vm531_vm7, 1.0, %v14767_v23  ;;  %v9229_v30 = vsel %vm487_vm9, 1.0, %v14767_v23  ;;  %v12375_v28 = vsel %vm12135_vm6, 1.0, %v14767_v23 }
 0x410   :  { %v812_v34 = vmul.f32 1.442695, %v810_v35  ;;  %v573_v36 = vadd.s32 %v572_v22, %v570_v32  ;;  %v628_v37 = vadd.f32 %v9234_v33, %v626_v31  ;;  %v625_v46 = vadd.f32 %v9231_v39, %v9229_v30 }
 0x411   :  { %v613_v44 = vpop.xlane.xlu0 %612  ;;  %v941_v31 = vmul.f32 %v12375_v28, %v12145_v55  ;;  %v942_v35 = vmul.f32 %v12375_v28, %v12152_v58  ;;  %vm232_vm6 = vcmp.ge.s32.totalorder %v12059_v19, 16  ;;  %vm237_vm7 = vcmp.ge.s32.totalorder %v12059_v19, 64 }
 0x412   :  { %11648 = vpow2.f32 %v812_v34  ;;  %vm575_vm10 = vcmp.eq.s32.totalorder %v12059_v19, %v573_v36  ;;  %v614_v42 = vcvt.f32.s32 %v613_v44  ;;  %10139 = vmatprep.mubr.f32.mxu0 %v628_v37  ;;  %vm234_vm13 = vmand %vm232_vm6, %vm233_vm12  ;;  %vm238_vm8 = vcmp.lt.s32.totalorder %v12059_v19, 96 }
 0x413   :  { %v9233_v43 = vsel %vm575_vm10, 1.0, %v14767_v23  ;;  %vm239_vm9 = vmand %vm237_vm7, %vm238_vm8  ;;  %vm249_vm10 = vcmp.ge.s32.totalorder %v12059_v19, 96 }
 0x414   :  { %v617_v3 = vadd.s32 %v616_v40, %v614_v42  ;;  %v627_v61 = vadd.f32 %v9233_v43, %v625_v46 }
 0x415   :  { %v809_v56 = vpop.xlane.xlu0 %808 }
 0x416   :  { %vm619_vm11 = vcmp.eq.s32.totalorder %v12059_v19, %v617_v3  ;;  %v811_v9 = vsub.f32 %v12270_v48, %v809_v56 }
 0x417   :  { %v9235_v59 = vsel %vm619_vm11, 1.0, %v14767_v23  ;;  %vm1907_vm11 = vcmask 31744  }
 0x418   :  { %v629_v62 = vadd.f32 %v9235_v59, %v627_v61  ;;  %v814_v49 = vmul.f32 1.442695, %v811_v9 }
 0x41a   :  { %v12352_v50 = vadd.f32 %v629_v62, %v628_v37  ;;  %11650 = vpow2.f32 %v814_v49  ;;  %10140 = vmatmul.mubr.f32.vlgmr.msra.gmra.mrb[0].mxu0 %v629_v62 }
 0x41c   :  { %14897 = vst [vmem:[#allocation18_spill] sm:$0xff] %v12352_v50  ;;  %v11649_v1 = vpop.eup %11648 }
 0x41d   :  { %v816_v13 = vsel %vm803_vm15, %v11649_v1, 0.0 }
 0x41e   :  { %817 = vadd.xlane.f32.xlu1 %v816_v13 }
 0x424   :  { %v11651_v5 = vpop.eup %11650 }
 0x425   :  { %v819_v25 = vsel %vm803_vm15, %v11651_v5, 0.0 }
 0x426   :  { %820 = vadd.xlane.f32.xlu0 %v819_v25 }
 0x4ab   :  { %v818_v26 = vpop.xlane.xlu1 %817 }
 0x4ac   :  { %11652 = vrcp.f32 %v818_v26 }
 0x4b3   :  { %v821_v7 = vpop.xlane.xlu0 %820 }
 0x4b4   :  { %11654 = vrcp.f32 %v821_v7  ;;  %v12400_v7 = vsel %vm234_vm13, 1.0, %v14767_v23 }
 0x4b6   :  { %v11653_v48 = vpop.eup %11652 }
 0x4b7   :  { %v824_v11 = vmul.f32 %v11653_v48, %v11649_v1 }
 0x4b9   :  { %826 = vxpose.xlu1.b32.start [1/2] (short) (narrow) %v824_v11, 16  ;;  %v1155_v11 = vmul.f32 %v12400_v7, %v12145_v55 }
 0x4be   :  { %v11655_v12 = vpop.eup %11654 }
 0x4bf   :  { %v825_v15 = vmul.f32 %v11655_v12, %v11651_v5  ;;  %v12413_v12 = vsel %vm246_vm1, 1.0, %v14767_v23 }
 0x4c1   :  { %827 = vxpose.xlu1.b32.end [2/2] (short) (narrow) %v825_v15, 16  ;;  %v1156_v15 = vmul.f32 %v12400_v7, %v12152_v58 }
 0x4ed   :  { %v12356_v16 = vpop.f32.mrb[0].mxu0 }
 0x4ee   :  { %v725_v21 = vmul.f32 %v12356_v16, %v12149_v57  ;;  %v12360_v22 = vpop.f32.mrb[1].mxu0 }
 0x4ef   :  { %v724_v24 = vmul.f32 %v12360_v22, %v12143_v54 }
 0x4f1   :  { %v12364_v27 = vpack.c.bf16 %v725_v21, %v724_v24  ;;  %v1369_v21 = vmul.f32 %v12413_v12, %v12145_v55  ;;  %v1370_v24 = vmul.f32 %v12413_v12, %v12152_v58  ;;  %v12430_v55 = vsel %vm226_vm5, 1.0, %v14767_v23 }
 0x4f3   :  { %10903 = vmatprep.subr.bf16.mxu1 %v12364_v27  ;;  %10919 = vmatprep.subr.bf16.mxu0 %v12364_v27 }
 0x4f4   :  { %10905 = vmatpush3.bf16.msra.mxu1 %v12364_v27  ;;  %10921 = vmatpush3.bf16.msra.mxu0 %v12364_v27 }
 0x4f5   :  { %10907 = vmatprep.subr.bf16.mxu1 %v12163_v2  ;;  %10927 = vmatprep.subr.bf16.mxu0 %v12364_v27 }
 0x53d   :  { %v842_v57 = vpop.trf.xlu1 }
 0x53e   :  { %10153 = vmatprep.mubr.msk.f32.mxu1 %vm803_vm15, %v842_v57  ;;  %v12427_v57 = vsel %vm212_vm14, 1.0, %v14767_v23 }
 0x541   :  { %v843_v54 = vpop.trf.xlu1 }
 0x542   :  { %10154 = vmatmul.mubr.msk.f32.vlgmr.msra.gmra.mrb[12].mxu1 %vm803_vm15, %v843_v54 }
 0x543   :  { %10909 = vmatpush3.bf16.xpose.msra.mxu1 %v12163_v2  ;;  %10160 = vmatprep.mubr.f32.mxu1 %v941_v31 }
 0x544   :  { %10911 = vmatprep.subr.bf16.mxu1 %v12364_v27 }
 0x54a   :  { %10161 = vmatmul.mubr.f32.vlgmr.msra.gmra.mrb[14].mxu1 %v942_v35 }
 0x54b   :  { %10913 = vmatpush3.bf16.msra.mxu1 %v12364_v27 }
 0x54c   :  { %10915 = vmatprep.subr.bf16.mxu1 %v12163_v2 }
 0x615   :  { %v12387_v52 = vpop.f32.mrb[12].mxu1 }
 0x616   :  { %v12389_v32 = vpop.f32.mrb[13].mxu1 }
 0x617   :  { %v939_v35 = vmul.f32 %v12427_v57, %v12389_v32 }
 0x61d   :  { %v10162_v33 = vpop.f32.mrb[14].mxu1 }
 0x61e   :  { %v1009_v34 = vpop.f32.mrb[15].mxu1  ;;  %v1015_v37 = vadd.f32 %v10162_v33, %v12253_v41 }
 0x61f   :  { %v1010_v36 = vadd.f32 %v1009_v34, %v12214_v20 }
 0x620   :  { %v1021_v44 = vsel %vm803_vm15, %v1015_v37, -inf }
 0x621   :  { %v1018_v39 = vsel %vm803_vm15, %v1010_v36, -inf }
 0x622   :  { %1019 = vmax.xlane.f32.xlu0 %v1018_v39 }
 0x626   :  { %1022 = vmax.xlane.f32.xlu0 %v1021_v44 }
 0x6af   :  { %v1020_v40 = vpop.xlane.xlu0 %1019 }
 0x6b0   :  { %v1024_v42 = vsub.f32 %v1010_v36, %v1020_v40 }
 0x6b2   :  { %v1026_v30 = vmul.f32 1.442695, %v1024_v42 }
 0x6b3   :  { %v1023_v43 = vpop.xlane.xlu0 %1022 }
 0x6b4   :  { %11656 = vpow2.f32 %v1026_v30  ;;  %v1025_v46 = vsub.f32 %v1015_v37, %v1023_v43 }
 0x6b6   :  { %v1028_v3 = vmul.f32 1.442695, %v1025_v46 }
 0x6b8   :  { %11658 = vpow2.f32 %v1028_v3 }
 0x6be   :  { %v11657_v56 = vpop.eup %11656 }
 0x6bf   :  { %v1030_v61 = vsel %vm803_vm15, %v11657_v56, 0.0 }
 0x6c0   :  { %1031 = vadd.xlane.f32.xlu0 %v1030_v61 }
 0x6c2   :  { %v11659_v9 = vpop.eup %11658 }
 0x6c3   :  { %v1033_v59 = vsel %vm803_vm15, %v11659_v9, 0.0 }
 0x6c4   :  { %1034 = vadd.xlane.f32.xlu0 %v1033_v59 }
 0x74d   :  { %v1032_v62 = vpop.xlane.xlu0 %1031 }
 0x74e   :  { %11660 = vrcp.f32 %v1032_v62 }
 0x751   :  { %v1035_v49 = vpop.xlane.xlu0 %1034 }
 0x752   :  { %11662 = vrcp.f32 %v1035_v49 }
 0x758   :  { %v11661_v1 = vpop.eup %11660 }
 0x759   :  { %v1038_v13 = vmul.f32 %v11661_v1, %v11657_v56 }
 0x75b   :  { %1040 = vxpose.xlu0.b32.start [1/2] (short) (narrow) %v1038_v13, 16 }
 0x75c   :  { %v11663_v5 = vpop.eup %11662 }
 0x75d   :  { %v1039_v25 = vmul.f32 %v11663_v5, %v11659_v9 }
 0x75f   :  { %1041 = vxpose.xlu0.b32.end [2/2] (short) (narrow) %v1039_v25, 16 }
 0x7db   :  { %v1056_v26 = vpop.trf.xlu0 }
 0x7dc   :  { %10167 = vmatprep.mubr.msk.f32.mxu1 %vm803_vm15, %v1056_v26 }
 0x7df   :  { %v1057_v48 = vpop.trf.xlu0 }
 0x7e0   :  { %10168 = vmatmul.mubr.msk.f32.vlgmr.msra.gmra.mrb[16].mxu1 %vm803_vm15, %v1057_v48 }
 0x7e1   :  { %10917 = vmatpush3.bf16.xpose.msra.mxu1 %v12163_v2  ;;  %10174 = vmatprep.mubr.f32.mxu1 %v1155_v11 }
 0x7e2   :  { %10923 = vmatprep.subr.bf16.mxu1 %v12163_v2 }
 0x7e8   :  { %10175 = vmatmul.mubr.f32.vlgmr.msra.gmra.mrb[18].mxu1 %v1156_v15 }
 0x7e9   :  { %10925 = vmatpush3.bf16.xpose.msra.mxu1 %v12163_v2  ;;  %10188 = vmatprep.mubr.f32.mxu1 %v1369_v21  ;;  %v940_v2 = vmul.f32 %v12387_v52, %v12427_v57 }
 0x7f0   :  { %10189 = vmatmul.mubr.f32.vlgmr.msra.gmra.mrb[20].mxu1 %v1370_v24 }
 0x8b3   :  { %v10169_v54 = vpop.f32.mrb[16].mxu1 }
 0x8b4   :  { %v1154_v58 = vmul.f32 %v10169_v54, %v12430_v55  ;;  %v1144_v31 = vpop.f32.mrb[17].mxu1 }
 0x8b5   :  { %v1153_v33 = vmul.f32 %v12430_v55, %v1144_v31 }
 0x8b6   :  { %v12438_v34 = vadd.f32 %v1154_v58, %v940_v2 }
 0x8b7   :  { %v12440_v36 = vadd.f32 %v1153_v33, %v939_v35 }
 0x8bb   :  { %v10176_v37 = vpop.f32.mrb[18].mxu1 }
 0x8bc   :  { %v1229_v39 = vadd.f32 %v10176_v37, %v12253_v41  ;;  %v1223_v44 = vpop.f32.mrb[19].mxu1 }
 0x8bd   :  { %v1224_v40 = vadd.f32 %v1223_v44, %v12214_v20 }
 0x8be   :  { %v1235_v52 = vsel %vm803_vm15, %v1229_v39, -inf }
 0x8bf   :  { %1236 = vmax.xlane.f32.xlu0 %v1235_v52  ;;  %v1232_v42 = vsel %vm803_vm15, %v1224_v40, -inf }
 0x8c0   :  { %1233 = vmax.xlane.f32.xlu1 %v1232_v42 }
 0x8c3   :  { %v10190_v30 = vpop.f32.mrb[20].mxu1 }
 0x8c4   :  { %v1437_v32 = vpop.f32.mrb[21].mxu1  ;;  %v1443_v46 = vadd.f32 %v10190_v30, %v12253_v41 }
 0x8c5   :  { %v1438_v43 = vadd.f32 %v1437_v32, %v12214_v20 }
 0x8c6   :  { %v1449_v56 = vsel %vm803_vm15, %v1443_v46, -inf }
 0x8c7   :  { %v1446_v3 = vsel %vm803_vm15, %v1438_v43, -inf }
 0x8c8   :  { %1447 = vmax.xlane.f32.xlu1 %v1446_v3  ;;  %v187_v3 = vld [vmem:[%s14753_s9] sm:$0xff] }
 0x8cc   :  { %1450 = vmax.xlane.f32.xlu1 %v1449_v56  ;;  %v188_v56 = vld [vmem:[%s14753_s9 + $0x8] sm:$0xff] }
 0x94c   :  { %v1237_v61 = vpop.xlane.xlu0 %1236 }
 0x94d   :  { %v1239_v9 = vsub.f32 %v1229_v39, %v1237_v61  ;;  %v1234_v59 = vpop.xlane.xlu1 %1233  ;;  %v12461_v61 = vpack.c.bf16 %v188_v56, %v187_v3  ;;  %v277_v3 = vld [vmem:[%s14756_s12 + $0x30] sm:$0xff]  ;;  %v278_v56 = vld [vmem:[%s14756_s12 + $0x38] sm:$0xff] }
 0x94e   :  { %v1238_v62 = vsub.f32 %v1224_v40, %v1234_v59 }
 0x94f   :  { %v1242_v49 = vmul.f32 1.442695, %v1239_v9 }
 0x950   :  { %v1240_v1 = vmul.f32 1.442695, %v1238_v62  ;;  %v189_v62 = vld [vmem:[%s14753_s9 + $0x10] sm:$0xff] }
 0x951   :  { %11664 = vpow2.f32 %v1242_v49  ;;  %v190_v49 = vld [vmem:[%s14753_s9 + $0x18] sm:$0xff] }
 0x952   :  { %11666 = vpow2.f32 %v1240_v1  ;;  %v12473_v1 = vpack.c.bf16 %v190_v49, %v189_v62  ;;  %v280_v62 = vld [vmem:[%s14756_s12 + $0x48] sm:$0xff] }
 0x955   :  { %v1448_v13 = vpop.xlane.xlu1 %1447 }
 0x956   :  { %v1452_v5 = vsub.f32 %v1438_v43, %v1448_v13 }
 0x958   :  { %v1454_v25 = vmul.f32 1.442695, %v1452_v5  ;;  %v191_v5 = vld [vmem:[%s14753_s9 + $0x20] sm:$0xff] }
 0x959   :  { %v1451_v20 = vpop.xlane.xlu1 %1450 }
 0x95a   :  { %11668 = vpow2.f32 %v1454_v25  ;;  %v1453_v41 = vsub.f32 %v1443_v46, %v1451_v20  ;;  %v192_v25 = vld [vmem:[%s14753_s9 + $0x28] sm:$0xff]  ;;  %v193_v20 = vld [vmem:[%s14753_s9 + $0x30] sm:$0xff] }
 0x95b   :  { %v11665_v26 = vpop.eup %11664 }
 0x95c   :  { %v1456_v48 = vmul.f32 1.442695, %v1453_v41  ;;  %v1247_v11 = vsel %vm803_vm15, %v11665_v26, 0.0  ;;  %v11667_v15 = vpop.eup %11666  ;;  %v194_v41 = vld [vmem:[%s14753_s9 + $0x38] sm:$0xff] }
 0x95d   :  { %1248 = vadd.xlane.f32.xlu1 %v1247_v11  ;;  %v1244_v21 = vsel %vm803_vm15, %v11667_v15, 0.0  ;;  %v196_v11 = vld [vmem:[%s14753_s9 + $0x48] sm:$0xff] }
 0x95e   :  { %11670 = vpow2.f32 %v1456_v48  ;;  %v195_v48 = vld [vmem:[%s14753_s9 + $0x40] sm:$0xff] }
 0x961   :  { %1245 = vadd.xlane.f32.xlu1 %v1244_v21  ;;  %v197_v21 = vld [vmem:[%s14753_s9 + $0x50] sm:$0xff] }
 0x964   :  { %v11669_v24 = vpop.eup %11668 }
 0x965   :  { %v1458_v54 = vsel %vm803_vm15, %v11669_v24, 0.0 }
 0x966   :  { %1459 = vadd.xlane.f32.xlu1 %v1458_v54 }
 0x968   :  { %v11671_v2 = vpop.eup %11670 }
 0x969   :  { %v1461_v58 = vsel %vm803_vm15, %v11671_v2, 0.0 }
 0x96a   :  { %1462 = vadd.xlane.f32.xlu0 %v1461_v58  ;;  %v200_v58 = vld [vmem:[%s14753_s9 + $0x68] sm:$0xff] }
 0x9ea   :  { %v1249_v31 = vpop.xlane.xlu1 %1248 }
 0x9ee   :  { %v1246_v35 = vpop.xlane.xlu1 %1245 }
 0x9ef   :  { %11672 = vrcp.f32 %v1246_v35  ;;  %v201_v35 = vld [vmem:[%s14753_s9 + $0x70] sm:$0xff] }
 0x9f0   :  { %11674 = vrcp.f32 %v1249_v31 }
 0x9f3   :  { %v1460_v33 = vpop.xlane.xlu1 %1459 }
 0x9f4   :  { %11676 = vrcp.f32 %v1460_v33  ;;  %v202_v33 = vld [vmem:[%s14753_s9 + $0x78] sm:$0xff] }
 0x9f7   :  { %v1463_v37 = vpop.xlane.xlu0 %1462 }
 0x9f8   :  { %11678 = vrcp.f32 %v1463_v37  ;;  %v12535_v37 = vpack.c.bf16 %v202_v33, %v201_v35  ;;  %v12591_v33 = vsel %vm249_vm10, 1.0, %v14767_v23 }
 0x9f9   :  { %v11673_v39 = vpop.eup %11672  ;;  %14898 = vst [vmem:[#allocation19_spill] sm:$0xff] %v12591_v33 }
 0x9fa   :  { %v1252_v44 = vmul.f32 %v11673_v39, %v11667_v15  ;;  %v11675_v40 = vpop.eup %11674  ;;  %v12504_v15 = vpack.c.bf16 %v196_v11, %v195_v48  ;;  %v271_v39 = vld [vmem:[%s14756_s12] sm:$0xff]  ;;  %v12584_v11 = vsel %vm239_vm9, 1.0, %v14767_v23 }
 0x9fb   :  { %v1253_v42 = vmul.f32 %v11675_v40, %v11665_v26  ;;  %v12494_v26 = vpack.c.bf16 %v194_v41, %v193_v20  ;;  %v273_v40 = vld [vmem:[%s14756_s12 + $0x10] sm:$0xff]  ;;  %v283_v20 = vld [vmem:[%s14756_s12 + $0x60] sm:$0xff]  ;;  %v284_v41 = vld [vmem:[%s14756_s12 + $0x68] sm:$0xff] }
 0x9fc   :  { %1254 = vxpose.xlu1.b32.start [1/2] (short) (narrow) %v1252_v44, 16  ;;  %v272_v44 = vld [vmem:[%s14756_s12 + $0x8] sm:$0xff]  ;;  %v10986_v48 = vpack.c.bf16 %v284_v41, %v283_v20 }
 0x9fe   :  { %v11677_v52 = vpop.eup %11676 }
 0x9ff   :  { %v1466_v30 = vmul.f32 %v11677_v52, %v11669_v24  ;;  %v198_v24 = vld [vmem:[%s14753_s9 + $0x58] sm:$0xff]  ;;  %v10962_v52 = vpack.c.bf16 %v272_v44, %v271_v39 }
 0xa00   :  { %1255 = vxpose.xlu1.b32.end [2/2] (short) (narrow) %v1253_v42, 16  ;;  %v12515_v54 = vpack.c.bf16 %v198_v24, %v197_v21  ;;  %v274_v42 = vld [vmem:[%s14756_s12 + $0x18] sm:$0xff] }
 0xa01   :  { %1468 = vxpose.xlu0.b32.start [1/2] (short) (narrow) %v1466_v30, 16  ;;  %v10966_v30 = vpack.c.bf16 %v274_v42, %v273_v40  ;;  %10963 = vmatprep.subr.bf16.mxu1 %v10962_v52 }
 0xa02   :  { %v11679_v32 = vpop.eup %11678  ;;  %10965 = vmatpush3.bf16.msra.mxu1 %v10962_v52 }
 0xa03   :  { %v1467_v43 = vmul.f32 %v11679_v32, %v11671_v2  ;;  %v199_v2 = vld [vmem:[%s14753_s9 + $0x60] sm:$0xff]  ;;  %10967 = vmatprep.subr.bf16.mxu1 %v10966_v30 }
 0xa04   :  { %v12525_v31 = vpack.c.bf16 %v200_v58, %v199_v2  ;;  %v275_v32 = vld [vmem:[%s14756_s12 + $0x20] sm:$0xff] }
 0xa05   :  { %1469 = vxpose.xlu0.b32.end [2/2] (short) (narrow) %v1467_v43, 16  ;;  %v276_v43 = vld [vmem:[%s14756_s12 + $0x28] sm:$0xff] }
 0xa06   :  { %10969 = vmatpush3.bf16.msra.mxu1 %v10966_v30 }
 0xa7c   :  { %v1270_v46 = vpop.trf.xlu1 }
 0xa7d   :  { %10181 = vmatprep.mubr.msk.f32.mxu0 %vm803_vm15, %v1270_v46  ;;  %v10970_v46 = vpack.c.bf16 %v276_v43, %v275_v32  ;;  %v285_v43 = vld [vmem:[%s14756_s12 + $0x70] sm:$0xff] }
 0xa7f   :  { %10971 = vmatprep.subr.bf16.mxu1 %v10970_v46 }
 0xa80   :  { %v1271_v9 = vpop.trf.xlu1  ;;  %10973 = vmatpush3.bf16.msra.mxu1 %v10970_v46 }
 0xa81   :  { %v1484_v59 = vpop.trf.xlu0  ;;  %10182 = vmatmul.mubr.msk.f32.vlgmr.msra.gmra.mrb[2].mxu0 %vm803_vm15, %v1271_v9  ;;  %v10974_v9 = vpack.c.bf16 %v278_v56, %v277_v3 }
 0xa82   :  { %10929 = vmatpush3.bf16.msra.mxu0 %v12364_v27  ;;  %10195 = vmatprep.mubr.msk.f32.mxu0 %vm803_vm15, %v1484_v59  ;;  %v12484_v27 = vpack.c.bf16 %v192_v25, %v191_v5  ;;  %v279_v59 = vld [vmem:[%s14756_s12 + $0x40] sm:$0xff]  ;;  %v282_v5 = vld [vmem:[%s14756_s12 + $0x58] sm:$0xff] }
 0xa83   :  { %10931 = vmatprep.subr.bf16.mxu0 %v12461_v61  ;;  %10975 = vmatprep.subr.bf16.mxu1 %v10974_v9  ;;  %v10978_v49 = vpack.c.bf16 %v280_v62, %v279_v59 }
 0xa84   :  { %10977 = vmatpush3.bf16.msra.mxu1 %v10974_v9 }
 0xa85   :  { %v1485_v13 = vpop.trf.xlu0  ;;  %10979 = vmatprep.subr.bf16.mxu1 %v10978_v49 }
 0xa86   :  { %10196 = vmatmul.mubr.msk.f32.vlgmr.msra.gmra.mrb[4].mxu0 %vm803_vm15, %v1485_v13  ;;  %v281_v13 = vld [vmem:[%s14756_s12 + $0x50] sm:$0xff] }
 0xa87   :  { %10933 = vmatpush3.bf16.msra.mxu0 %v12461_v61  ;;  %v10982_v25 = vpack.c.bf16 %v282_v5, %v281_v13 }
 0xa88   :  { %10935 = vmatprep.subr.bf16.mxu0 %v12473_v1  ;;  %10981 = vmatpush3.bf16.msra.mxu1 %v10978_v49 }
 0xa89   :  { %10983 = vmatprep.subr.bf16.mxu1 %v10982_v25 }
 0xa8b   :  { %10937 = vmatpush3.bf16.msra.mxu0 %v12473_v1 }
 0xa8c   :  { %10939 = vmatprep.subr.bf16.mxu0 %v12484_v27  ;;  %10985 = vmatpush3.bf16.msra.mxu1 %v10982_v25 }
 0xa8d   :  { %10987 = vmatprep.subr.bf16.mxu1 %v10986_v48 }
 0xa8f   :  { %10941 = vmatpush3.bf16.msra.mxu0 %v12484_v27 }
 0xa90   :  { %10943 = vmatprep.subr.bf16.mxu0 %v12494_v26  ;;  %10989 = vmatpush3.bf16.msra.mxu1 %v10986_v48 }
 0xa93   :  { %10945 = vmatpush3.bf16.msra.mxu0 %v12494_v26 }
 0xa94   :  { %10947 = vmatprep.subr.bf16.mxu0 %v12504_v15 }
 0xa97   :  { %10949 = vmatpush3.bf16.msra.mxu0 %v12504_v15 }
 0xa98   :  { %10951 = vmatprep.subr.bf16.mxu0 %v12515_v54 }
 0xa9b   :  { %10953 = vmatpush3.bf16.msra.mxu0 %v12515_v54 }
 0xa9c   :  { %10955 = vmatprep.subr.bf16.mxu0 %v12525_v31 }
 0xa9f   :  { %10957 = vmatpush3.bf16.msra.mxu0 %v12525_v31 }
 0xaa0   :  { %10959 = vmatprep.subr.bf16.mxu0 %v12535_v37 }
 0xaa3   :  { %10961 = vmatpush3.bf16.msra.mxu0 %v12535_v37 }
 0xb54   :  { %v10183_v21 = vpop.f32.mrb[2].mxu0 }
 0xb55   :  { %v1368_v24 = vmul.f32 %v10183_v21, %v12584_v11  ;;  %v1358_v2 = vpop.f32.mrb[3].mxu0 }
 0xb56   :  { %v1367_v58 = vmul.f32 %v12584_v11, %v1358_v2 }
 0xb57   :  { %v1586_v35 = vadd.f32 %v12438_v34, %v1368_v24  ;;  %v286_v34 = vld [vmem:[%s14756_s12 + $0x78] sm:$0xff] }
 0xb58   :  { %v1585_v39 = vadd.f32 %v12440_v36, %v1367_v58  ;;  %v10990_v46 = vpack.c.bf16 %v286_v34, %v285_v43 }
 0xb59   :  { %v10197_v44 = vpop.f32.mrb[4].mxu0 }
 0xb5a   :  { %v1582_v40 = vmul.f32 %v10197_v44, %v12591_v33  ;;  %v1572_v52 = vpop.f32.mrb[5].mxu0  ;;  %10991 = vmatprep.subr.bf16.mxu1 %v10990_v46  ;;  %v1784_v44 = vld [vmem:[%s14758_s14 + $0x10] sm:$0xff] }
 0xb5b   :  { %v1581_v42 = vmul.f32 %v12591_v33, %v1572_v52  ;;  %10993 = vmatpush3.bf16.msra.mxu1 %v10990_v46 }
 0xb5c   :  { %v1588_v30 = vadd.f32 %v1586_v35, %v1582_v40  ;;  %v1783_v35 = vld [vmem:[%s14758_s14 + $0x8] sm:$0xff]  ;;  %v1785_v40 = vld [vmem:[%s14758_s14 + $0x18] sm:$0xff] }
 0xb5d   :  { %v1587_v32 = vadd.f32 %v1585_v39, %v1581_v42  ;;  %v10998_v52 = vpack.c.bf16 %v1785_v40, %v1784_v44 }
 0xb5f   :  { %10230 = vmatprep.mubr.f32.mxu0 %v1587_v32 }
 0xb60   :  { %10231 = vmatmul.mubr.f32.vlgmr.msra.gmra.mrb[6].mxu0 %v1588_v30 }
 0xc33   :  { %v10232_v36 = vpop.f32.mrb[6].mxu0 }
 0xc34   :  { %v1665_v3 = vmul.f32 %v10232_v36, %v12356_v16  ;;  %v1655_v56 = vpop.f32.mrb[7].mxu0  ;;  %v12623_v36 = vshrl.u32 %v61_v18, 7 }
 0xc35   :  { %v1664_v9 = vmul.f32 %v1655_v56, %v12360_v22  ;;  %v12631_v56 = vld [vmem:[%s14757_s13] sm:$0xf] }
 0xc37   :  { %10265 = vmatprep.mubr.f32.mxu1 %v1664_v9  ;;  %v12634_v9 = vsub.s32 1, %v12623_v36 }
 0xc38   :  { %10266 = vmatmul.mubr.f32.vlgmr.msra.gmra.mrb[22].mxu1 %v1665_v3  ;;  %v12626_v3 = vsub.s32 0, %v12623_v36 }
 0xc39   :  { %14900 = vst [vmem:[#allocation21_spill] sm:$0xff] %v12634_v9  ;;  %v1779_v18 = vrot.slane %v12631_v56, %v12634_v9 }
 0xc3a   :  { %14899 = vst [vmem:[#allocation20_spill] sm:$0xff] %v12626_v3 }
 0xd0b   :  { %v10267_v59 = vpop.f32.mrb[22].mxu1 }
 0xd0c   :  { %v1742_v62 = vadd.f32 %v10267_v59, %v12119_v51  ;;  %v1732_v49 = vpop.f32.mrb[23].mxu1  ;;  %v1773_v59 = vrot.slane %v12631_v56, %v12626_v3 }
 0xd0d   :  { %v1741_v13 = vadd.f32 %v1732_v49, %v12105_v45  ;;  %v1782_v45 = vld [vmem:[%s14758_s14] sm:$0xff] }
 0xd0e   :  { %v1746_v5 = vsel %vm287_vm3, %v1742_v62, 0.0  ;;  %v10994_v39 = vpack.c.bf16 %v1783_v35, %v1782_v45 }
 0xd0f   :  { %1747 = vadd.xlane.f32.xlu1 %v1746_v5  ;;  %v1743_v25 = vsel %vm287_vm3, %v1741_v13, 0.0 }
 0xd10   :  { %1744 = vadd.xlane.f32.xlu0 %v1743_v25  ;;  %10995 = vmatprep.subr.bf16.mxu0 %v10994_v39 }
 0xd11   :  { %10997 = vmatpush3.bf16.msra.mxu0 %v10994_v39 }
 0xd12   :  { %10999 = vmatprep.subr.bf16.mxu0 %v10998_v52 }
 0xd15   :  { %11001 = vmatpush3.bf16.msra.mxu0 %v10998_v52 }
 0xd9c   :  { %v1748_v20 = vpop.xlane.xlu1 %1747 }
 0xd9d   :  { %v1751_v41 = vmul.f32 0.03125, %v1748_v20  ;;  %v1745_v16 = vpop.xlane.xlu0 %1744 }
 0xd9e   :  { %v1750_v48 = vmul.f32 0.03125, %v1745_v16 }
 0xd9f   :  { %v1753_v21 = vsub.f32 %v1742_v62, %v1751_v41 }
 0xda0   :  { %v1752_v22 = vsub.f32 %v1741_v13, %v1750_v48 }
 0xda1   :  { %v1755_v24 = vmul.f32 %v1753_v21, %v1753_v21 }
 0xda2   :  { %v1754_v2 = vmul.f32 %v1752_v22, %v1752_v22 }
 0xda3   :  { %v1759_v58 = vsel %vm287_vm3, %v1755_v24, 0.0 }
 0xda4   :  { %1760 = vadd.xlane.f32.xlu0 %v1759_v58  ;;  %v1756_v51 = vsel %vm287_vm3, %v1754_v2, 0.0 }
 0xda5   :  { %1757 = vadd.xlane.f32.xlu1 %v1756_v51 }
 0xe31   :  { %v1761_v42 = vpop.xlane.xlu0 %1760 }
 0xe32   :  { %v1763_v30 = vmul.f32 0.03125, %v1761_v42  ;;  %v1758_v32 = vpop.xlane.xlu1 %1757 }
 0xe33   :  { %v1762_v43 = vmul.f32 0.03125, %v1758_v32 }
 0xe34   :  { %v1765_v34 = vadd.f32 1e-05, %v1763_v30 }
 0xe35   :  { %v1764_v46 = vadd.f32 1e-05, %v1762_v43 }
 0xe36   :  { %11680 = vrsqrt.f32 %v1765_v34 }
 0xe37   :  { %11682 = vrsqrt.f32 %v1764_v46 }
 0xe40   :  { %v11681_v62 = vpop.eup %11680 }
 0xe41   :  { %v11683_v49 = vpop.eup %11682  ;;  %v1769_v13 = vmul.f32 %v11681_v62, %v1753_v21 }
 0xe42   :  { %v1768_v5 = vmul.f32 %v11683_v49, %v1752_v22 }
 0xe43   :  { %v1775_v25 = vmul.f32 %v1773_v59, %v1769_v13 }
 0xe44   :  { %v1774_v20 = vmul.f32 %v1773_v59, %v1768_v5 }
 0xe45   :  { %v12642_v16 = vadd.f32 %v1779_v18, %v1775_v25 }
 0xe46   :  { %v12640_v41 = vadd.f32 %v1779_v18, %v1774_v20 }
 0xe48   :  { %10276 = vmatprep.mubr.msk.f32.mxu0 %vm287_vm3, %v12640_v41 }
 0xe49   :  { %10277 = vmatmul.mubr.msk.f32.vlgmr.msra.gmra.mrb[8].mxu0 %vm287_vm3, %v12642_v16 }
 0xe4a   :  { %2311 = vmatprep.mubr.f32.mxu0 %v14767_v23 }
 0xf1c   :  { %v10278_v48 = vpop.f32.mrb[8].mxu0 }
 0xf1d   :  { %v1898_v21 = vpop.f32.mrb[9].mxu0  ;;  %v1911_v22 = vsel %vm1907_vm11, %v10278_v48, -inf }
 0xf1e   :  { %1912 = vmax.xlane.f32.xlu0 %v1911_v22  ;;  %v1908_v24 = vsel %vm1907_vm11, %v1898_v21, -inf }
 0xf1f   :  { %1909 = vmax.xlane.f32.xlu1 %v1908_v24 }
 0xfab   :  { %v12651_v2 = vpop.xlane.xlu0 %1912 }
 0xfac   :  { %vm1915_vm6 = vcmp.eq.f32.partialorder %v10278_v48, %v12651_v2  ;;  %v12654_v58 = vpop.xlane.xlu1 %1909 }
 0xfad   :  { %vm1914_vm12 = vcmp.eq.f32.partialorder %v1898_v21, %v12654_v58  ;;  %v1917_v51 = vsel %vm1915_vm6, %v12059_v19, 4 }
 0xfae   :  { %v1933_v45 = vsel %vm1907_vm11, %v1917_v51, 2147483647  ;;  %v1916_v35 = vsel %vm1914_vm12, %v12059_v19, 4 }
 0xfaf   :  { %v1935_v39 = vshra.s32 %v1933_v45, 16  ;;  %v1918_v44 = vsel %vm1907_vm11, %v1916_v35, 2147483647  ;;  %v1934_v30 = vand.u32 65535, %v1933_v45 }
 0xfb0   :  { %v1920_v40 = vshra.s32 %v1918_v44, 16  ;;  %v1919_v32 = vand.u32 65535, %v1918_v44 }
 0xfb1   :  { %v1937_v52 = vcvt.s32.f32 %v1935_v39  ;;  %v1936_v34 = vcvt.s32.f32 %v1934_v30 }
 0xfb2   :  { %v1922_v42 = vcvt.s32.f32 %v1920_v40  ;;  %v1921_v59 = vcvt.s32.f32 %v1919_v32 }
 0xfb3   :  { %1938 = vmin.xlane.f32.xlu0 %v1937_v52 }
 0xfb4   :  { %1923 = vmin.xlane.f32.xlu1 %v1922_v42 }
0x1040   :  { %v1939_v43 = vpop.xlane.xlu0 %1938 }
0x1041   :  { %v1924_v46 = vpop.xlane.xlu1 %1923  ;;  %vm1940_vm13 = vcmp.eq.f32.partialorder %v1937_v52, %v1939_v43  ;;  %v1945_v13 = vcvt.f32.s32 %v1939_v43 }
0x1042   :  { %v1941_v62 = vsel %vm1940_vm13, %v1936_v34, inf  ;;  %vm1925_vm14 = vcmp.eq.f32.partialorder %v1922_v42, %v1924_v46  ;;  %v1930_v5 = vcvt.f32.s32 %v1924_v46 }
0x1043   :  { %1942 = vmin.xlane.f32.xlu0 %v1941_v62  ;;  %v1926_v49 = vsel %vm1925_vm14, %v1921_v59, inf  ;;  %v1946_v25 = vshll.u32 %v1945_v13, 16 }
0x1044   :  { %1927 = vmin.xlane.f32.xlu1 %v1926_v49  ;;  %v1931_v24 = vshll.u32 %v1930_v5, 16 }
0x10d0   :  { %v1943_v18 = vpop.xlane.xlu0 %1942 }
0x10d1   :  { %v1944_v20 = vcvt.f32.s32 %v1943_v18  ;;  %v1928_v22 = vpop.xlane.xlu1 %1927 }
0x10d2   :  { %v1929_v51 = vcvt.f32.s32 %v1928_v22 }
0x10d3   :  { %v1947_v45 = vadd.s32 %v1946_v25, %v1944_v20 }
0x10d4   :  { %v1932_v35 = vadd.s32 %v1931_v24, %v1929_v51 }
0x10d5   :  { %vm1949_vm0 = vcmp.eq.s32.totalorder %v12059_v19, %v1947_v45 }
0x10d6   :  { %v12663_v39 = vsel %vm1949_vm0, 1.0, %v14767_v23  ;;  %vm1948_vm1 = vcmp.eq.s32.totalorder %v12059_v19, %v1932_v35  ;;  %v169_v35 = vld [vmem:[%s14751_s7] sm:$0xff] }
0x10d7   :  { %14901 = vst [vmem:[#allocation22_spill] sm:$0xff] %v12663_v39  ;;  %v12667_v44 = vsel %vm1948_vm1, 1.0, %v14767_v23  ;;  %vm1955_vm2 = vcmp.gt.f32.partialorder %v12663_v39, 0.0  ;;  %10283 = vmatprep.mubr.msk.f32.mxu1 %vm803_vm15, %v169_v35  ;;  %v1791_v35 = vld [vmem:[%s14759_s15 + $0x28] sm:$0xff]  ;;  %vm2242_vm1 = vcmask 1043456  }
0x10d8   :  { %14902 = vst [vmem:[#allocation23_spill] sm:$0xff] %v12667_v44  ;;  %v1957_v40 = vsel %vm1955_vm2, -1e+30, %v10278_v48  ;;  %vm1954_vm4 = vcmp.gt.f32.partialorder %v12667_v44, 0.0 }
0x10d9   :  { %v1961_v52 = vsel %vm1907_vm11, %v1957_v40, -inf  ;;  %v1956_v42 = vsel %vm1954_vm4, -1e+30, %v1898_v21 }
0x10da   :  { %1962 = vmax.xlane.f32.xlu0 %v1961_v52  ;;  %v1958_v30 = vsel %vm1907_vm11, %v1956_v42, -inf }
0x10db   :  { %1959 = vmax.xlane.f32.xlu1 %v1958_v30 }
0x1167   :  { %v12673_v32 = vpop.xlane.xlu0 %1962 }
0x1168   :  { %vm1965_vm5 = vcmp.eq.f32.partialorder %v1957_v40, %v12673_v32  ;;  %v12676_v43 = vpop.xlane.xlu1 %1959 }
0x1169   :  { %vm1964_vm7 = vcmp.eq.f32.partialorder %v1956_v42, %v12676_v43  ;;  %v1967_v34 = vsel %vm1965_vm5, %v12059_v19, 4 }
0x116a   :  { %v1966_v48 = vsel %vm1964_vm7, %v12059_v19, 4  ;;  %v1983_v46 = vsel %vm1907_vm11, %v1967_v34, 2147483647 }
0x116b   :  { %v1985_v59 = vshra.s32 %v1983_v46, 16  ;;  %v1968_v21 = vsel %vm1907_vm11, %v1966_v48, 2147483647  ;;  %v1984_v5 = vand.u32 65535, %v1983_v46 }
0x116c   :  { %v1970_v62 = vshra.s32 %v1968_v21, 16  ;;  %v1969_v18 = vand.u32 65535, %v1968_v21 }
0x116d   :  { %v1987_v49 = vcvt.s32.f32 %v1985_v59  ;;  %v1986_v20 = vcvt.s32.f32 %v1984_v5 }
0x116e   :  { %v1972_v13 = vcvt.s32.f32 %v1970_v62  ;;  %v1971_v24 = vcvt.s32.f32 %v1969_v18  ;;  %v1787_v18 = vld [vmem:[%s14759_s15 + $0x8] sm:$0xff] }
0x116f   :  { %1988 = vmin.xlane.f32.xlu0 %v1987_v49 }
0x1170   :  { %1973 = vmin.xlane.f32.xlu1 %v1972_v13 }
0x11fc   :  { %v1989_v25 = vpop.xlane.xlu0 %1988 }
0x11fd   :  { %v1974_v22 = vpop.xlane.xlu1 %1973  ;;  %vm1990_vm8 = vcmp.eq.f32.partialorder %v1987_v49, %v1989_v25  ;;  %v1995_v40 = vcvt.f32.s32 %v1989_v25  ;;  %v1789_v25 = vld [vmem:[%s14759_s15 + $0x18] sm:$0xff] }
0x11fe   :  { %v1991_v51 = vsel %vm1990_vm8, %v1986_v20, inf  ;;  %vm1975_vm9 = vcmp.eq.f32.partialorder %v1972_v13, %v1974_v22  ;;  %v1980_v52 = vcvt.f32.s32 %v1974_v22 }
0x11ff   :  { %1992 = vmin.xlane.f32.xlu0 %v1991_v51  ;;  %v1976_v45 = vsel %vm1975_vm9, %v1971_v24, inf  ;;  %v1996_v30 = vshll.u32 %v1995_v40, 16  ;;  %v11006_v24 = vpack.c.bf16 %v1789_v25, %v1787_v18  ;;  %v1786_v51 = vld [vmem:[%s14759_s15] sm:$0xff]  ;;  %v1793_v40 = vld [vmem:[%s14759_s15 + $0x38] sm:$0xff] }
0x1200   :  { %1977 = vmin.xlane.f32.xlu1 %v1976_v45  ;;  %v1981_v46 = vshll.u32 %v1980_v52, 16  ;;  %v1788_v45 = vld [vmem:[%s14759_s15 + $0x10] sm:$0xff]  ;;  %v170_v52 = vld [vmem:[%s14751_s7 + $0x8] sm:$0xff] }
0x128c   :  { %v1993_v42 = vpop.xlane.xlu0 %1992 }
0x128d   :  { %v1994_v34 = vcvt.f32.s32 %v1993_v42  ;;  %v1978_v48 = vpop.xlane.xlu1 %1977  ;;  %v11008_v42 = vpack.c.bf16 %v1788_v45, %v1786_v51 }
0x128e   :  { %v1979_v59 = vcvt.f32.s32 %v1978_v48  ;;  %v1792_v48 = vld [vmem:[%s14759_s15 + $0x30] sm:$0xff] }
0x128f   :  { %v1997_v21 = vadd.s32 %v1996_v30, %v1994_v34  ;;  %v11010_v30 = vpack.c.bf16 %v1793_v40, %v1791_v35  ;;  %v1790_v34 = vld [vmem:[%s14759_s15 + $0x20] sm:$0xff] }
0x1290   :  { %v1982_v62 = vadd.s32 %v1981_v46, %v1979_v59  ;;  %v11012_v46 = vpack.c.bf16 %v1792_v48, %v1790_v34 }
0x1291   :  { %vm1999_vm10 = vcmp.eq.s32.totalorder %v12059_v19, %v1997_v21 }
0x1292   :  { %v12689_v49 = vsel %vm1999_vm10, 1.0, %v14767_v23  ;;  %vm1998_vm6 = vcmp.eq.s32.totalorder %v12059_v19, %v1982_v62 }
0x1293   :  { %14903 = vst [vmem:[#allocation24_spill] sm:$0xff] %v12689_v49  ;;  %v12693_v13 = vsel %vm1998_vm6, 1.0, %v14767_v23  ;;  %v2017_v5 = vadd.f32 %v12689_v49, %v12663_v39 }
0x1294   :  { %14904 = vst [vmem:[#allocation25_spill] sm:$0xff] %v12693_v13  ;;  %v2016_v20 = vadd.f32 %v12693_v13, %v12667_v44 }
0x1296   :  { %v11002_v22 = vpack.c.bf16 %v2017_v5, %v2016_v20 }
0x1298   :  { %11003 = vmatprep.subr.bf16.mxu1 %v11002_v22 }
0x1299   :  { %11005 = vmatpush3.bf16.msra.mxu1 %v11002_v22 }
0x129a   :  { %11007 = vmatprep.subr.bf16.mxu1 %v11006_v24 }
0x129c   :  { %10284 = vmatmul.mubr.msk.f32.vlgmr.msra.gmra.mrb[24].mxu1 %vm803_vm15, %v170_v52 }
0x129d   :  { %11009 = vmatpush1.bf16.msra.mxu1 %v11008_v42  ;;  %2217 = vmatprep.mubr.f32.mxu1 %v14767_v23 }
0x129e   :  { %11011 = vmatprep.subr.bf16.mxu1 %v11010_v30 }
0x12a1   :  { %11013 = vmatpush1.bf16.msra.mxu1 %v11012_v46 }
0x12a4   :  { %9256 = vmatmul.mubr.msk.f32.vlgmr.msra.gmra.mrb[26].mxu1 %vm287_vm3, %v12640_v41 }
0x12a5   :  { %2223 = vmatprep.mubr.f32.mxu1 %v14767_v23 }
0x12a8   :  { %9257 = vmatmul.mubr.msk.f32.gmra.mrb[28].mxu1 %vm287_vm3, %v12642_v16 }
0x12a9   :  { %2599 = vmatprep.mubr.f32.mxu1 %v14767_v23 }
0x136f   :  { %v10285_v59 = vpop.f32.mrb[24].mxu1 }
0x1370   :  { %v2100_v21 = vadd.f32 1.0, %v10285_v59  ;;  %v2116_v62 = vadd.f32 %v10285_v59, %v12663_v39  ;;  %v2090_v5 = vpop.f32.mrb[25].mxu1 }
0x1371   :  { %v2099_v18 = vadd.f32 1.0, %v2090_v5  ;;  %v2115_v25 = vadd.f32 %v12667_v44, %v2090_v5 }
0x1372   :  { %vm2102_vm12 = vcmp.le.f32.partialorder %v2100_v21, 5.0  ;;  %v2118_v20 = vadd.f32 1.0, %v2116_v62 }
0x1373   :  { %vm2101_vm13 = vcmp.le.f32.partialorder %v2099_v18, 5.0  ;;  %v2117_v22 = vadd.f32 1.0, %v2115_v25  ;;  %v9253_v24 = vsel %vm2102_vm12, 1.0, %v14767_v23  ;;  %v203_v25 = vld [vmem:[%s14754_s10] sm:$0xff] }
0x1374   :  { %vm2120_vm14 = vcmp.le.f32.partialorder %v2118_v20, 5.0  ;;  %v9252_v51 = vsel %vm2101_vm13, 1.0, %v14767_v23  ;;  %v2108_v34 = vmul.f32 %v9253_v24, %v12663_v39  ;;  %v12759_v20 = vcombine.high %v203_v25, %v203_v25  ;;  %v1811_v24 = vld [vmem:[%s14760_s16 + $0x88] sm:$0xff] }
0x1375   :  { %vm2119_vm0 = vcmp.le.f32.partialorder %v2117_v22, 5.0  ;;  %v2107_v45 = vmul.f32 %v9252_v51, %v12667_v44  ;;  %v9255_v40 = vsel %vm2120_vm14, 1.0, %v14767_v23  ;;  %v1810_v22 = vld [vmem:[%s14760_s16 + $0x80] sm:$0xff] }
0x1376   :  { %v9254_v35 = vsel %vm2119_vm0, 1.0, %v14767_v23  ;;  %v2126_v59 = vmul.f32 %v9255_v40, %v12689_v49  ;;  %v2112_v62 = vsel %vm1907_vm11, %v2108_v34, 0.0  ;;  %14905 = vst [vmem:[#allocation26_spill] sm:$0xff] %v12759_v20  ;;  %9258 = vmatprep.subr.msk.mxu0 %vm2242_vm1, %v12759_v20  ;;  %v11014_v51 = vpack.c.bf16 %v1811_v24, %v1810_v22 }
0x1377   :  { %v12741_v52 = vpop.f32.mrb[26].mxu1  ;;  %v2109_v42 = vsel %vm1907_vm11, %v2107_v45, 0.0  ;;  %v2125_v30 = vmul.f32 %v9254_v35, %v12693_v13  ;;  %9259 = vmatpush1.msk.msra.mxu0 %vm2242_vm1, %v203_v25  ;;  %v2004_v45 = vsub.f32 %v12676_v43, %v12654_v58  ;;  %v2005_v35 = vsub.f32 %v12673_v32, %v12651_v2 }
0x1378   :  { %v12746_v48 = vpop.f32.mrb[27].mxu1  ;;  %2110 = vadd.xlane.f32.xlu1 %v2109_v42  ;;  %v2130_v18 = vsel %vm1907_vm11, %v2126_v59, 0.0  ;;  %11015 = vmatprep.subr.bf16.mxu0 %v11014_v51 }
0x1379   :  { %v2127_v46 = vsel %vm1907_vm11, %v2125_v30, 0.0  ;;  %v2006_v40 = vmul.f32 1.442695, %v2004_v45  ;;  %v2008_v42 = vmul.f32 1.442695, %v2005_v35 }
0x137a   :  { %2128 = vadd.xlane.f32.xlu0 %v2127_v46 }
0x137b   :  { %v12750_v21 = vpop.f32.mrb[28].mxu1  ;;  %11684 = vpow2.f32 %v2006_v40 }
0x137c   :  { %v12753_v5 = vpop.f32.mrb[29].mxu1  ;;  %2113 = vadd.xlane.f32.xlu1 %v2112_v62  ;;  %11686 = vpow2.f32 %v2008_v42 }
0x137e   :  { %2131 = vadd.xlane.f32.xlu0 %v2130_v18 }
0x1385   :  { %v11685_v30 = vpop.eup %11684 }
0x1386   :  { %v2010_v34 = vadd.f32 1.0, %v11685_v30  ;;  %v11687_v46 = vpop.eup %11686 }
0x1387   :  { %v2011_v59 = vadd.f32 1.0, %v11687_v46 }
0x1388   :  { %11688 = vrcp.f32 %v2010_v34 }
0x1389   :  { %11690 = vrcp.f32 %v2011_v59 }
0x1392   :  { %v11689_v62 = vpop.eup %11688 }
0x1393   :  { %v2014_v25 = vmul.f32 %v11689_v62, %v11685_v30  ;;  %v11691_v22 = vpop.eup %11690 }
0x1394   :  { %v2015_v51 = vmul.f32 %v11691_v22, %v11687_v46  ;;  %v1795_v46 = vld [vmem:[%s14760_s16 + $0x8] sm:$0xff] }
0x1405   :  { %v12774_v18 = vpop.xlane.xlu1 %2110 }
0x1406   :  { %14906 = vst [vmem:[#allocation27_spill] sm:$0xff] %v12774_v18  ;;  %v2133_v58 = vmul.f32 %v11689_v62, %v12774_v18  ;;  %v1796_v18 = vld [vmem:[%s14760_s16 + $0x10] sm:$0xff] }
0x1407   :  { %v12776_v24 = vpop.xlane.xlu0 %2128 }
0x1408   :  { %14907 = vst [vmem:[#allocation28_spill] sm:$0xff] %v12776_v24  ;;  %v2135_v2 = vmul.f32 %v12776_v24, %v2014_v25  ;;  %v1794_v25 = vld [vmem:[%s14760_s16] sm:$0xff] }
0x1409   :  { %v12780_v32 = vpop.xlane.xlu1 %2113 }
0x140a   :  { %14908 = vst [vmem:[#allocation29_spill] sm:$0xff] %v12780_v32  ;;  %v2137_v43 = vadd.f32 %v2135_v2, %v2133_v58  ;;  %v2134_v40 = vmul.f32 %v11691_v22, %v12780_v32  ;;  %v1812_v22 = vld [vmem:[%s14760_s16 + $0x90] sm:$0xff]  ;;  %v1797_v32 = vld [vmem:[%s14760_s16 + $0x18] sm:$0xff] }
0x140b   :  { %v12782_v45 = vpop.xlane.xlu0 %2131 }
0x140c   :  { %14909 = vst [vmem:[#allocation30_spill] sm:$0xff] %v12782_v45  ;;  %v2139_v35 = vadd.f32 1e-09, %v2137_v43  ;;  %v2136_v42 = vmul.f32 %v12782_v45, %v2015_v51  ;;  %v1813_v43 = vld [vmem:[%s14760_s16 + $0x98] sm:$0xff] }
0x140d   :  { %v11018_v50 = vpack.c.bf16 %v1813_v43, %v1812_v22 }
0x140e   :  { %11692 = vrcp.f32 %v2139_v35  ;;  %v2138_v30 = vadd.f32 %v2136_v42, %v2134_v40  ;;  %v11016_v35 = vpack.c.bf16 %v1795_v46, %v1794_v25  ;;  %v14910_v25 = vmov 0.0  }
0x140f   :  { %v11020_v46 = vpack.c.bf16 %v1797_v32, %v1796_v18 }
0x1410   :  { %v2140_v34 = vadd.f32 1e-09, %v2138_v30 }
0x1412   :  { %11694 = vrcp.f32 %v2140_v34 }
0x1418   :  { %v11693_v59 = vpop.eup %11692 }
0x1419   :  { %v2143_v23 = vmul.f32 %v11693_v59, %v2133_v58  ;;  %v2145_v62 = vmul.f32 %v11693_v59, %v2135_v2 }
0x141b   :  { %v2147_v51 = vmul.f32 %v12667_v44, %v2143_v23  ;;  %v2149_v58 = vmul.f32 %v12693_v13, %v2145_v62  ;;  %v1814_v23 = vld [vmem:[%s14760_s16 + $0xa0] sm:$0xff]  ;;  %v1815_v62 = vld [vmem:[%s14760_s16 + $0xa8] sm:$0xff] }
0x141c   :  { %v11695_v2 = vpop.eup %11694  ;;  %v11022_v43 = vpack.c.bf16 %v1815_v62, %v1814_v23  ;;  %v1800_v23 = vld [vmem:[%s14760_s16 + $0x30] sm:$0xff]  ;;  %v1801_v62 = vld [vmem:[%s14760_s16 + $0x38] sm:$0xff] }
0x141d   :  { %v2151_v30 = vadd.f32 %v2149_v58, %v2147_v51  ;;  %v2146_v34 = vmul.f32 %v11695_v2, %v2136_v42  ;;  %v2144_v59 = vmul.f32 %v11695_v2, %v2134_v40  ;;  %v1798_v51 = vld [vmem:[%s14760_s16 + $0x20] sm:$0xff]  ;;  %v1799_v58 = vld [vmem:[%s14760_s16 + $0x28] sm:$0xff]  ;;  %v1816_v2 = vld [vmem:[%s14760_s16 + $0xb0] sm:$0xff] }
0x141e   :  { %v11024_v32 = vpack.c.bf16 %v1799_v58, %v1798_v51  ;;  %v1820_v51 = vld [vmem:[%s14760_s16 + $0xd0] sm:$0xff]  ;;  %v1821_v58 = vld [vmem:[%s14760_s16 + $0xd8] sm:$0xff] }
0x141f   :  { %v2150_v42 = vmul.f32 %v12689_v49, %v2146_v34  ;;  %9260 = vmatmul.mubr.msk.f32.vlgmr.msra.gmra.mrb[10].mxu0 %vm1907_vm11, %v2151_v30  ;;  %v2148_v40 = vmul.f32 %v12663_v39, %v2144_v59  ;;  %v2418_v18 = vsel %vm1907_vm11, %v2151_v30, 0.0  ;;  %v1819_v30 = vld [vmem:[%s14760_s16 + $0xc8] sm:$0xff] }
0x1420   :  { %2317 = vmatprep.mubr.f32.mxu0 %v14910_v25  ;;  %11017 = vmatpush3.bf16.msra.mxu0 %v11016_v35  ;;  %v1817_v35 = vld [vmem:[%s14760_s16 + $0xb8] sm:$0xff] }
0x1421   :  { %v2152_v22 = vadd.f32 %v2150_v42, %v2148_v40  ;;  %11019 = vmatprep.subr.bf16.mxu0 %v11018_v50  ;;  %v11026_v59 = vpack.c.bf16 %v1817_v35, %v1816_v2  ;;  %v1818_v42 = vld [vmem:[%s14760_s16 + $0xc0] sm:$0xff]  ;;  %v11028_v40 = vpack.c.bf16 %v1801_v62, %v1800_v23  ;;  %v11034_v35 = vpack.c.bf16 %v1821_v58, %v1820_v51  ;;  %v1808_v51 = vld [vmem:[%s14760_s16 + $0x70] sm:$0xff]  ;;  %v1809_v58 = vld [vmem:[%s14760_s16 + $0x78] sm:$0xff] }
0x1423   :  { %9261 = vmatmul.mubr.msk.f32.gmra.mrb[12].mxu0 %vm1907_vm11, %v2152_v22  ;;  %v2419_v50 = vsel %vm1907_vm11, %v2152_v22, 0.0  ;;  %v1802_v22 = vld [vmem:[%s14760_s16 + $0x40] sm:$0xff] }
0x1424   :  { %11021 = vmatpush3.bf16.msra.mxu0 %v11020_v46  ;;  %v12831_v34 = vadd.f32 %v2419_v50, %v2418_v18  ;;  %v11030_v46 = vpack.c.bf16 %v1819_v30, %v1818_v42  ;;  %v1804_v50 = vld [vmem:[%s14760_s16 + $0x50] sm:$0xff]  ;;  %v1805_v18 = vld [vmem:[%s14760_s16 + $0x58] sm:$0xff]  ;;  %v1806_v42 = vld [vmem:[%s14760_s16 + $0x60] sm:$0xff] }
0x1425   :  { %11023 = vmatprep.subr.bf16.mxu0 %v11022_v43  ;;  %v1803_v43 = vld [vmem:[%s14760_s16 + $0x48] sm:$0xff]  ;;  %v11036_v23 = vpack.c.bf16 %v1805_v18, %v1804_v50  ;;  %v2231_v50 = vmax.f32 %v12746_v48, 0.0 }
0x1426   :  { %14911 = vst [vmem:[#allocation31_spill] sm:$0xff] %v12831_v34  ;;  %v11032_v2 = vpack.c.bf16 %v1803_v43, %v1802_v22  ;;  %v1807_v30 = vld [vmem:[%s14760_s16 + $0x68] sm:$0xff]  ;;  %v1825_v22 = vld [vmem:[%s14760_s16 + $0xf8] sm:$0xff]  ;;  %v9278_v34 = vld [vmem:[%s14755_s11 + $0xf0] sm:$0xff] }
0x1428   :  { %11025 = vmatpush3.bf16.msra.mxu0 %v11024_v32  ;;  %v1822_v32 = vld [vmem:[%s14760_s16 + $0xe0] sm:$0xff] }
0x1429   :  { %11027 = vmatprep.subr.bf16.mxu0 %v11026_v59  ;;  %v1823_v59 = vld [vmem:[%s14760_s16 + $0xe8] sm:$0xff] }
0x142a   :  { %v11038_v62 = vpack.c.bf16 %v1823_v59, %v1822_v32 }
0x142c   :  { %11029 = vmatpush3.bf16.msra.mxu0 %v11028_v40  ;;  %v11040_v40 = vpack.c.bf16 %v1807_v30, %v1806_v42  ;;  %v2233_v42 = vmax.f32 %v12753_v5, 0.0 }
0x142d   :  { %11031 = vmatprep.subr.bf16.mxu0 %v11030_v46  ;;  %v1824_v46 = vld [vmem:[%s14760_s16 + $0xf0] sm:$0xff] }
0x142e   :  { %v11042_v43 = vpack.c.bf16 %v1825_v22, %v1824_v46 }
0x1430   :  { %11033 = vmatpush3.bf16.msra.mxu0 %v11032_v2  ;;  %v11044_v2 = vpack.c.bf16 %v1809_v58, %v1808_v51 }
0x1431   :  { %11035 = vmatprep.subr.bf16.mxu0 %v11034_v35  ;;  %v2230_v35 = vmax.f32 %v12741_v52, 0.0 }
0x1434   :  { %11037 = vmatpush3.bf16.msra.mxu0 %v11036_v23 }
0x1435   :  { %11039 = vmatprep.subr.bf16.mxu0 %v11038_v62  ;;  %v2232_v62 = vmax.f32 %v12750_v21, 0.0 }
0x1438   :  { %11041 = vmatpush3.bf16.msra.mxu0 %v11040_v40 }
0x1439   :  { %11043 = vmatprep.subr.bf16.mxu0 %v11042_v43 }
0x143c   :  { %11045 = vmatpush3.bf16.msra.mxu0 %v11044_v2 }
0x14f2   :  { %v2313_v18 = vpop.f32.mrb[10].mxu0 }
0x14f3   :  { %v2324_v32 = vmul.f32 %v2313_v18, %v2230_v35  ;;  %v2315_v59 = vpop.f32.mrb[11].mxu0 }
0x14f4   :  { %v2325_v23 = vmul.f32 %v2315_v59, %v2231_v50 }
0x14f6   :  { %v2319_v30 = vpop.f32.mrb[12].mxu0  ;;  %2392 = vmatprep.mubr.f32.mxu0 %v2325_v23 }
0x14f7   :  { %v2326_v40 = vmul.f32 %v2319_v30, %v2232_v62  ;;  %v2321_v46 = vpop.f32.mrb[13].mxu0  ;;  %2393 = vmatmul.mubr.f32.vlgmr.msra.gmra.mrb[14].mxu0 %v2324_v32 }
0x14f8   :  { %v2327_v22 = vmul.f32 %v2321_v46, %v2233_v42 }
0x14fa   :  { %2397 = vmatprep.mubr.f32.mxu0 %v2327_v22  ;;  %v9269_v22 = vld [vmem:[%s14755_s11 + $0xa8] sm:$0xff] }
0x14fb   :  { %2398 = vmatmul.mubr.f32.gmra.mrb[16].mxu0 %v2326_v40 }
0x15ca   :  { %v9674_v43 = vpop.f32.mrb[14].mxu0 }
0x15cb   :  { %v9675_v52 = vpop.f32.mrb[15].mxu0 }
0x15cc   :  { %v9676_v51 = vadd.f32 %v9675_v52, %v9674_v43  ;;  %v9264_v52 = vld [vmem:[%s14755_s11 + $0x80] sm:$0xff] }
0x15ce   :  { %v9677_v48 = vpop.f32.mrb[16].mxu0  ;;  %v2444_v58 = vadd.f32 %v9676_v51, %v12640_v41  ;;  %v9268_v51 = vld [vmem:[%s14755_s11 + $0xa0] sm:$0xff] }
0x15cf   :  { %v9678_v2 = vpop.f32.mrb[17].mxu0 }
0x15d0   :  { %v9679_v35 = vadd.f32 %v9678_v2, %v9677_v48  ;;  %v2446_v21 = vsel %vm287_vm3, %v2444_v58, 0.0  ;;  %v12911_v48 = vpack.c.bf16 %v9268_v51, %v9264_v52  ;;  %v9277_v2 = vld [vmem:[%s14755_s11 + $0xe8] sm:$0xff]  ;;  %v12946_v52 = vsub.s32 3, %v12623_v36 }
0x15d1   :  { %2447 = vadd.xlane.f32.xlu1 %v2446_v21  ;;  %v9272_v21 = vld [vmem:[%s14755_s11 + $0xc0] sm:$0xff] }
0x15d2   :  { %v2445_v5 = vadd.f32 %v9679_v35, %v12642_v16  ;;  %v9265_v16 = vld [vmem:[%s14755_s11 + $0x88] sm:$0xff]  ;;  %14915 = vst [vmem:[#allocation35_spill] sm:$0xff] %v12946_v52 }
0x15d3   :  { %v12903_v43 = vpack.c.bf16 %v9269_v22, %v9265_v16  ;;  %v12943_v22 = vsub.s32 2, %v12623_v36  ;;  %v9262_v36 = vld [vmem:[%s14747_s3] ss:$0 sm:$0xff] }
0x15d4   :  { %v2449_v50 = vsel %vm287_vm3, %v2445_v5, 0.0 }
0x15d5   :  { %2450 = vadd.xlane.f32.xlu0 %v2449_v50  ;;  %11047 = vmatprep.subr.bf16.mxu1 %v12903_v43  ;;  %14914 = vst [vmem:[#allocation34_spill] sm:$0xff] %v12943_v22  ;;  %v2475_v51 = vrot.slane %v12631_v56, %v12943_v22 }
0x15d6   :  { %11049 = vmatpush1.bf16.msra.mxu1 %v12911_v48 }
0x165e   :  { %v2448_v18 = vpop.xlane.xlu1 %2447 }
0x165f   :  { %v2452_v32 = vmul.f32 0.03125, %v2448_v18  ;;  %v9267_v18 = vld [vmem:[%s14755_s11 + $0x98] sm:$0xff] }
0x1661   :  { %v2454_v59 = vsub.f32 %v2444_v58, %v2452_v32  ;;  %v9273_v58 = vld [vmem:[%s14755_s11 + $0xc8] sm:$0xff]  ;;  %v9271_v32 = vld [vmem:[%s14755_s11 + $0xb8] sm:$0xff] }
0x1662   :  { %v2451_v23 = vpop.xlane.xlu0 %2450  ;;  %v12921_v35 = vpack.c.bf16 %v9277_v2, %v9273_v58  ;;  %v2481_v2 = vrot.slane %v12631_v56, %v12946_v52  ;;  %v9279_v56 = vld [vmem:[%s14755_s11 + $0xf8] sm:$0xff] }
0x1663   :  { %v2453_v62 = vmul.f32 0.03125, %v2451_v23  ;;  %v2456_v42 = vmul.f32 %v2454_v59, %v2454_v59  ;;  %v12939_v23 = vpack.c.bf16 %v9271_v32, %v9267_v18  ;;  %v9266_v18 = vld [vmem:[%s14755_s11 + $0x90] sm:$0xff] }
0x1664   :  { %11051 = vmatprep.subr.bf16.mxu1 %v12921_v35  ;;  %v9270_v32 = vld [vmem:[%s14755_s11 + $0xb0] sm:$0xff] }
0x1665   :  { %v2455_v30 = vsub.f32 %v2445_v5, %v2453_v62  ;;  %v2458_v40 = vsel %vm287_vm3, %v2456_v42, 0.0  ;;  %v9276_v5 = vld [vmem:[%s14755_s11 + $0xe0] sm:$0xff]  ;;  %14913 = vst [vmem:[#allocation33_spill] sm:$0xff] %v12939_v23 }
0x1666   :  { %2459 = vadd.xlane.f32.xlu1 %v2458_v40  ;;  %v12929_v50 = vpack.c.bf16 %v9276_v5, %v9272_v21 }
0x1667   :  { %v2457_v41 = vmul.f32 %v2455_v30, %v2455_v30 }
0x1668   :  { %14912 = vst [vmem:[#allocation32_spill] sm:$0xff] %v12929_v50  ;;  %11053 = vmatpush1.bf16.msra.mxu1 %v12929_v50 }
0x1669   :  { %v2461_v46 = vsel %vm287_vm3, %v2457_v41, 0.0  ;;  %11055 = vmatprep.subr.bf16.mxu1 %v12939_v23 }
0x166a   :  { %2462 = vadd.xlane.f32.xlu0 %v2461_v46 }
0x16f3   :  { %v2460_v62 = vpop.xlane.xlu1 %2459 }
0x16f4   :  { %v2464_v42 = vmul.f32 0.03125, %v2460_v62 }
0x16f6   :  { %v2466_v40 = vadd.f32 1e-05, %v2464_v42  ;;  %v9275_v42 = vld [vmem:[%s14755_s11 + $0xd8] sm:$0xff] }
0x16f7   :  { %v2463_v41 = vpop.xlane.xlu0 %2462 }
0x16f8   :  { %11696 = vrsqrt.f32 %v2466_v40  ;;  %v2465_v46 = vmul.f32 0.03125, %v2463_v41  ;;  %v12967_v41 = vpack.c.bf16 %v9270_v32, %v9266_v18 }
0x16fa   :  { %v2467_v16 = vadd.f32 1e-05, %v2465_v46  ;;  %14916 = vst [vmem:[#allocation36_spill] sm:$0xff] %v12967_v41 }
0x16fc   :  { %11698 = vrsqrt.f32 %v2467_v16 }
0x1702   :  { %v11697_v58 = vpop.eup %11696 }
0x1703   :  { %v2470_v21 = vmul.f32 %v11697_v58, %v2454_v59  ;;  %v12971_v58 = vpack.c.bf16 %v9279_v56, %v9275_v42 }
0x1705   :  { %v2476_v5 = vmul.f32 %v2475_v51, %v2470_v21  ;;  %14917 = vst [vmem:[#allocation37_spill] sm:$0xff] %v12971_v58  ;;  %v9274_v21 = vld [vmem:[%s14755_s11 + $0xd0] sm:$0xff] }
0x1706   :  { %v11699_v62 = vpop.eup %11698 }
0x1707   :  { %v2482_v59 = vadd.f32 %v2481_v2, %v2476_v5  ;;  %v2471_v40 = vmul.f32 %v11699_v62, %v2455_v30  ;;  %v12983_v30 = vpack.c.bf16 %v9278_v34, %v9274_v21 }
0x1709   :  { %v12969_v46 = vadd.f32 %v9262_v36, %v2482_v59  ;;  %v2477_v16 = vmul.f32 %v2475_v51, %v2471_v40  ;;  %14918 = vst [vmem:[#allocation38_spill] sm:$0xff] %v12983_v30 }
0x170b   :  { %9296 = vmatmul.mubr.msk.f32.vlgmr.msra.gmra.mrb[30].mxu1 %vm287_vm3, %v12969_v46  ;;  %v2483_v5 = vadd.f32 %v2481_v2, %v2477_v16 }
0x170c   :  { %11057 = vmatpush1.bf16.msra.mxu1 %v12967_v41  ;;  %2605 = vmatprep.mubr.f32.mxu1 %v14910_v25 }
0x170d   :  { %v12985_v51 = vadd.f32 %v9262_v36, %v2483_v5  ;;  %11059 = vmatprep.subr.bf16.mxu1 %v12971_v58 }
0x170f   :  { %9297 = vmatmul.mubr.msk.f32.gmra.mrb[32].mxu1 %vm287_vm3, %v12985_v51 }
0x1710   :  { %11061 = vmatpush1.bf16.msra.mxu1 %v12983_v30  ;;  %2676 = vmatprep.mubr.f32.mxu1 %v14910_v25 }
0x1711   :  { %11063 = vmatprep.subr.bf16.mxu1 %v12226_v29 }
0x1713   :  { %9298 = vmatmul.mubr.msk.f32.vlgmr.msra.gmra.mrb[34].mxu1 %vm287_vm3, %v12969_v46 }
0x1714   :  { %2682 = vmatprep.mubr.f32.mxu1 %v14910_v25  ;;  %11065 = vmatpush3.bf16.msra.mxu1 %v12226_v29 }
0x1715   :  { %11067 = vmatprep.subr.bf16.mxu1 %v12244_v38 }
0x1717   :  { %9299 = vmatmul.mubr.msk.f32.gmra.mrb[36].mxu1 %vm287_vm3, %v12985_v51 }
0x1718   :  { %11069 = vmatpush3.bf16.msra.mxu1 %v12244_v38 }
0x1719   :  { %11071 = vmatprep.subr.bf16.mxu1 %v12264_v47 }
0x171c   :  { %11073 = vmatpush3.bf16.msra.mxu1 %v12264_v47 }
0x171d   :  { %11075 = vmatprep.subr.bf16.mxu1 %v12280_v63 }
0x1720   :  { %11077 = vmatpush3.bf16.msra.mxu1 %v12280_v63 }
0x1721   :  { %11079 = vmatprep.subr.bf16.mxu1 %v12292_v4 }
0x1724   :  { %11081 = vmatpush3.bf16.msra.mxu1 %v12292_v4 }
0x1725   :  { %11083 = vmatprep.subr.bf16.mxu1 %v12302_v10 }
0x1728   :  { %11085 = vmatpush3.bf16.msra.mxu1 %v12302_v10 }
0x1729   :  { %11087 = vmatprep.subr.bf16.mxu1 %v12312_v14 }
0x172c   :  { %11089 = vmatpush3.bf16.msra.mxu1 %v12312_v14 }
0x172d   :  { %11091 = vmatprep.subr.bf16.mxu1 %v12322_v17 }
0x1730   :  { %11093 = vmatpush3.bf16.msra.mxu1 %v12322_v17 }
0x17de   :  { %v13013_v34 = vpop.f32.mrb[30].mxu1 }
0x17df   :  { %v13015_v2 = vpop.f32.mrb[31].mxu1 }
0x17e0   :  { %v2967_v18 = vmul.f32 %v12141_v53, %v13015_v2 }
0x17e2   :  { %v13019_v32 = vpop.f32.mrb[32].mxu1  ;;  %10325 = vmatprep.mubr.f32.mxu0 %v2967_v18 }
0x17e3   :  { %v13021_v62 = vpop.f32.mrb[33].mxu1 }
0x17e6   :  { %v2678_v36 = vpop.f32.mrb[34].mxu1 }
0x17e7   :  { %v2680_v42 = vpop.f32.mrb[35].mxu1 }
0x17e8   :  { %v2733_v56 = vadd.f32 %v2680_v42, %v12159_v0  ;;  %v2689_v59 = vadd.f32 %v2680_v42, %v12155_v60  ;;  %v2777_v5 = vadd.f32 %v2680_v42, %v12169_v6 }
0x17ea   :  { %2735 = vmax.xlane.f32.xlu0 %v2733_v56  ;;  %2691 = vmax.xlane.f32.xlu1 %v2689_v59  ;;  %v2684_v40 = vpop.f32.mrb[36].mxu1 }
0x17eb   :  { %v13025_v16 = vpack.c.bf16 %v2684_v40, %v2678_v36  ;;  %v2686_v21 = vpop.f32.mrb[37].mxu1  ;;  %v2968_v36 = vmul.f32 %v12141_v53, %v13021_v62  ;;  %v2821_v40 = vadd.f32 %v2680_v42, %v12175_v8 }
0x17ec   :  { %v2734_v44 = vadd.f32 %v2686_v21, %v12159_v0  ;;  %v2690_v18 = vadd.f32 %v2686_v21, %v12155_v60  ;;  %v2778_v39 = vadd.f32 %v2686_v21, %v12169_v6  ;;  %v2822_v13 = vadd.f32 %v2686_v21, %v12175_v8 }
0x17ed   :  { %11095 = vmatprep.subr.bf16.mxu0 %v13025_v16 }
0x17ee   :  { %2779 = vmax.xlane.f32.xlu1 %v2777_v5  ;;  %11097 = vmatpush3.bf16.xpose.msra.mxu0 %v13025_v16 }
0x17ef   :  { %2737 = vmax.xlane.f32.xlu0 %v2734_v44 }
0x17f2   :  { %2693 = vmax.xlane.f32.xlu1 %v2690_v18 }
0x17f3   :  { %2781 = vmax.xlane.f32.xlu0 %v2778_v39 }
0x17f5   :  { %10326 = vmatmul.mubr.f32.vlgmr.msra.gmra.mrb[18].mxu0 %v2968_v36 }
0x17f6   :  { %2823 = vmax.xlane.f32.xlu1 %v2821_v40 }
0x17f7   :  { %2825 = vmax.xlane.f32.xlu0 %v2822_v13 }
0x1877   :  { %v2736_v24 = vpop.xlane.xlu0 %2735  ;;  %v2692_v49 = vpop.xlane.xlu1 %2691 }
0x1878   :  { %vm2739_vm2 = vcmp.eq.f32.partialorder %v2733_v56, %v2736_v24  ;;  %vm2695_vm4 = vcmp.eq.f32.partialorder %v2689_v59, %v2692_v49 }
0x1879   :  { %v2741_v45 = vsel %vm2739_vm2, %v12059_v19, 128  ;;  %v2697_v6 = vsel %vm2695_vm4, %v12059_v19, 128 }
0x187a   :  { %v2744_v60 = vshra.s32 %v2741_v45, 16  ;;  %v2700_v0 = vshra.s32 %v2697_v6, 16  ;;  %v2743_v29 = vand.u32 65535, %v2741_v45  ;;  %v2699_v30 = vand.u32 65535, %v2697_v6 }
0x187b   :  { %v2780_v17 = vpop.xlane.xlu1 %2779 }
0x187c   :  { %vm2783_vm5 = vcmp.eq.f32.partialorder %v2777_v5, %v2780_v17  ;;  %v2738_v53 = vpop.xlane.xlu0 %2737  ;;  %v2746_v14 = vcvt.s32.f32 %v2744_v60  ;;  %v2702_v42 = vcvt.s32.f32 %v2700_v0 }
0x187d   :  { %v2785_v36 = vsel %vm2783_vm5, %v12059_v19, 128  ;;  %vm2740_vm7 = vcmp.eq.f32.partialorder %v2734_v44, %v2738_v53 }
0x187e   :  { %v2742_v21 = vsel %vm2740_vm7, %v12059_v19, 128  ;;  %2747 = vmin.xlane.f32.xlu0 %v2746_v14  ;;  %2703 = vmin.xlane.f32.xlu1 %v2702_v42  ;;  %v2788_v24 = vshra.s32 %v2785_v36, 16 }
0x187f   :  { %v2694_v49 = vpop.xlane.xlu1 %2693  ;;  %v2758_v56 = vshra.s32 %v2742_v21, 16 }
0x1880   :  { %v2782_v59 = vpop.xlane.xlu0 %2781  ;;  %vm2696_vm8 = vcmp.eq.f32.partialorder %v2690_v18, %v2694_v49  ;;  %v2790_v8 = vcvt.s32.f32 %v2788_v24 }
0x1881   :  { %vm2784_vm9 = vcmp.eq.f32.partialorder %v2778_v39, %v2782_v59  ;;  %v2698_v10 = vsel %vm2696_vm8, %v12059_v19, 128  ;;  %v2760_v17 = vcvt.s32.f32 %v2758_v56 }
0x1882   :  { %v2786_v60 = vsel %vm2784_vm9, %v12059_v19, 128  ;;  %2791 = vmin.xlane.f32.xlu1 %v2790_v8  ;;  %v2714_v0 = vshra.s32 %v2698_v10, 16 }
0x1883   :  { %2761 = vmin.xlane.f32.xlu0 %v2760_v17  ;;  %v2824_v53 = vpop.xlane.xlu1 %2823  ;;  %v2802_v44 = vshra.s32 %v2786_v60, 16  ;;  %v2801_v45 = vand.u32 65535, %v2786_v60 }
0x1884   :  { %v2826_v5 = vpop.xlane.xlu0 %2825  ;;  %vm2827_vm10 = vcmp.eq.f32.partialorder %v2821_v40, %v2824_v53  ;;  %v2716_v4 = vcvt.s32.f32 %v2714_v0  ;;  %v2787_v40 = vand.u32 65535, %v2785_v36  ;;  %v2745_v53 = vcvt.s32.f32 %v2743_v29 }
0x1885   :  { %vm2828_vm6 = vcmp.eq.f32.partialorder %v2822_v13, %v2826_v5  ;;  %v2829_v63 = vsel %vm2827_vm10, %v12059_v19, 128  ;;  %v2804_v47 = vcvt.s32.f32 %v2802_v44  ;;  %v2701_v5 = vcvt.s32.f32 %v2699_v30 }
0x1886   :  { %v2830_v18 = vsel %vm2828_vm6, %v12059_v19, 128  ;;  %2717 = vmin.xlane.f32.xlu1 %v2716_v4  ;;  %v2832_v39 = vshra.s32 %v2829_v63, 16  ;;  %v2757_v44 = vand.u32 65535, %v2742_v21  ;;  %v2789_v52 = vcvt.s32.f32 %v2787_v40 }
0x1887   :  { %2805 = vmin.xlane.f32.xlu0 %v2804_v47  ;;  %v2846_v24 = vshra.s32 %v2830_v18, 16  ;;  %v2831_v29 = vand.u32 65535, %v2829_v63  ;;  %v2803_v21 = vcvt.s32.f32 %v2801_v45  ;;  %v13048_v63 = vld [vmem:[%s14750_s6] sm:$0xff] }
0x1888   :  { %v2834_v49 = vcvt.s32.f32 %v2832_v39  ;;  %v2713_v39 = vand.u32 65535, %v2698_v10  ;;  %v2759_v23 = vcvt.s32.f32 %v2757_v44 }
0x1889   :  { %v2848_v56 = vcvt.s32.f32 %v2846_v24 }
0x188a   :  { %2835 = vmin.xlane.f32.xlu1 %v2834_v49  ;;  %v2715_v30 = vcvt.s32.f32 %v2713_v39 }
0x188b   :  { %2849 = vmin.xlane.f32.xlu0 %v2848_v56 }
0x18c8   :  { %v10327_v59 = vpop.f32.mrb[18].mxu0 }
0x18c9   :  { %v3035_v38 = vpop.f32.mrb[19].mxu0 }
0x190b   :  { %v2748_v0 = vpop.xlane.xlu0 %2747  ;;  %v2704_v13 = vpop.xlane.xlu1 %2703 }
0x190c   :  { %vm2749_vm12 = vcmp.eq.f32.partialorder %v2746_v14, %v2748_v0  ;;  %vm2705_vm13 = vcmp.eq.f32.partialorder %v2702_v42, %v2704_v13 }
0x190d   :  { %v2750_v58 = vsel %vm2749_vm12, %v2745_v53, inf  ;;  %v2706_v41 = vsel %vm2705_vm13, %v2701_v5, inf  ;;  %v2710_v53 = vcvt.f32.s32 %v2704_v13 }
0x190e   :  { %2751 = vmin.xlane.f32.xlu0 %v2750_v58  ;;  %2707 = vmin.xlane.f32.xlu1 %v2706_v41  ;;  %v2845_v58 = vand.u32 65535, %v2830_v18 }
0x190f   :  { %v2792_v24 = vpop.xlane.xlu1 %2791 }
0x1910   :  { %v2762_v22 = vpop.xlane.xlu0 %2761  ;;  %vm2793_vm14 = vcmp.eq.f32.partialorder %v2790_v8, %v2792_v24  ;;  %v2833_v8 = vcvt.s32.f32 %v2831_v29  ;;  %v2798_v39 = vcvt.f32.s32 %v2792_v24  ;;  %v2711_v29 = vshll.u32 %v2710_v53, 16 }
0x1911   :  { %vm2763_vm0 = vcmp.eq.f32.partialorder %v2760_v17, %v2762_v22  ;;  %v2794_v6 = vsel %vm2793_vm14, %v2789_v52, inf  ;;  %v2847_v17 = vcvt.s32.f32 %v2845_v58 }
0x1912   :  { %v2764_v36 = vsel %vm2763_vm0, %v2759_v23, inf  ;;  %2795 = vmin.xlane.f32.xlu1 %v2794_v6  ;;  %v13051_v23 = vadd.f32 %v13048_v63, %v3035_v38  ;;  %v2799_v58 = vshll.u32 %v2798_v39, 16 }
0x1913   :  { %2765 = vmin.xlane.f32.xlu0 %v2764_v36  ;;  %v2718_v14 = vpop.xlane.xlu1 %2717 }
0x1914   :  { %v2806_v42 = vpop.xlane.xlu0 %2805  ;;  %vm2719_vm2 = vcmp.eq.f32.partialorder %v2716_v4, %v2718_v14 }
0x1915   :  { %vm2807_vm4 = vcmp.eq.f32.partialorder %v2804_v47, %v2806_v42  ;;  %v2720_v10 = vsel %vm2719_vm2, %v2715_v30, inf  ;;  %v13056_v47 = vld [vmem:[%s14750_s6 + $0x8] sm:$0xff]  ;;  %v2724_v30 = vcvt.f32.s32 %v2718_v14 }
0x1916   :  { %v2808_v41 = vsel %vm2807_vm4, %v2803_v21, inf  ;;  %2721 = vmin.xlane.f32.xlu1 %v2720_v10  ;;  %v13059_v52 = vadd.f32 %v13056_v47, %v10327_v59  ;;  %v2768_v59 = vcvt.f32.s32 %v2762_v22 }
0x1917   :  { %2809 = vmin.xlane.f32.xlu0 %v2808_v41  ;;  %v2836_v40 = vpop.xlane.xlu1 %2835  ;;  %v2725_v13 = vshll.u32 %v2724_v30, 16 }
0x1918   :  { %v2850_v60 = vpop.xlane.xlu0 %2849  ;;  %vm2837_vm5 = vcmp.eq.f32.partialorder %v2834_v49, %v2836_v40  ;;  %v3044_v49 = vsel %vm803_vm15, %v13051_v23, -inf  ;;  %v3047_v38 = vsel %vm803_vm15, %v13059_v52, -inf }
0x1919   :  { %vm2851_vm7 = vcmp.eq.f32.partialorder %v2848_v56, %v2850_v60  ;;  %v2838_v4 = vsel %vm2837_vm5, %v2833_v8, inf  ;;  %v2754_v56 = vcvt.f32.s32 %v2748_v0 }
0x191a   :  { %v2852_v18 = vsel %vm2851_vm7, %v2847_v17, inf  ;;  %2839 = vmin.xlane.f32.xlu1 %v2838_v4  ;;  %v2769_v4 = vshll.u32 %v2768_v59, 16 }
0x191b   :  { %2853 = vmin.xlane.f32.xlu0 %v2852_v18  ;;  %v2755_v36 = vshll.u32 %v2754_v56, 16  ;;  %v2812_v18 = vcvt.f32.s32 %v2806_v42 }
0x191d   :  { %v2813_v56 = vshll.u32 %v2812_v18, 16 }
0x191e   :  { %3045 = vmax.xlane.f32.xlu1 %v3044_v49 }
0x191f   :  { %3048 = vmax.xlane.f32.xlu0 %v3047_v38  ;;  %v2842_v38 = vcvt.f32.s32 %v2836_v40 }
0x199b   :  { %v2752_v5 = vpop.xlane.xlu0 %2751  ;;  %v2708_v44 = vpop.xlane.xlu1 %2707 }
0x199c   :  { %v2753_v45 = vcvt.f32.s32 %v2752_v5  ;;  %v2709_v6 = vcvt.f32.s32 %v2708_v44  ;;  %v2856_v5 = vcvt.f32.s32 %v2850_v60  ;;  %v2843_v44 = vshll.u32 %v2842_v38, 16 }
0x199e   :  { %v2756_v10 = vadd.s32 %v2755_v36, %v2753_v45  ;;  %v2712_v41 = vadd.s32 %v2711_v29, %v2709_v6  ;;  %v2857_v6 = vshll.u32 %v2856_v5, 16 }
0x199f   :  { %v2796_v21 = vpop.xlane.xlu1 %2795 }
0x19a0   :  { %v2766_v8 = vpop.xlane.xlu0 %2765  ;;  %v2797_v17 = vcvt.f32.s32 %v2796_v21  ;;  %vm2771_vm8 = vcmp.eq.s32.totalorder %v12059_v19, %v2756_v10  ;;  %vm2727_vm9 = vcmp.eq.s32.totalorder %v12059_v19, %v2712_v41 }
0x19a1   :  { %v2767_v49 = vcvt.f32.s32 %v2766_v8  ;;  %v9302_v39 = vsel %vm2771_vm8, 1.0, %v14910_v25  ;;  %v9300_v40 = vsel %vm2727_vm9, 1.0, %v14910_v25 }
0x19a2   :  { %v2800_v0 = vadd.s32 %v2799_v58, %v2797_v17  ;;  %v2865_v58 = vadd.f32 %v9302_v39, %v9300_v40 }
0x19a3   :  { %v2770_v50 = vadd.s32 %v2769_v4, %v2767_v49  ;;  %v2722_v24 = vpop.xlane.xlu1 %2721 }
0x19a4   :  { %v2810_v22 = vpop.xlane.xlu0 %2809  ;;  %v2723_v14 = vcvt.f32.s32 %v2722_v24  ;;  %vm2815_vm10 = vcmp.eq.s32.totalorder %v12059_v19, %v2800_v0 }
0x19a5   :  { %v2811_v53 = vcvt.f32.s32 %v2810_v22  ;;  %vm2772_vm6 = vcmp.eq.s32.totalorder %v12059_v19, %v2770_v50  ;;  %v9304_v59 = vsel %vm2815_vm10, 1.0, %v14910_v25 }
0x19a6   :  { %v2726_v42 = vadd.s32 %v2725_v13, %v2723_v14  ;;  %v9303_v30 = vsel %vm2772_vm6, 1.0, %v14910_v25  ;;  %v2867_v13 = vadd.f32 %v9304_v59, %v2865_v58 }
0x19a7   :  { %v2814_v45 = vadd.s32 %v2813_v56, %v2811_v53  ;;  %v2840_v60 = vpop.xlane.xlu1 %2839 }
0x19a8   :  { %vm2728_vm12 = vcmp.eq.s32.totalorder %v12059_v19, %v2726_v42  ;;  %v2854_v36 = vpop.xlane.xlu0 %2853  ;;  %v2841_v29 = vcvt.f32.s32 %v2840_v60 }
0x19a9   :  { %vm2816_vm13 = vcmp.eq.s32.totalorder %v12059_v19, %v2814_v45  ;;  %v9301_v50 = vsel %vm2728_vm12, 1.0, %v14910_v25  ;;  %v2855_v21 = vcvt.f32.s32 %v2854_v36 }
0x19aa   :  { %v2866_v10 = vadd.f32 %v9303_v30, %v9301_v50  ;;  %v2844_v41 = vadd.s32 %v2843_v44, %v2841_v29  ;;  %v9305_v8 = vsel %vm2816_vm13, 1.0, %v14910_v25 }
0x19ab   :  { %v2858_v17 = vadd.s32 %v2857_v6, %v2855_v21  ;;  %v3046_v4 = vpop.xlane.xlu1 %3045 }
0x19ac   :  { %v2868_v18 = vadd.f32 %v9305_v8, %v2866_v10  ;;  %vm2859_vm14 = vcmp.eq.s32.totalorder %v12059_v19, %v2844_v41  ;;  %v3049_v49 = vpop.xlane.xlu0 %3048  ;;  %v3050_v0 = vsub.f32 %v13051_v23, %v3046_v4  ;;  %v3182_v41 = vmul.f32 %v12375_v28, %v13021_v62 }
0x19ad   :  { %vm2860_vm0 = vcmp.eq.s32.totalorder %v12059_v19, %v2858_v17  ;;  %v3051_v38 = vsub.f32 %v13059_v52, %v3049_v49  ;;  %v9306_v24 = vsel %vm2859_vm14, 1.0, %v14910_v25  ;;  %v3395_v8 = vmul.f32 %v12400_v7, %v13015_v2 }
0x19ae   :  { %v9307_v5 = vsel %vm2860_vm0, 1.0, %v14910_v25  ;;  %v3052_v22 = vmul.f32 1.442695, %v3050_v0  ;;  %v2869_v14 = vadd.f32 %v9306_v24, %v2867_v13  ;;  %v3396_v17 = vmul.f32 %v12400_v7, %v13021_v62 }
0x19af   :  { %v2870_v56 = vadd.f32 %v9307_v5, %v2868_v18  ;;  %v3054_v53 = vmul.f32 1.442695, %v3051_v38 }
0x19b0   :  { %11700 = vpow2.f32 %v3052_v22  ;;  %10318 = vmatprep.mubr.f32.mxu1 %v2869_v14 }
0x19b1   :  { %11702 = vpow2.f32 %v3054_v53  ;;  %v13083_v42 = vadd.f32 %v2870_v56, %v2869_v14  ;;  %10319 = vmatmul.mubr.f32.vlgmr.msra.gmra.mrb[38].mxu1 %v2870_v56 }
0x19b3   :  { %14919 = vst [vmem:[#allocation39_spill] sm:$0xff] %v13083_v42 }
0x19ba   :  { %v11701_v23 = vpop.eup %11700 }
0x19bb   :  { %v11703_v44 = vpop.eup %11702  ;;  %v3056_v39 = vsel %vm803_vm15, %v11701_v23, 0.0 }
0x19bc   :  { %v3059_v52 = vsel %vm803_vm15, %v11703_v44, 0.0  ;;  %3057 = vadd.xlane.f32.xlu1 %v3056_v39 }
0x19bd   :  { %3060 = vadd.xlane.f32.xlu0 %v3059_v52 }
0x1a49   :  { %v3058_v40 = vpop.xlane.xlu1 %3057 }
0x1a4a   :  { %v3061_v45 = vpop.xlane.xlu0 %3060  ;;  %11704 = vrcp.f32 %v3058_v40 }
0x1a4b   :  { %11706 = vrcp.f32 %v3061_v45 }
0x1a54   :  { %v11705_v60 = vpop.eup %11704 }
0x1a55   :  { %v3064_v6 = vmul.f32 %v11705_v60, %v11701_v23  ;;  %v11707_v59 = vpop.eup %11706 }
0x1a56   :  { %v3065_v36 = vmul.f32 %v11707_v59, %v11703_v44 }
0x1a57   :  { %3066 = vxpose.xlu1.b32.start [1/2] (short) (narrow) %v3064_v6, 16 }
0x1a5b   :  { %3067 = vxpose.xlu1.b32.end [2/2] (short) (narrow) %v3065_v36, 16 }
0x1a84   :  { %v13087_v29 = vpop.f32.mrb[38].mxu1 }
0x1a85   :  { %v2966_v30 = vmul.f32 %v13087_v29, %v13019_v32  ;;  %v13091_v50 = vpop.f32.mrb[39].mxu1 }
0x1a86   :  { %v2965_v21 = vmul.f32 %v13091_v50, %v13013_v34  ;;  %v3181_v34 = vmul.f32 %v12375_v28, %v13015_v2 }
0x1a88   :  { %v13095_v58 = vpack.c.bf16 %v2966_v30, %v2965_v21 }
0x1a8a   :  { %11099 = vmatprep.subr.bf16.mxu0 %v13095_v58  ;;  %11107 = vmatprep.subr.bf16.mxu1 %v13095_v58 }
0x1a8b   :  { %11101 = vmatpush3.bf16.msra.mxu0 %v13095_v58  ;;  %11109 = vmatpush3.bf16.msra.mxu1 %v13095_v58 }
0x1a8c   :  { %11103 = vmatprep.subr.bf16.mxu0 %v13025_v16  ;;  %11115 = vmatprep.subr.bf16.mxu1 %v13095_v58 }
0x1ad7   :  { %v3082_v32 = vpop.trf.xlu1 }
0x1ad8   :  { %10332 = vmatprep.mubr.msk.f32.mxu0 %vm803_vm15, %v3082_v32 }
0x1adb   :  { %v3083_v10 = vpop.trf.xlu1 }
0x1adc   :  { %10333 = vmatmul.mubr.msk.f32.vlgmr.msra.gmra.mrb[20].mxu0 %vm803_vm15, %v3083_v10 }
0x1add   :  { %11105 = vmatpush3.bf16.xpose.msra.mxu0 %v13025_v16  ;;  %10339 = vmatprep.mubr.f32.mxu0 %v3181_v34 }
0x1ade   :  { %11111 = vmatprep.subr.bf16.mxu0 %v13025_v16 }
0x1ae4   :  { %10340 = vmatmul.mubr.f32.vlgmr.msra.gmra.mrb[22].mxu0 %v3182_v41 }
0x1ae5   :  { %11113 = vmatpush3.bf16.xpose.msra.mxu0 %v13025_v16  ;;  %10353 = vmatprep.mubr.f32.mxu0 %v3395_v8 }
0x1ae6   :  { %11123 = vmatprep.subr.bf16.mxu0 %v13095_v58 }
0x1aec   :  { %10354 = vmatmul.mubr.f32.vlgmr.msra.gmra.mrb[24].mxu0 %v3396_v17 }
0x1aed   :  { %11125 = vmatpush3.bf16.msra.mxu0 %v13095_v58 }
0x1aee   :  { %11127 = vmatprep.subr.bf16.mxu0 %v12461_v61 }
0x1baf   :  { %v13119_v4 = vpop.f32.mrb[20].mxu0 }
0x1bb0   :  { %v13121_v18 = vpop.f32.mrb[21].mxu0 }
0x1bb7   :  { %v10341_v49 = vpop.f32.mrb[22].mxu0 }
0x1bb8   :  { %v3249_v0 = vpop.f32.mrb[23].mxu0  ;;  %v3255_v38 = vadd.f32 %v13056_v47, %v10341_v49 }
0x1bb9   :  { %v3250_v13 = vadd.f32 %v13048_v63, %v3249_v0 }
0x1bba   :  { %v3261_v22 = vsel %vm803_vm15, %v3255_v38, -inf }
0x1bbb   :  { %v3258_v24 = vsel %vm803_vm15, %v3250_v13, -inf }
0x1bbc   :  { %3259 = vmax.xlane.f32.xlu0 %v3258_v24 }
0x1bbf   :  { %v10355_v5 = vpop.f32.mrb[24].mxu0 }
0x1bc0   :  { %v3463_v14 = vpop.f32.mrb[25].mxu0  ;;  %3262 = vmax.xlane.f32.xlu0 %v3261_v22  ;;  %v3469_v53 = vadd.f32 %v13056_v47, %v10355_v5 }
0x1bc1   :  { %v3464_v56 = vadd.f32 %v13048_v63, %v3463_v14 }
0x1bc2   :  { %v3475_v44 = vsel %vm803_vm15, %v3469_v53, -inf }
0x1bc3   :  { %v3472_v23 = vsel %vm803_vm15, %v3464_v56, -inf }
0x1bc4   :  { %3473 = vmax.xlane.f32.xlu0 %v3472_v23 }
0x1bc8   :  { %3476 = vmax.xlane.f32.xlu0 %v3475_v44 }
0x1c49   :  { %v3260_v39 = vpop.xlane.xlu0 %3259 }
0x1c4a   :  { %v3264_v52 = vsub.f32 %v3250_v13, %v3260_v39 }
0x1c4c   :  { %v3266_v40 = vmul.f32 1.442695, %v3264_v52 }
0x1c4d   :  { %v3263_v45 = vpop.xlane.xlu0 %3262 }
0x1c4e   :  { %11708 = vpow2.f32 %v3266_v40  ;;  %v3265_v60 = vsub.f32 %v3255_v38, %v3263_v45 }
0x1c50   :  { %v3268_v6 = vmul.f32 1.442695, %v3265_v60 }
0x1c51   :  { %v3474_v59 = vpop.xlane.xlu0 %3473 }
0x1c52   :  { %11710 = vpow2.f32 %v3268_v6  ;;  %v3478_v36 = vsub.f32 %v3464_v56, %v3474_v59 }
0x1c54   :  { %v3480_v30 = vmul.f32 1.442695, %v3478_v36 }
0x1c55   :  { %v3477_v21 = vpop.xlane.xlu0 %3476 }
0x1c56   :  { %11712 = vpow2.f32 %v3480_v30  ;;  %v3479_v32 = vsub.f32 %v3469_v53, %v3477_v21  ;;  %v3609_v30 = vmul.f32 %v12413_v12, %v13015_v2  ;;  %v3610_v21 = vmul.f32 %v12413_v12, %v13021_v62 }
0x1c58   :  { %v11709_v10 = vpop.eup %11708  ;;  %v3482_v34 = vmul.f32 1.442695, %v3479_v32 }
0x1c59   :  { %v3270_v41 = vsel %vm803_vm15, %v11709_v10, 0.0 }
0x1c5a   :  { %11714 = vpow2.f32 %v3482_v34  ;;  %3271 = vadd.xlane.f32.xlu0 %v3270_v41  ;;  %v3179_v41 = vmul.f32 %v12427_v57, %v13121_v18 }
0x1c5c   :  { %v11711_v8 = vpop.eup %11710 }
0x1c5d   :  { %v3273_v17 = vsel %vm803_vm15, %v11711_v8, 0.0 }
0x1c5e   :  { %3274 = vadd.xlane.f32.xlu0 %v3273_v17 }
0x1c60   :  { %v11713_v49 = vpop.eup %11712 }
0x1c61   :  { %v3484_v0 = vsel %vm803_vm15, %v11713_v49, 0.0 }
0x1c62   :  { %3485 = vadd.xlane.f32.xlu0 %v3484_v0 }
0x1c64   :  { %v11715_v13 = vpop.eup %11714 }
0x1c65   :  { %v3487_v38 = vsel %vm803_vm15, %v11715_v13, 0.0 }
0x1c66   :  { %3488 = vadd.xlane.f32.xlu0 %v3487_v38 }
0x1ce7   :  { %v3272_v24 = vpop.xlane.xlu0 %3271 }
0x1ce8   :  { %11716 = vrcp.f32 %v3272_v24 }
0x1ceb   :  { %v3275_v5 = vpop.xlane.xlu0 %3274 }
0x1cec   :  { %11718 = vrcp.f32 %v3275_v5 }
0x1cef   :  { %v3486_v22 = vpop.xlane.xlu0 %3485 }
0x1cf0   :  { %11720 = vrcp.f32 %v3486_v22 }
0x1cf2   :  { %v11717_v14 = vpop.eup %11716 }
0x1cf3   :  { %v3489_v56 = vpop.xlane.xlu0 %3488  ;;  %v3278_v53 = vmul.f32 %v11717_v14, %v11709_v10 }
0x1cf4   :  { %11722 = vrcp.f32 %v3489_v56 }
0x1cf5   :  { %3280 = vxpose.xlu0.b32.start [1/2] (short) (narrow) %v3278_v53, 16 }
0x1cf6   :  { %v11719_v23 = vpop.eup %11718 }
0x1cf7   :  { %v3279_v44 = vmul.f32 %v11719_v23, %v11711_v8 }
0x1cf9   :  { %3281 = vxpose.xlu0.b32.end [2/2] (short) (narrow) %v3279_v44, 16 }
0x1cfa   :  { %v11721_v39 = vpop.eup %11720 }
0x1cfb   :  { %v3492_v52 = vmul.f32 %v11721_v39, %v11713_v49 }
0x1cfd   :  { %3494 = vxpose.xlu1.b32.start [1/2] (short) (narrow) %v3492_v52, 16 }
0x1cfe   :  { %v11723_v40 = vpop.eup %11722 }
0x1cff   :  { %v3493_v45 = vmul.f32 %v11723_v40, %v11715_v13 }
0x1d01   :  { %3495 = vxpose.xlu1.b32.end [2/2] (short) (narrow) %v3493_v45, 16 }
0x1d75   :  { %v3296_v60 = vpop.trf.xlu0 }
0x1d76   :  { %10346 = vmatprep.mubr.msk.f32.mxu1 %vm803_vm15, %v3296_v60 }
0x1d79   :  { %v3297_v6 = vpop.trf.xlu0 }
0x1d7a   :  { %10347 = vmatmul.mubr.msk.f32.vlgmr.msra.gmra.mrb[40].mxu1 %vm803_vm15, %v3297_v6 }
0x1d7b   :  { %11117 = vmatpush3.bf16.msra.mxu1 %v13095_v58  ;;  %v3180_v58 = vmul.f32 %v13119_v4, %v12427_v57 }
0x1d7c   :  { %11119 = vmatprep.subr.bf16.mxu1 %v13025_v16 }
0x1d7d   :  { %v3510_v59 = vpop.trf.xlu1 }
0x1d7e   :  { %10360 = vmatprep.mubr.msk.f32.mxu1 %vm803_vm15, %v3510_v59 }
0x1d81   :  { %v3511_v36 = vpop.trf.xlu1 }
0x1d82   :  { %10361 = vmatmul.mubr.msk.f32.vlgmr.msra.gmra.mrb[42].mxu1 %vm803_vm15, %v3511_v36 }
0x1d83   :  { %10367 = vmatprep.mubr.f32.mxu1 %v3609_v30 }
0x1d84   :  { %11121 = vmatpush3.bf16.xpose.msra.mxu1 %v13025_v16 }
0x1d8b   :  { %10368 = vmatmul.mubr.f32.vlgmr.msra.gmra.mrb[44].mxu1 %v3610_v21 }
0x1e4d   :  { %v10348_v32 = vpop.f32.mrb[40].mxu1 }
0x1e4e   :  { %v3394_v10 = vmul.f32 %v10348_v32, %v12430_v55  ;;  %v3384_v34 = vpop.f32.mrb[41].mxu1 }
0x1e4f   :  { %v3393_v2 = vmul.f32 %v12430_v55, %v3384_v34  ;;  %v9281_v34 = vld [vmem:[%s14756_s12 + $0x88] sm:$0xff] }
0x1e50   :  { %v3824_v8 = vadd.f32 %v3394_v10, %v3180_v58  ;;  %v9280_v10 = vld [vmem:[%s14756_s12 + $0x80] sm:$0xff] }
0x1e51   :  { %v3823_v17 = vadd.f32 %v3393_v2, %v3179_v41  ;;  %v9282_v41 = vld [vmem:[%s14756_s12 + $0x90] sm:$0xff]  ;;  %v13190_v2 = vpack.c.bf16 %v9281_v34, %v9280_v10 }
0x1e53   :  { %11159 = vmatprep.subr.bf16.mxu1 %v13190_v2 }
0x1e54   :  { %11161 = vmatpush3.bf16.msra.mxu1 %v13190_v2 }
0x1e55   :  { %v10362_v49 = vpop.f32.mrb[42].mxu1 }
0x1e56   :  { %v3608_v16 = vmul.f32 %v10362_v49, %v12584_v11  ;;  %v3598_v0 = vpop.f32.mrb[43].mxu1  ;;  %v9284_v49 = vld [vmem:[%s14756_s12 + $0xa0] sm:$0xff] }
0x1e57   :  { %v3607_v62 = vmul.f32 %v12584_v11, %v3598_v0 }
0x1e58   :  { %v13154_v13 = vadd.f32 %v3824_v8, %v3608_v16  ;;  %v9283_v8 = vld [vmem:[%s14756_s12 + $0x98] sm:$0xff]  ;;  %v9285_v16 = vld [vmem:[%s14756_s12 + $0xa8] sm:$0xff] }
0x1e59   :  { %v13156_v38 = vadd.f32 %v3823_v17, %v3607_v62  ;;  %v13195_v17 = vpack.c.bf16 %v9283_v8, %v9282_v41  ;;  %v13206_v0 = vpack.c.bf16 %v9285_v16, %v9284_v49  ;;  %v9286_v62 = vld [vmem:[%s14756_s12 + $0xb0] sm:$0xff] }
0x1e5b   :  { %11163 = vmatprep.subr.bf16.mxu1 %v13195_v17 }
0x1e5c   :  { %11165 = vmatpush3.bf16.msra.mxu1 %v13195_v17 }
0x1e5d   :  { %11167 = vmatprep.subr.bf16.mxu1 %v13206_v0 }
0x1e5e   :  { %v10369_v4 = vpop.f32.mrb[44].mxu1 }
0x1e5f   :  { %v3683_v24 = vadd.f32 %v13056_v47, %v10369_v4  ;;  %v3677_v5 = vpop.f32.mrb[45].mxu1  ;;  %v9287_v4 = vld [vmem:[%s14756_s12 + $0xb8] sm:$0xff] }
0x1e60   :  { %v3678_v18 = vadd.f32 %v13048_v63, %v3677_v5  ;;  %v9288_v5 = vld [vmem:[%s14756_s12 + $0xc0] sm:$0xff]  ;;  %11169 = vmatpush3.bf16.msra.mxu1 %v13206_v0 }
0x1e61   :  { %v3689_v22 = vsel %vm803_vm15, %v3683_v24, -inf }
0x1e62   :  { %3690 = vmax.xlane.f32.xlu0 %v3689_v22  ;;  %v3686_v14 = vsel %vm803_vm15, %v3678_v18, -inf }
0x1e63   :  { %3687 = vmax.xlane.f32.xlu1 %v3686_v14  ;;  %v9290_v14 = vld [vmem:[%s14756_s12 + $0xd0] sm:$0xff] }
0x1eef   :  { %v3691_v56 = vpop.xlane.xlu0 %3690 }
0x1ef0   :  { %v3693_v53 = vsub.f32 %v3683_v24, %v3691_v56  ;;  %v3688_v23 = vpop.xlane.xlu1 %3687  ;;  %v13216_v24 = vpack.c.bf16 %v9287_v4, %v9286_v62  ;;  %v9291_v56 = vld [vmem:[%s14756_s12 + $0xd8] sm:$0xff] }
0x1ef1   :  { %v3692_v44 = vsub.f32 %v3678_v18, %v3688_v23  ;;  %v9289_v18 = vld [vmem:[%s14756_s12 + $0xc8] sm:$0xff]  ;;  %v9292_v23 = vld [vmem:[%s14756_s12 + $0xe0] sm:$0xff] }
0x1ef2   :  { %v3696_v39 = vmul.f32 1.442695, %v3693_v53  ;;  %11171 = vmatprep.subr.bf16.mxu1 %v13216_v24  ;;  %v13226_v22 = vpack.c.bf16 %v9289_v18, %v9288_v5  ;;  %v13236_v53 = vpack.c.bf16 %v9291_v56, %v9290_v14 }
0x1ef3   :  { %v3694_v52 = vmul.f32 1.442695, %v3692_v44  ;;  %11173 = vmatpush3.bf16.msra.mxu1 %v13216_v24  ;;  %v9293_v44 = vld [vmem:[%s14756_s12 + $0xe8] sm:$0xff] }
0x1ef4   :  { %11175 = vmatprep.subr.bf16.mxu1 %v13226_v22 }
0x1ef5   :  { %11724 = vpow2.f32 %v3694_v52 }
0x1ef6   :  { %11726 = vpow2.f32 %v3696_v39  ;;  %v13246_v39 = vpack.c.bf16 %v9293_v44, %v9292_v23  ;;  %v9317_v23 = vld [vmem:[%s14758_s14 + $0x28] sm:$0xff] }
0x1ef7   :  { %11177 = vmatpush3.bf16.msra.mxu1 %v13226_v22 }
0x1ef8   :  { %11179 = vmatprep.subr.bf16.mxu1 %v13236_v53 }
0x1efb   :  { %11181 = vmatpush3.bf16.msra.mxu1 %v13236_v53 }
0x1efc   :  { %11183 = vmatprep.subr.bf16.mxu1 %v13246_v39 }
0x1eff   :  { %v11725_v40 = vpop.eup %11724  ;;  %11185 = vmatpush3.bf16.msra.mxu1 %v13246_v39 }
0x1f00   :  { %v3698_v47 = vsel %vm803_vm15, %v11725_v40, 0.0  ;;  %v11727_v45 = vpop.eup %11726 }
0x1f01   :  { %3699 = vadd.xlane.f32.xlu1 %v3698_v47  ;;  %v3701_v63 = vsel %vm803_vm15, %v11727_v45, 0.0 }
0x1f05   :  { %3702 = vadd.xlane.f32.xlu1 %v3701_v63 }
0x1f8e   :  { %v3700_v60 = vpop.xlane.xlu1 %3699 }
0x1f8f   :  { %11728 = vrcp.f32 %v3700_v60 }
0x1f92   :  { %v3703_v6 = vpop.xlane.xlu1 %3702 }
0x1f93   :  { %11730 = vrcp.f32 %v3703_v6  ;;  %v9294_v6 = vld [vmem:[%s14756_s12 + $0xf0] sm:$0xff] }
0x1f99   :  { %v11729_v59 = vpop.eup %11728 }
0x1f9a   :  { %v3706_v36 = vmul.f32 %v11729_v59, %v11725_v40  ;;  %v9295_v59 = vld [vmem:[%s14756_s12 + $0xf8] sm:$0xff] }
0x1f9c   :  { %3708 = vxpose.xlu1.b32.start [1/2] (short) (narrow) %v3706_v36, 16  ;;  %v13261_v36 = vpack.c.bf16 %v9295_v59, %v9294_v6 }
0x1f9d   :  { %v11731_v30 = vpop.eup %11730 }
0x1f9e   :  { %v3707_v21 = vmul.f32 %v11731_v30, %v11727_v45  ;;  %11187 = vmatprep.subr.bf16.mxu1 %v13261_v36 }
0x1f9f   :  { %11189 = vmatpush3.bf16.msra.mxu1 %v13261_v36 }
0x1fa0   :  { %3709 = vxpose.xlu1.b32.end [2/2] (short) (narrow) %v3707_v21, 16 }
0x201c   :  { %v3724_v32 = vpop.trf.xlu1 }
0x201d   :  { %10374 = vmatprep.mubr.msk.f32.mxu0 %vm803_vm15, %v3724_v32  ;;  %v11886_v32 = vld [vmem:[%s14751_s7] sm:$0xff] }
0x2020   :  { %v3725_v58 = vpop.trf.xlu1 }
0x2021   :  { %10375 = vmatmul.mubr.msk.f32.vlgmr.msra.gmra.mrb[26].mxu0 %vm803_vm15, %v3725_v58 }
0x2022   :  { %11129 = vmatpush3.bf16.msra.mxu0 %v12461_v61 }
0x2023   :  { %11131 = vmatprep.subr.bf16.mxu0 %v12473_v1 }
0x2026   :  { %11133 = vmatpush3.bf16.msra.mxu0 %v12473_v1 }
0x2027   :  { %11135 = vmatprep.subr.bf16.mxu0 %v12484_v27 }
0x202a   :  { %11137 = vmatpush3.bf16.msra.mxu0 %v12484_v27 }
0x202b   :  { %11139 = vmatprep.subr.bf16.mxu0 %v12494_v26 }
0x202e   :  { %11141 = vmatpush3.bf16.msra.mxu0 %v12494_v26 }
0x202f   :  { %11143 = vmatprep.subr.bf16.mxu0 %v12504_v15 }
0x2032   :  { %11145 = vmatpush3.bf16.msra.mxu0 %v12504_v15 }
0x2033   :  { %11147 = vmatprep.subr.bf16.mxu0 %v12515_v54 }
0x2036   :  { %11149 = vmatpush3.bf16.msra.mxu0 %v12515_v54 }
0x2037   :  { %11151 = vmatprep.subr.bf16.mxu0 %v12525_v31 }
0x203a   :  { %11153 = vmatpush3.bf16.msra.mxu0 %v12525_v31 }
0x203b   :  { %11155 = vmatprep.subr.bf16.mxu0 %v12535_v37 }
0x203e   :  { %11157 = vmatpush3.bf16.msra.mxu0 %v12535_v37 }
0x20f4   :  { %v10376_v52 = vpop.f32.mrb[26].mxu0 }
0x20f5   :  { %v3822_v40 = vmul.f32 %v10376_v52, %v12591_v33  ;;  %v3812_v47 = vpop.f32.mrb[27].mxu0  ;;  %v9318_v52 = vld [vmem:[%s14758_s14 + $0x30] sm:$0xff] }
0x20f6   :  { %v3821_v45 = vmul.f32 %v12591_v33, %v3812_v47 }
0x20f7   :  { %v3828_v63 = vadd.f32 %v13154_v13, %v3822_v40  ;;  %v9319_v40 = vld [vmem:[%s14758_s14 + $0x38] sm:$0xff] }
0x20f8   :  { %v3827_v60 = vadd.f32 %v13156_v38, %v3821_v45  ;;  %v13293_v47 = vpack.c.bf16 %v9319_v40, %v9318_v52 }
0x20fa   :  { %10409 = vmatprep.mubr.f32.mxu0 %v3827_v60  ;;  %14920 = vst [vmem:[#allocation40_spill] sm:$0xff] %v13293_v47 }
0x20fb   :  { %10410 = vmatmul.mubr.f32.vlgmr.msra.gmra.mrb[28].mxu0 %v3828_v63 }
0x21ce   :  { %v10411_v30 = vpop.f32.mrb[28].mxu0 }
0x21cf   :  { %v3905_v13 = vmul.f32 %v10411_v30, %v13087_v29  ;;  %v3895_v38 = vpop.f32.mrb[29].mxu0 }
0x21d0   :  { %v3904_v21 = vmul.f32 %v3895_v38, %v13091_v50 }
0x21d2   :  { %10444 = vmatprep.mubr.f32.mxu1 %v3904_v21 }
0x21d3   :  { %10445 = vmatmul.mubr.f32.vlgmr.msra.gmra.mrb[46].mxu1 %v3905_v13  ;;  %v13302_v13 = vld [vmem:[%s14757_s13 + $0x4] sm:$0xf] }
0x21d4   :  { %10462 = vmatprep.mubr.msk.f32.mxu1 %vm803_vm15, %v11886_v32  ;;  %v13306_v38 = vrot.slane %v13302_v13, %v12626_v3 }
0x21d6   :  { %14921 = vst [vmem:[#allocation41_spill] sm:$0xff] %v13306_v38 }
0x22a6   :  { %v10446_v58 = vpop.f32.mrb[46].mxu1 }
0x22a7   :  { %v3972_v10 = vpop.f32.mrb[47].mxu1  ;;  %v3982_v41 = vadd.f32 %v10446_v58, %v12985_v51  ;;  %v9316_v51 = vld [vmem:[%s14758_s14 + $0x20] sm:$0xff]  ;;  %v13310_v58 = vrot.slane %v13302_v13, %v12634_v9 }
0x22a8   :  { %v3981_v34 = vadd.f32 %v3972_v10, %v12969_v46  ;;  %v13283_v44 = vpack.c.bf16 %v9317_v23, %v9316_v51 }
0x22a9   :  { %v3986_v29 = vsel %vm287_vm3, %v3982_v41, 0.0  ;;  %14922 = vst [vmem:[#allocation42_spill] sm:$0xff] %v13310_v58 }
0x22aa   :  { %v3983_v8 = vsel %vm287_vm3, %v3981_v34, 0.0  ;;  %11191 = vmatprep.subr.bf16.mxu0 %v13283_v44 }
0x22ab   :  { %3984 = vadd.xlane.f32.xlu0 %v3983_v8  ;;  %11193 = vmatpush3.bf16.msra.mxu0 %v13283_v44 }
0x22ac   :  { %11195 = vmatprep.subr.bf16.mxu0 %v13293_v47 }
0x22af   :  { %3987 = vadd.xlane.f32.xlu0 %v3986_v29  ;;  %11197 = vmatpush3.bf16.msra.mxu0 %v13293_v47 }
0x22b0   :  { %9374 = vmatprep.subr.msk.mxu0 %vm2242_vm1, %v12759_v20 }
0x2338   :  { %v3985_v50 = vpop.xlane.xlu0 %3984 }
0x2339   :  { %v3989_v49 = vmul.f32 0.03125, %v3985_v50 }
0x233b   :  { %v3991_v16 = vsub.f32 %v3981_v34, %v3989_v49  ;;  %v11887_v49 = vld [vmem:[%s14754_s10] sm:$0xff] }
0x233c   :  { %v3988_v62 = vpop.xlane.xlu0 %3987 }
0x233d   :  { %v3990_v4 = vmul.f32 0.03125, %v3988_v62  ;;  %v3993_v5 = vmul.f32 %v3991_v16, %v3991_v16 }
0x233f   :  { %v3992_v18 = vsub.f32 %v3982_v41, %v3990_v4  ;;  %v3995_v14 = vsel %vm287_vm3, %v3993_v5, 0.0 }
0x2340   :  { %3996 = vadd.xlane.f32.xlu0 %v3995_v14 }
0x2341   :  { %v3994_v56 = vmul.f32 %v3992_v18, %v3992_v18 }
0x2343   :  { %v3998_v46 = vsel %vm287_vm3, %v3994_v56, 0.0 }
0x2344   :  { %3999 = vadd.xlane.f32.xlu0 %v3998_v46 }
0x23cd   :  { %v3997_v45 = vpop.xlane.xlu0 %3996 }
0x23ce   :  { %v4001_v63 = vmul.f32 0.03125, %v3997_v45 }
0x23d0   :  { %v4003_v60 = vadd.f32 1e-05, %v4001_v63 }
0x23d1   :  { %v4000_v6 = vpop.xlane.xlu0 %3999 }
0x23d2   :  { %11732 = vrsqrt.f32 %v4003_v60  ;;  %v4002_v59 = vmul.f32 0.03125, %v4000_v6 }
0x23d4   :  { %v4004_v30 = vadd.f32 1e-05, %v4002_v59 }
0x23d6   :  { %11734 = vrsqrt.f32 %v4004_v30 }
0x23dc   :  { %v11733_v21 = vpop.eup %11732 }
0x23dd   :  { %v4007_v32 = vmul.f32 %v11733_v21, %v3991_v16 }
0x23df   :  { %v4013_v10 = vmul.f32 %v13306_v38, %v4007_v32 }
0x23e0   :  { %v11735_v34 = vpop.eup %11734 }
0x23e1   :  { %v4008_v41 = vmul.f32 %v11735_v34, %v3992_v18  ;;  %v13314_v8 = vadd.f32 %v13310_v58, %v4013_v10 }
0x23e3   :  { %10455 = vmatprep.mubr.msk.f32.mxu0 %vm287_vm3, %v13314_v8  ;;  %v4014_v29 = vmul.f32 %v13306_v38, %v4008_v41 }
0x23e5   :  { %v13320_v50 = vadd.f32 %v13310_v58, %v4014_v29 }
0x23e7   :  { %10456 = vmatmul.mubr.msk.f32.vlgmr.msra.gmra.mrb[30].mxu0 %vm287_vm3, %v13320_v50 }
0x23e8   :  { %9375 = vmatpush1.msk.msra.mxu0 %vm2242_vm1, %v11887_v49  ;;  %4539 = vmatprep.mubr.f32.mxu0 %v14910_v25 }
0x24ba   :  { %v10457_v16 = vpop.f32.mrb[30].mxu0 }
0x24bb   :  { %v4140_v62 = vpop.f32.mrb[31].mxu0  ;;  %v4152_v5 = vsel %vm1907_vm11, %v10457_v16, -inf }
0x24bc   :  { %v4149_v4 = vsel %vm1907_vm11, %v4140_v62, -inf }
0x24bd   :  { %4150 = vmax.xlane.f32.xlu0 %v4149_v4 }
0x24c1   :  { %4153 = vmax.xlane.f32.xlu0 %v4152_v5 }
0x254a   :  { %v13331_v18 = vpop.xlane.xlu0 %4150 }
0x254b   :  { %vm4155_vm2 = vcmp.eq.f32.partialorder %v4140_v62, %v13331_v18 }
0x254c   :  { %v4157_v14 = vsel %vm4155_vm2, %v12059_v19, 4 }
0x254d   :  { %v4159_v56 = vsel %vm1907_vm11, %v4157_v14, 2147483647 }
0x254e   :  { %v13336_v46 = vpop.xlane.xlu0 %4153  ;;  %v4161_v51 = vshra.s32 %v4159_v56, 16  ;;  %v4160_v60 = vand.u32 65535, %v4159_v56 }
0x254f   :  { %vm4156_vm4 = vcmp.eq.f32.partialorder %v10457_v16, %v13336_v46 }
0x2550   :  { %v4158_v23 = vsel %vm4156_vm4, %v12059_v19, 4  ;;  %v4163_v52 = vcvt.s32.f32 %v4161_v51  ;;  %v4162_v59 = vcvt.s32.f32 %v4160_v60 }
0x2551   :  { %v4174_v40 = vsel %vm1907_vm11, %v4158_v23, 2147483647 }
0x2552   :  { %4164 = vmin.xlane.f32.xlu0 %v4163_v52  ;;  %v4176_v45 = vshra.s32 %v4174_v40, 16  ;;  %v4175_v30 = vand.u32 65535, %v4174_v40 }
0x2554   :  { %v4178_v63 = vcvt.s32.f32 %v4176_v45  ;;  %v4177_v10 = vcvt.s32.f32 %v4175_v30 }
0x2556   :  { %4179 = vmin.xlane.f32.xlu0 %v4178_v63 }
0x25df   :  { %v4165_v6 = vpop.xlane.xlu0 %4164 }
0x25e0   :  { %vm4166_vm5 = vcmp.eq.f32.partialorder %v4163_v52, %v4165_v6  ;;  %v4171_v41 = vcvt.f32.s32 %v4165_v6 }
0x25e1   :  { %v4167_v21 = vsel %vm4166_vm5, %v4162_v59, inf }
0x25e2   :  { %4168 = vmin.xlane.f32.xlu0 %v4167_v21  ;;  %v4172_v49 = vshll.u32 %v4171_v41, 16 }
0x25e3   :  { %v4180_v32 = vpop.xlane.xlu0 %4179 }
0x25e4   :  { %vm4181_vm7 = vcmp.eq.f32.partialorder %v4178_v63, %v4180_v32  ;;  %v4186_v4 = vcvt.f32.s32 %v4180_v32 }
0x25e5   :  { %v4182_v34 = vsel %vm4181_vm7, %v4177_v10, inf }
0x25e6   :  { %4183 = vmin.xlane.f32.xlu0 %v4182_v34  ;;  %v4187_v23 = vshll.u32 %v4186_v4, 16 }
0x266f   :  { %v4169_v29 = vpop.xlane.xlu0 %4168 }
0x2670   :  { %v4170_v5 = vcvt.f32.s32 %v4169_v29 }
0x2672   :  { %v4173_v14 = vadd.s32 %v4172_v49, %v4170_v5 }
0x2673   :  { %v4184_v51 = vpop.xlane.xlu0 %4183 }
0x2674   :  { %vm4189_vm8 = vcmp.eq.s32.totalorder %v12059_v19, %v4173_v14  ;;  %v4185_v56 = vcvt.f32.s32 %v4184_v51 }
0x2675   :  { %v13343_v52 = vsel %vm4189_vm8, 1.0, %v14910_v25 }
0x2676   :  { %14923 = vst [vmem:[#allocation43_spill] sm:$0xff] %v13343_v52  ;;  %v4188_v40 = vadd.s32 %v4187_v23, %v4185_v56  ;;  %vm4195_vm9 = vcmp.gt.f32.partialorder %v13343_v52, 0.0 }
0x2677   :  { %v4197_v45 = vsel %vm4195_vm9, -1e+30, %v4140_v62 }
0x2678   :  { %vm4190_vm10 = vcmp.eq.s32.totalorder %v12059_v19, %v4188_v40  ;;  %v4199_v63 = vsel %vm1907_vm11, %v4197_v45, -inf }
0x2679   :  { %v13349_v60 = vsel %vm4190_vm10, 1.0, %v14910_v25  ;;  %4200 = vmax.xlane.f32.xlu1 %v4199_v63 }
0x267a   :  { %14924 = vst [vmem:[#allocation44_spill] sm:$0xff] %v13349_v60  ;;  %vm4196_vm6 = vcmp.gt.f32.partialorder %v13349_v60, 0.0 }
0x267b   :  { %v4198_v6 = vsel %vm4196_vm6, -1e+30, %v10457_v16 }
0x267c   :  { %v4202_v59 = vsel %vm1907_vm11, %v4198_v6, -inf }
0x267d   :  { %4203 = vmax.xlane.f32.xlu0 %v4202_v59 }
0x2706   :  { %v13353_v30 = vpop.xlane.xlu1 %4200 }
0x2707   :  { %vm4205_vm12 = vcmp.eq.f32.partialorder %v4197_v45, %v13353_v30 }
0x2708   :  { %v4207_v62 = vsel %vm4205_vm12, %v12059_v19, 4 }
0x2709   :  { %v4209_v21 = vsel %vm1907_vm11, %v4207_v62, 2147483647 }
0x270a   :  { %v13358_v32 = vpop.xlane.xlu0 %4203  ;;  %v4211_v10 = vshra.s32 %v4209_v21, 16  ;;  %v4210_v4 = vand.u32 65535, %v4209_v21 }
0x270b   :  { %vm4206_vm13 = vcmp.eq.f32.partialorder %v4198_v6, %v13358_v32 }
0x270c   :  { %v4208_v34 = vsel %vm4206_vm13, %v12059_v19, 4  ;;  %v4213_v41 = vcvt.s32.f32 %v4211_v10  ;;  %v4212_v14 = vcvt.s32.f32 %v4210_v4  ;;  %v9321_v4 = vld [vmem:[%s14759_s15 + $0x48] sm:$0xff] }
0x270d   :  { %v4224_v16 = vsel %vm1907_vm11, %v4208_v34, 2147483647 }
0x270e   :  { %4214 = vmin.xlane.f32.xlu0 %v4213_v41  ;;  %v4226_v29 = vshra.s32 %v4224_v16, 16  ;;  %v4225_v51 = vand.u32 65535, %v4224_v16 }
0x2710   :  { %v4228_v49 = vcvt.s32.f32 %v4226_v29  ;;  %v4227_v40 = vcvt.s32.f32 %v4225_v51 }
0x2712   :  { %4229 = vmin.xlane.f32.xlu0 %v4228_v49 }
0x279b   :  { %v4215_v5 = vpop.xlane.xlu0 %4214 }
0x279c   :  { %vm4216_vm14 = vcmp.eq.f32.partialorder %v4213_v41, %v4215_v5  ;;  %v4221_v63 = vcvt.f32.s32 %v4215_v5  ;;  %v9323_v5 = vld [vmem:[%s14759_s15 + $0x58] sm:$0xff] }
0x279d   :  { %v4217_v23 = vsel %vm4216_vm14, %v4212_v14, inf }
0x279e   :  { %4218 = vmin.xlane.f32.xlu0 %v4217_v23  ;;  %v4222_v59 = vshll.u32 %v4221_v63, 16  ;;  %v13381_v23 = vpack.c.bf16 %v9323_v5, %v9321_v4  ;;  %v9327_v63 = vld [vmem:[%s14759_s15 + $0x78] sm:$0xff] }
0x279f   :  { %v4230_v56 = vpop.xlane.xlu0 %4229 }
0x27a0   :  { %vm4231_vm0 = vcmp.eq.f32.partialorder %v4228_v49, %v4230_v56  ;;  %v4236_v62 = vcvt.f32.s32 %v4230_v56  ;;  %14927 = vst [vmem:[#allocation47_spill] sm:$0xff] %v13381_v23  ;;  %v9320_v56 = vld [vmem:[%s14759_s15 + $0x40] sm:$0xff] }
0x27a1   :  { %v4232_v45 = vsel %vm4231_vm0, %v4227_v40, inf  ;;  %v9322_v40 = vld [vmem:[%s14759_s15 + $0x50] sm:$0xff] }
0x27a2   :  { %4233 = vmin.xlane.f32.xlu0 %v4232_v45  ;;  %v4237_v42 = vshll.u32 %v4236_v62, 16  ;;  %v9325_v45 = vld [vmem:[%s14759_s15 + $0x68] sm:$0xff]  ;;  %v9324_v62 = vld [vmem:[%s14759_s15 + $0x60] sm:$0xff] }
0x282b   :  { %v4219_v6 = vpop.xlane.xlu0 %4218 }
0x282c   :  { %v4220_v10 = vcvt.f32.s32 %v4219_v6  ;;  %v13395_v6 = vpack.c.bf16 %v9322_v40, %v9320_v56 }
0x282e   :  { %v4223_v34 = vadd.s32 %v4222_v59, %v4220_v10  ;;  %14928 = vst [vmem:[#allocation48_spill] sm:$0xff] %v13395_v6  ;;  %v13398_v59 = vpack.c.bf16 %v9327_v63, %v9325_v45  ;;  %v9326_v10 = vld [vmem:[%s14759_s15 + $0x70] sm:$0xff] }
0x282f   :  { %v4234_v29 = vpop.xlane.xlu0 %4233 }
0x2830   :  { %vm4239_vm2 = vcmp.eq.s32.totalorder %v12059_v19, %v4223_v34  ;;  %v4235_v21 = vcvt.f32.s32 %v4234_v29  ;;  %14929 = vst [vmem:[#allocation49_spill] sm:$0xff] %v13398_v59  ;;  %v11888_v34 = vld [vmem:[%s14751_s7 + $0x8] sm:$0xff]  ;;  %v13411_v29 = vpack.c.bf16 %v9326_v10, %v9324_v62 }
0x2831   :  { %v13365_v41 = vsel %vm4239_vm2, 1.0, %v14910_v25 }
0x2832   :  { %v4238_v16 = vadd.s32 %v4237_v42, %v4235_v21  ;;  %14925 = vst [vmem:[#allocation45_spill] sm:$0xff] %v13365_v41  ;;  %v4257_v14 = vadd.f32 %v13365_v41, %v13343_v52  ;;  %14930 = vst [vmem:[#allocation50_spill] sm:$0xff] %v13411_v29  ;;  %v14931_v21 = vld [vmem:[#allocation32_spill] sm:$0xff] }
0x2834   :  { %vm4240_vm4 = vcmp.eq.s32.totalorder %v12059_v19, %v4238_v16  ;;  %v14932_v16 = vld [vmem:[#allocation33_spill] sm:$0xff] }
0x2835   :  { %v13369_v49 = vsel %vm4240_vm4, 1.0, %v14910_v25 }
0x2836   :  { %14926 = vst [vmem:[#allocation46_spill] sm:$0xff] %v13369_v49  ;;  %v4258_v42 = vadd.f32 %v13369_v49, %v13349_v60 }
0x2838   :  { %v11198_v51 = vpack.c.bf16 %v4258_v42, %v4257_v14 }
0x283a   :  { %11199 = vmatprep.subr.bf16.mxu1 %v11198_v51 }
0x283b   :  { %11201 = vmatpush3.bf16.msra.mxu1 %v11198_v51 }
0x283c   :  { %11203 = vmatprep.subr.bf16.mxu1 %v13381_v23 }
0x283e   :  { %10463 = vmatmul.mubr.msk.f32.vlgmr.msra.gmra.mrb[48].mxu1 %vm803_vm15, %v11888_v34 }
0x283f   :  { %11205 = vmatpush1.bf16.msra.mxu1 %v13395_v6  ;;  %4452 = vmatprep.mubr.f32.mxu1 %v14910_v25 }
0x2840   :  { %11207 = vmatprep.subr.bf16.mxu1 %v13398_v59 }
0x2843   :  { %11209 = vmatpush1.bf16.msra.mxu1 %v13411_v29 }
0x2844   :  { %11243 = vmatprep.subr.bf16.mxu1 %v12903_v43 }
0x2846   :  { %9372 = vmatmul.mubr.msk.f32.vlgmr.msra.gmra.mrb[50].mxu1 %vm287_vm3, %v13314_v8 }
0x2847   :  { %4458 = vmatprep.mubr.f32.mxu1 %v14910_v25  ;;  %11245 = vmatpush1.bf16.msra.mxu1 %v12911_v48 }
0x2848   :  { %11247 = vmatprep.subr.bf16.mxu1 %v12921_v35 }
0x284a   :  { %9373 = vmatmul.mubr.msk.f32.gmra.mrb[52].mxu1 %vm287_vm3, %v13320_v50 }
0x284b   :  { %11249 = vmatpush1.bf16.msra.mxu1 %v14931_v21  ;;  %4791 = vmatprep.mubr.f32.mxu1 %v14910_v25 }
0x284c   :  { %11251 = vmatprep.subr.bf16.mxu1 %v14932_v16 }
0x2911   :  { %v10464_v4 = vpop.f32.mrb[48].mxu1 }
0x2912   :  { %v4335_v43 = vadd.f32 1.0, %v10464_v4  ;;  %v4351_v5 = vadd.f32 %v10464_v4, %v13349_v60  ;;  %v4325_v14 = vpop.f32.mrb[49].mxu1 }
0x2913   :  { %v4334_v42 = vadd.f32 1.0, %v4325_v14  ;;  %v4350_v51 = vadd.f32 %v13343_v52, %v4325_v14 }
0x2914   :  { %vm4337_vm5 = vcmp.le.f32.partialorder %v4335_v43, 5.0  ;;  %v4353_v56 = vadd.f32 1.0, %v4351_v5 }
0x2915   :  { %v9369_v48 = vsel %vm4337_vm5, 1.0, %v14910_v25  ;;  %vm4336_vm7 = vcmp.le.f32.partialorder %v4334_v42, 5.0  ;;  %v4352_v35 = vadd.f32 1.0, %v4350_v51 }
0x2916   :  { %v9368_v40 = vsel %vm4336_vm7, 1.0, %v14910_v25  ;;  %v4343_v45 = vmul.f32 %v9369_v48, %v13349_v60  ;;  %vm4355_vm9 = vcmp.le.f32.partialorder %v4353_v56, 5.0  ;;  %v9345_v56 = vld [vmem:[%s14760_s16 + $0x188] sm:$0xff] }
0x2917   :  { %vm4354_vm8 = vcmp.le.f32.partialorder %v4352_v35, 5.0  ;;  %v4342_v62 = vmul.f32 %v9368_v40, %v13343_v52  ;;  %v9371_v43 = vsel %vm4355_vm9, 1.0, %v14910_v25  ;;  %v9344_v35 = vld [vmem:[%s14760_s16 + $0x180] sm:$0xff] }
0x2918   :  { %v4347_v63 = vsel %vm1907_vm11, %v4343_v45, 0.0  ;;  %v9370_v10 = vsel %vm4354_vm8, 1.0, %v14910_v25  ;;  %v4361_v51 = vmul.f32 %v9371_v43, %v13369_v49  ;;  %v13455_v40 = vpack.c.bf16 %v9345_v56, %v9344_v35 }
0x2919   :  { %4348 = vadd.xlane.f32.xlu0 %v4347_v63  ;;  %v13435_v34 = vpop.f32.mrb[50].mxu1  ;;  %v4344_v16 = vsel %vm1907_vm11, %v4342_v62, 0.0  ;;  %v4360_v4 = vmul.f32 %v9370_v10, %v13365_v41  ;;  %v4245_v45 = vsub.f32 %v13353_v30, %v13331_v18  ;;  %v4246_v62 = vsub.f32 %v13358_v32, %v13336_v46 }
0x291a   :  { %v13437_v21 = vpop.f32.mrb[51].mxu1  ;;  %v4365_v48 = vsel %vm1907_vm11, %v4361_v51, 0.0  ;;  %14933 = vst [vmem:[#allocation32_spill] sm:$0xff] %v13455_v40  ;;  %11211 = vmatprep.subr.bf16.mxu0 %v13455_v40 }
0x291b   :  { %v4362_v42 = vsel %vm1907_vm11, %v4360_v4, 0.0  ;;  %v4247_v63 = vmul.f32 1.442695, %v4245_v45  ;;  %v4249_v10 = vmul.f32 1.442695, %v4246_v62 }
0x291d   :  { %v13442_v5 = vpop.f32.mrb[52].mxu1  ;;  %4345 = vadd.xlane.f32.xlu0 %v4344_v16  ;;  %11736 = vpow2.f32 %v4247_v63 }
0x291e   :  { %v13444_v14 = vpop.f32.mrb[53].mxu1  ;;  %11738 = vpow2.f32 %v4249_v10 }
0x2921   :  { %4363 = vadd.xlane.f32.xlu0 %v4362_v42 }
0x2925   :  { %4366 = vadd.xlane.f32.xlu0 %v4365_v48 }
0x2927   :  { %v11737_v16 = vpop.eup %11736 }
0x2928   :  { %v4251_v4 = vadd.f32 1.0, %v11737_v16  ;;  %v11739_v43 = vpop.eup %11738 }
0x2929   :  { %v4252_v42 = vadd.f32 1.0, %v11739_v43 }
0x292a   :  { %11740 = vrcp.f32 %v4251_v4 }
0x292b   :  { %11742 = vrcp.f32 %v4252_v42 }
0x2934   :  { %v11741_v48 = vpop.eup %11740 }
0x2935   :  { %v4255_v56 = vmul.f32 %v11741_v48, %v11737_v16  ;;  %v11743_v18 = vpop.eup %11742 }
0x2936   :  { %v4256_v63 = vmul.f32 %v11743_v18, %v11739_v43  ;;  %v9329_v43 = vld [vmem:[%s14760_s16 + $0x108] sm:$0xff] }
0x29a6   :  { %v13462_v51 = vpop.xlane.xlu0 %4348 }
0x29a7   :  { %14934 = vst [vmem:[#allocation33_spill] sm:$0xff] %v13462_v51  ;;  %v4369_v10 = vmul.f32 %v11743_v18, %v13462_v51 }
0x29aa   :  { %v13464_v35 = vpop.xlane.xlu0 %4345 }
0x29ab   :  { %14935 = vst [vmem:[#allocation51_spill] sm:$0xff] %v13464_v35  ;;  %v4368_v46 = vmul.f32 %v11741_v48, %v13464_v35  ;;  %v9328_v48 = vld [vmem:[%s14760_s16 + $0x100] sm:$0xff]  ;;  %v9330_v35 = vld [vmem:[%s14760_s16 + $0x110] sm:$0xff] }
0x29ae   :  { %v13466_v30 = vpop.xlane.xlu0 %4363 }
0x29af   :  { %14936 = vst [vmem:[#allocation52_spill] sm:$0xff] %v13466_v30  ;;  %v4370_v32 = vmul.f32 %v13466_v30, %v4255_v56  ;;  %v9346_v56 = vld [vmem:[%s14760_s16 + $0x190] sm:$0xff]  ;;  %v9331_v30 = vld [vmem:[%s14760_s16 + $0x118] sm:$0xff] }
0x29b1   :  { %v4372_v45 = vadd.f32 %v4370_v32, %v4368_v46 }
0x29b2   :  { %v13470_v62 = vpop.xlane.xlu0 %4366 }
0x29b3   :  { %14937 = vst [vmem:[#allocation53_spill] sm:$0xff] %v13470_v62  ;;  %v4374_v4 = vadd.f32 1e-09, %v4372_v45  ;;  %v4371_v42 = vmul.f32 %v13470_v62, %v4256_v63  ;;  %v4467_v62 = vmax.f32 %v13442_v5, 0.0 }
0x29b5   :  { %11744 = vrcp.f32 %v4374_v4  ;;  %v4373_v9 = vadd.f32 %v4371_v42, %v4369_v10 }
0x29b7   :  { %v4375_v3 = vadd.f32 1e-09, %v4373_v9  ;;  %v9347_v9 = vld [vmem:[%s14760_s16 + $0x198] sm:$0xff] }
0x29b9   :  { %11746 = vrcp.f32 %v4375_v3 }
0x29bf   :  { %v11745_v16 = vpop.eup %11744 }
0x29c0   :  { %v4378_v29 = vmul.f32 %v11745_v16, %v4368_v46  ;;  %v4380_v59 = vmul.f32 %v11745_v16, %v4370_v32  ;;  %v13488_v32 = vpack.c.bf16 %v9329_v43, %v9328_v48  ;;  %v13490_v16 = vpack.c.bf16 %v9347_v9, %v9346_v56  ;;  %v9332_v9 = vld [vmem:[%s14760_s16 + $0x120] sm:$0xff] }
0x29c1   :  { %v13509_v48 = vpack.c.bf16 %v9331_v30, %v9330_v35  ;;  %v9351_v35 = vld [vmem:[%s14760_s16 + $0x1b8] sm:$0xff] }
0x29c2   :  { %v4382_v3 = vmul.f32 %v13343_v52, %v4378_v29  ;;  %v4384_v18 = vmul.f32 %v13365_v41, %v4380_v59  ;;  %14938 = vst [vmem:[#allocation54_spill] sm:$0xff] %v13488_v32  ;;  %14939 = vst [vmem:[#allocation55_spill] sm:$0xff] %v13490_v16  ;;  %v9348_v59 = vld [vmem:[%s14760_s16 + $0x1a0] sm:$0xff]  ;;  %v9349_v29 = vld [vmem:[%s14760_s16 + $0x1a8] sm:$0xff]  ;;  %v4465_v41 = vmax.f32 %v13435_v34, 0.0 }
0x29c3   :  { %v11747_v46 = vpop.eup %11746  ;;  %14940 = vst [vmem:[#allocation56_spill] sm:$0xff] %v13509_v48  ;;  %v13512_v56 = vpack.c.bf16 %v9349_v29, %v9348_v59  ;;  %v9334_v29 = vld [vmem:[%s14760_s16 + $0x130] sm:$0xff] }
0x29c4   :  { %v4386_v45 = vadd.f32 %v4384_v18, %v4382_v3  ;;  %v4381_v63 = vmul.f32 %v11747_v46, %v4371_v42  ;;  %v4379_v4 = vmul.f32 %v11747_v46, %v4369_v10  ;;  %v9333_v3 = vld [vmem:[%s14760_s16 + $0x128] sm:$0xff]  ;;  %v9350_v18 = vld [vmem:[%s14760_s16 + $0x1b0] sm:$0xff] }
0x29c5   :  { %14941 = vst [vmem:[#allocation57_spill] sm:$0xff] %v13512_v56  ;;  %v13535_v59 = vpack.c.bf16 %v9351_v35, %v9350_v18  ;;  %v9337_v18 = vld [vmem:[%s14760_s16 + $0x148] sm:$0xff]  ;;  %v9354_v35 = vld [vmem:[%s14760_s16 + $0x1d0] sm:$0xff] }
0x29c6   :  { %v4385_v10 = vmul.f32 %v13369_v49, %v4381_v63  ;;  %9376 = vmatmul.mubr.msk.f32.vlgmr.msra.gmra.mrb[32].mxu0 %vm1907_vm11, %v4386_v45  ;;  %v4383_v42 = vmul.f32 %v13349_v60, %v4379_v4  ;;  %v4646_v46 = vsel %vm1907_vm11, %v4386_v45, 0.0  ;;  %v13530_v63 = vpack.c.bf16 %v9333_v3, %v9332_v9  ;;  %v9352_v45 = vld [vmem:[%s14760_s16 + $0x1c0] sm:$0xff] }
0x29c7   :  { %4545 = vmatprep.mubr.f32.mxu0 %v14910_v25  ;;  %11213 = vmatpush3.bf16.msra.mxu0 %v13488_v32  ;;  %14944 = vst [vmem:[#allocation60_spill] sm:$0xff] %v13535_v59  ;;  %v9336_v3 = vld [vmem:[%s14760_s16 + $0x140] sm:$0xff]  ;;  %v4466_v60 = vmax.f32 %v13437_v21, 0.0 }
0x29c8   :  { %v4387_v43 = vadd.f32 %v4385_v10, %v4383_v42  ;;  %11215 = vmatprep.subr.bf16.mxu0 %v13490_v16  ;;  %14942 = vst [vmem:[#allocation58_spill] sm:$0xff] %v13530_v63  ;;  %v9335_v10 = vld [vmem:[%s14760_s16 + $0x138] sm:$0xff]  ;;  %v9353_v42 = vld [vmem:[%s14760_s16 + $0x1c8] sm:$0xff] }
0x29c9   :  { %v13553_v9 = vpack.c.bf16 %v9353_v42, %v9352_v45  ;;  %v9339_v45 = vld [vmem:[%s14760_s16 + $0x158] sm:$0xff]  ;;  %v9356_v42 = vld [vmem:[%s14760_s16 + $0x1e0] sm:$0xff] }
0x29ca   :  { %9377 = vmatmul.mubr.msk.f32.gmra.mrb[34].mxu0 %vm1907_vm11, %v4387_v43  ;;  %v4647_v30 = vsel %vm1907_vm11, %v4387_v43, 0.0  ;;  %v13550_v43 = vpack.c.bf16 %v9335_v10, %v9334_v29  ;;  %v9338_v10 = vld [vmem:[%s14760_s16 + $0x150] sm:$0xff] }
0x29cb   :  { %11217 = vmatpush3.bf16.msra.mxu0 %v13509_v48  ;;  %v13532_v4 = vadd.f32 %v4647_v30, %v4646_v46  ;;  %14946 = vst [vmem:[#allocation62_spill] sm:$0xff] %v13553_v9  ;;  %v9355_v30 = vld [vmem:[%s14760_s16 + $0x1d8] sm:$0xff]  ;;  %v13568_v46 = vpack.c.bf16 %v9337_v18, %v9336_v3  ;;  %v9357_v3 = vld [vmem:[%s14760_s16 + $0x1e8] sm:$0xff]  ;;  %v13586_v18 = vpack.c.bf16 %v9339_v45, %v9338_v10  ;;  %v9358_v10 = vld [vmem:[%s14760_s16 + $0x1f0] sm:$0xff] }
0x29cc   :  { %11219 = vmatprep.subr.bf16.mxu0 %v13512_v56  ;;  %14945 = vst [vmem:[#allocation61_spill] sm:$0xff] %v13550_v43  ;;  %v13571_v29 = vpack.c.bf16 %v9355_v30, %v9354_v35  ;;  %v13589_v35 = vpack.c.bf16 %v9357_v3, %v9356_v42  ;;  %v9340_v30 = vld [vmem:[%s14760_s16 + $0x160] sm:$0xff]  ;;  %v9359_v45 = vld [vmem:[%s14760_s16 + $0x1f8] sm:$0xff]  ;;  %v9342_v3 = vld [vmem:[%s14760_s16 + $0x170] sm:$0xff] }
0x29cd   :  { %14943 = vst [vmem:[#allocation59_spill] sm:$0xff] %v13532_v4  ;;  %14947 = vst [vmem:[#allocation63_spill] sm:$0xff] %v13568_v46  ;;  %v9341_v4 = vld [vmem:[%s14760_s16 + $0x168] sm:$0xff]  ;;  %v13608_v42 = vpack.c.bf16 %v9359_v45, %v9358_v10 }
0x29ce   :  { %14948 = vst [vmem:[#allocation64_spill] sm:$0xff] %v13571_v29  ;;  %14949 = vst [vmem:[#allocation65_spill] sm:$0xff] %v13586_v18  ;;  %v13598_v52 = vpack.c.bf16 %v9341_v4, %v9340_v30  ;;  %v9343_v4 = vld [vmem:[%s14760_s16 + $0x178] sm:$0xff] }
0x29cf   :  { %11221 = vmatpush3.bf16.msra.mxu0 %v13530_v63  ;;  %14950 = vst [vmem:[#allocation66_spill] sm:$0xff] %v13589_v35  ;;  %14952 = vst [vmem:[#allocation68_spill] sm:$0xff] %v13608_v42  ;;  %v13616_v30 = vpack.c.bf16 %v9343_v4, %v9342_v3 }
0x29d0   :  { %11223 = vmatprep.subr.bf16.mxu0 %v13535_v59  ;;  %14951 = vst [vmem:[#allocation67_spill] sm:$0xff] %v13598_v52 }
0x29d1   :  { %14953 = vst [vmem:[#allocation69_spill] sm:$0xff] %v13616_v30 }
0x29d3   :  { %11225 = vmatpush3.bf16.msra.mxu0 %v13550_v43 }
0x29d4   :  { %11227 = vmatprep.subr.bf16.mxu0 %v13553_v9 }
0x29d7   :  { %11229 = vmatpush3.bf16.msra.mxu0 %v13568_v46 }
0x29d8   :  { %11231 = vmatprep.subr.bf16.mxu0 %v13571_v29 }
0x29db   :  { %11233 = vmatpush3.bf16.msra.mxu0 %v13586_v18 }
0x29dc   :  { %11235 = vmatprep.subr.bf16.mxu0 %v13589_v35 }
0x29df   :  { %11237 = vmatpush3.bf16.msra.mxu0 %v13598_v52  ;;  %v4468_v52 = vmax.f32 %v13444_v14, 0.0 }
0x29e0   :  { %11239 = vmatprep.subr.bf16.mxu0 %v13608_v42 }
0x29e3   :  { %11241 = vmatpush3.bf16.msra.mxu0 %v13616_v30 }
0x2a99   :  { %v4541_v10 = vpop.f32.mrb[32].mxu0 }
0x2a9a   :  { %v4552_v45 = vmul.f32 %v4541_v10, %v4465_v41  ;;  %v4543_v51 = vpop.f32.mrb[33].mxu0 }
0x2a9b   :  { %v4553_v49 = vmul.f32 %v4543_v51, %v4466_v60 }
0x2a9d   :  { %v4547_v35 = vpop.f32.mrb[34].mxu0  ;;  %4620 = vmatprep.mubr.f32.mxu0 %v4553_v49 }
0x2a9e   :  { %v4554_v3 = vmul.f32 %v4547_v35, %v4467_v62  ;;  %v4549_v4 = vpop.f32.mrb[35].mxu0  ;;  %4621 = vmatmul.mubr.f32.vlgmr.msra.gmra.mrb[36].mxu0 %v4552_v45 }
0x2a9f   :  { %v4555_v42 = vmul.f32 %v4549_v4, %v4468_v52 }
0x2aa1   :  { %4625 = vmatprep.mubr.f32.mxu0 %v4555_v42 }
0x2aa2   :  { %4626 = vmatmul.mubr.f32.gmra.mrb[38].mxu0 %v4554_v3 }
0x2b71   :  { %v9808_v30 = vpop.f32.mrb[36].mxu0 }
0x2b72   :  { %v9809_v34 = vpop.f32.mrb[37].mxu0 }
0x2b73   :  { %v9810_v18 = vadd.f32 %v9809_v34, %v9808_v30 }
0x2b75   :  { %v4672_v21 = vadd.f32 %v9810_v18, %v13314_v8  ;;  %v9811_v41 = vpop.f32.mrb[38].mxu0 }
0x2b76   :  { %v9812_v10 = vpop.f32.mrb[39].mxu0 }
0x2b77   :  { %v9813_v60 = vadd.f32 %v9812_v10, %v9811_v41  ;;  %v4674_v5 = vsel %vm287_vm3, %v4672_v21, 0.0 }
0x2b78   :  { %4675 = vadd.xlane.f32.xlu1 %v4674_v5 }
0x2b79   :  { %v4673_v14 = vadd.f32 %v9813_v60, %v13320_v50 }
0x2b7b   :  { %v4677_v49 = vsel %vm287_vm3, %v4673_v14, 0.0 }
0x2b7c   :  { %4678 = vadd.xlane.f32.xlu0 %v4677_v49  ;;  %v14956_v49 = vld [vmem:[#allocation35_spill] sm:$0xff] }
0x2c05   :  { %v4676_v51 = vpop.xlane.xlu1 %4675 }
0x2c06   :  { %v4680_v52 = vmul.f32 0.03125, %v4676_v51  ;;  %v13636_v51 = vrot.slane %v13302_v13, %v14956_v49 }
0x2c08   :  { %v4682_v62 = vsub.f32 %v4672_v21, %v4680_v52  ;;  %v14954_v21 = vld [vmem:[#allocation34_spill] sm:$0xff]  ;;  %14957 = vst [vmem:[#allocation71_spill] sm:$0xff] %v13636_v51 }
0x2c09   :  { %v4679_v35 = vpop.xlane.xlu0 %4678  ;;  %v13632_v5 = vrot.slane %v13302_v13, %v14954_v21  ;;  %v14972_v21 = vld [vmem:[#allocation7_spill] sm:$0xff] }
0x2c0a   :  { %v4681_v42 = vmul.f32 0.03125, %v4679_v35  ;;  %v4684_v45 = vmul.f32 %v4682_v62, %v4682_v62 }
0x2c0b   :  { %14955 = vst [vmem:[#allocation70_spill] sm:$0xff] %v13632_v5 }
0x2c0c   :  { %v4683_v30 = vsub.f32 %v4673_v14, %v4681_v42  ;;  %v4686_v8 = vsel %vm287_vm3, %v4684_v45, 0.0  ;;  %v9378_v45 = vld [vmem:[%s14747_s3 + $0x1] ss:$0 sm:$0xff] }
0x2c0d   :  { %4687 = vadd.xlane.f32.xlu1 %v4686_v8 }
0x2c0e   :  { %v4685_v18 = vmul.f32 %v4683_v30, %v4683_v30 }
0x2c10   :  { %v4689_v3 = vsel %vm287_vm3, %v4685_v18, 0.0 }
0x2c11   :  { %4690 = vadd.xlane.f32.xlu0 %v4689_v3 }
0x2c9a   :  { %v4688_v4 = vpop.xlane.xlu1 %4687 }
0x2c9b   :  { %v4692_v34 = vmul.f32 0.03125, %v4688_v4 }
0x2c9d   :  { %v4694_v50 = vadd.f32 1e-05, %v4692_v34 }
0x2c9e   :  { %v4691_v41 = vpop.xlane.xlu0 %4690 }
0x2c9f   :  { %11748 = vrsqrt.f32 %v4694_v50  ;;  %v4693_v10 = vmul.f32 0.03125, %v4691_v41  ;;  %v14961_v50 = vld [vmem:[#allocation37_spill] sm:$0xff]  ;;  %v14963_v41 = vld [vmem:[#allocation10_spill] sm:$0xff] }
0x2ca1   :  { %v4695_v60 = vadd.f32 1e-05, %v4693_v10  ;;  %v14964_v10 = vld [vmem:[#allocation11_spill] sm:$0xff] }
0x2ca3   :  { %11750 = vrsqrt.f32 %v4695_v60  ;;  %v14965_v60 = vld [vmem:[#allocation12_spill] sm:$0xff] }
0x2ca9   :  { %v11749_v14 = vpop.eup %11748 }
0x2caa   :  { %v4698_v52 = vmul.f32 %v11749_v14, %v4682_v62  ;;  %v14959_v62 = vld [vmem:[#allocation36_spill] sm:$0xff]  ;;  %v14966_v14 = vld [vmem:[#allocation13_spill] sm:$0xff] }
0x2cac   :  { %v4704_v35 = vmul.f32 %v13632_v5, %v4698_v52  ;;  %v14967_v52 = vld [vmem:[#allocation14_spill] sm:$0xff] }
0x2cad   :  { %v11751_v42 = vpop.eup %11750 }
0x2cae   :  { %v4710_v8 = vadd.f32 %v13636_v51, %v4704_v35  ;;  %v4699_v18 = vmul.f32 %v11751_v42, %v4683_v30  ;;  %v14962_v30 = vld [vmem:[#allocation38_spill] sm:$0xff]  ;;  %v14968_v35 = vld [vmem:[#allocation15_spill] sm:$0xff]  ;;  %v14969_v42 = vld [vmem:[#allocation16_spill] sm:$0xff] }
0x2cb0   :  { %v13643_v3 = vadd.f32 %v9378_v45, %v4710_v8  ;;  %v4705_v4 = vmul.f32 %v13632_v5, %v4699_v18 }
0x2cb2   :  { %14958 = vst [vmem:[#allocation72_spill] sm:$0xff] %v13643_v3  ;;  %9379 = vmatmul.mubr.msk.f32.vlgmr.msra.gmra.mrb[54].mxu1 %vm287_vm3, %v13643_v3  ;;  %v4711_v13 = vadd.f32 %v13636_v51, %v4705_v4  ;;  %v14971_v4 = vld [vmem:[#allocation5_spill] sm:$0xff] }
0x2cb3   :  { %11253 = vmatpush1.bf16.msra.mxu1 %v14959_v62  ;;  %4797 = vmatprep.mubr.f32.mxu1 %v14910_v25 }
0x2cb4   :  { %v13651_v34 = vadd.f32 %v9378_v45, %v4711_v13  ;;  %11255 = vmatprep.subr.bf16.mxu1 %v14961_v50  ;;  %v14970_v45 = vld [vmem:[#allocation17_spill] sm:$0xff] }
0x2cb6   :  { %14960 = vst [vmem:[#allocation36_spill] sm:$0xff] %v13651_v34  ;;  %9380 = vmatmul.mubr.msk.f32.gmra.mrb[56].mxu1 %vm287_vm3, %v13651_v34 }
0x2cb7   :  { %11257 = vmatpush1.bf16.msra.mxu1 %v14962_v30  ;;  %4868 = vmatprep.mubr.f32.mxu1 %v14910_v25 }
0x2cb8   :  { %11259 = vmatprep.subr.bf16.mxu1 %v14963_v41 }
0x2cba   :  { %9381 = vmatmul.mubr.msk.f32.vlgmr.msra.gmra.mrb[58].mxu1 %vm287_vm3, %v13643_v3 }
0x2cbb   :  { %4874 = vmatprep.mubr.f32.mxu1 %v14910_v25  ;;  %11261 = vmatpush3.bf16.msra.mxu1 %v14963_v41 }
0x2cbc   :  { %11263 = vmatprep.subr.bf16.mxu1 %v14964_v10 }
0x2cbe   :  { %9382 = vmatmul.mubr.msk.f32.gmra.mrb[60].mxu1 %vm287_vm3, %v13651_v34 }
0x2cbf   :  { %11265 = vmatpush3.bf16.msra.mxu1 %v14964_v10  ;;  %v14974_v10 = vld [vmem:[#allocation8_spill] sm:$0xff] }
0x2cc0   :  { %11267 = vmatprep.subr.bf16.mxu1 %v14965_v60 }
0x2cc3   :  { %11269 = vmatpush3.bf16.msra.mxu1 %v14965_v60 }
0x2cc4   :  { %11271 = vmatprep.subr.bf16.mxu1 %v14966_v14 }
0x2cc7   :  { %11273 = vmatpush3.bf16.msra.mxu1 %v14966_v14 }
0x2cc8   :  { %11275 = vmatprep.subr.bf16.mxu1 %v14967_v52 }
0x2ccb   :  { %11277 = vmatpush3.bf16.msra.mxu1 %v14967_v52 }
0x2ccc   :  { %11279 = vmatprep.subr.bf16.mxu1 %v14968_v35 }
0x2ccf   :  { %11281 = vmatpush3.bf16.msra.mxu1 %v14968_v35  ;;  %v14973_v35 = vld [vmem:[#allocation6_spill] sm:$0xff] }
0x2cd0   :  { %11283 = vmatprep.subr.bf16.mxu1 %v14969_v42 }
0x2cd3   :  { %11285 = vmatpush3.bf16.msra.mxu1 %v14969_v42 }
0x2cd4   :  { %11287 = vmatprep.subr.bf16.mxu1 %v14970_v45 }
0x2cd7   :  { %11289 = vmatpush3.bf16.msra.mxu1 %v14970_v45 }
0x2d85   :  { %v13679_v8 = vpop.f32.mrb[54].mxu1 }
0x2d86   :  { %v13681_v18 = vpop.f32.mrb[55].mxu1 }
0x2d87   :  { %v5160_v13 = vmul.f32 %v14971_v4, %v13681_v18 }
0x2d89   :  { %v13685_v62 = vpop.f32.mrb[56].mxu1  ;;  %10504 = vmatprep.mubr.f32.mxu0 %v5160_v13 }
0x2d8a   :  { %v13687_v50 = vpop.f32.mrb[57].mxu1 }
0x2d8d   :  { %v4870_v30 = vpop.f32.mrb[58].mxu1 }
0x2d8e   :  { %v4872_v49 = vpop.f32.mrb[59].mxu1 }
0x2d8f   :  { %v4925_v42 = vadd.f32 %v4872_v49, %v14972_v21  ;;  %v4881_v52 = vadd.f32 %v4872_v49, %v14973_v35  ;;  %v4969_v41 = vadd.f32 %v4872_v49, %v14974_v10 }
0x2d91   :  { %4927 = vmax.xlane.f32.xlu0 %v4925_v42  ;;  %4883 = vmax.xlane.f32.xlu1 %v4881_v52  ;;  %v4876_v45 = vpop.f32.mrb[60].mxu1 }
0x2d92   :  { %v13691_v14 = vpack.c.bf16 %v4876_v45, %v4870_v30  ;;  %v4878_v60 = vpop.f32.mrb[61].mxu1  ;;  %v5161_v45 = vmul.f32 %v14971_v4, %v13687_v50  ;;  %v14975_v30 = vld [vmem:[#allocation9_spill] sm:$0xff] }
0x2d93   :  { %v4926_v51 = vadd.f32 %v4878_v60, %v14972_v21  ;;  %v4882_v13 = vadd.f32 %v4878_v60, %v14973_v35  ;;  %v4970_v5 = vadd.f32 %v4878_v60, %v14974_v10  ;;  %v5013_v29 = vadd.f32 %v4872_v49, %v14975_v30 }
0x2d94   :  { %11291 = vmatprep.subr.bf16.mxu0 %v13691_v14  ;;  %v5014_v21 = vadd.f32 %v4878_v60, %v14975_v30 }
0x2d95   :  { %4971 = vmax.xlane.f32.xlu1 %v4969_v41  ;;  %11293 = vmatpush3.bf16.xpose.msra.mxu0 %v13691_v14 }
0x2d96   :  { %4929 = vmax.xlane.f32.xlu0 %v4926_v51 }
0x2d99   :  { %4885 = vmax.xlane.f32.xlu1 %v4882_v13 }
0x2d9a   :  { %4973 = vmax.xlane.f32.xlu0 %v4970_v5 }
0x2d9c   :  { %10505 = vmatmul.mubr.f32.vlgmr.msra.gmra.mrb[40].mxu0 %v5161_v45 }
0x2d9d   :  { %5015 = vmax.xlane.f32.xlu1 %v5013_v29 }
0x2d9e   :  { %5017 = vmax.xlane.f32.xlu0 %v5014_v21 }
0x2e1e   :  { %v4928_v46 = vpop.xlane.xlu0 %4927  ;;  %v4884_v9 = vpop.xlane.xlu1 %4883 }
0x2e1f   :  { %vm4931_vm10 = vcmp.eq.f32.partialorder %v4925_v42, %v4928_v46  ;;  %vm4887_vm6 = vcmp.eq.f32.partialorder %v4881_v52, %v4884_v9 }
0x2e20   :  { %v4933_v35 = vsel %vm4931_vm10, %v12059_v19, 128  ;;  %v4889_v10 = vsel %vm4887_vm6, %v12059_v19, 128 }
0x2e21   :  { %v4936_v43 = vshra.s32 %v4933_v35, 16  ;;  %v4892_v59 = vshra.s32 %v4889_v10, 16  ;;  %v4935_v40 = vand.u32 65535, %v4933_v35  ;;  %v4891_v58 = vand.u32 65535, %v4889_v10 }
0x2e22   :  { %v4972_v63 = vpop.xlane.xlu1 %4971 }
0x2e23   :  { %vm4975_vm12 = vcmp.eq.f32.partialorder %v4969_v41, %v4972_v63  ;;  %v4930_v4 = vpop.xlane.xlu0 %4929  ;;  %v4938_v56 = vcvt.s32.f32 %v4936_v43  ;;  %v4894_v49 = vcvt.s32.f32 %v4892_v59 }
0x2e24   :  { %v4977_v45 = vsel %vm4975_vm12, %v12059_v19, 128  ;;  %vm4932_vm13 = vcmp.eq.f32.partialorder %v4926_v51, %v4930_v4 }
0x2e25   :  { %v4980_v60 = vshra.s32 %v4977_v45, 16  ;;  %v4934_v30 = vsel %vm4932_vm13, %v12059_v19, 128  ;;  %4939 = vmin.xlane.f32.xlu0 %v4938_v56  ;;  %4895 = vmin.xlane.f32.xlu1 %v4894_v49 }
0x2e26   :  { %v4950_v9 = vshra.s32 %v4934_v30, 16  ;;  %v4886_v46 = vpop.xlane.xlu1 %4885 }
0x2e27   :  { %v4974_v52 = vpop.xlane.xlu0 %4973  ;;  %vm4888_vm14 = vcmp.eq.f32.partialorder %v4882_v13, %v4886_v46  ;;  %v4982_v42 = vcvt.s32.f32 %v4980_v60 }
0x2e28   :  { %vm4976_vm0 = vcmp.eq.f32.partialorder %v4970_v5, %v4974_v52  ;;  %v4890_v48 = vsel %vm4888_vm14, %v12059_v19, 128  ;;  %v4952_v63 = vcvt.s32.f32 %v4950_v9 }
0x2e29   :  { %v4978_v43 = vsel %vm4976_vm0, %v12059_v19, 128  ;;  %v4906_v59 = vshra.s32 %v4890_v48, 16  ;;  %4983 = vmin.xlane.f32.xlu1 %v4982_v42 }
0x2e2a   :  { %v4994_v41 = vshra.s32 %v4978_v43, 16  ;;  %4953 = vmin.xlane.f32.xlu0 %v4952_v63  ;;  %v5016_v51 = vpop.xlane.xlu1 %5015  ;;  %v4993_v20 = vand.u32 65535, %v4978_v43 }
0x2e2b   :  { %v5018_v4 = vpop.xlane.xlu0 %5017  ;;  %vm5019_vm2 = vcmp.eq.f32.partialorder %v5013_v29, %v5016_v51  ;;  %v4908_v16 = vcvt.s32.f32 %v4906_v59  ;;  %v4979_v29 = vand.u32 65535, %v4977_v45  ;;  %v4937_v51 = vcvt.s32.f32 %v4935_v40 }
0x2e2c   :  { %vm5020_vm4 = vcmp.eq.f32.partialorder %v5014_v21, %v5018_v4  ;;  %v5021_v32 = vsel %vm5019_vm2, %v12059_v19, 128  ;;  %v4996_v6 = vcvt.s32.f32 %v4994_v41  ;;  %v4893_v4 = vcvt.s32.f32 %v4891_v58 }
0x2e2d   :  { %v5022_v13 = vsel %vm5020_vm4, %v12059_v19, 128  ;;  %v5024_v5 = vshra.s32 %v5021_v32, 16  ;;  %4909 = vmin.xlane.f32.xlu1 %v4908_v16  ;;  %v4949_v41 = vand.u32 65535, %v4934_v30  ;;  %v4981_v3 = vcvt.s32.f32 %v4979_v29 }
0x2e2e   :  { %v5038_v60 = vshra.s32 %v5022_v13, 16  ;;  %4997 = vmin.xlane.f32.xlu0 %v4996_v6  ;;  %v5023_v40 = vand.u32 65535, %v5021_v32  ;;  %v5037_v30 = vand.u32 65535, %v5022_v13  ;;  %v4995_v45 = vcvt.s32.f32 %v4993_v20 }
0x2e2f   :  { %v5026_v9 = vcvt.s32.f32 %v5024_v5  ;;  %v4905_v5 = vand.u32 65535, %v4890_v48  ;;  %v4951_v33 = vcvt.s32.f32 %v4949_v41 }
0x2e30   :  { %v5040_v46 = vcvt.s32.f32 %v5038_v60  ;;  %v5025_v43 = vcvt.s32.f32 %v5023_v40 }
0x2e31   :  { %5027 = vmin.xlane.f32.xlu1 %v5026_v9 }
0x2e32   :  { %5041 = vmin.xlane.f32.xlu0 %v5040_v46 }
0x2e6f   :  { %v10506_v52 = vpop.f32.mrb[40].mxu0 }
0x2e70   :  { %v5228_v23 = vpop.f32.mrb[41].mxu0 }
0x2eb2   :  { %v4940_v59 = vpop.xlane.xlu0 %4939  ;;  %v4896_v21 = vpop.xlane.xlu1 %4895 }
0x2eb3   :  { %vm4941_vm5 = vcmp.eq.f32.partialorder %v4938_v56, %v4940_v59  ;;  %vm4897_vm7 = vcmp.eq.f32.partialorder %v4894_v49, %v4896_v21  ;;  %v4907_v56 = vcvt.s32.f32 %v4905_v5 }
0x2eb4   :  { %v4942_v38 = vsel %vm4941_vm5, %v4937_v51, inf  ;;  %v4898_v34 = vsel %vm4897_vm7, %v4893_v4, inf }
0x2eb5   :  { %4943 = vmin.xlane.f32.xlu0 %v4942_v38  ;;  %4899 = vmin.xlane.f32.xlu1 %v4898_v34 }
0x2eb6   :  { %v4984_v60 = vpop.xlane.xlu1 %4983 }
0x2eb7   :  { %v4954_v47 = vpop.xlane.xlu0 %4953  ;;  %vm4985_vm8 = vcmp.eq.f32.partialorder %v4982_v42, %v4984_v60  ;;  %v4990_v4 = vcvt.f32.s32 %v4984_v60 }
0x2eb8   :  { %vm4955_vm9 = vcmp.eq.f32.partialorder %v4952_v63, %v4954_v47  ;;  %v4986_v10 = vsel %vm4985_vm8, %v4981_v3, inf  ;;  %v5039_v63 = vcvt.s32.f32 %v5037_v30 }
0x2eb9   :  { %v4956_v35 = vsel %vm4955_vm9, %v4951_v33, inf  ;;  %4987 = vmin.xlane.f32.xlu1 %v4986_v10  ;;  %v13714_v33 = vld [vmem:[%s14750_s6] sm:$0xff]  ;;  %v4991_v30 = vshll.u32 %v4990_v4, 16 }
0x2eba   :  { %4957 = vmin.xlane.f32.xlu0 %v4956_v35  ;;  %v4910_v58 = vpop.xlane.xlu1 %4909  ;;  %v13717_v32 = vadd.f32 %v13714_v33, %v5228_v23 }
0x2ebb   :  { %v4998_v49 = vpop.xlane.xlu0 %4997  ;;  %vm4911_vm10 = vcmp.eq.f32.partialorder %v4908_v16, %v4910_v58  ;;  %v4916_v40 = vcvt.f32.s32 %v4910_v58 }
0x2ebc   :  { %vm4999_vm6 = vcmp.eq.f32.partialorder %v4996_v6, %v4998_v49  ;;  %v4912_v38 = vsel %vm4911_vm10, %v4907_v56, inf  ;;  %v13722_v6 = vld [vmem:[%s14750_s6 + $0x8] sm:$0xff]  ;;  %v5237_v13 = vsel %vm803_vm15, %v13717_v32, -inf }
0x2ebd   :  { %v5000_v48 = vsel %vm4999_vm6, %v4995_v45, inf  ;;  %4913 = vmin.xlane.f32.xlu1 %v4912_v38  ;;  %v13725_v16 = vadd.f32 %v13722_v6, %v10506_v52  ;;  %v4960_v52 = vcvt.f32.s32 %v4954_v47 }
0x2ebe   :  { %5001 = vmin.xlane.f32.xlu0 %v5000_v48  ;;  %v5028_v34 = vpop.xlane.xlu1 %5027 }
0x2ebf   :  { %v5042_v42 = vpop.xlane.xlu0 %5041  ;;  %vm5029_vm12 = vcmp.eq.f32.partialorder %v5026_v9, %v5028_v34  ;;  %v5240_v23 = vsel %vm803_vm15, %v13725_v16, -inf  ;;  %v4946_v9 = vcvt.f32.s32 %v4940_v59 }
0x2ec0   :  { %vm5043_vm13 = vcmp.eq.f32.partialorder %v5040_v46, %v5042_v42  ;;  %v5030_v20 = vsel %vm5029_vm12, %v5025_v43, inf  ;;  %v4902_v46 = vcvt.f32.s32 %v4896_v21  ;;  %v4917_v21 = vshll.u32 %v4916_v40, 16 }
0x2ec1   :  { %v5044_v3 = vsel %vm5043_vm13, %v5039_v63, inf  ;;  %5031 = vmin.xlane.f32.xlu1 %v5030_v20  ;;  %v4947_v10 = vshll.u32 %v4946_v9, 16  ;;  %v4961_v63 = vshll.u32 %v4960_v52, 16  ;;  %v5004_v20 = vcvt.f32.s32 %v4998_v49 }
0x2ec2   :  { %5045 = vmin.xlane.f32.xlu0 %v5044_v3  ;;  %v4903_v35 = vshll.u32 %v4902_v46, 16 }
0x2ec3   :  { %v5005_v9 = vshll.u32 %v5004_v20, 16 }
0x2ec5   :  { %5238 = vmax.xlane.f32.xlu1 %v5237_v13  ;;  %v5034_v13 = vcvt.f32.s32 %v5028_v34 }
0x2ec6   :  { %5241 = vmax.xlane.f32.xlu0 %v5240_v23 }
0x2f42   :  { %v4944_v29 = vpop.xlane.xlu0 %4943  ;;  %v4900_v51 = vpop.xlane.xlu1 %4899 }
0x2f43   :  { %v4945_v41 = vcvt.f32.s32 %v4944_v29  ;;  %v4901_v5 = vcvt.f32.s32 %v4900_v51  ;;  %v5048_v29 = vcvt.f32.s32 %v5042_v42  ;;  %v5035_v51 = vshll.u32 %v5034_v13, 16 }
0x2f45   :  { %v4948_v45 = vadd.s32 %v4947_v10, %v4945_v41  ;;  %v4904_v38 = vadd.s32 %v4903_v35, %v4901_v5  ;;  %v5049_v5 = vshll.u32 %v5048_v29, 16 }
0x2f46   :  { %v4988_v56 = vpop.xlane.xlu1 %4987 }
0x2f47   :  { %v4958_v48 = vpop.xlane.xlu0 %4957  ;;  %v4989_v43 = vcvt.f32.s32 %v4988_v56  ;;  %vm4963_vm14 = vcmp.eq.s32.totalorder %v12059_v19, %v4948_v45  ;;  %vm4919_vm0 = vcmp.eq.s32.totalorder %v12059_v19, %v4904_v38 }
0x2f48   :  { %v4959_v3 = vcvt.f32.s32 %v4958_v48  ;;  %v9385_v4 = vsel %vm4963_vm14, 1.0, %v14910_v25  ;;  %v9383_v34 = vsel %vm4919_vm0, 1.0, %v14910_v25 }
0x2f49   :  { %v4992_v59 = vadd.s32 %v4991_v30, %v4989_v43  ;;  %v5057_v45 = vadd.f32 %v9385_v4, %v9383_v34 }
0x2f4a   :  { %v4962_v23 = vadd.s32 %v4961_v63, %v4959_v3  ;;  %v4914_v60 = vpop.xlane.xlu1 %4913 }
0x2f4b   :  { %v5002_v47 = vpop.xlane.xlu0 %5001  ;;  %v4915_v58 = vcvt.f32.s32 %v4914_v60  ;;  %vm5007_vm2 = vcmp.eq.s32.totalorder %v12059_v19, %v4992_v59 }
0x2f4c   :  { %v5003_v46 = vcvt.f32.s32 %v5002_v47  ;;  %vm4964_vm4 = vcmp.eq.s32.totalorder %v12059_v19, %v4962_v23  ;;  %v9387_v52 = vsel %vm5007_vm2, 1.0, %v14910_v25 }
0x2f4d   :  { %v4918_v49 = vadd.s32 %v4917_v21, %v4915_v58  ;;  %v9386_v40 = vsel %vm4964_vm4, 1.0, %v14910_v25  ;;  %v5059_v13 = vadd.f32 %v9387_v52, %v5057_v45 }
0x2f4e   :  { %v5006_v41 = vadd.s32 %v5005_v9, %v5003_v46  ;;  %v5032_v42 = vpop.xlane.xlu1 %5031 }
0x2f4f   :  { %vm4920_vm5 = vcmp.eq.s32.totalorder %v12059_v19, %v4918_v49  ;;  %v5046_v10 = vpop.xlane.xlu0 %5045  ;;  %v5033_v35 = vcvt.f32.s32 %v5032_v42 }
0x2f50   :  { %vm5008_vm7 = vcmp.eq.s32.totalorder %v12059_v19, %v5006_v41  ;;  %v9384_v56 = vsel %vm4920_vm5, 1.0, %v14910_v25  ;;  %v5047_v30 = vcvt.f32.s32 %v5046_v10 }
0x2f51   :  { %v5058_v38 = vadd.f32 %v9386_v40, %v9384_v56  ;;  %v5036_v48 = vadd.s32 %v5035_v51, %v5033_v35  ;;  %v9388_v43 = vsel %vm5008_vm7, 1.0, %v14910_v25 }
0x2f52   :  { %v5050_v63 = vadd.s32 %v5049_v5, %v5047_v30  ;;  %v5239_v20 = vpop.xlane.xlu1 %5238 }
0x2f53   :  { %v5060_v3 = vadd.f32 %v9388_v43, %v5058_v38  ;;  %vm5051_vm8 = vcmp.eq.s32.totalorder %v12059_v19, %v5036_v48  ;;  %v5242_v59 = vpop.xlane.xlu0 %5241  ;;  %v5243_v21 = vsub.f32 %v13717_v32, %v5239_v20  ;;  %v5375_v48 = vmul.f32 %v12375_v28, %v13687_v50 }
0x2f54   :  { %vm5052_vm9 = vcmp.eq.s32.totalorder %v12059_v19, %v5050_v63  ;;  %v5244_v23 = vsub.f32 %v13725_v16, %v5242_v59  ;;  %v9389_v60 = vsel %vm5051_vm8, 1.0, %v14910_v25  ;;  %v5588_v43 = vmul.f32 %v12400_v7, %v13681_v18 }
0x2f55   :  { %v9390_v29 = vsel %vm5052_vm9, 1.0, %v14910_v25  ;;  %v5245_v47 = vmul.f32 1.442695, %v5243_v21  ;;  %v5061_v58 = vadd.f32 %v9389_v60, %v5059_v13  ;;  %v5589_v63 = vmul.f32 %v12400_v7, %v13687_v50 }
0x2f56   :  { %v5062_v9 = vadd.f32 %v9390_v29, %v5060_v3  ;;  %v5247_v46 = vmul.f32 1.442695, %v5244_v23 }
0x2f57   :  { %11752 = vpow2.f32 %v5245_v47  ;;  %10497 = vmatprep.mubr.f32.mxu1 %v5061_v58 }
0x2f58   :  { %11754 = vpow2.f32 %v5247_v46  ;;  %v13749_v49 = vadd.f32 %v5062_v9, %v5061_v58  ;;  %10498 = vmatmul.mubr.f32.vlgmr.msra.gmra.mrb[62].mxu1 %v5062_v9 }
0x2f61   :  { %v11753_v32 = vpop.eup %11752 }
0x2f62   :  { %v11755_v51 = vpop.eup %11754  ;;  %v5249_v4 = vsel %vm803_vm15, %v11753_v32, 0.0 }
0x2f63   :  { %v5252_v16 = vsel %vm803_vm15, %v11755_v51, 0.0  ;;  %5250 = vadd.xlane.f32.xlu1 %v5249_v4 }
0x2f64   :  { %5253 = vadd.xlane.f32.xlu0 %v5252_v16 }
0x2ff0   :  { %v5251_v34 = vpop.xlane.xlu1 %5250 }
0x2ff1   :  { %v5254_v41 = vpop.xlane.xlu0 %5253  ;;  %11756 = vrcp.f32 %v5251_v34 }
0x2ff2   :  { %11758 = vrcp.f32 %v5254_v41 }
0x2ffb   :  { %v11757_v42 = vpop.eup %11756 }
0x2ffc   :  { %v5257_v5 = vmul.f32 %v11757_v42, %v11753_v32  ;;  %v11759_v52 = vpop.eup %11758 }
0x2ffd   :  { %v5258_v10 = vmul.f32 %v11759_v52, %v11755_v51 }
0x2ffe   :  { %5259 = vxpose.xlu1.b32.start [1/2] (short) (narrow) %v5257_v5, 16 }
0x3002   :  { %5260 = vxpose.xlu1.b32.end [2/2] (short) (narrow) %v5258_v10, 16 }
0x302b   :  { %v13753_v35 = vpop.f32.mrb[62].mxu1 }
0x302c   :  { %v5159_v40 = vmul.f32 %v13753_v35, %v13685_v62  ;;  %v13757_v56 = vpop.f32.mrb[63].mxu1 }
0x302d   :  { %v5158_v30 = vmul.f32 %v13757_v56, %v13679_v8  ;;  %v5374_v8 = vmul.f32 %v12375_v28, %v13681_v18 }
0x302f   :  { %v13761_v45 = vpack.c.bf16 %v5159_v40, %v5158_v30 }
0x3031   :  { %11295 = vmatprep.subr.bf16.mxu0 %v13761_v45  ;;  %11303 = vmatprep.subr.bf16.mxu1 %v13761_v45 }
0x3032   :  { %11297 = vmatpush3.bf16.msra.mxu0 %v13761_v45  ;;  %11305 = vmatpush3.bf16.msra.mxu1 %v13761_v45 }
0x3033   :  { %11299 = vmatprep.subr.bf16.mxu0 %v13691_v14  ;;  %11311 = vmatprep.subr.bf16.mxu1 %v13761_v45 }
0x307e   :  { %v5275_v62 = vpop.trf.xlu1 }
0x307f   :  { %10511 = vmatprep.mubr.msk.f32.mxu0 %vm803_vm15, %v5275_v62 }
0x3082   :  { %v5276_v38 = vpop.trf.xlu1 }
0x3083   :  { %10512 = vmatmul.mubr.msk.f32.vlgmr.msra.gmra.mrb[42].mxu0 %vm803_vm15, %v5276_v38 }
0x3084   :  { %11301 = vmatpush3.bf16.xpose.msra.mxu0 %v13691_v14  ;;  %10518 = vmatprep.mubr.f32.mxu0 %v5374_v8 }
0x3085   :  { %11307 = vmatprep.subr.bf16.mxu0 %v13691_v14 }
0x308b   :  { %10519 = vmatmul.mubr.f32.vlgmr.msra.gmra.mrb[44].mxu0 %v5375_v48 }
0x308c   :  { %11309 = vmatpush3.bf16.xpose.msra.mxu0 %v13691_v14  ;;  %10532 = vmatprep.mubr.f32.mxu0 %v5588_v43 }
0x308d   :  { %11319 = vmatprep.subr.bf16.mxu0 %v13761_v45 }
0x3093   :  { %10533 = vmatmul.mubr.f32.vlgmr.msra.gmra.mrb[46].mxu0 %v5589_v63 }
0x3094   :  { %11321 = vmatpush3.bf16.msra.mxu0 %v13761_v45 }
0x3095   :  { %11323 = vmatprep.subr.bf16.mxu0 %v12461_v61 }
0x3156   :  { %v13785_v20 = vpop.f32.mrb[42].mxu0 }
0x3157   :  { %v13787_v3 = vpop.f32.mrb[43].mxu0 }
0x315e   :  { %v10520_v59 = vpop.f32.mrb[44].mxu0 }
0x315f   :  { %v5442_v21 = vpop.f32.mrb[45].mxu0  ;;  %v5448_v23 = vadd.f32 %v13722_v6, %v10520_v59 }
0x3160   :  { %v5443_v13 = vadd.f32 %v13714_v33, %v5442_v21 }
0x3161   :  { %v5454_v47 = vsel %vm803_vm15, %v5448_v23, -inf }
0x3162   :  { %v5451_v60 = vsel %vm803_vm15, %v5443_v13, -inf }
0x3163   :  { %5452 = vmax.xlane.f32.xlu0 %v5451_v60 }
0x3166   :  { %v10534_v29 = vpop.f32.mrb[46].mxu0 }
0x3167   :  { %v5656_v58 = vpop.f32.mrb[47].mxu0  ;;  %5455 = vmax.xlane.f32.xlu0 %v5454_v47  ;;  %v5662_v46 = vadd.f32 %v13722_v6, %v10534_v29 }
0x3168   :  { %v5657_v9 = vadd.f32 %v13714_v33, %v5656_v58 }
0x3169   :  { %v5668_v51 = vsel %vm803_vm15, %v5662_v46, -inf }
0x316a   :  { %v5665_v32 = vsel %vm803_vm15, %v5657_v9, -inf }
0x316b   :  { %5666 = vmax.xlane.f32.xlu0 %v5665_v32 }
0x316f   :  { %5669 = vmax.xlane.f32.xlu0 %v5668_v51 }
0x31f0   :  { %v5453_v4 = vpop.xlane.xlu0 %5452 }
0x31f1   :  { %v5457_v16 = vsub.f32 %v5443_v13, %v5453_v4 }
0x31f3   :  { %v5459_v34 = vmul.f32 1.442695, %v5457_v16 }
0x31f4   :  { %v5456_v41 = vpop.xlane.xlu0 %5455 }
0x31f5   :  { %11760 = vpow2.f32 %v5459_v34  ;;  %v5458_v42 = vsub.f32 %v5448_v23, %v5456_v41 }
0x31f7   :  { %v5461_v5 = vmul.f32 1.442695, %v5458_v42 }
0x31f8   :  { %v5667_v52 = vpop.xlane.xlu0 %5666 }
0x31f9   :  { %11762 = vpow2.f32 %v5461_v5  ;;  %v5671_v10 = vsub.f32 %v5657_v9, %v5667_v52 }
0x31fb   :  { %v5673_v40 = vmul.f32 1.442695, %v5671_v10 }
0x31fc   :  { %v5670_v30 = vpop.xlane.xlu0 %5669 }
0x31fd   :  { %11764 = vpow2.f32 %v5673_v40  ;;  %v5672_v62 = vsub.f32 %v5662_v46, %v5670_v30  ;;  %v5802_v40 = vmul.f32 %v12413_v12, %v13681_v18  ;;  %v5803_v30 = vmul.f32 %v12413_v12, %v13687_v50 }
0x31ff   :  { %v11761_v38 = vpop.eup %11760  ;;  %v5675_v8 = vmul.f32 1.442695, %v5672_v62 }
0x3200   :  { %v5463_v48 = vsel %vm803_vm15, %v11761_v38, 0.0 }
0x3201   :  { %11766 = vpow2.f32 %v5675_v8  ;;  %5464 = vadd.xlane.f32.xlu0 %v5463_v48 }
0x3203   :  { %v11763_v43 = vpop.eup %11762 }
0x3204   :  { %v5466_v63 = vsel %vm803_vm15, %v11763_v43, 0.0 }
0x3205   :  { %5467 = vadd.xlane.f32.xlu0 %v5466_v63 }
0x3207   :  { %v11765_v59 = vpop.eup %11764 }
0x3208   :  { %v5677_v21 = vsel %vm803_vm15, %v11765_v59, 0.0 }
0x3209   :  { %5678 = vadd.xlane.f32.xlu0 %v5677_v21 }
0x320b   :  { %v11767_v13 = vpop.eup %11766 }
0x320c   :  { %v5680_v23 = vsel %vm803_vm15, %v11767_v13, 0.0 }
0x320d   :  { %5681 = vadd.xlane.f32.xlu0 %v5680_v23 }
0x328e   :  { %v5465_v60 = vpop.xlane.xlu0 %5464 }
0x328f   :  { %11768 = vrcp.f32 %v5465_v60 }
0x3292   :  { %v5468_v29 = vpop.xlane.xlu0 %5467 }
0x3293   :  { %11770 = vrcp.f32 %v5468_v29 }
0x3296   :  { %v5679_v47 = vpop.xlane.xlu0 %5678 }
0x3297   :  { %11772 = vrcp.f32 %v5679_v47 }
0x3299   :  { %v11769_v58 = vpop.eup %11768 }
0x329a   :  { %v5471_v9 = vmul.f32 %v11769_v58, %v11761_v38  ;;  %v5682_v46 = vpop.xlane.xlu0 %5681 }
0x329b   :  { %11774 = vrcp.f32 %v5682_v46 }
0x329c   :  { %5473 = vxpose.xlu0.b32.start [1/2] (short) (narrow) %v5471_v9, 16 }
0x329d   :  { %v11771_v32 = vpop.eup %11770 }
0x329e   :  { %v5472_v51 = vmul.f32 %v11771_v32, %v11763_v43 }
0x32a0   :  { %5474 = vxpose.xlu0.b32.end [2/2] (short) (narrow) %v5472_v51, 16 }
0x32a1   :  { %v11773_v4 = vpop.eup %11772 }
0x32a2   :  { %v5685_v16 = vmul.f32 %v11773_v4, %v11765_v59 }
0x32a4   :  { %5687 = vxpose.xlu1.b32.start [1/2] (short) (narrow) %v5685_v16, 16 }
0x32a5   :  { %v11775_v34 = vpop.eup %11774 }
0x32a6   :  { %v5686_v41 = vmul.f32 %v11775_v34, %v11767_v13 }
0x32a8   :  { %5688 = vxpose.xlu1.b32.end [2/2] (short) (narrow) %v5686_v41, 16 }
0x331c   :  { %v5489_v42 = vpop.trf.xlu0 }
0x331d   :  { %10525 = vmatprep.mubr.msk.f32.mxu1 %vm803_vm15, %v5489_v42 }
0x3320   :  { %v5490_v5 = vpop.trf.xlu0 }
0x3321   :  { %10526 = vmatmul.mubr.msk.f32.vlgmr.msra.gmra.mrb[64].mxu1 %vm803_vm15, %v5490_v5  ;;  %v14976_v5 = vld [vmem:[#allocation19_spill] sm:$0xff] }
0x3322   :  { %11313 = vmatpush3.bf16.msra.mxu1 %v13761_v45 }
0x3323   :  { %11315 = vmatprep.subr.bf16.mxu1 %v13691_v14 }
0x3324   :  { %v5703_v52 = vpop.trf.xlu1 }
0x3325   :  { %10539 = vmatprep.mubr.msk.f32.mxu1 %vm803_vm15, %v5703_v52 }
0x3328   :  { %v5704_v10 = vpop.trf.xlu1 }
0x3329   :  { %10540 = vmatmul.mubr.msk.f32.vlgmr.msra.gmra.mrb[66].mxu1 %vm803_vm15, %v5704_v10 }
0x332a   :  { %10546 = vmatprep.mubr.f32.mxu1 %v5802_v40 }
0x332b   :  { %11317 = vmatpush3.bf16.xpose.msra.mxu1 %v13691_v14 }
0x332c   :  { %11355 = vmatprep.subr.bf16.mxu1 %v13190_v2 }
0x3332   :  { %10547 = vmatmul.mubr.f32.vlgmr.msra.gmra.mrb[68].mxu1 %v5803_v30 }
0x3333   :  { %11357 = vmatpush3.bf16.msra.mxu1 %v13190_v2 }
0x3334   :  { %11359 = vmatprep.subr.bf16.mxu1 %v13195_v17 }
0x3337   :  { %11361 = vmatpush3.bf16.msra.mxu1 %v13195_v17  ;;  %v5373_v17 = vmul.f32 %v13785_v20, %v12427_v57 }
0x3338   :  { %11363 = vmatprep.subr.bf16.mxu1 %v13206_v0 }
0x333b   :  { %11365 = vmatpush3.bf16.msra.mxu1 %v13206_v0 }
0x333c   :  { %11367 = vmatprep.subr.bf16.mxu1 %v13216_v24 }
0x333f   :  { %11369 = vmatpush3.bf16.msra.mxu1 %v13216_v24 }
0x3340   :  { %11371 = vmatprep.subr.bf16.mxu1 %v13226_v22 }
0x3343   :  { %11373 = vmatpush3.bf16.msra.mxu1 %v13226_v22  ;;  %v5372_v22 = vmul.f32 %v12427_v57, %v13787_v3 }
0x3344   :  { %11375 = vmatprep.subr.bf16.mxu1 %v13236_v53 }
0x3347   :  { %11377 = vmatpush3.bf16.msra.mxu1 %v13236_v53 }
0x3348   :  { %11379 = vmatprep.subr.bf16.mxu1 %v13246_v39 }
0x334b   :  { %11381 = vmatpush3.bf16.msra.mxu1 %v13246_v39 }
0x334c   :  { %11383 = vmatprep.subr.bf16.mxu1 %v13261_v36 }
0x334f   :  { %11385 = vmatpush3.bf16.msra.mxu1 %v13261_v36 }
0x33f4   :  { %v10527_v2 = vpop.f32.mrb[64].mxu1 }
0x33f5   :  { %v5587_v0 = vmul.f32 %v10527_v2, %v12430_v55  ;;  %v5577_v24 = vpop.f32.mrb[65].mxu1 }
0x33f6   :  { %v5586_v53 = vmul.f32 %v12430_v55, %v5577_v24 }
0x33f7   :  { %v6017_v14 = vadd.f32 %v5587_v0, %v5373_v17  ;;  %v14977_v17 = vld [vmem:[#allocation40_spill] sm:$0xff]  ;;  %v14978_v0 = vld [vmem:[#allocation26_spill] sm:$0xff] }
0x33f8   :  { %v6016_v18 = vadd.f32 %v5586_v53, %v5372_v22 }
0x33fc   :  { %v10541_v50 = vpop.f32.mrb[66].mxu1 }
0x33fd   :  { %v5801_v39 = vmul.f32 %v10541_v50, %v12584_v11  ;;  %v5791_v45 = vpop.f32.mrb[67].mxu1 }
0x33fe   :  { %v5800_v36 = vmul.f32 %v12584_v11, %v5791_v45 }
0x33ff   :  { %v6019_v62 = vadd.f32 %v6017_v14, %v5801_v39  ;;  %v14979_v39 = vld [vmem:[#allocation72_spill] sm:$0xff] }
0x3400   :  { %v6018_v38 = vadd.f32 %v6016_v18, %v5800_v36  ;;  %v11891_v18 = vld [vmem:[%s14751_s7] sm:$0xff] }
0x3401   :  { %v14980_v36 = vld [vmem:[#allocation36_spill] sm:$0xff] }
0x3405   :  { %v10548_v8 = vpop.f32.mrb[68].mxu1 }
0x3406   :  { %v5876_v20 = vadd.f32 %v13722_v6, %v10548_v8  ;;  %v5870_v48 = vpop.f32.mrb[69].mxu1 }
0x3407   :  { %v5871_v43 = vadd.f32 %v13714_v33, %v5870_v48 }
0x3408   :  { %v5882_v3 = vsel %vm803_vm15, %v5876_v20, -inf }
0x3409   :  { %5883 = vmax.xlane.f32.xlu0 %v5882_v3  ;;  %v5879_v63 = vsel %vm803_vm15, %v5871_v43, -inf }
0x340a   :  { %5880 = vmax.xlane.f32.xlu1 %v5879_v63 }
0x3496   :  { %v5884_v59 = vpop.xlane.xlu0 %5883 }
0x3497   :  { %v5886_v21 = vsub.f32 %v5876_v20, %v5884_v59  ;;  %v5881_v13 = vpop.xlane.xlu1 %5880 }
0x3498   :  { %v5885_v23 = vsub.f32 %v5871_v43, %v5881_v13 }
0x3499   :  { %v5889_v60 = vmul.f32 1.442695, %v5886_v21 }
0x349a   :  { %v5887_v29 = vmul.f32 1.442695, %v5885_v23 }
0x349c   :  { %11776 = vpow2.f32 %v5887_v29 }
0x349d   :  { %11778 = vpow2.f32 %v5889_v60 }
0x34a6   :  { %v11777_v47 = vpop.eup %11776 }
0x34a7   :  { %v5891_v6 = vsel %vm803_vm15, %v11777_v47, 0.0  ;;  %v11779_v58 = vpop.eup %11778 }
0x34a8   :  { %5892 = vadd.xlane.f32.xlu1 %v5891_v6  ;;  %v5894_v33 = vsel %vm803_vm15, %v11779_v58, 0.0 }
0x34ac   :  { %5895 = vadd.xlane.f32.xlu1 %v5894_v33 }
0x3535   :  { %v5893_v9 = vpop.xlane.xlu1 %5892 }
0x3536   :  { %11780 = vrcp.f32 %v5893_v9 }
0x3539   :  { %v5896_v46 = vpop.xlane.xlu1 %5895 }
0x353a   :  { %11782 = vrcp.f32 %v5896_v46  ;;  %v14981_v46 = vld [vmem:[#allocation41_spill] sm:$0xff] }
0x3540   :  { %v11781_v32 = vpop.eup %11780 }
0x3541   :  { %v5899_v51 = vmul.f32 %v11781_v32, %v11777_v47 }
0x3543   :  { %5901 = vxpose.xlu1.b32.start [1/2] (short) (narrow) %v5899_v51, 16 }
0x3544   :  { %v11783_v4 = vpop.eup %11782 }
0x3545   :  { %v5900_v16 = vmul.f32 %v11783_v4, %v11779_v58 }
0x3547   :  { %5902 = vxpose.xlu1.b32.end [2/2] (short) (narrow) %v5900_v16, 16  ;;  %v14982_v16 = vld [vmem:[#allocation42_spill] sm:$0xff] }
0x35c3   :  { %v5917_v34 = vpop.trf.xlu1 }
0x35c4   :  { %10553 = vmatprep.mubr.msk.f32.mxu0 %vm803_vm15, %v5917_v34 }
0x35c7   :  { %v5918_v41 = vpop.trf.xlu1 }
0x35c8   :  { %10554 = vmatmul.mubr.msk.f32.vlgmr.msra.gmra.mrb[48].mxu0 %vm803_vm15, %v5918_v41 }
0x35c9   :  { %11325 = vmatpush3.bf16.msra.mxu0 %v12461_v61 }
0x35ca   :  { %11327 = vmatprep.subr.bf16.mxu0 %v12473_v1 }
0x35cd   :  { %11329 = vmatpush3.bf16.msra.mxu0 %v12473_v1 }
0x35ce   :  { %11331 = vmatprep.subr.bf16.mxu0 %v12484_v27 }
0x35d1   :  { %11333 = vmatpush3.bf16.msra.mxu0 %v12484_v27 }
0x35d2   :  { %11335 = vmatprep.subr.bf16.mxu0 %v12494_v26 }
0x35d5   :  { %11337 = vmatpush3.bf16.msra.mxu0 %v12494_v26 }
0x35d6   :  { %11339 = vmatprep.subr.bf16.mxu0 %v12504_v15 }
0x35d9   :  { %11341 = vmatpush3.bf16.msra.mxu0 %v12504_v15 }
0x35da   :  { %11343 = vmatprep.subr.bf16.mxu0 %v12515_v54 }
0x35dd   :  { %11345 = vmatpush3.bf16.msra.mxu0 %v12515_v54 }
0x35de   :  { %11347 = vmatprep.subr.bf16.mxu0 %v12525_v31 }
0x35e1   :  { %11349 = vmatpush3.bf16.msra.mxu0 %v12525_v31 }
0x35e2   :  { %11351 = vmatprep.subr.bf16.mxu0 %v12535_v37 }
0x35e5   :  { %11353 = vmatpush3.bf16.msra.mxu0 %v12535_v37 }
0x35e6   :  { %11387 = vmatprep.subr.bf16.mxu0 %v13283_v44 }
0x369b   :  { %v10555_v42 = vpop.f32.mrb[48].mxu0 }
0x369c   :  { %v6015_v52 = vmul.f32 %v10555_v42, %v14976_v5  ;;  %v6005_v10 = vpop.f32.mrb[49].mxu0 }
0x369d   :  { %v6014_v40 = vmul.f32 %v14976_v5, %v6005_v10  ;;  %v14983_v10 = vld [vmem:[#allocation32_spill] sm:$0xff] }
0x369e   :  { %v6021_v30 = vadd.f32 %v6019_v62, %v6015_v52  ;;  %v11892_v52 = vld [vmem:[%s14754_s10] sm:$0xff] }
0x369f   :  { %v6020_v2 = vadd.f32 %v6018_v38, %v6014_v40 }
0x36a1   :  { %10588 = vmatprep.mubr.f32.mxu0 %v6020_v2 }
0x36a2   :  { %10589 = vmatmul.mubr.f32.vlgmr.msra.gmra.mrb[50].mxu0 %v6021_v30 }
0x36a3   :  { %11389 = vmatpush3.bf16.msra.mxu0 %v13283_v44 }
0x36a4   :  { %11391 = vmatprep.subr.bf16.mxu0 %v14977_v17 }
0x36a7   :  { %11393 = vmatpush3.bf16.msra.mxu0 %v14977_v17 }
0x36a8   :  { %9413 = vmatprep.subr.msk.mxu0 %vm2242_vm1, %v14978_v0 }
0x3775   :  { %v10590_v24 = vpop.f32.mrb[50].mxu0 }
0x3776   :  { %v6098_v22 = vmul.f32 %v10590_v24, %v13753_v35  ;;  %v6088_v53 = vpop.f32.mrb[51].mxu0 }
0x3777   :  { %v6097_v14 = vmul.f32 %v6088_v53, %v13757_v56 }
0x3779   :  { %10623 = vmatprep.mubr.f32.mxu1 %v6097_v14 }
0x377a   :  { %10624 = vmatmul.mubr.f32.vlgmr.msra.gmra.mrb[70].mxu1 %v6098_v22 }
0x377b   :  { %10641 = vmatprep.mubr.msk.f32.mxu1 %vm803_vm15, %v11891_v18 }
0x384d   :  { %v10625_v44 = vpop.f32.mrb[70].mxu1 }
0x384e   :  { %v6165_v50 = vpop.f32.mrb[71].mxu1  ;;  %v6175_v62 = vadd.f32 %v10625_v44, %v14980_v36 }
0x384f   :  { %v6174_v45 = vadd.f32 %v6165_v50, %v14979_v39 }
0x3850   :  { %v6179_v35 = vsel %vm287_vm3, %v6175_v62, 0.0 }
0x3851   :  { %v6176_v38 = vsel %vm287_vm3, %v6174_v45, 0.0 }
0x3852   :  { %6177 = vadd.xlane.f32.xlu0 %v6176_v38 }
0x3856   :  { %6180 = vadd.xlane.f32.xlu0 %v6179_v35 }
0x38df   :  { %v6178_v56 = vpop.xlane.xlu0 %6177 }
0x38e0   :  { %v6182_v8 = vmul.f32 0.03125, %v6178_v56 }
0x38e2   :  { %v6184_v20 = vsub.f32 %v6174_v45, %v6182_v8 }
0x38e3   :  { %v6181_v48 = vpop.xlane.xlu0 %6180 }
0x38e4   :  { %v6183_v43 = vmul.f32 0.03125, %v6181_v48  ;;  %v6186_v3 = vmul.f32 %v6184_v20, %v6184_v20 }
0x38e6   :  { %v6185_v63 = vsub.f32 %v6175_v62, %v6183_v43  ;;  %v6188_v59 = vsel %vm287_vm3, %v6186_v3, 0.0 }
0x38e7   :  { %6189 = vadd.xlane.f32.xlu0 %v6188_v59 }
0x38e8   :  { %v6187_v21 = vmul.f32 %v6185_v63, %v6185_v63 }
0x38ea   :  { %v6191_v13 = vsel %vm287_vm3, %v6187_v21, 0.0 }
0x38eb   :  { %6192 = vadd.xlane.f32.xlu0 %v6191_v13 }
0x3974   :  { %v6190_v23 = vpop.xlane.xlu0 %6189 }
0x3975   :  { %v6194_v60 = vmul.f32 0.03125, %v6190_v23 }
0x3977   :  { %v6196_v29 = vadd.f32 1e-05, %v6194_v60 }
0x3978   :  { %v6193_v47 = vpop.xlane.xlu0 %6192 }
0x3979   :  { %11784 = vrsqrt.f32 %v6196_v29  ;;  %v6195_v6 = vmul.f32 0.03125, %v6193_v47 }
0x397b   :  { %v6197_v58 = vadd.f32 1e-05, %v6195_v6 }
0x397d   :  { %11786 = vrsqrt.f32 %v6197_v58 }
0x3983   :  { %v11785_v33 = vpop.eup %11784 }
0x3984   :  { %v6200_v9 = vmul.f32 %v11785_v33, %v6184_v20 }
0x3986   :  { %v6202_v32 = vmul.f32 %v6200_v9, %v14981_v46 }
0x3987   :  { %v11787_v51 = vpop.eup %11786 }
0x3988   :  { %v6201_v4 = vmul.f32 %v11787_v51, %v6185_v63  ;;  %v13881_v34 = vadd.f32 %v6202_v32, %v14982_v16 }
0x398a   :  { %10634 = vmatprep.mubr.msk.f32.mxu0 %vm287_vm3, %v13881_v34  ;;  %v6203_v41 = vmul.f32 %v6201_v4, %v14981_v46 }
0x398c   :  { %v13887_v42 = vadd.f32 %v6203_v41, %v14982_v16 }
0x398e   :  { %10635 = vmatmul.mubr.msk.f32.vlgmr.msra.gmra.mrb[52].mxu0 %vm287_vm3, %v13887_v42 }
0x398f   :  { %9414 = vmatpush1.msk.msra.mxu0 %vm2242_vm1, %v11892_v52  ;;  %6677 = vmatprep.mubr.f32.mxu0 %v14910_v25 }
0x3990   :  { %11407 = vmatprep.subr.bf16.mxu0 %v14983_v10 }
0x3a61   :  { %v10636_v40 = vpop.f32.mrb[52].mxu0 }
0x3a62   :  { %v6278_v30 = vpop.f32.mrb[53].mxu0  ;;  %v6290_v17 = vsel %vm1907_vm11, %v10636_v40, -inf }
0x3a63   :  { %v6287_v2 = vsel %vm1907_vm11, %v6278_v30, -inf }
0x3a64   :  { %6288 = vmax.xlane.f32.xlu0 %v6287_v2 }
0x3a68   :  { %6291 = vmax.xlane.f32.xlu0 %v6290_v17 }
0x3af1   :  { %v13899_v24 = vpop.xlane.xlu0 %6288 }
0x3af2   :  { %vm6293_vm10 = vcmp.eq.f32.partialorder %v6278_v30, %v13899_v24 }
0x3af3   :  { %v6295_v22 = vsel %vm6293_vm10, %v12059_v19, 4 }
0x3af4   :  { %v6297_v53 = vsel %vm1907_vm11, %v6295_v22, 2147483647 }
0x3af5   :  { %v13904_v14 = vpop.xlane.xlu0 %6291  ;;  %v6299_v18 = vshra.s32 %v6297_v53, 16  ;;  %v6298_v62 = vand.u32 65535, %v6297_v53 }
0x3af6   :  { %vm6294_vm6 = vcmp.eq.f32.partialorder %v10636_v40, %v13904_v14 }
0x3af7   :  { %v6296_v44 = vsel %vm6294_vm6, %v12059_v19, 4  ;;  %v6301_v50 = vcvt.s32.f32 %v6299_v18  ;;  %v6300_v35 = vcvt.s32.f32 %v6298_v62 }
0x3af8   :  { %v6312_v39 = vsel %vm1907_vm11, %v6296_v44, 2147483647 }
0x3af9   :  { %6302 = vmin.xlane.f32.xlu0 %v6301_v50  ;;  %v6314_v45 = vshra.s32 %v6312_v39, 16  ;;  %v6313_v56 = vand.u32 65535, %v6312_v39 }
0x3afb   :  { %v6316_v36 = vcvt.s32.f32 %v6314_v45  ;;  %v6315_v48 = vcvt.s32.f32 %v6313_v56 }
0x3afd   :  { %6317 = vmin.xlane.f32.xlu0 %v6316_v36 }
0x3b86   :  { %v6303_v38 = vpop.xlane.xlu0 %6302 }
0x3b87   :  { %vm6304_vm12 = vcmp.eq.f32.partialorder %v6301_v50, %v6303_v38  ;;  %v6309_v3 = vcvt.f32.s32 %v6303_v38 }
0x3b88   :  { %v6305_v8 = vsel %vm6304_vm12, %v6300_v35, inf }
0x3b89   :  { %6306 = vmin.xlane.f32.xlu0 %v6305_v8  ;;  %v6310_v59 = vshll.u32 %v6309_v3, 16 }
0x3b8a   :  { %v6318_v20 = vpop.xlane.xlu0 %6317 }
0x3b8b   :  { %vm6319_vm13 = vcmp.eq.f32.partialorder %v6316_v36, %v6318_v20  ;;  %v6324_v21 = vcvt.f32.s32 %v6318_v20 }
0x3b8c   :  { %v6320_v43 = vsel %vm6319_vm13, %v6315_v48, inf }
0x3b8d   :  { %6321 = vmin.xlane.f32.xlu0 %v6320_v43  ;;  %v6325_v29 = vshll.u32 %v6324_v21, 16 }
0x3c16   :  { %v6307_v63 = vpop.xlane.xlu0 %6306 }
0x3c17   :  { %v6308_v13 = vcvt.f32.s32 %v6307_v63 }
0x3c19   :  { %v6311_v23 = vadd.s32 %v6310_v59, %v6308_v13 }
0x3c1a   :  { %v6322_v60 = vpop.xlane.xlu0 %6321 }
0x3c1b   :  { %vm6327_vm14 = vcmp.eq.s32.totalorder %v12059_v19, %v6311_v23  ;;  %v6323_v47 = vcvt.f32.s32 %v6322_v60 }
0x3c1c   :  { %v13911_v6 = vsel %vm6327_vm14, 1.0, %v14910_v25 }
0x3c1d   :  { %v6326_v58 = vadd.s32 %v6325_v29, %v6323_v47  ;;  %vm6333_vm0 = vcmp.gt.f32.partialorder %v13911_v6, 0.0  ;;  %v14984_v47 = vld [vmem:[#allocation47_spill] sm:$0xff] }
0x3c1e   :  { %v6335_v33 = vsel %vm6333_vm0, -1e+30, %v6278_v30 }
0x3c1f   :  { %vm6328_vm2 = vcmp.eq.s32.totalorder %v12059_v19, %v6326_v58  ;;  %v6337_v9 = vsel %vm1907_vm11, %v6335_v33, -inf  ;;  %v11893_v58 = vld [vmem:[%s14751_s7 + $0x8] sm:$0xff] }
0x3c20   :  { %v13917_v46 = vsel %vm6328_vm2, 1.0, %v14910_v25  ;;  %6338 = vmax.xlane.f32.xlu1 %v6337_v9  ;;  %v14986_v9 = vld [vmem:[#allocation49_spill] sm:$0xff] }
0x3c21   :  { %vm6334_vm4 = vcmp.gt.f32.partialorder %v13917_v46, 0.0 }
0x3c22   :  { %v6336_v32 = vsel %vm6334_vm4, -1e+30, %v10636_v40 }
0x3c23   :  { %v6340_v51 = vsel %vm1907_vm11, %v6336_v32, -inf }
0x3c24   :  { %6341 = vmax.xlane.f32.xlu0 %v6340_v51 }
0x3cad   :  { %v13921_v4 = vpop.xlane.xlu1 %6338 }
0x3cae   :  { %vm6343_vm5 = vcmp.eq.f32.partialorder %v6335_v33, %v13921_v4  ;;  %v14985_v33 = vld [vmem:[#allocation48_spill] sm:$0xff] }
0x3caf   :  { %v6345_v16 = vsel %vm6343_vm5, %v12059_v19, 4 }
0x3cb0   :  { %v6347_v41 = vsel %vm1907_vm11, %v6345_v16, 2147483647 }
0x3cb1   :  { %v13926_v52 = vpop.xlane.xlu0 %6341  ;;  %v6349_v10 = vshra.s32 %v6347_v41, 16  ;;  %v6348_v53 = vand.u32 65535, %v6347_v41 }
0x3cb2   :  { %vm6344_vm7 = vcmp.eq.f32.partialorder %v6336_v32, %v13926_v52  ;;  %v14987_v32 = vld [vmem:[#allocation50_spill] sm:$0xff] }
0x3cb3   :  { %v6346_v30 = vsel %vm6344_vm7, %v12059_v19, 4  ;;  %v6351_v2 = vcvt.s32.f32 %v6349_v10  ;;  %v6350_v44 = vcvt.s32.f32 %v6348_v53 }
0x3cb4   :  { %v6362_v40 = vsel %vm1907_vm11, %v6346_v30, 2147483647 }
0x3cb5   :  { %6352 = vmin.xlane.f32.xlu0 %v6351_v2  ;;  %v6364_v17 = vshra.s32 %v6362_v40, 16  ;;  %v6363_v50 = vand.u32 65535, %v6362_v40 }
0x3cb7   :  { %v6366_v22 = vcvt.s32.f32 %v6364_v17  ;;  %v6365_v36 = vcvt.s32.f32 %v6363_v50 }
0x3cb9   :  { %6367 = vmin.xlane.f32.xlu0 %v6366_v22 }
0x3d42   :  { %v6353_v18 = vpop.xlane.xlu0 %6352 }
0x3d43   :  { %vm6354_vm8 = vcmp.eq.f32.partialorder %v6351_v2, %v6353_v18  ;;  %v6359_v38 = vcvt.f32.s32 %v6353_v18 }
0x3d44   :  { %v6355_v39 = vsel %vm6354_vm8, %v6350_v44, inf }
0x3d45   :  { %6356 = vmin.xlane.f32.xlu0 %v6355_v39  ;;  %v6360_v56 = vshll.u32 %v6359_v38, 16 }
0x3d46   :  { %v6368_v45 = vpop.xlane.xlu0 %6367 }
0x3d47   :  { %vm6369_vm9 = vcmp.eq.f32.partialorder %v6366_v22, %v6368_v45  ;;  %v6374_v8 = vcvt.f32.s32 %v6368_v45 }
0x3d48   :  { %v6370_v62 = vsel %vm6369_vm9, %v6365_v36, inf }
0x3d49   :  { %6371 = vmin.xlane.f32.xlu0 %v6370_v62  ;;  %v6375_v3 = vshll.u32 %v6374_v8, 16 }
0x3dd2   :  { %v6357_v35 = vpop.xlane.xlu0 %6356 }
0x3dd3   :  { %v6358_v20 = vcvt.f32.s32 %v6357_v35 }
0x3dd5   :  { %v6361_v48 = vadd.s32 %v6360_v56, %v6358_v20 }
0x3dd6   :  { %v6372_v43 = vpop.xlane.xlu0 %6371 }
0x3dd7   :  { %vm6377_vm10 = vcmp.eq.s32.totalorder %v12059_v19, %v6361_v48  ;;  %v6373_v63 = vcvt.f32.s32 %v6372_v43 }
0x3dd8   :  { %v13933_v21 = vsel %vm6377_vm10, 1.0, %v14910_v25 }
0x3dd9   :  { %v6376_v59 = vadd.s32 %v6375_v3, %v6373_v63  ;;  %v6395_v23 = vadd.f32 %v13933_v21, %v13911_v6  ;;  %v6383_v3 = vsub.f32 %v13921_v4, %v13899_v24 }
0x3ddb   :  { %vm6378_vm6 = vcmp.eq.s32.totalorder %v12059_v19, %v6376_v59  ;;  %v6385_v63 = vmul.f32 1.442695, %v6383_v3  ;;  %v6384_v59 = vsub.f32 %v13926_v52, %v13904_v14 }
0x3ddc   :  { %v13937_v13 = vsel %vm6378_vm6, 1.0, %v14910_v25 }
0x3ddd   :  { %v6396_v60 = vadd.f32 %v13937_v13, %v13917_v46  ;;  %11788 = vpow2.f32 %v6385_v63 }
0x3ddf   :  { %v11394_v29 = vpack.c.bf16 %v6396_v60, %v6395_v23  ;;  %v6387_v23 = vmul.f32 1.442695, %v6384_v59 }
0x3de1   :  { %11395 = vmatprep.subr.bf16.mxu1 %v11394_v29  ;;  %11790 = vpow2.f32 %v6387_v23 }
0x3de2   :  { %11397 = vmatpush3.bf16.msra.mxu1 %v11394_v29 }
0x3de3   :  { %11399 = vmatprep.subr.bf16.mxu1 %v14984_v47 }
0x3de5   :  { %10642 = vmatmul.mubr.msk.f32.vlgmr.msra.gmra.mrb[72].mxu1 %vm803_vm15, %v11893_v58 }
0x3de6   :  { %11401 = vmatpush1.bf16.msra.mxu1 %v14985_v33  ;;  %6590 = vmatprep.mubr.f32.mxu1 %v14910_v25 }
0x3de7   :  { %11403 = vmatprep.subr.bf16.mxu1 %v14986_v9  ;;  %v11789_v60 = vpop.eup %11788 }
0x3de8   :  { %v6389_v29 = vadd.f32 1.0, %v11789_v60 }
0x3dea   :  { %11405 = vmatpush1.bf16.msra.mxu1 %v14987_v32  ;;  %11792 = vrcp.f32 %v6389_v29 }
0x3deb   :  { %v11791_v47 = vpop.eup %11790 }
0x3dec   :  { %v6390_v58 = vadd.f32 1.0, %v11791_v47 }
0x3ded   :  { %9411 = vmatmul.mubr.msk.f32.vlgmr.msra.gmra.mrb[74].mxu1 %vm287_vm3, %v13881_v34 }
0x3dee   :  { %6596 = vmatprep.mubr.f32.mxu1 %v14910_v25  ;;  %11794 = vrcp.f32 %v6390_v58 }
0x3df1   :  { %9412 = vmatmul.mubr.msk.f32.gmra.mrb[76].mxu1 %vm287_vm3, %v13887_v42 }
0x3df2   :  { %6950 = vmatprep.mubr.f32.mxu1 %v14910_v25 }
0x3df4   :  { %v11793_v9 = vpop.eup %11792 }
0x3eb8   :  { %v10643_v51 = vpop.f32.mrb[72].mxu1 }
0x3eb9   :  { %v6473_v16 = vadd.f32 1.0, %v10643_v51  ;;  %v6489_v41 = vadd.f32 %v10643_v51, %v13917_v46  ;;  %v6463_v10 = vpop.f32.mrb[73].mxu1  ;;  %v6393_v51 = vmul.f32 %v11793_v9, %v11789_v60 }
0x3eba   :  { %v6472_v30 = vadd.f32 1.0, %v6463_v10  ;;  %v6488_v2 = vadd.f32 %v13911_v6, %v6463_v10 }
0x3ebb   :  { %vm6475_vm12 = vcmp.le.f32.partialorder %v6473_v16, 5.0  ;;  %v6491_v22 = vadd.f32 1.0, %v6489_v41  ;;  %v11795_v16 = vpop.eup %11794 }
0x3ebc   :  { %v9408_v40 = vsel %vm6475_vm12, 1.0, %v14910_v25  ;;  %vm6474_vm13 = vcmp.le.f32.partialorder %v6472_v30, 5.0  ;;  %v6490_v17 = vadd.f32 1.0, %v6488_v2  ;;  %v6394_v2 = vmul.f32 %v11795_v16, %v11791_v47 }
0x3ebd   :  { %v9407_v53 = vsel %vm6474_vm13, 1.0, %v14910_v25  ;;  %v6481_v18 = vmul.f32 %v9408_v40, %v13917_v46  ;;  %vm6493_vm0 = vcmp.le.f32.partialorder %v6491_v22, 5.0 }
0x3ebe   :  { %vm6492_vm14 = vcmp.le.f32.partialorder %v6490_v17, 5.0  ;;  %v6480_v50 = vmul.f32 %v9407_v53, %v13911_v6  ;;  %v9410_v35 = vsel %vm6493_vm0, 1.0, %v14910_v25 }
0x3ebf   :  { %v6485_v44 = vsel %vm1907_vm11, %v6481_v18, 0.0  ;;  %v9409_v39 = vsel %vm6492_vm14, 1.0, %v14910_v25  ;;  %v6499_v48 = vmul.f32 %v9410_v35, %v13937_v13 }
0x3ec0   :  { %6486 = vadd.xlane.f32.xlu0 %v6485_v44  ;;  %v13966_v45 = vpop.f32.mrb[74].mxu1  ;;  %v6482_v62 = vsel %vm1907_vm11, %v6480_v50, 0.0  ;;  %v6498_v38 = vmul.f32 %v9409_v39, %v13933_v21 }
0x3ec1   :  { %v13968_v36 = vpop.f32.mrb[75].mxu1  ;;  %v6503_v43 = vsel %vm1907_vm11, %v6499_v48, 0.0 }
0x3ec2   :  { %v6500_v20 = vsel %vm1907_vm11, %v6498_v38, 0.0 }
0x3ec4   :  { %v13973_v56 = vpop.f32.mrb[76].mxu1  ;;  %6483 = vadd.xlane.f32.xlu0 %v6482_v62 }
0x3ec5   :  { %v13975_v8 = vpop.f32.mrb[77].mxu1 }
0x3ec8   :  { %6501 = vadd.xlane.f32.xlu0 %v6500_v20 }
0x3ecc   :  { %6504 = vadd.xlane.f32.xlu0 %v6503_v43 }
0x3f4d   :  { %v6487_v33 = vpop.xlane.xlu0 %6486 }
0x3f4e   :  { %v6507_v40 = vmul.f32 %v11795_v16, %v6487_v33  ;;  %v6770_v22 = vmul.f32 %v13917_v46, %v6487_v33  ;;  %v14990_v16 = vld [vmem:[#allocation56_spill] sm:$0xff] }
0x3f51   :  { %v6484_v32 = vpop.xlane.xlu0 %6483 }
0x3f52   :  { %v6506_v24 = vmul.f32 %v11793_v9, %v6484_v32  ;;  %v6769_v4 = vmul.f32 %v13911_v6, %v6484_v32  ;;  %v14988_v9 = vld [vmem:[#allocation54_spill] sm:$0xff] }
0x3f55   :  { %v6502_v41 = vpop.xlane.xlu0 %6501 }
0x3f56   :  { %v6508_v10 = vmul.f32 %v6502_v41, %v6393_v51  ;;  %v6771_v14 = vmul.f32 %v13933_v21, %v6502_v41  ;;  %v14989_v51 = vld [vmem:[#allocation55_spill] sm:$0xff]  ;;  %v14991_v41 = vld [vmem:[#allocation57_spill] sm:$0xff] }
0x3f58   :  { %v6510_v52 = vadd.f32 %v6508_v10, %v6506_v24  ;;  %v6773_v30 = vadd.f32 %v6771_v14, %v6769_v4  ;;  %v14994_v4 = vld [vmem:[#allocation61_spill] sm:$0xff]  ;;  %v14996_v14 = vld [vmem:[#allocation63_spill] sm:$0xff] }
0x3f59   :  { %v6505_v17 = vpop.xlane.xlu0 %6504 }
0x3f5a   :  { %v6512_v53 = vadd.f32 1e-09, %v6510_v52  ;;  %v6509_v18 = vmul.f32 %v6505_v17, %v6394_v2  ;;  %v6772_v44 = vmul.f32 %v13937_v13, %v6505_v17  ;;  %v6775_v62 = vsel %vm1907_vm11, %v6773_v30, 0.0  ;;  %v14997_v52 = vld [vmem:[#allocation64_spill] sm:$0xff]  ;;  %v14998_v30 = vld [vmem:[#allocation65_spill] sm:$0xff]  ;;  %v14999_v2 = vld [vmem:[#allocation66_spill] sm:$0xff] }
0x3f5b   :  { %v15001_v17 = vld [vmem:[#allocation68_spill] sm:$0xff] }
0x3f5c   :  { %11796 = vrcp.f32 %v6512_v53  ;;  %v6511_v50 = vadd.f32 %v6509_v18, %v6507_v40  ;;  %v6774_v39 = vadd.f32 %v6772_v44, %v6770_v22  ;;  %v15002_v22 = vld [vmem:[#allocation69_spill] sm:$0xff]  ;;  %v6603_v53 = vmax.f32 %v13966_v45, 0.0 }
0x3f5e   :  { %v6513_v38 = vadd.f32 1e-09, %v6511_v50  ;;  %v6776_v35 = vsel %vm1907_vm11, %v6774_v39, 0.0 }
0x3f5f   :  { %v13990_v20 = vadd.f32 %v6776_v35, %v6775_v62  ;;  %v6606_v35 = vmax.f32 %v13975_v8, 0.0 }
0x3f60   :  { %11798 = vrcp.f32 %v6513_v38  ;;  %v6605_v38 = vmax.f32 %v13973_v56, 0.0 }
0x3f66   :  { %v11797_v48 = vpop.eup %11796 }
0x3f67   :  { %v6516_v43 = vmul.f32 %v11797_v48, %v6506_v24  ;;  %v6518_v3 = vmul.f32 %v11797_v48, %v6508_v10  ;;  %v14993_v24 = vld [vmem:[#allocation60_spill] sm:$0xff]  ;;  %v14995_v10 = vld [vmem:[#allocation62_spill] sm:$0xff] }
0x3f69   :  { %v6520_v63 = vmul.f32 %v13911_v6, %v6516_v43  ;;  %v6522_v59 = vmul.f32 %v13933_v21, %v6518_v3 }
0x3f6a   :  { %v11799_v23 = vpop.eup %11798 }
0x3f6b   :  { %v6524_v60 = vadd.f32 %v6522_v59, %v6520_v63  ;;  %v6519_v29 = vmul.f32 %v11799_v23, %v6509_v18  ;;  %v6517_v47 = vmul.f32 %v11799_v23, %v6507_v40  ;;  %v15000_v40 = vld [vmem:[#allocation67_spill] sm:$0xff]  ;;  %v6604_v18 = vmax.f32 %v13968_v36, 0.0 }
0x3f6d   :  { %v6523_v58 = vmul.f32 %v13937_v13, %v6519_v29  ;;  %9415 = vmatmul.mubr.msk.f32.vlgmr.msra.gmra.mrb[54].mxu0 %vm1907_vm11, %v6524_v60  ;;  %v6521_v33 = vmul.f32 %v13917_v46, %v6517_v47  ;;  %v6784_v6 = vsel %vm1907_vm11, %v6524_v60, 0.0  ;;  %v14992_v46 = vld [vmem:[#allocation58_spill] sm:$0xff] }
0x3f6e   :  { %6683 = vmatprep.mubr.f32.mxu0 %v14910_v25  ;;  %11409 = vmatpush3.bf16.msra.mxu0 %v14988_v9 }
0x3f6f   :  { %v6525_v32 = vadd.f32 %v6523_v58, %v6521_v33  ;;  %11411 = vmatprep.subr.bf16.mxu0 %v14989_v51 }
0x3f71   :  { %9416 = vmatmul.mubr.msk.f32.gmra.mrb[56].mxu0 %vm1907_vm11, %v6525_v32  ;;  %v6785_v21 = vsel %vm1907_vm11, %v6525_v32, 0.0 }
0x3f72   :  { %11413 = vmatpush3.bf16.msra.mxu0 %v14990_v16  ;;  %v14004_v13 = vadd.f32 %v6785_v21, %v6784_v6 }
0x3f73   :  { %11415 = vmatprep.subr.bf16.mxu0 %v14991_v41 }
0x3f76   :  { %11417 = vmatpush3.bf16.msra.mxu0 %v14992_v46 }
0x3f77   :  { %11419 = vmatprep.subr.bf16.mxu0 %v14993_v24  ;;  %v9423_v24 = vld [vmem:[%s14755_s11 + $0x128] sm:$0xff] }
0x3f7a   :  { %11421 = vmatpush3.bf16.msra.mxu0 %v14994_v4 }
0x3f7b   :  { %11423 = vmatprep.subr.bf16.mxu0 %v14995_v10  ;;  %v9418_v10 = vld [vmem:[%s14755_s11 + $0x100] sm:$0xff] }
0x3f7e   :  { %11425 = vmatpush3.bf16.msra.mxu0 %v14996_v14  ;;  %v9422_v14 = vld [vmem:[%s14755_s11 + $0x120] sm:$0xff] }
0x3f7f   :  { %11427 = vmatprep.subr.bf16.mxu0 %v14997_v52  ;;  %v11440_v52 = vpack.c.bf16 %v9422_v14, %v9418_v10  ;;  %v15011_v10 = vld [vmem:[#allocation16_spill] sm:$0xff]  ;;  %v15012_v14 = vld [vmem:[#allocation17_spill] sm:$0xff] }
0x3f82   :  { %11429 = vmatpush3.bf16.msra.mxu0 %v14998_v30  ;;  %v9427_v30 = vld [vmem:[%s14755_s11 + $0x148] sm:$0xff] }
0x3f83   :  { %11431 = vmatprep.subr.bf16.mxu0 %v14999_v2  ;;  %v9431_v2 = vld [vmem:[%s14755_s11 + $0x168] sm:$0xff] }
0x3f86   :  { %11433 = vmatpush3.bf16.msra.mxu0 %v15000_v40  ;;  %v11442_v40 = vpack.c.bf16 %v9431_v2, %v9427_v30  ;;  %v15013_v2 = vld [vmem:[#allocation5_spill] sm:$0xff] }
0x3f87   :  { %11435 = vmatprep.subr.bf16.mxu0 %v15001_v17  ;;  %v9426_v17 = vld [vmem:[%s14755_s11 + $0x140] sm:$0xff] }
0x3f8a   :  { %11437 = vmatpush3.bf16.msra.mxu0 %v15002_v22  ;;  %v9430_v22 = vld [vmem:[%s14755_s11 + $0x160] sm:$0xff] }
0x4040   :  { %v6679_v44 = vpop.f32.mrb[54].mxu0 }
0x4041   :  { %v6690_v50 = vmul.f32 %v6679_v44, %v6603_v53  ;;  %v6681_v39 = vpop.f32.mrb[55].mxu0  ;;  %v11444_v53 = vpack.c.bf16 %v9430_v22, %v9426_v17  ;;  %v9425_v44 = vld [vmem:[%s14755_s11 + $0x138] sm:$0xff] }
0x4042   :  { %v6691_v62 = vmul.f32 %v6681_v39, %v6604_v18  ;;  %v9421_v18 = vld [vmem:[%s14755_s11 + $0x118] sm:$0xff] }
0x4044   :  { %v6685_v48 = vpop.f32.mrb[56].mxu0  ;;  %6758 = vmatprep.mubr.f32.mxu0 %v6691_v62 }
0x4045   :  { %v6692_v43 = vmul.f32 %v6685_v48, %v6605_v38  ;;  %v6687_v3 = vpop.f32.mrb[57].mxu0  ;;  %6759 = vmatmul.mubr.f32.vlgmr.msra.gmra.mrb[58].mxu0 %v6690_v50  ;;  %v11446_v50 = vpack.c.bf16 %v9425_v44, %v9421_v18  ;;  %v15014_v44 = vld [vmem:[#allocation7_spill] sm:$0xff] }
0x4046   :  { %v6693_v63 = vmul.f32 %v6687_v3, %v6606_v35 }
0x4048   :  { %6763 = vmatprep.mubr.f32.mxu0 %v6693_v63 }
0x4049   :  { %6764 = vmatmul.mubr.f32.gmra.mrb[60].mxu0 %v6692_v43 }
0x4118   :  { %v9942_v59 = vpop.f32.mrb[58].mxu0 }
0x4119   :  { %v9943_v45 = vpop.f32.mrb[59].mxu0 }
0x411a   :  { %v9944_v23 = vadd.f32 %v9943_v45, %v9942_v59  ;;  %v9420_v59 = vld [vmem:[%s14755_s11 + $0x110] sm:$0xff] }
0x411b   :  { %v9424_v45 = vld [vmem:[%s14755_s11 + $0x130] sm:$0xff] }
0x411c   :  { %v6810_v36 = vadd.f32 %v9944_v23, %v13881_v34  ;;  %v9945_v60 = vpop.f32.mrb[60].mxu0  ;;  %v9429_v23 = vld [vmem:[%s14755_s11 + $0x158] sm:$0xff] }
0x411d   :  { %v9946_v29 = vpop.f32.mrb[61].mxu0 }
0x411e   :  { %v9947_v47 = vadd.f32 %v9946_v29, %v9945_v60  ;;  %v6812_v56 = vsel %vm287_vm3, %v6810_v36, 0.0  ;;  %v15003_v60 = vld [vmem:[#allocation70_spill] sm:$0xff] }
0x411f   :  { %6813 = vadd.xlane.f32.xlu0 %v6812_v56  ;;  %v11448_v56 = vpack.c.bf16 %v9424_v45, %v9420_v59 }
0x4120   :  { %v6811_v8 = vadd.f32 %v9947_v47, %v13887_v42  ;;  %v9419_v42 = vld [vmem:[%s14755_s11 + $0x108] sm:$0xff] }
0x4121   :  { %v11438_v4 = vpack.c.bf16 %v9423_v24, %v9419_v42  ;;  %v15008_v42 = vld [vmem:[#allocation13_spill] sm:$0xff]  ;;  %v15009_v24 = vld [vmem:[#allocation14_spill] sm:$0xff] }
0x4122   :  { %v6815_v58 = vsel %vm287_vm3, %v6811_v8, 0.0 }
0x4123   :  { %6816 = vadd.xlane.f32.xlu1 %v6815_v58  ;;  %11439 = vmatprep.subr.bf16.mxu1 %v11438_v4  ;;  %v15010_v4 = vld [vmem:[#allocation15_spill] sm:$0xff] }
0x4124   :  { %11441 = vmatpush1.bf16.msra.mxu1 %v11440_v52 }
0x4125   :  { %11443 = vmatprep.subr.bf16.mxu1 %v11442_v40 }
0x4128   :  { %11445 = vmatpush1.bf16.msra.mxu1 %v11444_v53 }
0x4129   :  { %11447 = vmatprep.subr.bf16.mxu1 %v11446_v50 }
0x41ac   :  { %v6814_v33 = vpop.xlane.xlu0 %6813 }
0x41ad   :  { %v6818_v9 = vmul.f32 0.03125, %v6814_v33 }
0x41af   :  { %v6820_v32 = vsub.f32 %v6810_v36, %v6818_v9  ;;  %v9433_v36 = vld [vmem:[%s14755_s11 + $0x178] sm:$0xff] }
0x41b0   :  { %v6817_v51 = vpop.xlane.xlu1 %6816  ;;  %v11450_v9 = vpack.c.bf16 %v9433_v36, %v9429_v23  ;;  %v15017_v36 = vld [vmem:[#allocation9_spill] sm:$0xff] }
0x41b1   :  { %v6819_v6 = vmul.f32 0.03125, %v6817_v51  ;;  %v6822_v21 = vmul.f32 %v6820_v32, %v6820_v32  ;;  %v9432_v51 = vld [vmem:[%s14755_s11 + $0x170] sm:$0xff] }
0x41b3   :  { %v6821_v16 = vsub.f32 %v6811_v8, %v6819_v6  ;;  %v6824_v34 = vsel %vm287_vm3, %v6822_v21, 0.0  ;;  %v15004_v8 = vld [vmem:[#allocation71_spill] sm:$0xff] }
0x41b4   :  { %6825 = vadd.xlane.f32.xlu0 %v6824_v34  ;;  %v15005_v34 = vld [vmem:[#allocation10_spill] sm:$0xff] }
0x41b5   :  { %v6823_v41 = vmul.f32 %v6821_v16, %v6821_v16 }
0x41b7   :  { %v6827_v46 = vsel %vm287_vm3, %v6823_v41, 0.0  ;;  %v15006_v41 = vld [vmem:[#allocation11_spill] sm:$0xff] }
0x41b8   :  { %6828 = vadd.xlane.f32.xlu1 %v6827_v46  ;;  %v15007_v46 = vld [vmem:[#allocation12_spill] sm:$0xff] }
0x4241   :  { %v6826_v39 = vpop.xlane.xlu0 %6825 }
0x4242   :  { %v6830_v62 = vmul.f32 0.03125, %v6826_v39  ;;  %v15015_v39 = vld [vmem:[#allocation6_spill] sm:$0xff] }
0x4244   :  { %v6832_v38 = vadd.f32 1e-05, %v6830_v62 }
0x4245   :  { %v6829_v35 = vpop.xlane.xlu1 %6828 }
0x4246   :  { %11800 = vrsqrt.f32 %v6832_v38  ;;  %v6831_v48 = vmul.f32 0.03125, %v6829_v35 }
0x4248   :  { %v6833_v43 = vadd.f32 1e-05, %v6831_v48 }
0x424a   :  { %11802 = vrsqrt.f32 %v6833_v43  ;;  %v15016_v43 = vld [vmem:[#allocation8_spill] sm:$0xff] }
0x4250   :  { %v11801_v3 = vpop.eup %11800 }
0x4251   :  { %v6836_v63 = vmul.f32 %v11801_v3, %v6820_v32  ;;  %v9428_v32 = vld [vmem:[%s14755_s11 + $0x150] sm:$0xff] }
0x4252   :  { %v11452_v21 = vpack.c.bf16 %v9432_v51, %v9428_v32 }
0x4253   :  { %v6838_v29 = vmul.f32 %v6836_v63, %v15003_v60 }
0x4254   :  { %v11803_v47 = vpop.eup %11802 }
0x4255   :  { %v14072_v58 = vadd.f32 %v6838_v29, %v15004_v8  ;;  %v6837_v33 = vmul.f32 %v11803_v47, %v6821_v16 }
0x4257   :  { %9450 = vmatmul.mubr.msk.f32.vlgmr.msra.gmra.mrb[78].mxu1 %vm287_vm3, %v14072_v58  ;;  %v6839_v6 = vmul.f32 %v6837_v33, %v15003_v60 }
0x4258   :  { %11449 = vmatpush1.bf16.msra.mxu1 %v11448_v56  ;;  %6956 = vmatprep.mubr.f32.mxu1 %v14910_v25 }
0x4259   :  { %v14085_v16 = vadd.f32 %v6839_v6, %v15004_v8  ;;  %11451 = vmatprep.subr.bf16.mxu1 %v11450_v9 }
0x425b   :  { %9451 = vmatmul.mubr.msk.f32.gmra.mrb[80].mxu1 %vm287_vm3, %v14085_v16 }
0x425c   :  { %11453 = vmatpush1.bf16.msra.mxu1 %v11452_v21  ;;  %7027 = vmatprep.mubr.f32.mxu1 %v14910_v25 }
0x425d   :  { %11455 = vmatprep.subr.bf16.mxu1 %v15005_v34 }
0x425f   :  { %9452 = vmatmul.mubr.msk.f32.vlgmr.msra.gmra.mrb[82].mxu1 %vm287_vm3, %v14072_v58 }
0x4260   :  { %7033 = vmatprep.mubr.f32.mxu1 %v14910_v25  ;;  %11457 = vmatpush3.bf16.msra.mxu1 %v15005_v34 }
0x4261   :  { %11459 = vmatprep.subr.bf16.mxu1 %v15006_v41 }
0x4263   :  { %9453 = vmatmul.mubr.msk.f32.gmra.mrb[84].mxu1 %vm287_vm3, %v14085_v16 }
0x4264   :  { %11461 = vmatpush3.bf16.msra.mxu1 %v15006_v41 }
0x4265   :  { %11463 = vmatprep.subr.bf16.mxu1 %v15007_v46 }
0x4268   :  { %11465 = vmatpush3.bf16.msra.mxu1 %v15007_v46 }
0x4269   :  { %11467 = vmatprep.subr.bf16.mxu1 %v15008_v42 }
0x426c   :  { %11469 = vmatpush3.bf16.msra.mxu1 %v15008_v42 }
0x426d   :  { %11471 = vmatprep.subr.bf16.mxu1 %v15009_v24 }
0x4270   :  { %11473 = vmatpush3.bf16.msra.mxu1 %v15009_v24 }
0x4271   :  { %11475 = vmatprep.subr.bf16.mxu1 %v15010_v4 }
0x4274   :  { %11477 = vmatpush3.bf16.msra.mxu1 %v15010_v4 }
0x4275   :  { %11479 = vmatprep.subr.bf16.mxu1 %v15011_v10 }
0x4278   :  { %11481 = vmatpush3.bf16.msra.mxu1 %v15011_v10 }
0x4279   :  { %11483 = vmatprep.subr.bf16.mxu1 %v15012_v14 }
0x427c   :  { %11485 = vmatpush3.bf16.msra.mxu1 %v15012_v14 }
0x432a   :  { %v14111_v52 = vpop.f32.mrb[78].mxu1 }
0x432b   :  { %v14113_v30 = vpop.f32.mrb[79].mxu1 }
0x432c   :  { %v7318_v40 = vmul.f32 %v15013_v2, %v14113_v30 }
0x432e   :  { %v14117_v17 = vpop.f32.mrb[80].mxu1  ;;  %10683 = vmatprep.mubr.f32.mxu0 %v7318_v40 }
0x432f   :  { %v14119_v22 = vpop.f32.mrb[81].mxu1 }
0x4330   :  { %v7319_v23 = vmul.f32 %v15013_v2, %v14119_v22 }
0x4332   :  { %v7029_v53 = vpop.f32.mrb[82].mxu1 }
0x4333   :  { %v7031_v18 = vpop.f32.mrb[83].mxu1 }
0x4334   :  { %v7084_v50 = vadd.f32 %v7031_v18, %v15014_v44  ;;  %v7040_v62 = vadd.f32 %v7031_v18, %v15015_v39  ;;  %v7128_v3 = vadd.f32 %v7031_v18, %v15016_v43  ;;  %v7172_v60 = vadd.f32 %v7031_v18, %v15017_v36 }
0x4336   :  { %7086 = vmax.xlane.f32.xlu1 %v7084_v50  ;;  %7042 = vmax.xlane.f32.xlu0 %v7040_v62  ;;  %v7035_v38 = vpop.f32.mrb[84].mxu1 }
0x4337   :  { %v14123_v35 = vpack.c.bf16 %v7035_v38, %v7029_v53  ;;  %v7037_v48 = vpop.f32.mrb[85].mxu1 }
0x4338   :  { %v7085_v63 = vadd.f32 %v7037_v48, %v15014_v44  ;;  %v7041_v59 = vadd.f32 %v7037_v48, %v15015_v39  ;;  %v7129_v45 = vadd.f32 %v7037_v48, %v15016_v43  ;;  %v7173_v29 = vadd.f32 %v7037_v48, %v15017_v36 }
0x4339   :  { %11487 = vmatprep.subr.bf16.mxu0 %v14123_v35 }
0x433a   :  { %7130 = vmax.xlane.f32.xlu0 %v7128_v3  ;;  %11489 = vmatpush3.bf16.xpose.msra.mxu0 %v14123_v35 }
0x433b   :  { %7088 = vmax.xlane.f32.xlu1 %v7085_v63 }
0x433e   :  { %7044 = vmax.xlane.f32.xlu0 %v7041_v59 }
0x433f   :  { %7132 = vmax.xlane.f32.xlu1 %v7129_v45 }
0x4341   :  { %10684 = vmatmul.mubr.f32.vlgmr.msra.gmra.mrb[62].mxu0 %v7319_v23 }
0x4342   :  { %7174 = vmax.xlane.f32.xlu0 %v7172_v60 }
0x4343   :  { %7176 = vmax.xlane.f32.xlu1 %v7173_v29 }
0x43c3   :  { %v7087_v47 = vpop.xlane.xlu1 %7086  ;;  %v7043_v56 = vpop.xlane.xlu0 %7042 }
0x43c4   :  { %vm7090_vm2 = vcmp.eq.f32.partialorder %v7084_v50, %v7087_v47  ;;  %vm7046_vm4 = vcmp.eq.f32.partialorder %v7040_v62, %v7043_v56 }
0x43c5   :  { %v7092_v8 = vsel %vm7090_vm2, %v12059_v19, 128  ;;  %v7048_v33 = vsel %vm7046_vm4, %v12059_v19, 128 }
0x43c6   :  { %v7095_v9 = vshra.s32 %v7092_v8, 16  ;;  %v7051_v32 = vshra.s32 %v7048_v33, 16  ;;  %v7094_v47 = vand.u32 65535, %v7092_v8  ;;  %v7050_v56 = vand.u32 65535, %v7048_v33 }
0x43c7   :  { %v7131_v51 = vpop.xlane.xlu0 %7130 }
0x43c8   :  { %v7053_v6 = vcvt.s32.f32 %v7051_v32  ;;  %vm7134_vm5 = vcmp.eq.f32.partialorder %v7128_v3, %v7131_v51  ;;  %v7089_v21 = vpop.xlane.xlu1 %7088  ;;  %v7097_v34 = vcvt.s32.f32 %v7095_v9  ;;  %v7052_v9 = vcvt.s32.f32 %v7050_v56 }
0x43c9   :  { %v7136_v41 = vsel %vm7134_vm5, %v12059_v19, 128  ;;  %vm7091_vm7 = vcmp.eq.f32.partialorder %v7085_v63, %v7089_v21  ;;  %v7096_v51 = vcvt.s32.f32 %v7094_v47 }
0x43ca   :  { %v7139_v46 = vshra.s32 %v7136_v41, 16  ;;  %v7093_v42 = vsel %vm7091_vm7, %v12059_v19, 128  ;;  %7098 = vmin.xlane.f32.xlu1 %v7097_v34  ;;  %7054 = vmin.xlane.f32.xlu0 %v7053_v6 }
0x43cb   :  { %v7109_v24 = vshra.s32 %v7093_v42, 16  ;;  %v7045_v4 = vpop.xlane.xlu0 %7044  ;;  %v7108_v21 = vand.u32 65535, %v7093_v42 }
0x43cc   :  { %v7141_v10 = vcvt.s32.f32 %v7139_v46  ;;  %v7133_v14 = vpop.xlane.xlu1 %7132  ;;  %vm7047_vm8 = vcmp.eq.f32.partialorder %v7041_v59, %v7045_v4 }
0x43cd   :  { %vm7135_vm9 = vcmp.eq.f32.partialorder %v7129_v45, %v7133_v14  ;;  %v7049_v2 = vsel %vm7047_vm8, %v12059_v19, 128  ;;  %v7111_v40 = vcvt.s32.f32 %v7109_v24  ;;  %v7110_v8 = vcvt.s32.f32 %v7108_v21 }
0x43ce   :  { %v7137_v53 = vsel %vm7135_vm9, %v12059_v19, 128  ;;  %v7065_v18 = vshra.s32 %v7049_v2, 16  ;;  %7142 = vmin.xlane.f32.xlu0 %v7141_v10  ;;  %v7064_v14 = vand.u32 65535, %v7049_v2 }
0x43cf   :  { %v7153_v44 = vshra.s32 %v7137_v53, 16  ;;  %7112 = vmin.xlane.f32.xlu1 %v7111_v40  ;;  %v7175_v50 = vpop.xlane.xlu0 %7174 }
0x43d0   :  { %v7067_v39 = vcvt.s32.f32 %v7065_v18  ;;  %v7177_v62 = vpop.xlane.xlu1 %7176  ;;  %vm7178_vm10 = vcmp.eq.f32.partialorder %v7172_v60, %v7175_v50  ;;  %v7138_v60 = vand.u32 65535, %v7136_v41 }
0x43d1   :  { %vm7179_vm6 = vcmp.eq.f32.partialorder %v7173_v29, %v7177_v62  ;;  %v7180_v38 = vsel %vm7178_vm10, %v12059_v19, 128  ;;  %v7155_v48 = vcvt.s32.f32 %v7153_v44  ;;  %v7152_v44 = vand.u32 65535, %v7137_v53 }
0x43d2   :  { %v7181_v43 = vsel %vm7179_vm6, %v12059_v19, 128  ;;  %v7183_v3 = vshra.s32 %v7180_v38, 16  ;;  %7068 = vmin.xlane.f32.xlu0 %v7067_v39  ;;  %v7140_v4 = vcvt.s32.f32 %v7138_v60  ;;  %v7066_v62 = vcvt.s32.f32 %v7064_v14 }
0x43d3   :  { %v7197_v63 = vshra.s32 %v7181_v43, 16  ;;  %7156 = vmin.xlane.f32.xlu1 %v7155_v48 }
0x43d4   :  { %v7185_v59 = vcvt.s32.f32 %v7183_v3  ;;  %v7182_v3 = vand.u32 65535, %v7180_v38  ;;  %v14146_v38 = vld [vmem:[%s14750_s6] sm:$0xff] }
0x43d5   :  { %v7199_v45 = vcvt.s32.f32 %v7197_v63  ;;  %v7154_v63 = vcvt.s32.f32 %v7152_v44 }
0x43d6   :  { %7186 = vmin.xlane.f32.xlu0 %v7185_v59  ;;  %v7184_v53 = vcvt.s32.f32 %v7182_v3 }
0x43d7   :  { %7200 = vmin.xlane.f32.xlu1 %v7199_v45 }
0x4414   :  { %v10685_v23 = vpop.f32.mrb[62].mxu0 }
0x4415   :  { %v7386_v36 = vpop.f32.mrb[63].mxu0 }
0x4457   :  { %v7099_v29 = vpop.xlane.xlu1 %7098  ;;  %v7055_v32 = vpop.xlane.xlu0 %7054 }
0x4458   :  { %vm7056_vm12 = vcmp.eq.f32.partialorder %v7053_v6, %v7055_v32  ;;  %vm7100_vm13 = vcmp.eq.f32.partialorder %v7097_v34, %v7099_v29  ;;  %v7196_v34 = vand.u32 65535, %v7181_v43  ;;  %v14149_v43 = vadd.f32 %v14146_v38, %v7386_v36 }
0x4459   :  { %v7101_v46 = vsel %vm7100_vm13, %v7096_v51, inf  ;;  %v7057_v24 = vsel %vm7056_vm12, %v7052_v9, inf  ;;  %v7061_v51 = vcvt.f32.s32 %v7055_v32 }
0x445a   :  { %7102 = vmin.xlane.f32.xlu1 %v7101_v46  ;;  %7058 = vmin.xlane.f32.xlu0 %v7057_v24  ;;  %v7395_v60 = vsel %vm803_vm15, %v14149_v43, -inf }
0x445b   :  { %v7143_v18 = vpop.xlane.xlu0 %7142  ;;  %v7062_v14 = vshll.u32 %v7061_v51, 16 }
0x445c   :  { %v7113_v50 = vpop.xlane.xlu1 %7112  ;;  %vm7144_vm14 = vcmp.eq.f32.partialorder %v7141_v10, %v7143_v18  ;;  %v7149_v46 = vcvt.f32.s32 %v7143_v18 }
0x445d   :  { %vm7114_vm0 = vcmp.eq.f32.partialorder %v7111_v40, %v7113_v50  ;;  %v7145_v33 = vsel %vm7144_vm14, %v7140_v4, inf  ;;  %v7198_v40 = vcvt.s32.f32 %v7196_v34 }
0x445e   :  { %v7115_v41 = vsel %vm7114_vm0, %v7110_v8, inf  ;;  %7146 = vmin.xlane.f32.xlu0 %v7145_v33 }
0x445f   :  { %7116 = vmin.xlane.f32.xlu1 %v7115_v41  ;;  %v7069_v6 = vpop.xlane.xlu0 %7068 }
0x4460   :  { %v7157_v42 = vpop.xlane.xlu1 %7156  ;;  %vm7070_vm2 = vcmp.eq.f32.partialorder %v7067_v39, %v7069_v6  ;;  %v7075_v3 = vcvt.f32.s32 %v7069_v6 }
0x4461   :  { %vm7158_vm4 = vcmp.eq.f32.partialorder %v7155_v48, %v7157_v42  ;;  %v7071_v47 = vsel %vm7070_vm2, %v7066_v62, inf  ;;  %v14154_v48 = vld [vmem:[%s14750_s6 + $0x8] sm:$0xff]  ;;  %v7150_v62 = vshll.u32 %v7149_v46, 16 }
0x4462   :  { %v7159_v2 = vsel %vm7158_vm4, %v7154_v63, inf  ;;  %7072 = vmin.xlane.f32.xlu0 %v7071_v47  ;;  %v14157_v9 = vadd.f32 %v14154_v48, %v10685_v23  ;;  %v7119_v23 = vcvt.f32.s32 %v7113_v50  ;;  %v7163_v47 = vcvt.f32.s32 %v7157_v42 }
0x4463   :  { %7160 = vmin.xlane.f32.xlu1 %v7159_v2  ;;  %v7187_v10 = vpop.xlane.xlu0 %7186 }
0x4464   :  { %v7201_v56 = vpop.xlane.xlu1 %7200  ;;  %vm7188_vm5 = vcmp.eq.f32.partialorder %v7185_v59, %v7187_v10  ;;  %v7398_v36 = vsel %vm803_vm15, %v14157_v9, -inf  ;;  %v7120_v63 = vshll.u32 %v7119_v23, 16 }
0x4465   :  { %vm7202_vm7 = vcmp.eq.f32.partialorder %v7199_v45, %v7201_v56  ;;  %v7189_v39 = vsel %vm7188_vm5, %v7184_v53, inf  ;;  %v7105_v45 = vcvt.f32.s32 %v7099_v29  ;;  %v7207_v6 = vcvt.f32.s32 %v7201_v56 }
0x4466   :  { %v7203_v59 = vsel %vm7202_vm7, %v7198_v40, inf  ;;  %7190 = vmin.xlane.f32.xlu0 %v7189_v39  ;;  %v7076_v40 = vshll.u32 %v7075_v3, 16  ;;  %v7193_v39 = vcvt.f32.s32 %v7187_v10 }
0x4467   :  { %7204 = vmin.xlane.f32.xlu1 %v7203_v59  ;;  %v7106_v21 = vshll.u32 %v7105_v45, 16 }
0x4468   :  { %v7194_v10 = vshll.u32 %v7193_v39, 16 }
0x446a   :  { %7396 = vmax.xlane.f32.xlu0 %v7395_v60 }
0x446b   :  { %7399 = vmax.xlane.f32.xlu1 %v7398_v36 }
0x44e7   :  { %v7103_v24 = vpop.xlane.xlu1 %7102  ;;  %v7059_v4 = vpop.xlane.xlu0 %7058 }
0x44e8   :  { %v7104_v44 = vcvt.f32.s32 %v7103_v24  ;;  %v7060_v8 = vcvt.f32.s32 %v7059_v4 }
0x44ea   :  { %v7107_v33 = vadd.s32 %v7106_v21, %v7104_v44  ;;  %v7063_v41 = vadd.s32 %v7062_v14, %v7060_v8  ;;  %v7164_v21 = vshll.u32 %v7163_v47, 16  ;;  %v7208_v44 = vshll.u32 %v7207_v6, 16 }
0x44eb   :  { %v7147_v34 = vpop.xlane.xlu0 %7146 }
0x44ec   :  { %vm7122_vm8 = vcmp.eq.s32.totalorder %v12059_v19, %v7107_v33  ;;  %vm7078_vm9 = vcmp.eq.s32.totalorder %v12059_v19, %v7063_v41  ;;  %v7117_v29 = vpop.xlane.xlu1 %7116  ;;  %v7148_v32 = vcvt.f32.s32 %v7147_v34 }
0x44ed   :  { %v9456_v18 = vsel %vm7122_vm8, 1.0, %v14910_v25  ;;  %v9454_v2 = vsel %vm7078_vm9, 1.0, %v14910_v25  ;;  %v7118_v50 = vcvt.f32.s32 %v7117_v29 }
0x44ee   :  { %v7151_v53 = vadd.s32 %v7150_v62, %v7148_v32  ;;  %v7216_v36 = vadd.f32 %v9456_v18, %v9454_v2 }
0x44ef   :  { %v7121_v59 = vadd.s32 %v7120_v63, %v7118_v50  ;;  %v7073_v60 = vpop.xlane.xlu0 %7072 }
0x44f0   :  { %vm7166_vm10 = vcmp.eq.s32.totalorder %v12059_v19, %v7151_v53  ;;  %v7161_v45 = vpop.xlane.xlu1 %7160  ;;  %v7074_v51 = vcvt.f32.s32 %v7073_v60 }
0x44f1   :  { %v9458_v46 = vsel %vm7166_vm10, 1.0, %v14910_v25  ;;  %v7162_v42 = vcvt.f32.s32 %v7161_v45  ;;  %vm7123_vm6 = vcmp.eq.s32.totalorder %v12059_v19, %v7121_v59 }
0x44f2   :  { %v7077_v24 = vadd.s32 %v7076_v40, %v7074_v51  ;;  %v7218_v4 = vadd.f32 %v9458_v46, %v7216_v36  ;;  %v9457_v33 = vsel %vm7123_vm6, 1.0, %v14910_v25 }
0x44f3   :  { %v7165_v14 = vadd.s32 %v7164_v21, %v7162_v42  ;;  %v7191_v23 = vpop.xlane.xlu0 %7190 }
0x44f4   :  { %vm7079_vm12 = vcmp.eq.s32.totalorder %v12059_v19, %v7077_v24  ;;  %v7205_v56 = vpop.xlane.xlu1 %7204  ;;  %v7192_v8 = vcvt.f32.s32 %v7191_v23 }
0x44f5   :  { %vm7167_vm13 = vcmp.eq.s32.totalorder %v12059_v19, %v7165_v14  ;;  %v9455_v41 = vsel %vm7079_vm12, 1.0, %v14910_v25  ;;  %v7206_v62 = vcvt.f32.s32 %v7205_v56 }
0x44f6   :  { %v7217_v3 = vadd.f32 %v9457_v33, %v9455_v41  ;;  %v7195_v34 = vadd.s32 %v7194_v10, %v7192_v8  ;;  %v9459_v63 = vsel %vm7167_vm13, 1.0, %v14910_v25  ;;  %v7533_v41 = vmul.f32 %v12375_v28, %v14119_v22 }
0x44f7   :  { %v7209_v29 = vadd.s32 %v7208_v44, %v7206_v62  ;;  %v7397_v32 = vpop.xlane.xlu0 %7396  ;;  %v7746_v62 = vmul.f32 %v12400_v7, %v14113_v30 }
0x44f8   :  { %v7219_v47 = vadd.f32 %v9459_v63, %v7217_v3  ;;  %vm7210_vm14 = vcmp.eq.s32.totalorder %v12059_v19, %v7195_v34  ;;  %v7400_v18 = vpop.xlane.xlu1 %7399  ;;  %v7401_v2 = vsub.f32 %v14149_v43, %v7397_v32  ;;  %v7747_v3 = vmul.f32 %v12400_v7, %v14119_v22 }
0x44f9   :  { %vm7211_vm0 = vcmp.eq.s32.totalorder %v12059_v19, %v7209_v29  ;;  %v7402_v50 = vsub.f32 %v14157_v9, %v7400_v18  ;;  %v9460_v53 = vsel %vm7210_vm14, 1.0, %v14910_v25 }
0x44fa   :  { %v9461_v40 = vsel %vm7211_vm0, 1.0, %v14910_v25  ;;  %v7403_v39 = vmul.f32 1.442695, %v7401_v2  ;;  %v7220_v59 = vadd.f32 %v9460_v53, %v7218_v4 }
0x44fb   :  { %v7221_v60 = vadd.f32 %v9461_v40, %v7219_v47  ;;  %v7405_v6 = vmul.f32 1.442695, %v7402_v50 }
0x44fc   :  { %11804 = vpow2.f32 %v7403_v39  ;;  %10676 = vmatprep.mubr.f32.mxu1 %v7220_v59 }
0x44fd   :  { %11806 = vpow2.f32 %v7405_v6  ;;  %v14181_v36 = vadd.f32 %v7221_v60, %v7220_v59  ;;  %10677 = vmatmul.mubr.f32.vlgmr.msra.gmra.mrb[86].mxu1 %v7221_v60 }
0x4506   :  { %v11805_v45 = vpop.eup %11804 }
0x4507   :  { %v11807_v43 = vpop.eup %11806  ;;  %v7407_v51 = vsel %vm803_vm15, %v11805_v45, 0.0 }
0x4508   :  { %v7410_v9 = vsel %vm803_vm15, %v11807_v43, 0.0  ;;  %7408 = vadd.xlane.f32.xlu0 %v7407_v51 }
0x4509   :  { %7411 = vadd.xlane.f32.xlu1 %v7410_v9 }
0x4595   :  { %v7409_v21 = vpop.xlane.xlu0 %7408 }
0x4596   :  { %v7412_v46 = vpop.xlane.xlu1 %7411  ;;  %11808 = vrcp.f32 %v7409_v21 }
0x4597   :  { %11810 = vrcp.f32 %v7412_v46 }
0x45a0   :  { %v11809_v42 = vpop.eup %11808 }
0x45a1   :  { %v7415_v24 = vmul.f32 %v11809_v42, %v11805_v45  ;;  %v11811_v4 = vpop.eup %11810 }
0x45a2   :  { %v7416_v14 = vmul.f32 %v11811_v4, %v11807_v43 }
0x45a3   :  { %7417 = vxpose.xlu0.b32.start [1/2] (short) (narrow) %v7415_v24, 16 }
0x45a7   :  { %7418 = vxpose.xlu0.b32.end [2/2] (short) (narrow) %v7416_v14, 16 }
0x45d0   :  { %v14185_v23 = vpop.f32.mrb[86].mxu1 }
0x45d1   :  { %v7317_v44 = vmul.f32 %v14185_v23, %v14117_v17  ;;  %v14189_v10 = vpop.f32.mrb[87].mxu1 }
0x45d2   :  { %v7316_v56 = vmul.f32 %v14189_v10, %v14111_v52  ;;  %v7532_v52 = vmul.f32 %v12375_v28, %v14113_v30 }
0x45d4   :  { %v14193_v8 = vpack.c.bf16 %v7317_v44, %v7316_v56 }
0x45d6   :  { %11491 = vmatprep.subr.bf16.mxu0 %v14193_v8  ;;  %11499 = vmatprep.subr.bf16.mxu1 %v14193_v8 }
0x45d7   :  { %11493 = vmatpush3.bf16.msra.mxu0 %v14193_v8  ;;  %11501 = vmatpush3.bf16.msra.mxu1 %v14193_v8 }
0x45d8   :  { %11495 = vmatprep.subr.bf16.mxu0 %v14123_v35  ;;  %11507 = vmatprep.subr.bf16.mxu1 %v14193_v8 }
0x4623   :  { %v7433_v17 = vpop.trf.xlu0 }
0x4624   :  { %10690 = vmatprep.mubr.msk.f32.mxu0 %vm803_vm15, %v7433_v17 }
0x4627   :  { %v7434_v33 = vpop.trf.xlu0 }
0x4628   :  { %10691 = vmatmul.mubr.msk.f32.vlgmr.msra.gmra.mrb[64].mxu0 %vm803_vm15, %v7434_v33 }
0x4629   :  { %11497 = vmatpush3.bf16.xpose.msra.mxu0 %v14123_v35  ;;  %10697 = vmatprep.mubr.f32.mxu0 %v7532_v52 }
0x462a   :  { %11503 = vmatprep.subr.bf16.mxu0 %v14123_v35 }
0x4630   :  { %10698 = vmatmul.mubr.f32.vlgmr.msra.gmra.mrb[66].mxu0 %v7533_v41 }
0x4631   :  { %11505 = vmatpush3.bf16.xpose.msra.mxu0 %v14123_v35  ;;  %10711 = vmatprep.mubr.f32.mxu0 %v7746_v62 }
0x4632   :  { %11515 = vmatprep.subr.bf16.mxu0 %v14193_v8 }
0x4638   :  { %10712 = vmatmul.mubr.f32.vlgmr.msra.gmra.mrb[68].mxu0 %v7747_v3 }
0x4639   :  { %11517 = vmatpush3.bf16.msra.mxu0 %v14193_v8 }
0x463a   :  { %11519 = vmatprep.subr.bf16.mxu0 %v12461_v61 }
0x46fb   :  { %v14217_v34 = vpop.f32.mrb[64].mxu0 }
0x46fc   :  { %v14219_v28 = vpop.f32.mrb[65].mxu0 }
0x4703   :  { %v10699_v63 = vpop.f32.mrb[66].mxu0 }
0x4704   :  { %v7600_v29 = vpop.f32.mrb[67].mxu0  ;;  %v7606_v47 = vadd.f32 %v14154_v48, %v10699_v63 }
0x4705   :  { %v7601_v32 = vadd.f32 %v14146_v38, %v7600_v29 }
0x4706   :  { %v7612_v7 = vsel %vm803_vm15, %v7606_v47, -inf }
0x4707   :  { %v7609_v18 = vsel %vm803_vm15, %v7601_v32, -inf }
0x4708   :  { %7610 = vmax.xlane.f32.xlu1 %v7609_v18 }
0x470b   :  { %v10713_v2 = vpop.f32.mrb[68].mxu0 }
0x470c   :  { %v7814_v50 = vpop.f32.mrb[69].mxu0  ;;  %7613 = vmax.xlane.f32.xlu1 %v7612_v7  ;;  %v7820_v40 = vadd.f32 %v14154_v48, %v10713_v2 }
0x470d   :  { %v7815_v53 = vadd.f32 %v14146_v38, %v7814_v50 }
0x470e   :  { %v7826_v59 = vsel %vm803_vm15, %v7820_v40, -inf }
0x470f   :  { %v7823_v39 = vsel %vm803_vm15, %v7815_v53, -inf }
0x4710   :  { %7824 = vmax.xlane.f32.xlu1 %v7823_v39 }
0x4714   :  { %7827 = vmax.xlane.f32.xlu1 %v7826_v59 }
0x4795   :  { %v7611_v60 = vpop.xlane.xlu1 %7610 }
0x4796   :  { %v7615_v6 = vsub.f32 %v7601_v32, %v7611_v60 }
0x4798   :  { %v7617_v45 = vmul.f32 1.442695, %v7615_v6 }
0x4799   :  { %v7614_v43 = vpop.xlane.xlu1 %7613 }
0x479a   :  { %11812 = vpow2.f32 %v7617_v45  ;;  %v7616_v51 = vsub.f32 %v7606_v47, %v7614_v43 }
0x479c   :  { %v7619_v9 = vmul.f32 1.442695, %v7616_v51  ;;  %v7960_v51 = vmul.f32 %v12413_v12, %v14113_v30 }
0x479d   :  { %v7825_v21 = vpop.xlane.xlu1 %7824 }
0x479e   :  { %11814 = vpow2.f32 %v7619_v9  ;;  %v7829_v46 = vsub.f32 %v7815_v53, %v7825_v21  ;;  %v7961_v9 = vmul.f32 %v12413_v12, %v14119_v22 }
0x47a0   :  { %v7831_v42 = vmul.f32 1.442695, %v7829_v46 }
0x47a1   :  { %v7828_v24 = vpop.xlane.xlu1 %7827 }
0x47a2   :  { %11816 = vpow2.f32 %v7831_v42  ;;  %v7830_v4 = vsub.f32 %v7820_v40, %v7828_v24  ;;  %v7530_v24 = vmul.f32 %v12427_v57, %v14219_v28 }
0x47a4   :  { %v11813_v14 = vpop.eup %11812  ;;  %v7833_v44 = vmul.f32 1.442695, %v7830_v4 }
0x47a5   :  { %v7621_v56 = vsel %vm803_vm15, %v11813_v14, 0.0 }
0x47a6   :  { %11818 = vpow2.f32 %v7833_v44  ;;  %7622 = vadd.xlane.f32.xlu1 %v7621_v56 }
0x47a8   :  { %v11815_v17 = vpop.eup %11814 }
0x47a9   :  { %v7624_v33 = vsel %vm803_vm15, %v11815_v17, 0.0 }
0x47aa   :  { %7625 = vadd.xlane.f32.xlu1 %v7624_v33 }
0x47ac   :  { %v11817_v52 = vpop.eup %11816 }
0x47ad   :  { %v7835_v41 = vsel %vm803_vm15, %v11817_v52, 0.0 }
0x47ae   :  { %7836 = vadd.xlane.f32.xlu1 %v7835_v41 }
0x47b0   :  { %v11819_v62 = vpop.eup %11818 }
0x47b1   :  { %v7838_v3 = vsel %vm803_vm15, %v11819_v62, 0.0 }
0x47b2   :  { %7839 = vadd.xlane.f32.xlu1 %v7838_v3 }
0x4833   :  { %v7623_v63 = vpop.xlane.xlu1 %7622 }
0x4834   :  { %11820 = vrcp.f32 %v7623_v63 }
0x4837   :  { %v7626_v29 = vpop.xlane.xlu1 %7625 }
0x4838   :  { %11822 = vrcp.f32 %v7626_v29 }
0x483b   :  { %v7837_v32 = vpop.xlane.xlu1 %7836 }
0x483c   :  { %11824 = vrcp.f32 %v7837_v32 }
0x483e   :  { %v11821_v47 = vpop.eup %11820 }
0x483f   :  { %v7840_v18 = vpop.xlane.xlu1 %7839  ;;  %v7629_v2 = vmul.f32 %v11821_v47, %v11813_v14 }
0x4840   :  { %11826 = vrcp.f32 %v7840_v18 }
0x4841   :  { %7631 = vxpose.xlu1.b32.start [1/2] (short) (narrow) %v7629_v2, 16 }
0x4842   :  { %v11823_v7 = vpop.eup %11822 }
0x4843   :  { %v7630_v50 = vmul.f32 %v11823_v7, %v11815_v17 }
0x4845   :  { %7632 = vxpose.xlu1.b32.end [2/2] (short) (narrow) %v7630_v50, 16 }
0x4846   :  { %v11825_v53 = vpop.eup %11824 }
0x4847   :  { %v7843_v40 = vmul.f32 %v11825_v53, %v11817_v52 }
0x4849   :  { %7845 = vxpose.xlu0.b32.start [1/2] (short) (narrow) %v7843_v40, 16 }
0x484a   :  { %v11827_v39 = vpop.eup %11826 }
0x484b   :  { %v7844_v59 = vmul.f32 %v11827_v39, %v11819_v62 }
0x484d   :  { %7846 = vxpose.xlu0.b32.end [2/2] (short) (narrow) %v7844_v59, 16 }
0x48c1   :  { %v7647_v60 = vpop.trf.xlu1 }
0x48c2   :  { %10704 = vmatprep.mubr.msk.f32.mxu1 %vm803_vm15, %v7647_v60 }
0x48c5   :  { %v7648_v6 = vpop.trf.xlu1 }
0x48c6   :  { %10705 = vmatmul.mubr.msk.f32.vlgmr.msra.gmra.mrb[88].mxu1 %vm803_vm15, %v7648_v6  ;;  %v9440_v6 = vld [vmem:[%s14756_s12 + $0x130] sm:$0xff] }
0x48c7   :  { %11509 = vmatpush3.bf16.msra.mxu1 %v14193_v8  ;;  %v7531_v8 = vmul.f32 %v14217_v34, %v12427_v57 }
0x48c8   :  { %11511 = vmatprep.subr.bf16.mxu1 %v14123_v35 }
0x48c9   :  { %v7861_v45 = vpop.trf.xlu0 }
0x48ca   :  { %10718 = vmatprep.mubr.msk.f32.mxu1 %vm803_vm15, %v7861_v45  ;;  %v9441_v45 = vld [vmem:[%s14756_s12 + $0x138] sm:$0xff] }
0x48cd   :  { %v7862_v43 = vpop.trf.xlu0 }
0x48ce   :  { %10719 = vmatmul.mubr.msk.f32.vlgmr.msra.gmra.mrb[90].mxu1 %vm803_vm15, %v7862_v43  ;;  %v11562_v43 = vpack.c.bf16 %v9441_v45, %v9440_v6 }
0x48cf   :  { %10725 = vmatprep.mubr.f32.mxu1 %v7960_v51  ;;  %v9442_v51 = vld [vmem:[%s14756_s12 + $0x140] sm:$0xff] }
0x48d0   :  { %11513 = vmatpush3.bf16.xpose.msra.mxu1 %v14123_v35 }
0x48d7   :  { %10726 = vmatmul.mubr.f32.vlgmr.msra.gmra.mrb[92].mxu1 %v7961_v9  ;;  %v9443_v9 = vld [vmem:[%s14756_s12 + $0x148] sm:$0xff] }
0x4999   :  { %v10706_v21 = vpop.f32.mrb[88].mxu1 }
0x499a   :  { %v7745_v46 = vmul.f32 %v10706_v21, %v12430_v55  ;;  %v7735_v42 = vpop.f32.mrb[89].mxu1  ;;  %v11566_v21 = vpack.c.bf16 %v9443_v9, %v9442_v51 }
0x499b   :  { %v7744_v30 = vmul.f32 %v12430_v55, %v7735_v42 }
0x499c   :  { %v8175_v4 = vadd.f32 %v7745_v46, %v7531_v8  ;;  %v9444_v8 = vld [vmem:[%s14756_s12 + $0x150] sm:$0xff]  ;;  %v9445_v46 = vld [vmem:[%s14756_s12 + $0x158] sm:$0xff] }
0x499d   :  { %v8174_v14 = vadd.f32 %v7744_v30, %v7530_v24  ;;  %v11570_v42 = vpack.c.bf16 %v9445_v46, %v9444_v8  ;;  %v9446_v24 = vld [vmem:[%s14756_s12 + $0x160] sm:$0xff]  ;;  %v9447_v30 = vld [vmem:[%s14756_s12 + $0x168] sm:$0xff] }
0x49a1   :  { %v10720_v44 = vpop.f32.mrb[90].mxu1 }
0x49a2   :  { %v7959_v35 = vmul.f32 %v10720_v44, %v12584_v11  ;;  %v7949_v56 = vpop.f32.mrb[91].mxu1 }
0x49a3   :  { %v7958_v12 = vmul.f32 %v12584_v11, %v7949_v56 }
0x49a4   :  { %v14252_v22 = vadd.f32 %v8175_v4, %v7959_v35  ;;  %v11574_v4 = vpack.c.bf16 %v9447_v30, %v9446_v24  ;;  %v11897_v24 = vld [vmem:[%s14754_s10] sm:$0xff] }
0x49a5   :  { %v14254_v17 = vadd.f32 %v8174_v14, %v7958_v12 }
0x49aa   :  { %v10727_v34 = vpop.f32.mrb[92].mxu1 }
0x49ab   :  { %v8034_v33 = vadd.f32 %v14154_v48, %v10727_v34  ;;  %v8028_v52 = vpop.f32.mrb[93].mxu1 }
0x49ac   :  { %v8029_v57 = vadd.f32 %v14146_v38, %v8028_v52  ;;  %v9449_v52 = vld [vmem:[%s14756_s12 + $0x178] sm:$0xff] }
0x49ad   :  { %v8040_v55 = vsel %vm803_vm15, %v8034_v33, -inf }
0x49ae   :  { %8041 = vmax.xlane.f32.xlu1 %v8040_v55  ;;  %v8037_v28 = vsel %vm803_vm15, %v8029_v57, -inf }
0x49af   :  { %8038 = vmax.xlane.f32.xlu0 %v8037_v28 }
0x4a3b   :  { %v8042_v41 = vpop.xlane.xlu1 %8041 }
0x4a3c   :  { %v8044_v62 = vsub.f32 %v8034_v33, %v8042_v41  ;;  %v8039_v3 = vpop.xlane.xlu0 %8038  ;;  %v9448_v33 = vld [vmem:[%s14756_s12 + $0x170] sm:$0xff] }
0x4a3d   :  { %v8043_v11 = vsub.f32 %v8029_v57, %v8039_v3  ;;  %v11578_v57 = vpack.c.bf16 %v9449_v52, %v9448_v33 }
0x4a3e   :  { %v8047_v63 = vmul.f32 1.442695, %v8044_v62 }
0x4a3f   :  { %v8045_v29 = vmul.f32 1.442695, %v8043_v11 }
0x4a41   :  { %11828 = vpow2.f32 %v8045_v29 }
0x4a42   :  { %11830 = vpow2.f32 %v8047_v63 }
0x4a4b   :  { %v11829_v32 = vpop.eup %11828 }
0x4a4c   :  { %v8049_v48 = vsel %vm803_vm15, %v11829_v32, 0.0  ;;  %v11831_v47 = vpop.eup %11830 }
0x4a4d   :  { %8050 = vadd.xlane.f32.xlu0 %v8049_v48  ;;  %v8052_v38 = vsel %vm803_vm15, %v11831_v47, 0.0 }
0x4a51   :  { %8053 = vadd.xlane.f32.xlu0 %v8052_v38 }
0x4ada   :  { %v8051_v18 = vpop.xlane.xlu0 %8050 }
0x4adb   :  { %11832 = vrcp.f32 %v8051_v18 }
0x4ade   :  { %v8054_v2 = vpop.xlane.xlu0 %8053 }
0x4adf   :  { %11834 = vrcp.f32 %v8054_v2 }
0x4ae5   :  { %v11833_v7 = vpop.eup %11832 }
0x4ae6   :  { %v8057_v50 = vmul.f32 %v11833_v7, %v11829_v32 }
0x4ae8   :  { %8059 = vxpose.xlu0.b32.start [1/2] (short) (narrow) %v8057_v50, 16  ;;  %v9471_v50 = vld [vmem:[%s14758_s14 + $0x48] sm:$0xff] }
0x4ae9   :  { %v11835_v53 = vpop.eup %11834 }
0x4aea   :  { %v8058_v40 = vmul.f32 %v11835_v53, %v11831_v47 }
0x4aec   :  { %8060 = vxpose.xlu0.b32.end [2/2] (short) (narrow) %v8058_v40, 16  ;;  %v9472_v40 = vld [vmem:[%s14758_s14 + $0x50] sm:$0xff] }
0x4b68   :  { %v8075_v39 = vpop.trf.xlu0 }
0x4b69   :  { %10732 = vmatprep.mubr.msk.f32.mxu0 %vm803_vm15, %v8075_v39  ;;  %v9473_v39 = vld [vmem:[%s14758_s14 + $0x58] sm:$0xff] }
0x4b6c   :  { %v8076_v59 = vpop.trf.xlu0 }
0x4b6d   :  { %10733 = vmatmul.mubr.msk.f32.vlgmr.msra.gmra.mrb[70].mxu0 %vm803_vm15, %v8076_v59  ;;  %v11586_v59 = vpack.c.bf16 %v9473_v39, %v9472_v40 }
0x4b6e   :  { %11521 = vmatpush3.bf16.msra.mxu0 %v12461_v61  ;;  %v9434_v61 = vld [vmem:[%s14756_s12 + $0x100] sm:$0xff] }
0x4b6f   :  { %11523 = vmatprep.subr.bf16.mxu0 %v12473_v1 }
0x4b72   :  { %11525 = vmatpush3.bf16.msra.mxu0 %v12473_v1  ;;  %v9435_v1 = vld [vmem:[%s14756_s12 + $0x108] sm:$0xff] }
0x4b73   :  { %11527 = vmatprep.subr.bf16.mxu0 %v12484_v27 }
0x4b76   :  { %11529 = vmatpush3.bf16.msra.mxu0 %v12484_v27  ;;  %v9436_v27 = vld [vmem:[%s14756_s12 + $0x110] sm:$0xff] }
0x4b77   :  { %11531 = vmatprep.subr.bf16.mxu0 %v12494_v26 }
0x4b7a   :  { %11533 = vmatpush3.bf16.msra.mxu0 %v12494_v26  ;;  %v11550_v26 = vpack.c.bf16 %v9435_v1, %v9434_v61 }
0x4b7b   :  { %11535 = vmatprep.subr.bf16.mxu0 %v12504_v15 }
0x4b7c   :  { %11551 = vmatprep.subr.bf16.mxu1 %v11550_v26 }
0x4b7d   :  { %11553 = vmatpush3.bf16.msra.mxu1 %v11550_v26 }
0x4b7e   :  { %11537 = vmatpush3.bf16.msra.mxu0 %v12504_v15  ;;  %v9437_v15 = vld [vmem:[%s14756_s12 + $0x118] sm:$0xff] }
0x4b7f   :  { %11539 = vmatprep.subr.bf16.mxu0 %v12515_v54 }
0x4b82   :  { %11541 = vmatpush3.bf16.msra.mxu0 %v12515_v54  ;;  %v11554_v54 = vpack.c.bf16 %v9437_v15, %v9436_v27 }
0x4b83   :  { %11543 = vmatprep.subr.bf16.mxu0 %v12525_v31 }
0x4b84   :  { %11555 = vmatprep.subr.bf16.mxu1 %v11554_v54 }
0x4b85   :  { %11557 = vmatpush3.bf16.msra.mxu1 %v11554_v54 }
0x4b86   :  { %11545 = vmatpush3.bf16.msra.mxu0 %v12525_v31  ;;  %v9438_v31 = vld [vmem:[%s14756_s12 + $0x120] sm:$0xff] }
0x4b87   :  { %11547 = vmatprep.subr.bf16.mxu0 %v12535_v37 }
0x4b8a   :  { %11549 = vmatpush3.bf16.msra.mxu0 %v12535_v37  ;;  %v9439_v37 = vld [vmem:[%s14756_s12 + $0x128] sm:$0xff] }
0x4b8b   :  { %v11558_v60 = vpack.c.bf16 %v9439_v37, %v9438_v31  ;;  %v14360_v31 = vld [vmem:[%s14757_s13 + $0x8] sm:$0xf]  ;;  %v15018_v37 = vld [vmem:[#allocation20_spill] sm:$0xff] }
0x4b8d   :  { %11559 = vmatprep.subr.bf16.mxu1 %v11558_v60 }
0x4b8e   :  { %11561 = vmatpush3.bf16.msra.mxu1 %v11558_v60  ;;  %v8363_v60 = vrot.slane %v14360_v31, %v15018_v37 }
0x4b8f   :  { %11563 = vmatprep.subr.bf16.mxu1 %v11562_v43 }
0x4b92   :  { %11565 = vmatpush3.bf16.msra.mxu1 %v11562_v43  ;;  %v15019_v43 = vld [vmem:[#allocation21_spill] sm:$0xff] }
0x4b93   :  { %11567 = vmatprep.subr.bf16.mxu1 %v11566_v21 }
0x4b96   :  { %11569 = vmatpush3.bf16.msra.mxu1 %v11566_v21 }
0x4b97   :  { %11571 = vmatprep.subr.bf16.mxu1 %v11570_v42 }
0x4b9a   :  { %11573 = vmatpush3.bf16.msra.mxu1 %v11570_v42 }
0x4b9b   :  { %11575 = vmatprep.subr.bf16.mxu1 %v11574_v4 }
0x4b9e   :  { %11577 = vmatpush3.bf16.msra.mxu1 %v11574_v4 }
0x4b9f   :  { %11579 = vmatprep.subr.bf16.mxu1 %v11578_v57 }
0x4ba2   :  { %11581 = vmatpush3.bf16.msra.mxu1 %v11578_v57 }
0x4c40   :  { %v10734_v14 = vpop.f32.mrb[70].mxu0 }
0x4c41   :  { %v8173_v44 = vmul.f32 %v10734_v14, %v14976_v5  ;;  %v8163_v35 = vpop.f32.mrb[71].mxu0 }
0x4c42   :  { %v8172_v56 = vmul.f32 %v14976_v5, %v8163_v35 }
0x4c43   :  { %v8179_v12 = vadd.f32 %v14252_v22, %v8173_v44 }
0x4c44   :  { %v8178_v34 = vadd.f32 %v14254_v17, %v8172_v56  ;;  %v11896_v17 = vld [vmem:[%s14751_s7] sm:$0xff] }
0x4c46   :  { %10767 = vmatprep.mubr.f32.mxu0 %v8178_v34 }
0x4c47   :  { %10768 = vmatmul.mubr.f32.vlgmr.msra.gmra.mrb[72].mxu0 %v8179_v12 }
0x4d1a   :  { %v10769_v55 = vpop.f32.mrb[72].mxu0 }
0x4d1b   :  { %v8256_v5 = vmul.f32 %v10769_v55, %v14185_v23  ;;  %v8246_v28 = vpop.f32.mrb[73].mxu0 }
0x4d1c   :  { %v8255_v22 = vmul.f32 %v8246_v28, %v14189_v10 }
0x4d1e   :  { %10802 = vmatprep.mubr.f32.mxu1 %v8255_v22 }
0x4d1f   :  { %10803 = vmatmul.mubr.f32.vlgmr.msra.gmra.mrb[94].mxu1 %v8256_v5 }
0x4d20   :  { %10820 = vmatprep.mubr.msk.f32.mxu1 %vm803_vm15, %v11896_v17 }
0x4df2   :  { %v10804_v41 = vpop.f32.mrb[94].mxu1 }
0x4df3   :  { %v8323_v62 = vpop.f32.mrb[95].mxu1  ;;  %v8333_v11 = vadd.f32 %v10804_v41, %v14085_v16  ;;  %v9470_v16 = vld [vmem:[%s14758_s14 + $0x40] sm:$0xff] }
0x4df4   :  { %v8332_v3 = vadd.f32 %v8323_v62, %v14072_v58  ;;  %v11582_v53 = vpack.c.bf16 %v9471_v50, %v9470_v16 }
0x4df5   :  { %v8337_v23 = vsel %vm287_vm3, %v8333_v11, 0.0 }
0x4df6   :  { %v8334_v63 = vsel %vm287_vm3, %v8332_v3, 0.0  ;;  %11583 = vmatprep.subr.bf16.mxu0 %v11582_v53 }
0x4df7   :  { %8335 = vadd.xlane.f32.xlu1 %v8334_v63  ;;  %11585 = vmatpush3.bf16.msra.mxu0 %v11582_v53 }
0x4df8   :  { %11587 = vmatprep.subr.bf16.mxu0 %v11586_v59 }
0x4dfb   :  { %8338 = vadd.xlane.f32.xlu1 %v8337_v23  ;;  %11589 = vmatpush3.bf16.msra.mxu0 %v11586_v59 }
0x4dfc   :  { %9528 = vmatprep.subr.msk.mxu0 %vm2242_vm1, %v14978_v0  ;;  %v8369_v0 = vrot.slane %v14360_v31, %v15019_v43 }
0x4e84   :  { %v8336_v10 = vpop.xlane.xlu1 %8335 }
0x4e85   :  { %v8340_v29 = vmul.f32 0.03125, %v8336_v10 }
0x4e87   :  { %v8342_v32 = vsub.f32 %v8332_v3, %v8340_v29 }
0x4e88   :  { %v8339_v48 = vpop.xlane.xlu1 %8338 }
0x4e89   :  { %v8341_v47 = vmul.f32 0.03125, %v8339_v48  ;;  %v8344_v38 = vmul.f32 %v8342_v32, %v8342_v32 }
0x4e8b   :  { %v8343_v18 = vsub.f32 %v8333_v11, %v8341_v47  ;;  %v8346_v2 = vsel %vm287_vm3, %v8344_v38, 0.0 }
0x4e8c   :  { %8347 = vadd.xlane.f32.xlu1 %v8346_v2 }
0x4e8d   :  { %v8345_v7 = vmul.f32 %v8343_v18, %v8343_v18 }
0x4e8f   :  { %v8349_v58 = vsel %vm287_vm3, %v8345_v7, 0.0 }
0x4e90   :  { %8350 = vadd.xlane.f32.xlu1 %v8349_v58 }
0x4f19   :  { %v8348_v61 = vpop.xlane.xlu1 %8347 }
0x4f1a   :  { %v8352_v1 = vmul.f32 0.03125, %v8348_v61 }
0x4f1c   :  { %v8354_v27 = vadd.f32 1e-05, %v8352_v1 }
0x4f1d   :  { %v8351_v26 = vpop.xlane.xlu1 %8350 }
0x4f1e   :  { %11836 = vrsqrt.f32 %v8354_v27  ;;  %v8353_v15 = vmul.f32 0.03125, %v8351_v26 }
0x4f20   :  { %v8355_v54 = vadd.f32 1e-05, %v8353_v15 }
0x4f22   :  { %11838 = vrsqrt.f32 %v8355_v54 }
0x4f28   :  { %v11837_v6 = vpop.eup %11836 }
0x4f29   :  { %v8358_v45 = vmul.f32 %v11837_v6, %v8342_v32 }
0x4f2b   :  { %v8364_v51 = vmul.f32 %v8363_v60, %v8358_v45 }
0x4f2c   :  { %v11839_v9 = vpop.eup %11838 }
0x4f2d   :  { %v8359_v21 = vmul.f32 %v11839_v9, %v8343_v18  ;;  %v14366_v8 = vadd.f32 %v8369_v0, %v8364_v51 }
0x4f2f   :  { %v8365_v46 = vmul.f32 %v8363_v60, %v8359_v21  ;;  %10813 = vmatprep.mubr.msk.f32.mxu0 %vm287_vm3, %v14366_v8 }
0x4f31   :  { %v14370_v42 = vadd.f32 %v8369_v0, %v8365_v46 }
0x4f33   :  { %10814 = vmatmul.mubr.msk.f32.vlgmr.msra.gmra.mrb[74].mxu0 %vm287_vm3, %v14370_v42 }
0x4f34   :  { %9529 = vmatpush1.msk.msra.mxu0 %vm2242_vm1, %v11897_v24  ;;  %8890 = vmatprep.mubr.f32.mxu0 %v14910_v25 }
0x5006   :  { %v10815_v30 = vpop.f32.mrb[74].mxu0 }
0x5007   :  { %v8491_v4 = vpop.f32.mrb[75].mxu0  ;;  %v8503_v44 = vsel %vm1907_vm11, %v10815_v30, -inf }
0x5008   :  { %v8500_v14 = vsel %vm1907_vm11, %v8491_v4, -inf }
0x5009   :  { %8501 = vmax.xlane.f32.xlu1 %v8500_v14 }
0x500d   :  { %8504 = vmax.xlane.f32.xlu1 %v8503_v44 }
0x5096   :  { %v14381_v35 = vpop.xlane.xlu1 %8501 }
0x5097   :  { %vm8506_vm2 = vcmp.eq.f32.partialorder %v8491_v4, %v14381_v35 }
0x5098   :  { %v8508_v56 = vsel %vm8506_vm2, %v12059_v19, 4 }
0x5099   :  { %v8510_v12 = vsel %vm1907_vm11, %v8508_v56, 2147483647 }
0x509a   :  { %v14386_v34 = vpop.xlane.xlu1 %8504  ;;  %v8512_v33 = vshra.s32 %v8510_v12, 16  ;;  %v8511_v22 = vand.u32 65535, %v8510_v12 }
0x509b   :  { %vm8507_vm1 = vcmp.eq.f32.partialorder %v10815_v30, %v14386_v34 }
0x509c   :  { %v8509_v52 = vsel %vm8507_vm1, %v12059_v19, 4  ;;  %v8514_v57 = vcvt.s32.f32 %v8512_v33  ;;  %v8513_v41 = vcvt.s32.f32 %v8511_v22 }
0x509d   :  { %v8525_v55 = vsel %vm1907_vm11, %v8509_v52, 2147483647 }
0x509e   :  { %8515 = vmin.xlane.f32.xlu1 %v8514_v57  ;;  %v8527_v5 = vshra.s32 %v8525_v55, 16  ;;  %v8526_v62 = vand.u32 65535, %v8525_v55 }
0x50a0   :  { %v8529_v28 = vcvt.s32.f32 %v8527_v5  ;;  %v8528_v63 = vcvt.s32.f32 %v8526_v62 }
0x50a2   :  { %8530 = vmin.xlane.f32.xlu1 %v8529_v28 }
0x512b   :  { %v8516_v17 = vpop.xlane.xlu1 %8515 }
0x512c   :  { %vm8517_vm4 = vcmp.eq.f32.partialorder %v8514_v57, %v8516_v17  ;;  %v8522_v10 = vcvt.f32.s32 %v8516_v17  ;;  %v9475_v17 = vld [vmem:[%s14759_s15 + $0x88] sm:$0xff] }
0x512d   :  { %v8518_v3 = vsel %vm8517_vm4, %v8513_v41, inf  ;;  %v9477_v41 = vld [vmem:[%s14759_s15 + $0x98] sm:$0xff] }
0x512e   :  { %8519 = vmin.xlane.f32.xlu0 %v8518_v3  ;;  %v8523_v32 = vshll.u32 %v8522_v10, 16  ;;  %v9479_v10 = vld [vmem:[%s14759_s15 + $0xa8] sm:$0xff] }
0x512f   :  { %v8531_v11 = vpop.xlane.xlu1 %8530 }
0x5130   :  { %vm8532_vm5 = vcmp.eq.f32.partialorder %v8529_v28, %v8531_v11  ;;  %v8537_v48 = vcvt.f32.s32 %v8531_v11 }
0x5131   :  { %v8533_v23 = vsel %vm8532_vm5, %v8528_v63, inf  ;;  %v11594_v63 = vpack.c.bf16 %v9477_v41, %v9475_v17 }
0x5132   :  { %8534 = vmin.xlane.f32.xlu1 %v8533_v23  ;;  %v8538_v2 = vshll.u32 %v8537_v48, 16  ;;  %v9476_v23 = vld [vmem:[%s14759_s15 + $0x90] sm:$0xff] }
0x51bb   :  { %v8520_v29 = vpop.xlane.xlu0 %8519 }
0x51bc   :  { %v8521_v47 = vcvt.f32.s32 %v8520_v29  ;;  %v9481_v29 = vld [vmem:[%s14759_s15 + $0xb8] sm:$0xff] }
0x51bd   :  { %v11598_v48 = vpack.c.bf16 %v9481_v29, %v9479_v10 }
0x51be   :  { %v8524_v38 = vadd.s32 %v8523_v32, %v8521_v47  ;;  %v9478_v47 = vld [vmem:[%s14759_s15 + $0xa0] sm:$0xff] }
0x51bf   :  { %v8535_v18 = vpop.xlane.xlu1 %8534 }
0x51c0   :  { %vm8540_vm7 = vcmp.eq.s32.totalorder %v12059_v19, %v8524_v38  ;;  %v8536_v7 = vcvt.f32.s32 %v8535_v18  ;;  %v9480_v38 = vld [vmem:[%s14759_s15 + $0xb0] sm:$0xff]  ;;  %v11898_v18 = vld [vmem:[%s14751_s7 + $0x8] sm:$0xff] }
0x51c1   :  { %v14393_v58 = vsel %vm8540_vm7, 1.0, %v14910_v25 }
0x51c2   :  { %v8539_v16 = vadd.s32 %v8538_v2, %v8536_v7  ;;  %vm8546_vm8 = vcmp.gt.f32.partialorder %v14393_v58, 0.0  ;;  %v11600_v2 = vpack.c.bf16 %v9480_v38, %v9478_v47 }
0x51c3   :  { %v8548_v50 = vsel %vm8546_vm8, -1e+30, %v8491_v4 }
0x51c4   :  { %vm8541_vm9 = vcmp.eq.s32.totalorder %v12059_v19, %v8539_v16  ;;  %v8550_v53 = vsel %vm1907_vm11, %v8548_v50, -inf }
0x51c5   :  { %v14399_v40 = vsel %vm8541_vm9, 1.0, %v14910_v25  ;;  %8551 = vmax.xlane.f32.xlu1 %v8550_v53 }
0x51c6   :  { %vm8547_vm10 = vcmp.gt.f32.partialorder %v14399_v40, 0.0 }
0x51c7   :  { %v8549_v39 = vsel %vm8547_vm10, -1e+30, %v10815_v30 }
0x51c8   :  { %v8553_v59 = vsel %vm1907_vm11, %v8549_v39, -inf }
0x51c9   :  { %8554 = vmax.xlane.f32.xlu1 %v8553_v59 }
0x5252   :  { %v14403_v61 = vpop.xlane.xlu1 %8551 }
0x5253   :  { %vm8556_vm6 = vcmp.eq.f32.partialorder %v8548_v50, %v14403_v61 }
0x5254   :  { %v8558_v1 = vsel %vm8556_vm6, %v12059_v19, 4 }
0x5255   :  { %v8560_v27 = vsel %vm1907_vm11, %v8558_v1, 2147483647 }
0x5256   :  { %v14408_v26 = vpop.xlane.xlu1 %8554  ;;  %v8562_v15 = vshra.s32 %v8560_v27, 16  ;;  %v8561_v43 = vand.u32 65535, %v8560_v27 }
0x5257   :  { %vm8557_vm12 = vcmp.eq.f32.partialorder %v8549_v39, %v14408_v26 }
0x5258   :  { %v8559_v54 = vsel %vm8557_vm12, %v12059_v19, 4  ;;  %v8564_v37 = vcvt.s32.f32 %v8562_v15  ;;  %v8563_v51 = vcvt.s32.f32 %v8561_v43 }
0x5259   :  { %v8575_v60 = vsel %vm1907_vm11, %v8559_v54, 2147483647 }
0x525a   :  { %8565 = vmin.xlane.f32.xlu1 %v8564_v37  ;;  %v8577_v6 = vshra.s32 %v8575_v60, 16  ;;  %v8576_v9 = vand.u32 65535, %v8575_v60 }
0x525c   :  { %v8579_v45 = vcvt.s32.f32 %v8577_v6  ;;  %v8578_v24 = vcvt.s32.f32 %v8576_v9 }
0x525e   :  { %8580 = vmin.xlane.f32.xlu1 %v8579_v45 }
0x52e7   :  { %v8566_v0 = vpop.xlane.xlu1 %8565 }
0x52e8   :  { %vm8567_vm13 = vcmp.eq.f32.partialorder %v8564_v37, %v8566_v0  ;;  %v8572_v4 = vcvt.f32.s32 %v8566_v0 }
0x52e9   :  { %v8568_v21 = vsel %vm8567_vm13, %v8563_v51, inf }
0x52ea   :  { %8569 = vmin.xlane.f32.xlu1 %v8568_v21  ;;  %v8573_v44 = vshll.u32 %v8572_v4, 16 }
0x52eb   :  { %v8581_v46 = vpop.xlane.xlu1 %8580 }
0x52ec   :  { %vm8582_vm14 = vcmp.eq.f32.partialorder %v8579_v45, %v8581_v46  ;;  %v8587_v56 = vcvt.f32.s32 %v8581_v46 }
0x52ed   :  { %v8583_v30 = vsel %vm8582_vm14, %v8578_v24, inf }
0x52ee   :  { %8584 = vmin.xlane.f32.xlu1 %v8583_v30  ;;  %v8588_v57 = vshll.u32 %v8587_v56, 16  ;;  %v9499_v56 = vld [vmem:[%s14760_s16 + $0x288] sm:$0xff] }
0x5377   :  { %v8570_v14 = vpop.xlane.xlu1 %8569 }
0x5378   :  { %v8571_v12 = vcvt.f32.s32 %v8570_v14 }
0x537a   :  { %v8574_v33 = vadd.s32 %v8573_v44, %v8571_v12  ;;  %v9498_v44 = vld [vmem:[%s14760_s16 + $0x280] sm:$0xff] }
0x537b   :  { %v8585_v52 = vpop.xlane.xlu1 %8584  ;;  %v11602_v12 = vpack.c.bf16 %v9499_v56, %v9498_v44 }
0x537c   :  { %vm8590_vm0 = vcmp.eq.s32.totalorder %v12059_v19, %v8574_v33  ;;  %v8586_v55 = vcvt.f32.s32 %v8585_v52  ;;  %v8596_v33 = vsub.f32 %v14403_v61, %v14381_v35 }
0x537d   :  { %v14415_v28 = vsel %vm8590_vm0, 1.0, %v14910_v25  ;;  %11603 = vmatprep.subr.bf16.mxu0 %v11602_v12 }
0x537e   :  { %v8589_v5 = vadd.s32 %v8588_v57, %v8586_v55  ;;  %v8608_v62 = vadd.f32 %v14415_v28, %v14393_v58  ;;  %v8598_v52 = vmul.f32 1.442695, %v8596_v33  ;;  %v8597_v57 = vsub.f32 %v14408_v26, %v14386_v34  ;;  %v9484_v33 = vld [vmem:[%s14760_s16 + $0x210] sm:$0xff] }
0x5380   :  { %vm8591_vm2 = vcmp.eq.s32.totalorder %v12059_v19, %v8589_v5  ;;  %v9474_v19 = vld [vmem:[%s14759_s15 + $0x80] sm:$0xff]  ;;  %11840 = vpow2.f32 %v8598_v52  ;;  %v8600_v55 = vmul.f32 1.442695, %v8597_v57  ;;  %v9485_v52 = vld [vmem:[%s14760_s16 + $0x218] sm:$0xff] }
0x5381   :  { %v14419_v22 = vsel %vm8591_vm2, 1.0, %v14910_v25  ;;  %v11596_v32 = vpack.c.bf16 %v9476_v23, %v9474_v19 }
0x5382   :  { %v8609_v3 = vadd.f32 %v14419_v22, %v14399_v40  ;;  %11842 = vpow2.f32 %v8600_v55 }
0x5384   :  { %v11590_v11 = vpack.c.bf16 %v8609_v3, %v8608_v62 }
0x5386   :  { %11591 = vmatprep.subr.bf16.mxu1 %v11590_v11 }
0x5387   :  { %11593 = vmatpush3.bf16.msra.mxu1 %v11590_v11 }
0x5388   :  { %11595 = vmatprep.subr.bf16.mxu1 %v11594_v63 }
0x538a   :  { %10821 = vmatmul.mubr.msk.f32.vlgmr.msra.gmra.mrb[96].mxu1 %vm803_vm15, %v11898_v18  ;;  %v11841_v5 = vpop.eup %11840 }
0x538b   :  { %11597 = vmatpush1.bf16.msra.mxu1 %v11596_v32  ;;  %8803 = vmatprep.mubr.f32.mxu1 %v14910_v25  ;;  %v8602_v17 = vadd.f32 1.0, %v11841_v5 }
0x538c   :  { %11599 = vmatprep.subr.bf16.mxu1 %v11598_v48  ;;  %v11843_v41 = vpop.eup %11842 }
0x538d   :  { %v8603_v62 = vadd.f32 1.0, %v11843_v41  ;;  %11844 = vrcp.f32 %v8602_v17 }
0x538f   :  { %11601 = vmatpush1.bf16.msra.mxu1 %v11600_v2  ;;  %11846 = vrcp.f32 %v8603_v62  ;;  %v9486_v62 = vld [vmem:[%s14760_s16 + $0x220] sm:$0xff] }
0x5392   :  { %9526 = vmatmul.mubr.msk.f32.vlgmr.msra.gmra.mrb[98].mxu1 %vm287_vm3, %v14366_v8 }
0x5393   :  { %8809 = vmatprep.mubr.f32.mxu1 %v14910_v25 }
0x5396   :  { %9527 = vmatmul.mubr.msk.f32.gmra.mrb[100].mxu1 %vm287_vm3, %v14370_v42 }
0x5397   :  { %v11845_v11 = vpop.eup %11844 }
0x5398   :  { %v8606_v19 = vmul.f32 %v11845_v11, %v11841_v5  ;;  %v11608_v5 = vpack.c.bf16 %v9485_v52, %v9484_v33 }
0x5399   :  { %v11847_v23 = vpop.eup %11846 }
0x539a   :  { %v8607_v48 = vmul.f32 %v11847_v23, %v11843_v41 }
0x545d   :  { %v10822_v7 = vpop.f32.mrb[96].mxu1 }
0x545e   :  { %v8686_v16 = vadd.f32 1.0, %v10822_v7  ;;  %v8702_v50 = vadd.f32 %v10822_v7, %v14399_v40  ;;  %v8676_v53 = vpop.f32.mrb[97].mxu1 }
0x545f   :  { %v8685_v39 = vadd.f32 1.0, %v8676_v53  ;;  %v8701_v59 = vadd.f32 %v14393_v58, %v8676_v53 }
0x5460   :  { %vm8688_vm15 = vcmp.le.f32.partialorder %v8686_v16, 5.0  ;;  %v8704_v15 = vadd.f32 1.0, %v8702_v50 }
0x5461   :  { %v9523_v1 = vsel %vm8688_vm15, 1.0, %v14910_v25  ;;  %vm8687_vm1 = vcmp.le.f32.partialorder %v8685_v39, 5.0  ;;  %v8703_v27 = vadd.f32 1.0, %v8701_v59 }
0x5462   :  { %v9522_v54 = vsel %vm8687_vm1, 1.0, %v14910_v25  ;;  %v8694_v37 = vmul.f32 %v9523_v1, %v14399_v40  ;;  %vm8706_vm5 = vcmp.le.f32.partialorder %v8704_v15, 5.0 }
0x5463   :  { %vm8705_vm4 = vcmp.le.f32.partialorder %v8703_v27, 5.0  ;;  %v8693_v6 = vmul.f32 %v9522_v54, %v14393_v58  ;;  %v9525_v21 = vsel %vm8706_vm5, 1.0, %v14910_v25 }
0x5464   :  { %v8698_v60 = vsel %vm1907_vm11, %v8694_v37, 0.0  ;;  %v9524_v45 = vsel %vm8705_vm4, 1.0, %v14910_v25  ;;  %v8712_v4 = vmul.f32 %v9525_v21, %v14419_v22 }
0x5465   :  { %8699 = vadd.xlane.f32.xlu1 %v8698_v60  ;;  %v14467_v43 = vpop.f32.mrb[98].mxu1  ;;  %v8695_v51 = vsel %vm1907_vm11, %v8693_v6, 0.0  ;;  %v8711_v9 = vmul.f32 %v9524_v45, %v14415_v28  ;;  %v9482_v60 = vld [vmem:[%s14760_s16 + $0x200] sm:$0xff]  ;;  %v9483_v6 = vld [vmem:[%s14760_s16 + $0x208] sm:$0xff]  ;;  %v9500_v45 = vld [vmem:[%s14760_s16 + $0x290] sm:$0xff] }
0x5466   :  { %v14469_v0 = vpop.f32.mrb[99].mxu1  ;;  %v8716_v14 = vsel %vm1907_vm11, %v8712_v4, 0.0  ;;  %v11604_v4 = vpack.c.bf16 %v9483_v6, %v9482_v60  ;;  %v9513_v60 = vld [vmem:[%s14760_s16 + $0x2f8] sm:$0xff] }
0x5467   :  { %v8713_v30 = vsel %vm1907_vm11, %v8711_v9, 0.0 }
0x5469   :  { %v14474_v46 = vpop.f32.mrb[100].mxu1  ;;  %8696 = vadd.xlane.f32.xlu1 %v8695_v51  ;;  %v9501_v51 = vld [vmem:[%s14760_s16 + $0x298] sm:$0xff] }
0x546a   :  { %v14476_v24 = vpop.f32.mrb[101].mxu1  ;;  %v11606_v12 = vpack.c.bf16 %v9501_v51, %v9500_v45  ;;  %v9496_v45 = vld [vmem:[%s14760_s16 + $0x270] sm:$0xff]  ;;  %v9497_v51 = vld [vmem:[%s14760_s16 + $0x278] sm:$0xff] }
0x546b   :  { %v8819_v33 = vmax.f32 %v14476_v24, 0.0 }
0x546d   :  { %8714 = vadd.xlane.f32.xlu1 %v8713_v30 }
0x5471   :  { %8717 = vadd.xlane.f32.xlu1 %v8716_v14 }
0x54f2   :  { %v8700_v3 = vpop.xlane.xlu1 %8699 }
0x54f3   :  { %v8720_v47 = vmul.f32 %v11847_v23, %v8700_v3  ;;  %v8983_v18 = vmul.f32 %v14399_v40, %v8700_v3  ;;  %v9487_v3 = vld [vmem:[%s14760_s16 + $0x228] sm:$0xff] }
0x54f6   :  { %v8697_v63 = vpop.xlane.xlu1 %8696 }
0x54f7   :  { %v8719_v35 = vmul.f32 %v11845_v11, %v8697_v63  ;;  %v8982_v61 = vmul.f32 %v14393_v58, %v8697_v63  ;;  %v11612_v63 = vpack.c.bf16 %v9487_v3, %v9486_v62 }
0x54fa   :  { %v8715_v10 = vpop.xlane.xlu1 %8714 }
0x54fb   :  { %v8721_v29 = vmul.f32 %v8715_v10, %v8606_v19  ;;  %v8984_v34 = vmul.f32 %v14415_v28, %v8715_v10  ;;  %v9488_v10 = vld [vmem:[%s14760_s16 + $0x230] sm:$0xff] }
0x54fd   :  { %v8723_v26 = vadd.f32 %v8721_v29, %v8719_v35  ;;  %v8986_v32 = vadd.f32 %v8984_v34, %v8982_v61  ;;  %v9506_v61 = vld [vmem:[%s14760_s16 + $0x2c0] sm:$0xff] }
0x54fe   :  { %v8718_v38 = vpop.xlane.xlu1 %8717 }
0x54ff   :  { %v8725_v2 = vadd.f32 1e-09, %v8723_v26  ;;  %v8722_v7 = vmul.f32 %v8718_v38, %v8607_v48  ;;  %v8985_v16 = vmul.f32 %v14419_v22, %v8718_v38  ;;  %v8988_v39 = vsel %vm1907_vm11, %v8986_v32, 0.0  ;;  %v9490_v32 = vld [vmem:[%s14760_s16 + $0x240] sm:$0xff]  ;;  %v9491_v48 = vld [vmem:[%s14760_s16 + $0x248] sm:$0xff]  ;;  %v9509_v38 = vld [vmem:[%s14760_s16 + $0x2d8] sm:$0xff] }
0x5501   :  { %11848 = vrcp.f32 %v8725_v2  ;;  %v8724_v50 = vadd.f32 %v8722_v7, %v8720_v47  ;;  %v8987_v53 = vadd.f32 %v8985_v16, %v8983_v18  ;;  %v11620_v18 = vpack.c.bf16 %v9491_v48, %v9490_v32  ;;  %v9493_v16 = vld [vmem:[%s14760_s16 + $0x258] sm:$0xff] }
0x5503   :  { %v8726_v59 = vadd.f32 1e-09, %v8724_v50  ;;  %v8989_v1 = vsel %vm1907_vm11, %v8987_v53, 0.0  ;;  %v9510_v50 = vld [vmem:[%s14760_s16 + $0x2e0] sm:$0xff]  ;;  %v9511_v53 = vld [vmem:[%s14760_s16 + $0x2e8] sm:$0xff] }
0x5504   :  { %v14497_v27 = vadd.f32 %v8989_v1, %v8988_v39  ;;  %v9494_v1 = vld [vmem:[%s14760_s16 + $0x260] sm:$0xff] }
0x5505   :  { %11850 = vrcp.f32 %v8726_v59  ;;  %v11626_v59 = vpack.c.bf16 %v9511_v53, %v9510_v50 }
0x550b   :  { %v11849_v15 = vpop.eup %11848 }
0x550c   :  { %v8729_v54 = vmul.f32 %v11849_v15, %v8719_v35  ;;  %v8731_v37 = vmul.f32 %v11849_v15, %v8721_v29  ;;  %v9489_v35 = vld [vmem:[%s14760_s16 + $0x238] sm:$0xff]  ;;  %v9507_v29 = vld [vmem:[%s14760_s16 + $0x2c8] sm:$0xff] }
0x550d   :  { %v11616_v34 = vpack.c.bf16 %v9489_v35, %v9488_v10  ;;  %v11618_v26 = vpack.c.bf16 %v9507_v29, %v9506_v61  ;;  %v9495_v15 = vld [vmem:[%s14760_s16 + $0x268] sm:$0xff] }
0x550e   :  { %v8733_v9 = vmul.f32 %v14393_v58, %v8729_v54  ;;  %v8735_v21 = vmul.f32 %v14415_v28, %v8731_v37  ;;  %v9502_v58 = vld [vmem:[%s14760_s16 + $0x2a0] sm:$0xff]  ;;  %v9503_v28 = vld [vmem:[%s14760_s16 + $0x2a8] sm:$0xff]  ;;  %v11628_v54 = vpack.c.bf16 %v9495_v15, %v9494_v1  ;;  %v9512_v37 = vld [vmem:[%s14760_s16 + $0x2f0] sm:$0xff] }
0x550f   :  { %v11851_v30 = vpop.eup %11850  ;;  %v11610_v41 = vpack.c.bf16 %v9503_v28, %v9502_v58  ;;  %v11630_v6 = vpack.c.bf16 %v9513_v60, %v9512_v37  ;;  %v15022_v60 = vld [vmem:[#allocation30_spill] sm:$0xff] }
0x5510   :  { %v8737_v14 = vadd.f32 %v8735_v21, %v8733_v9  ;;  %v8732_v44 = vmul.f32 %v11851_v30, %v8722_v7  ;;  %v8730_v56 = vmul.f32 %v11851_v30, %v8720_v47  ;;  %v9508_v47 = vld [vmem:[%s14760_s16 + $0x2d0] sm:$0xff]  ;;  %v11632_v9 = vpack.c.bf16 %v9497_v51, %v9496_v45  ;;  %v15024_v51 = vld [vmem:[#allocation28_spill] sm:$0xff] }
0x5511   :  { %v11622_v2 = vpack.c.bf16 %v9509_v38, %v9508_v47  ;;  %v9492_v7 = vld [vmem:[%s14760_s16 + $0x250] sm:$0xff]  ;;  %v8816_v21 = vmax.f32 %v14467_v43, 0.0  ;;  %v8817_v30 = vmax.f32 %v14469_v0, 0.0 }
0x5512   :  { %v8736_v57 = vmul.f32 %v14419_v22, %v8732_v44  ;;  %9530 = vmatmul.mubr.msk.f32.vlgmr.msra.gmra.mrb[76].mxu0 %vm1907_vm11, %v8737_v14  ;;  %v8734_v55 = vmul.f32 %v14399_v40, %v8730_v56  ;;  %v9504_v22 = vld [vmem:[%s14760_s16 + $0x2b0] sm:$0xff]  ;;  %v8997_v40 = vsel %vm1907_vm11, %v8737_v14, 0.0  ;;  %v11624_v39 = vpack.c.bf16 %v9493_v16, %v9492_v7 }
0x5513   :  { %8896 = vmatprep.mubr.f32.mxu0 %v14910_v25  ;;  %11605 = vmatpush3.bf16.msra.mxu0 %v11604_v4  ;;  %v9505_v25 = vld [vmem:[%s14760_s16 + $0x2b8] sm:$0xff]  ;;  %v15020_v47 = vld [vmem:[#allocation34_spill] sm:$0xff] }
0x5514   :  { %v8738_v17 = vadd.f32 %v8736_v57, %v8734_v55  ;;  %11607 = vmatprep.subr.bf16.mxu0 %v11606_v12  ;;  %v11614_v23 = vpack.c.bf16 %v9505_v25, %v9504_v22  ;;  %v8818_v12 = vmax.f32 %v14474_v46, 0.0  ;;  %v9054_v38 = vrot.slane %v14360_v31, %v15020_v47  ;;  %v15021_v7 = vld [vmem:[#allocation35_spill] sm:$0xff] }
0x5515   :  { %v9060_v16 = vrot.slane %v14360_v31, %v15021_v7  ;;  %v15027_v31 = vld [vmem:[#allocation22_spill] sm:$0xff] }
0x5516   :  { %9531 = vmatmul.mubr.msk.f32.gmra.mrb[78].mxu0 %vm1907_vm11, %v8738_v17  ;;  %v8998_v11 = vsel %vm1907_vm11, %v8738_v17, 0.0 }
0x5517   :  { %11609 = vmatpush3.bf16.msra.mxu0 %v11608_v5  ;;  %v14544_v19 = vadd.f32 %v8998_v11, %v8997_v40 }
0x5518   :  { %11611 = vmatprep.subr.bf16.mxu0 %v11610_v41 }
0x551b   :  { %11613 = vmatpush3.bf16.msra.mxu0 %v11612_v63 }
0x551c   :  { %11615 = vmatprep.subr.bf16.mxu0 %v11614_v23 }
0x551f   :  { %11617 = vmatpush3.bf16.msra.mxu0 %v11616_v34 }
0x5520   :  { %11619 = vmatprep.subr.bf16.mxu0 %v11618_v26 }
0x5523   :  { %11621 = vmatpush3.bf16.msra.mxu0 %v11620_v18 }
0x5524   :  { %11623 = vmatprep.subr.bf16.mxu0 %v11622_v2 }
0x5527   :  { %11625 = vmatpush3.bf16.msra.mxu0 %v11624_v39 }
0x5528   :  { %11627 = vmatprep.subr.bf16.mxu0 %v11626_v59 }
0x552b   :  { %11629 = vmatpush3.bf16.msra.mxu0 %v11628_v54 }
0x552c   :  { %11631 = vmatprep.subr.bf16.mxu0 %v11630_v6  ;;  %v15023_v6 = vld [vmem:[#allocation24_spill] sm:$0xff] }
0x552d   :  { %v2406_v45 = vmul.f32 %v15023_v6, %v15022_v60 }
0x552f   :  { %11633 = vmatpush3.bf16.msra.mxu0 %v11632_v9  ;;  %v15025_v9 = vld [vmem:[#allocation25_spill] sm:$0xff] }
0x55e5   :  { %v8892_v4 = vpop.f32.mrb[76].mxu0 }
0x55e6   :  { %v8903_v14 = vmul.f32 %v8892_v4, %v8816_v21  ;;  %v8894_v44 = vpop.f32.mrb[77].mxu0  ;;  %v2405_v21 = vmul.f32 %v15025_v9, %v15024_v51 }
0x55e7   :  { %v8904_v56 = vmul.f32 %v8894_v44, %v8817_v30  ;;  %v15026_v30 = vld [vmem:[#allocation29_spill] sm:$0xff]  ;;  %v15029_v44 = vld [vmem:[#allocation23_spill] sm:$0xff] }
0x55e8   :  { %v2404_v4 = vmul.f32 %v15027_v31, %v15026_v30 }
0x55e9   :  { %v8898_v52 = vpop.f32.mrb[78].mxu0  ;;  %8971 = vmatprep.mubr.f32.mxu0 %v8904_v56 }
0x55ea   :  { %v8905_v58 = vmul.f32 %v8898_v52, %v8818_v12  ;;  %v8900_v28 = vpop.f32.mrb[79].mxu0  ;;  %8972 = vmatmul.mubr.f32.vlgmr.msra.gmra.mrb[80].mxu0 %v8903_v14  ;;  %v15028_v14 = vld [vmem:[#allocation27_spill] sm:$0xff]  ;;  %v2408_v12 = vadd.f32 %v2406_v45, %v2404_v4 }
0x55eb   :  { %v8906_v57 = vmul.f32 %v8900_v28, %v8819_v33  ;;  %v2403_v56 = vmul.f32 %v15029_v44, %v15028_v14  ;;  %v15030_v28 = vld [vmem:[#allocation18_spill] sm:$0xff] }
0x55ec   :  { %v2410_v52 = vsel %vm1907_vm11, %v2408_v12, 0.0 }
0x55ed   :  { %8976 = vmatprep.mubr.f32.mxu0 %v8906_v57  ;;  %v2407_v33 = vadd.f32 %v2405_v21, %v2403_v56  ;;  %v631_v57 = vrot.slane %v15030_v28, 4 }
0x55ee   :  { %8977 = vmatmul.mubr.f32.gmra.mrb[82].mxu0 %v8905_v58 }
0x55ef   :  { %v2409_v58 = vsel %vm1907_vm11, %v2407_v33, 0.0 }
0x56bd   :  { %v10076_v55 = vpop.f32.mrb[80].mxu0 }
0x56be   :  { %v10077_v43 = vpop.f32.mrb[81].mxu0 }
0x56bf   :  { %v10078_v5 = vadd.f32 %v10077_v43, %v10076_v55  ;;  %v2411_v55 = vadd.f32 %v2410_v52, %v2409_v58  ;;  %v15031_v43 = vld [vmem:[#allocation53_spill] sm:$0xff] }
0x56c1   :  { %v9023_v0 = vadd.f32 %v10078_v5, %v14366_v8  ;;  %v10079_v17 = vpop.f32.mrb[82].mxu0  ;;  %v15032_v5 = vld [vmem:[#allocation46_spill] sm:$0xff] }
0x56c2   :  { %v10080_v41 = vpop.f32.mrb[83].mxu0 }
0x56c3   :  { %v10081_v62 = vadd.f32 %v10080_v41, %v10079_v17  ;;  %v9025_v46 = vsel %vm287_vm3, %v9023_v0, 0.0  ;;  %v632_v17 = vadd.f32 %v631_v57, %v15030_v28  ;;  %v15033_v41 = vld [vmem:[#allocation33_spill] sm:$0xff] }
0x56c4   :  { %9026 = vadd.xlane.f32.xlu1 %v9025_v46 }
0x56c5   :  { %v9024_v24 = vadd.f32 %v10081_v62, %v14370_v42  ;;  %v15034_v62 = vld [vmem:[#allocation44_spill] sm:$0xff] }
0x56c6   :  { %v4632_v46 = vmul.f32 %v15034_v62, %v15033_v41 }
0x56c7   :  { %v9028_v3 = vsel %vm287_vm3, %v9024_v24, 0.0 }
0x56c8   :  { %9029 = vadd.xlane.f32.xlu0 %v9028_v3  ;;  %v15036_v3 = vld [vmem:[#allocation45_spill] sm:$0xff] }
0x5751   :  { %v9027_v22 = vpop.xlane.xlu1 %9026 }
0x5752   :  { %v9031_v25 = vmul.f32 0.03125, %v9027_v22 }
0x5754   :  { %v9033_v40 = vsub.f32 %v9023_v0, %v9031_v25  ;;  %v4634_v0 = vmul.f32 %v15032_v5, %v15031_v43  ;;  %v2412_v25 = vrot.slane %v2411_v55, 4 }
0x5755   :  { %v9030_v11 = vpop.xlane.xlu0 %9029 }
0x5756   :  { %v9032_v63 = vmul.f32 0.03125, %v9030_v11  ;;  %v9035_v23 = vmul.f32 %v9033_v40, %v9033_v40  ;;  %v15038_v11 = vld [vmem:[#allocation43_spill] sm:$0xff] }
0x5758   :  { %v9034_v10 = vsub.f32 %v9024_v24, %v9032_v63  ;;  %v9037_v8 = vsel %vm287_vm3, %v9035_v23, 0.0  ;;  %v15035_v24 = vld [vmem:[#allocation52_spill] sm:$0xff]  ;;  %v4636_v23 = vadd.f32 %v4634_v0, %v4632_v46 }
0x5759   :  { %9038 = vadd.xlane.f32.xlu1 %v9037_v8  ;;  %v4633_v22 = vmul.f32 %v15036_v3, %v15035_v24  ;;  %v9105_v46 = vld [vmem:[%s14749_s5] sm:$0xff]  ;;  %v9106_v24 = vld [vmem:[%s14749_s5 + $0x8] sm:$0xff] }
0x575a   :  { %v9036_v35 = vmul.f32 %v9034_v10, %v9034_v10  ;;  %v11634_v3 = vpack.c.bf16 %v9106_v24, %v9105_v46 }
0x575c   :  { %v9040_v61 = vsel %vm287_vm3, %v9036_v35, 0.0  ;;  %v2413_v35 = vadd.f32 %v2412_v25, %v2411_v55  ;;  %11635 = vmatprep.subr.bf16.mxu1 %v11634_v3  ;;  %v9108_v25 = vld [vmem:[%s14749_s5 + $0x18] sm:$0xff] }
0x575d   :  { %9041 = vadd.xlane.f32.xlu0 %v9040_v61  ;;  %v15039_v61 = vld [vmem:[#allocation31_spill] sm:$0xff]  ;;  %11637 = vmatpush3.bf16.msra.mxu1 %v11634_v3 }
0x575e   :  { %v2414_v47 = vrot.slane %v2413_v35, 2 }
0x57e6   :  { %v9039_v29 = vpop.xlane.xlu1 %9038 }
0x57e7   :  { %v9043_v34 = vmul.f32 0.03125, %v9039_v29  ;;  %v2421_v29 = vrot.slane %v15039_v61, 4 }
0x57e9   :  { %v9045_v42 = vadd.f32 1e-05, %v9043_v34  ;;  %v4638_v34 = vsel %vm1907_vm11, %v4636_v23, 0.0 }
0x57ea   :  { %v9042_v26 = vpop.xlane.xlu0 %9041 }
0x57eb   :  { %11852 = vrsqrt.f32 %v9045_v42  ;;  %v9044_v32 = vmul.f32 0.03125, %v9042_v26  ;;  %v15040_v42 = vld [vmem:[#allocation39_spill] sm:$0xff] }
0x57ec   :  { %v2872_v26 = vrot.slane %v15040_v42, 4 }
0x57ed   :  { %v9046_v48 = vadd.f32 1e-05, %v9044_v32 }
0x57ef   :  { %11854 = vrsqrt.f32 %v9046_v48 }
0x57f5   :  { %v11853_v18 = vpop.eup %11852 }
0x57f6   :  { %v9049_v2 = vmul.f32 %v11853_v18, %v9033_v40  ;;  %v15037_v40 = vld [vmem:[#allocation51_spill] sm:$0xff]  ;;  %v2422_v18 = vadd.f32 %v2421_v29, %v15039_v61 }
0x57f7   :  { %v4631_v63 = vmul.f32 %v15038_v11, %v15037_v40 }
0x57f8   :  { %v9055_v50 = vmul.f32 %v9054_v38, %v9049_v2 }
0x57f9   :  { %v11855_v53 = vpop.eup %11854  ;;  %v4635_v8 = vadd.f32 %v4633_v22, %v4631_v63  ;;  %v9107_v22 = vld [vmem:[%s14749_s5 + $0x10] sm:$0xff] }
0x57fa   :  { %v9061_v39 = vadd.f32 %v9060_v16, %v9055_v50  ;;  %v9050_v59 = vmul.f32 %v11855_v53, %v9034_v10  ;;  %v633_v10 = vrot.slane %v632_v17, 2  ;;  %v2415_v53 = vadd.f32 %v2414_v47, %v2413_v35 }
0x57fb   :  { %v4637_v32 = vsel %vm1907_vm11, %v4635_v8, 0.0  ;;  %v11638_v40 = vpack.c.bf16 %v9108_v25, %v9107_v22  ;;  %v5064_v47 = vrot.slane %v13749_v49, 4 }
0x57fc   :  { %v9067_v1 = vsel %vm287_vm3, %v9061_v39, 0.0  ;;  %v9056_v15 = vmul.f32 %v9054_v38, %v9050_v59  ;;  %v634_v48 = vadd.f32 %v633_v10, %v632_v17  ;;  %v4639_v38 = vadd.f32 %v4638_v34, %v4637_v32 }
0x57fd   :  { %9068 = vadd.xlane.f32.xlu1 %v9067_v1  ;;  %v2423_v1 = vrot.slane %v2422_v18, 2  ;;  %v2416_v51 = vrot.slane %v2415_v53, 1  ;;  %11639 = vmatprep.subr.bf16.mxu1 %v11638_v40 }
0x57fe   :  { %v9062_v54 = vadd.f32 %v9060_v16, %v9056_v15  ;;  %v2873_v16 = vadd.f32 %v2872_v26, %v15040_v42  ;;  %v635_v50 = vrot.slane %v634_v48, 1  ;;  %v4640_v15 = vrot.slane %v4639_v38, 4  ;;  %11641 = vmatpush3.bf16.msra.mxu1 %v11638_v40 }
0x57ff   :  { %v2424_v31 = vadd.f32 %v2423_v1, %v2422_v18  ;;  %v14652_v12 = vadd.f32 %v2416_v51, %v2415_v53  ;;  %v15041_v18 = vld [vmem:[#allocation59_spill] sm:$0xff]  ;;  %v5065_v53 = vadd.f32 %v5064_v47, %v13749_v49  ;;  %v9533_v1 = vld [vmem:[%s15042_s27 + $0x1] ss:$0 sm:$0xff]  ;;  %v6787_v47 = vrot.slane %v14004_v13, 4 }
0x5800   :  { %v9070_v37 = vsel %vm287_vm3, %v9062_v54, 0.0  ;;  %v636_v45 = vadd.f32 %v635_v50, %v634_v48  ;;  %v2874_v9 = vrot.slane %v2873_v16, 2  ;;  %v4641_v4 = vadd.f32 %v4640_v15, %v4639_v38 }
0x5801   :  { %9071 = vadd.xlane.f32.xlu0 %v9070_v37  ;;  %v2425_v33 = vrot.slane %v2424_v31, 1  ;;  %v2427_v28 = vsel %vm1907_vm11, %v14652_v12, 0.0 }
0x5802   :  { %v637_v14 = vmul.f32 0.000625, %v636_v45  ;;  %v2875_v44 = vadd.f32 %v2874_v9, %v2873_v16  ;;  %v4642_v52 = vrot.slane %v4641_v4, 2  ;;  %v9532_v16 = vld [vmem:[%s15042_s27] ss:$0 sm:$0xff]  ;;  %v5066_v9 = vrot.slane %v5065_v53, 2 }
0x5803   :  { %v14656_v57 = vadd.f32 %v2425_v33, %v2424_v31  ;;  %v6778_v31 = vrot.slane %v13990_v20, 4 }
0x5804   :  { %v2876_v58 = vrot.slane %v2875_v44, 1  ;;  %v4643_v55 = vadd.f32 %v4642_v52, %v4641_v4 }
0x5805   :  { %v2433_v5 = vsel %vm1907_vm11, %v14656_v57, 0.0 }
0x5806   :  { %v2877_v43 = vadd.f32 %v2876_v58, %v2875_v44  ;;  %v4644_v0 = vrot.slane %v4643_v55, 1  ;;  %v6779_v58 = vadd.f32 %v6778_v31, %v13990_v20 }
0x5808   :  { %v14660_v17 = vmul.f32 0.000625, %v2877_v43  ;;  %v14662_v41 = vadd.f32 %v4644_v0, %v4643_v55 }
0x580a   :  { %v4655_v62 = vsel %vm1907_vm11, %v14662_v41, 0.0  ;;  %v2882_v0 = vmul.f32 %v14660_v17, %v14660_v17  ;;  %v5070_v3 = vmul.f32 0.99, %v14660_v17 }
0x588a   :  { %v9069_v2 = vpop.xlane.xlu1 %9068 }
0x588b   :  { %v9073_v7 = vmul.f32 0.03125, %v9069_v2  ;;  %v4649_v2 = vrot.slane %v15041_v18, 4 }
0x588d   :  { %v14642_v59 = vsub.f32 %v9061_v39, %v9073_v7 }
0x588e   :  { %v9072_v37 = vpop.xlane.xlu0 %9071 }
0x588f   :  { %v9074_v60 = vmul.f32 0.03125, %v9072_v37  ;;  %v9077_v6 = vmul.f32 %v14642_v59, %v14642_v59  ;;  %v4650_v37 = vadd.f32 %v4649_v2, %v15041_v18  ;;  %v6788_v18 = vadd.f32 %v6787_v47, %v14004_v13 }
0x5891   :  { %v14646_v21 = vsub.f32 %v9062_v54, %v9074_v60  ;;  %v9079_v30 = vsel %vm287_vm3, %v9077_v6, 0.0  ;;  %v641_v54 = vmul.f32 %v637_v14, %v637_v14  ;;  %v4651_v49 = vrot.slane %v4650_v37, 2 }
0x5892   :  { %9080 = vadd.xlane.f32.xlu1 %v9079_v30 }
0x5893   :  { %v9078_v39 = vmul.f32 %v14646_v21, %v14646_v21 }
0x5895   :  { %v9082_v56 = vsel %vm287_vm3, %v9078_v39, 0.0 }
0x5896   :  { %639 = vadd.xlane.f32.xlu1 %v637_v14  ;;  %9083 = vadd.xlane.f32.xlu0 %v9082_v56  ;;  %v5067_v56 = vadd.f32 %v5066_v9, %v5065_v53 }
0x589a   :  { %642 = vadd.xlane.f32.xlu0 %v641_v54  ;;  %2428 = vadd.xlane.f32.xlu1 %v2427_v28  ;;  %v4652_v54 = vadd.f32 %v4651_v49, %v4650_v37  ;;  %v5068_v28 = vrot.slane %v5067_v56, 1 }
0x589c   :  { %v4653_v43 = vrot.slane %v4652_v54, 1 }
0x589e   :  { %2434 = vadd.xlane.f32.xlu0 %v2433_v5  ;;  %v6780_v5 = vrot.slane %v6779_v58, 2  ;;  %v4654_v46 = vadd.f32 %v4653_v43, %v4652_v54 }
0x58a0   :  { %v4661_v24 = vsel %vm1907_vm11, %v4654_v46, 0.0 }
0x58a2   :  { %2880 = vadd.xlane.f32.xlu0 %v14660_v17 }
0x58a6   :  { %4656 = vadd.xlane.f32.xlu0 %v4655_v62  ;;  %v5069_v62 = vadd.f32 %v5068_v28, %v5067_v56 }
0x591f   :  { %v9081_v11 = vpop.xlane.xlu1 %9080 }
0x5920   :  { %v9085_v63 = vmul.f32 0.03125, %v9081_v11 }
0x5922   :  { %v9087_v23 = vadd.f32 1e-05, %v9085_v63 }
0x5923   :  { %v640_v10 = vpop.xlane.xlu1 %639  ;;  %v9084_v8 = vpop.xlane.xlu0 %9083 }
0x5924   :  { %11856 = vrsqrt.f32 %v9087_v23  ;;  %v644_v35 = vadd.f32 1e-09, %v640_v10  ;;  %v9086_v61 = vmul.f32 0.03125, %v9084_v8 }
0x5926   :  { %v645_v29 = vmul.f32 %v644_v35, %v644_v35  ;;  %v9088_v34 = vadd.f32 1e-05, %v9086_v61 }
0x5927   :  { %v643_v42 = vpop.xlane.xlu0 %642  ;;  %v2429_v26 = vpop.xlane.xlu1 %2428 }
0x5928   :  { %11858 = vrcp.f32 %v645_v29  ;;  %v2430_v32 = vadd.f32 1e-09, %v2429_v26 }
0x5929   :  { %11860 = vrsqrt.f32 %v9088_v34 }
0x592a   :  { %11862 = vrcp.f32 %v2430_v32 }
0x592b   :  { %v2435_v48 = vpop.xlane.xlu0 %2434 }
0x592c   :  { %v2436_v38 = vadd.f32 1e-09, %v2435_v48 }
0x592e   :  { %v11857_v7 = vpop.eup %11856  ;;  %11864 = vrcp.f32 %v2436_v38  ;;  %v7223_v38 = vrot.slane %v14181_v36, 4 }
0x592f   :  { %v9091_v50 = vmul.f32 %v11857_v7, %v14642_v59  ;;  %v2881_v11 = vpop.xlane.xlu0 %2880  ;;  %v8991_v7 = vrot.slane %v14497_v27, 4 }
0x5930   :  { %v2885_v63 = vadd.f32 1e-09, %v2881_v11  ;;  %v7224_v2 = vadd.f32 %v7223_v38, %v14181_v36 }
0x5931   :  { %v9097_v15 = vmul.f32 %v9532_v16, %v9091_v50 }
0x5932   :  { %v11859_v60 = vpop.eup %11858  ;;  %v2886_v23 = vmul.f32 %v2885_v63, %v2885_v63 }
0x5933   :  { %v11861_v6 = vpop.eup %11860  ;;  %v647_v45 = vmul.f32 16.0, %v11859_v60  ;;  %v9103_v51 = vadd.f32 %v9533_v1, %v9097_v15  ;;  %v4657_v61 = vpop.xlane.xlu0 %4656 }
0x5934   :  { %v9092_v30 = vmul.f32 %v11861_v6, %v14646_v21  ;;  %v11863_v59 = vpop.eup %11862  ;;  %11866 = vrcp.f32 %v2886_v23  ;;  %v4658_v17 = vadd.f32 1e-09, %v4657_v61  ;;  %v8992_v6 = vadd.f32 %v8991_v7, %v14497_v27 }
0x5935   :  { %v648_v4 = vmul.f32 %v647_v45, %v643_v42  ;;  %10831 = vmatprep.mubr.msk.f32.mxu1 %vm287_vm3, %v9103_v51  ;;  %v2432_v33 = vmul.f32 %v11863_v59, %v14652_v12  ;;  %v6781_v12 = vadd.f32 %v6780_v5, %v6779_v58 }
0x5936   :  { %v9098_v39 = vmul.f32 %v9532_v16, %v9092_v30  ;;  %11868 = vrcp.f32 %v4658_v17  ;;  %v6789_v16 = vrot.slane %v6788_v18, 2  ;;  %v8993_v13 = vrot.slane %v8992_v6, 2 }
0x5937   :  { %v6782_v20 = vrot.slane %v6781_v12, 1 }
0x5938   :  { %v11865_v14 = vpop.eup %11864  ;;  %v9104_v44 = vadd.f32 %v9533_v1, %v9098_v39  ;;  %v7225_v1 = vrot.slane %v7224_v2, 2  ;;  %v6790_v60 = vadd.f32 %v6789_v16, %v6788_v18  ;;  %v8994_v49 = vadd.f32 %v8993_v13, %v8992_v6 }
0x5939   :  { %v2438_v52 = vmul.f32 %v11865_v14, %v14656_v57  ;;  %v5071_v57 = vmul.f32 0.000625, %v5069_v62  ;;  %v14702_v25 = vadd.f32 %v6782_v20, %v6781_v12 }
0x593a   :  { %10832 = vmatmul.mubr.msk.f32.vlgmr.msra.gmra.mrb[102].mxu1 %vm287_vm3, %v9104_v44  ;;  %v7226_v51 = vadd.f32 %v7225_v1, %v7224_v2  ;;  %v6791_v30 = vrot.slane %v6790_v60, 1  ;;  %vm9192_vm3 = vcmask 0  }
0x593b   :  { %v2439_v21 = vmul.f32 %v2438_v52, %v2432_v33  ;;  %v5072_v22 = vadd.f32 %v5071_v57, %v5070_v3  ;;  %v6793_v40 = vsel %vm1907_vm11, %v14702_v25, 0.0  ;;  %v9000_v3 = vrot.slane %v14544_v19, 4 }
0x593c   :  { %v7227_v31 = vrot.slane %v7226_v51, 1 }
0x593d   :  { %v2440_v55 = vsel %vm1907_vm11, %v2439_v21, 0.0  ;;  %v5075_v36 = vmul.f32 %v5072_v22, %v5072_v22 }
0x593e   :  { %2441 = vadd.xlane.f32.xlu1 %v2440_v55  ;;  %v11867_v10 = vpop.eup %11866  ;;  %v7228_v59 = vadd.f32 %v7227_v31, %v7226_v51 }
0x593f   :  { %v2888_v34 = vmul.f32 16.0, %v11867_v10 }
0x5940   :  { %v11869_v50 = vpop.eup %11868  ;;  %v7229_v14 = vmul.f32 0.000625, %v7228_v59 }
0x5941   :  { %v4660_v15 = vmul.f32 %v11869_v50, %v14662_v41  ;;  %v8995_v41 = vrot.slane %v8994_v49, 1 }
0x5942   :  { %2883 = vadd.xlane.f32.xlu1 %v2882_v0 }
0x5943   :  { %v14715_v44 = vadd.f32 %v8995_v41, %v8994_v49 }
0x5945   :  { %v9006_v27 = vsel %vm1907_vm11, %v14715_v44, 0.0 }
0x5946   :  { %4662 = vadd.xlane.f32.xlu1 %v4661_v24 }
0x594a   :  { %5073 = vadd.xlane.f32.xlu1 %v5072_v22  ;;  %v9001_v22 = vadd.f32 %v9000_v3, %v14544_v19 }
0x594e   :  { %6794 = vadd.xlane.f32.xlu1 %v6793_v40  ;;  %v9002_v40 = vrot.slane %v9001_v22, 2 }
0x59cb   :  { %v2442_v8 = vpop.xlane.xlu1 %2441 }
0x59cc   :  { %v2443_v35 = vmul.f32 4.0, %v2442_v8  ;;  %v9003_v8 = vadd.f32 %v9002_v40, %v9001_v22 }
0x59ce   :  { %v2484_v29 = vadd.f32 %v2443_v35, %v648_v4  ;;  %v6792_v4 = vadd.f32 %v6791_v30, %v6790_v60 }
0x59cf   :  { %v2884_v42 = vpop.xlane.xlu1 %2883 }
0x59d0   :  { %v2889_v26 = vmul.f32 %v2888_v34, %v2884_v42  ;;  %v6799_v39 = vsel %vm1907_vm11, %v6792_v4, 0.0  ;;  %v7233_v34 = vmul.f32 %v7229_v14, %v7229_v14 }
0x59d3   :  { %v4663_v32 = vpop.xlane.xlu1 %4662 }
0x59d4   :  { %v4664_v48 = vadd.f32 1e-09, %v4663_v32 }
0x59d6   :  { %11870 = vrcp.f32 %v4664_v48 }
0x59d7   :  { %v5074_v52 = vpop.xlane.xlu1 %5073 }
0x59d8   :  { %v5078_v54 = vadd.f32 1e-09, %v5074_v52 }
0x59da   :  { %v5079_v58 = vmul.f32 %v5078_v54, %v5078_v54 }
0x59db   :  { %v6795_v43 = vpop.xlane.xlu1 %6794 }
0x59dc   :  { %11872 = vrcp.f32 %v5079_v58 }
0x59e0   :  { %v11871_v53 = vpop.eup %11870 }
0x59e1   :  { %v4666_v37 = vmul.f32 %v11871_v53, %v4654_v46  ;;  %v6796_v46 = vadd.f32 1e-09, %v6795_v43 }
0x59e3   :  { %v4667_v45 = vmul.f32 %v4666_v37, %v4660_v15  ;;  %11874 = vrcp.f32 %v6796_v46 }
0x59e5   :  { %v4668_v9 = vsel %vm1907_vm11, %v4667_v45, 0.0 }
0x59e6   :  { %4669 = vadd.xlane.f32.xlu0 %v4668_v9  ;;  %v11873_v21 = vpop.eup %11872 }
0x59e7   :  { %v5081_v0 = vmul.f32 16.0, %v11873_v21 }
0x59ea   :  { %5076 = vadd.xlane.f32.xlu0 %v5075_v36 }
0x59ed   :  { %v11875_v11 = vpop.eup %11874 }
0x59ee   :  { %6800 = vadd.xlane.f32.xlu0 %v6799_v39  ;;  %v6798_v23 = vmul.f32 %v11875_v11, %v14702_v25 }
0x59f2   :  { %7231 = vadd.xlane.f32.xlu0 %v7229_v14 }
0x59f6   :  { %9007 = vadd.xlane.f32.xlu0 %v9006_v27 }
0x5a0d   :  { %v10833_v56 = vpop.f32.mrb[102].mxu1 }
0x5a0e   :  { %9191 = vst [vmem:[%s14761_s17 + $0x8] sm:$0xff] %v10833_v56  ;;  %v9181_v33 = vpop.f32.mrb[103].mxu1 }
0x5a0f   :  { %9190 = vst [vmem:[%s14761_s17] sm:$0xff] %v9181_v33  ;;  %s11926_s17 = smov [#allocation2]  }
0x5a10   :  { %s9202_s29 = sshll.u32 %s11926_s17, 4  ;;  %s9203_s29 = int_to_ptr.vmem [resolvable:$true] %s9202_s29 }
0x5a11   :  { %s11899_s19 = scalar_lea.vmem %s9203_s29, 16  ;;  %s11903_s7 = scalar_lea.vmem %s9203_s29, 32 }
0x5a12   :  { %p11900_p0 = scmp.ne.s32.totalorder %s9203_s29, %s11899_s19  ;;  %p11904_p1 = scmp.lt.s32.totalorder %s9203_s29, %s9203_s29 }
0x5a13   :  { %p11905_p2 = scmp.lt.s32.totalorder %s11903_s7, %s11899_s19 }
0x5a15   :  { %p11906_p3 = por %p11905_p2, %p11904_p1 }
0x5a17   :  { %p11907_p4 = pnand %p11906_p3, %p11900_p0 }
0x5a73   :  { %v4670_v28 = vpop.xlane.xlu0 %4669 }
0x5a74   :  { %v4671_v55 = vmul.f32 4.0, %v4670_v28 }
0x5a76   :  { %v4712_v5 = vadd.f32 %v4671_v55, %v2889_v26 }
0x5a77   :  { %v5077_v62 = vpop.xlane.xlu0 %5076 }
0x5a78   :  { %v4713_v12 = vadd.f32 %v4712_v5, %v2484_v29  ;;  %v5082_v57 = vmul.f32 %v5081_v0, %v5077_v62  ;;  %v9004_v29 = vrot.slane %v9003_v8, 1 }
0x5a7a   :  { %v9005_v42 = vadd.f32 %v9004_v29, %v9003_v8 }
0x5a7b   :  { %v6801_v24 = vpop.xlane.xlu0 %6800 }
0x5a7c   :  { %v6802_v20 = vadd.f32 1e-09, %v6801_v24  ;;  %v9012_v17 = vsel %vm1907_vm11, %v9005_v42, 0.0 }
0x5a7e   :  { %11876 = vrcp.f32 %v6802_v20 }
0x5a7f   :  { %v7232_v26 = vpop.xlane.xlu0 %7231 }
0x5a80   :  { %v7236_v19 = vadd.f32 1e-09, %v7232_v26 }
0x5a82   :  { %v7237_v32 = vmul.f32 %v7236_v19, %v7236_v19 }
0x5a83   :  { %v9008_v38 = vpop.xlane.xlu0 %9007 }
0x5a84   :  { %11878 = vrcp.f32 %v7237_v32  ;;  %v9009_v16 = vadd.f32 1e-09, %v9008_v38 }
0x5a86   :  { %11880 = vrcp.f32 %v9009_v16 }
0x5a88   :  { %v11877_v63 = vpop.eup %11876 }
0x5a89   :  { %v6804_v10 = vmul.f32 %v11877_v63, %v6792_v4 }
0x5a8b   :  { %v6805_v35 = vmul.f32 %v6804_v10, %v6798_v23 }
0x5a8d   :  { %v6806_v61 = vsel %vm1907_vm11, %v6805_v35, 0.0 }
0x5a8e   :  { %6807 = vadd.xlane.f32.xlu1 %v6806_v61  ;;  %v11879_v48 = vpop.eup %11878 }
0x5a8f   :  { %v7239_v2 = vmul.f32 16.0, %v11879_v48 }
0x5a90   :  { %v11881_v37 = vpop.eup %11880 }
0x5a91   :  { %v9011_v6 = vmul.f32 %v11881_v37, %v14715_v44 }
0x5a92   :  { %7234 = vadd.xlane.f32.xlu1 %v7233_v34 }
0x5a96   :  { %9013 = vadd.xlane.f32.xlu1 %v9012_v17 }
0x5b1b   :  { %v6808_v47 = vpop.xlane.xlu1 %6807 }
0x5b1c   :  { %v6809_v25 = vmul.f32 4.0, %v6808_v47 }
0x5b1e   :  { %v6842_v18 = vadd.f32 %v6809_v25, %v5082_v57 }
0x5b1f   :  { %v7235_v7 = vpop.xlane.xlu1 %7234 }
0x5b20   :  { %v6843_v50 = vadd.f32 %v6842_v18, %v4713_v12  ;;  %v7240_v53 = vmul.f32 %v7239_v2, %v7235_v7 }
0x5b23   :  { %v9014_v1 = vpop.xlane.xlu1 %9013 }
0x5b24   :  { %v9015_v15 = vadd.f32 1e-09, %v9014_v1 }
0x5b26   :  { %11882 = vrcp.f32 %v9015_v15 }
0x5b30   :  { %v11883_v60 = vpop.eup %11882 }
0x5b31   :  { %v9017_v45 = vmul.f32 %v11883_v60, %v9005_v42 }
0x5b33   :  { %v9018_v51 = vmul.f32 %v9017_v45, %v9011_v6 }
0x5b35   :  { %v9019_v9 = vsel %vm1907_vm11, %v9018_v51, 0.0 }
0x5b36   :  { %9020 = vadd.xlane.f32.xlu0 %v9019_v9 }
0x5bc3   :  { %v9021_v30 = vpop.xlane.xlu0 %9020 }
0x5bc4   :  { %v9022_v13 = vmul.f32 4.0, %v9021_v30 }
0x5bc6   :  { %v9063_v36 = vadd.f32 %v9022_v13, %v7240_v53 }
0x5bc8   :  { %v9064_v31 = vadd.f32 %v9063_v36, %v6843_v50 }
0x5bca   :  { %9193 = vst.msk [vmem:[#allocation2] sm:$0x1] %vm9192_vm3, %v9064_v31 }
0x5bcb   :  { %11910 = shalt.err (!%p11907_p4)
}
0x5bcc   :  { %s11911_s1 = scalar_lea.hbm %s14762_s18, 16 }
0x5bcd   :  { %p11912_p5 = scmp.ne.s32.totalorder %s14762_s18, %s11911_s1  ;;  %p11915_p6 = scmp.lt.u32.totalorder %s11911_s1, %s14762_s18 }
0x5bcf   :  { %p11917_p7 = pnand %p11915_p6, %p11912_p5 }
0x5bd1   :  { %11920 = shalt.err (!%p11917_p7)
}
0x5bd2   :  { %9205 = dma.vmem_to_hbm [thread:$0]  %s9203_s29, 16, %s14762_s18, [#allocation3]  }
0x5bd3   :  { %11921 = dma.done.wait [#allocation3], 16  }
0x5bd4   :  { %11922 = vsyncadd [#allocation3], 4294967280 }
0x5bd5   :  { %9211 = vsyncpa [#allocation3], 1 }

</bundles_post_ra>
